<compile_context>
chip_gen: v7x
topology: tpu7x:2x2x1
jax: 0.10.0
libtpu: 0.0.40
codegen_flags: <defaults>
</compile_context>

<pallas_src>
import functools
import math

import jax
import jax.numpy as jnp
from jax import lax
from jax.experimental import pallas as pl
from jax.experimental.pallas import tpu as pltpu


# ----------------------------- configuration ---------------------------------
CUTOFF = 5.0                      # cutoff distance (same units as d_ij)
N_RBF = 16                        # number_of_radial_basis_functions
NR_INTERACTION_BLOCKS = 3
NR_ATOM_BASIS = 8
FILTER_OUT = NR_INTERACTION_BLOCKS * 3 * NR_ATOM_BASIS  # 72 (shared_filters=False)
CHUNK = 3 * NR_ATOM_BASIS                                # 24

PAIR_TILE_MAX = 2048              # pairs per grid step (lane axis; multiple of 128)
LANE = 128
MIN_PAIRS_FOR_PALLAS = 1024       # below this, plain-JAX fused path wins


def _round_up(x, m):
    return ((x + m - 1) // m) * m


# ------------------------------- Pallas kernel --------------------------------
def _painn_filter_kernel(*refs, gamma, delta, cutoff, n_rbf, k_pad, n_blocks):
    d_ref = refs[0]
    w_refs = refs[1:1 + n_blocks]          # each (k_pad, chunk)
    o_refs = refs[1 + n_blocks:1 + 2 * n_blocks]   # each (pair_tile, chunk)

    d = d_ref[...]                                        # (1, tp), pairs on lanes

    # RBF centers generated in-kernel: center_k = k * delta (== linspace(0, cutoff, n_rbf)).
    # Row n_rbf is the bias row (value 1); rows > n_rbf hit zero weight rows.
    k = lax.broadcasted_iota(jnp.int32, (k_pad, 1), 0)    # (k_pad, 1)
    centers = k.astype(jnp.float32) * delta
    diff = d - centers                                    # (k_pad, tp), lane-dense
    g = jnp.exp(-gamma * diff * diff)
    g = jnp.where(k == n_rbf, 1.0, g)                     # bias row -> 1.0

    # Cosine cutoff: 0.5 * (cos(pi * d / cutoff) + 1) * (d < cutoff)
    fcut = 0.5 * (jnp.cos((jnp.pi / cutoff) * d) + 1.0)
    fcut = fcut * (d < cutoff).astype(jnp.float32)        # (1, tp)

    # Fold cutoff gate (and bias via the extra row) into the contraction operand.
    f_aug = g * fcut                                      # (k_pad, tp)

    # Single in-kernel transpose (XLU) to the torch-layout orientation.
    f_t = f_aug.T                                         # (tp, k_pad)

    # One small MXU matmul per interaction block -> chunk already at lane offset 0.
    for w_ref, o_ref in zip(w_refs, o_refs):
        o_ref[...] = jnp.dot(f_t, w_ref[...], preferred_element_type=jnp.float32)


# --------------------------- plain-JAX filter path -----------------------------
def _filters_ref(d_ij, w, b, *, cutoff=CUTOFF, n_rbf=N_RBF):
    """Pure-JAX reference / small-n fallback for the filter computation."""
    centers = jnp.linspace(0.0, cutoff, n_rbf, dtype=jnp.float32).reshape(1, n_rbf)
    delta = cutoff / (n_rbf - 1)
    gamma = 0.5 / (delta * delta)
    d = d_ij.astype(jnp.float32)
    f_ij = jnp.exp(-gamma * (d - centers) ** 2)
    fcut = 0.5 * (jnp.cos(jnp.pi * d / cutoff) + 1.0) * (d < cutoff)
    return (f_ij @ w.astype(jnp.float32) + b.astype(jnp.float32)[None, :]) * fcut


# ------------------------------- wrapper --------------------------------------
def painn_representation(d_ij, r_ij, atomic_embedding, w, b, *,
                         cutoff=CUTOFF, n_rbf=N_RBF,
                         nr_interaction_blocks=NR_INTERACTION_BLOCKS,
                         nr_atom_basis=NR_ATOM_BASIS,
                         force_pallas=False,
                         min_pairs_for_pallas=MIN_PAIRS_FOR_PALLAS):
    """JAX/Pallas equivalent of PaiNNRepresentation.forward (shared_filters=False).

    d_ij: (n_pairs, 1), r_ij: (n_pairs, 3), atomic_embedding: (n_atoms, nr_atom_basis)
    w: (n_rbf, F_out), b: (F_out,)   with F_out = nr_interaction_blocks * 3 * nr_atom_basis
    """
    n_pairs = d_ij.shape[0]
    f_out = w.shape[1]
    chunk = 3 * nr_atom_basis
    assert f_out == nr_interaction_blocks * chunk

    # dir_ij = r_ij / d_ij (no zero-distance guard, matching torch semantics).
    dir_ij = r_ij.astype(jnp.float32) / d_ij.astype(jnp.float32)

    # q = atomic_embedding[:, None];  mu = zeros((n_atoms, 3, embedding_dim))
    q = atomic_embedding[:, None, :]
    mu = jnp.zeros((q.shape[0], 3, q.shape[2]), dtype=jnp.float32)

    if n_pairs < min_pairs_for_pallas and not force_pallas:
        # Tiny pair counts: launch + pad/trim glue would dominate; let XLA fuse it.
        filters = _filters_ref(d_ij, w, b, cutoff=cutoff, n_rbf=n_rbf)
        filter_list = [filters[:, c * chunk:(c + 1) * chunk]
                       for c in range(nr_interaction_blocks)]
        return {"filters": filter_list, "dir_ij": dir_ij, "q": q, "mu": mu}

    # ------------------------------ Pallas path -------------------------------
    delta = cutoff / (n_rbf - 1)
    gamma = 0.5 / (delta * delta)
    k_pad = _round_up(n_rbf + 1, 8)          # rbf rows + bias row, padded for transpose

    # Lane-aligned pair tile; only the (tiny) distance input gets padded.
    pair_tile = min(PAIR_TILE_MAX, _round_up(max(n_pairs, 1), LANE))
    n_pad = _round_up(max(n_pairs, 1), pair_tile)
    grid = (n_pad // pair_tile,)

    d_flat = d_ij.astype(jnp.float32).reshape(n_pairs)
    # Pad value > cutoff so padded columns produce exactly-zero (and dropped) rows.
    d_padded = jnp.pad(d_flat, (0, n_pad - n_pairs),
                       constant_values=2.0 * cutoff).reshape(1, n_pad)

    # W_aug = [W; b; 0...] of shape (k_pad, f_out), pre-split into per-block chunks.
    pad_rows = k_pad - n_rbf - 1
    w_aug = jnp.concatenate(
        [w.astype(jnp.float32),
         b.astype(jnp.float32).reshape(1, f_out),
         jnp.zeros((pad_rows, f_out), jnp.float32)], axis=0)
    w_chunks = [w_aug[:, c * chunk:(c + 1) * chunk]
                for c in range(nr_interaction_blocks)]

    kernel = functools.partial(_painn_filter_kernel, gamma=gamma, delta=delta,
                               cutoff=cutoff, n_rbf=n_rbf, k_pad=k_pad,
                               n_blocks=nr_interaction_blocks)

    cost = pl.CostEstimate(
        flops=2 * k_pad * f_out * n_pad + 8 * k_pad * n_pad,
        transcendentals=(k_pad + 1) * n_pad,
        bytes_accessed=4 * (n_pad + k_pad * f_out + n_pairs * f_out),
    )

    in_specs = ([pl.BlockSpec((1, pair_tile), lambda i: (0, i))] +
                [pl.BlockSpec((k_pad, chunk), lambda i: (0, 0))
                 for _ in range(nr_interaction_blocks)])
    # Outputs are the torch-layout filter chunks themselves (unpadded first dim;
    # the final partial block is handled by Pallas' masked edge-block stores).
    out_specs = [pl.BlockSpec((pair_tile, chunk), lambda i: (i, 0))
                 for _ in range(nr_interaction_blocks)]
    out_shapes = tuple(jax.ShapeDtypeStruct((n_pairs, chunk), jnp.float32)
                       for _ in range(nr_interaction_blocks))

    filter_list = pl.pallas_call(
        kernel,
        out_shape=out_shapes,
        grid_spec=pltpu.PrefetchScalarGridSpec(
            num_scalar_prefetch=0,
            grid=grid,
            in_specs=in_specs,
            out_specs=out_specs,
        ),
        compiler_params=pltpu.CompilerParams(
            dimension_semantics=("parallel",)),
        cost_estimate=cost,
    )(d_padded, *w_chunks)

    return {"filters": list(filter_list), "dir_ij": dir_ij, "q": q, "mu": mu}


# ------------------------------------ main -------------------------------------
if __name__ == "__main__":
    key = jax.random.PRNGKey(0)
    k1, k2, k3, k4 = jax.random.split(key, 4)

    # Small but kernel-exercising sizes: 2500 pairs -> 2 grid steps (tile 2048)
    # with a partial final block; 8 atoms, embedding dim 8.
    n_pairs = 2500
    n_atoms = 8
    embedding_dim = NR_ATOM_BASIS

    r_ij = jax.random.normal(k1, (n_pairs, 3), dtype=jnp.float32) * 2.0
    d_ij = jnp.linalg.norm(r_ij, axis=-1, keepdims=True) + 1e-3     # (n_pairs, 1)
    atomic_embedding = jax.random.normal(k2, (n_atoms, embedding_dim),
                                         dtype=jnp.float32)

    w = (jax.random.normal(k3, (N_RBF, FILTER_OUT), dtype=jnp.float32)
         / math.sqrt(N_RBF))
    b = jax.random.normal(k4, (FILTER_OUT,), dtype=jnp.float32) * 0.01

    # --- Pallas path (forced so the kernel is definitely exercised) ---
    out = painn_representation(d_ij, r_ij, atomic_embedding, w, b,
                               force_pallas=True)
    jax.block_until_ready(out)

    # --- checks against the pure-JAX reference ---
    ref_filters = _filters_ref(d_ij, w, b)
    ref_dir = r_ij / d_ij
    ref_chunks = [ref_filters[:, c * CHUNK:(c + 1) * CHUNK]
                  for c in range(NR_INTERACTION_BLOCKS)]

    assert out["dir_ij"].shape == (n_pairs, 3)
    assert out["q"].shape == (n_atoms, 1, embedding_dim)
    assert out["mu"].shape == (n_atoms, 3, embedding_dim)
    assert len(out["filters"]) == NR_INTERACTION_BLOCKS
    assert jnp.allclose(out["dir_ij"], ref_dir, atol=1e-5)
    for got, want in zip(out["filters"], ref_chunks):
        assert got.shape == (n_pairs, CHUNK)
        assert jnp.allclose(got, want, atol=2e-4, rtol=2e-4)
    assert jnp.all(out["mu"] == 0.0)

    # --- small-n fallback path (plain JAX) ---
    out_small = painn_representation(d_ij[:24], r_ij[:24], atomic_embedding, w, b)
    jax.block_until_ready(out_small)
    ref_small = _filters_ref(d_ij[:24], w, b)
    for c, got in enumerate(out_small["filters"]):
        assert got.shape == (24, CHUNK)
        assert jnp.allclose(got, ref_small[:, c * CHUNK:(c + 1) * CHUNK],
                            atol=2e-4, rtol=2e-4)

    print("KERNEL_OK")
</pallas_src>

<mosaic_0001>
module attributes {stable_mosaic.version = 11 : i64} {
  func.func @_painn_filter_kernel(%arg0: i32, %arg1: memref<1x2048xf32, #tpu.memory_space<vmem>>, %arg2: memref<24x24xf32, #tpu.memory_space<vmem>>, %arg3: memref<24x24xf32, #tpu.memory_space<vmem>>, %arg4: memref<24x24xf32, #tpu.memory_space<vmem>>, %arg5: memref<2048x24xf32, #tpu.memory_space<vmem>>, %arg6: memref<2048x24xf32, #tpu.memory_space<vmem>>, %arg7: memref<2048x24xf32, #tpu.memory_space<vmem>>) attributes {dimension_semantics = [#tpu.dimension_semantics<parallel>], iteration_bounds = array<i64: 2>, scalar_prefetch = 0 : i64, scratch_operands = 0 : i64, tpu.core_type = #tpu.core_type<tc>, window_params = [{transform_indices = @transform_0, window_bounds = array<i64: 1, 2048>}, {pipeline_mode = #tpu.pipeline_mode<synchronous>, transform_indices = @transform_1, window_bounds = array<i64: 24, 24>}, {pipeline_mode = #tpu.pipeline_mode<synchronous>, transform_indices = @transform_2, window_bounds = array<i64: 24, 24>}, {pipeline_mode = #tpu.pipeline_mode<synchronous>, transform_indices = @transform_3, window_bounds = array<i64: 24, 24>}, {transform_indices = @transform_4, window_bounds = array<i64: 2048, 24>}, {transform_indices = @transform_5, window_bounds = array<i64: 2048, 24>}, {transform_indices = @transform_6, window_bounds = array<i64: 2048, 24>}]} {
    %c0 = arith.constant 0 : index
    %c0_0 = arith.constant 0 : index
    %0 = vector.load %arg1[%c0, %c0_0] : memref<1x2048xf32, #tpu.memory_space<vmem>>, vector<1x2048xf32>
    %1 = tpu.iota {dimensions = array<i32: 0>} : vector<24x1xi32>
    %2 = arith.sitofp %1 : vector<24x1xi32> to vector<24x1xf32>
    %cst = arith.constant 0.333333343 : f32
    %3 = vector.broadcast %cst : f32 to vector<24x1xf32>
    %4 = arith.mulf %2, %3 : vector<24x1xf32>
    %5 = vector.broadcast %0 : vector<1x2048xf32> to vector<24x2048xf32>
    %6 = vector.broadcast %4 : vector<24x1xf32> to vector<24x2048xf32>
    %7 = arith.subf %5, %6 : vector<24x2048xf32>
    %cst_1 = arith.constant -4.500000e+00 : f32
    %8 = vector.broadcast %cst_1 : f32 to vector<24x2048xf32>
    %9 = arith.mulf %8, %7 : vector<24x2048xf32>
    %10 = arith.mulf %9, %7 : vector<24x2048xf32>
    %11 = math.exp %10 : vector<24x2048xf32>
    %c16_i32 = arith.constant 16 : i32
    %12 = vector.broadcast %c16_i32 : i32 to vector<24x1xi32>
    %13 = arith.cmpi eq, %1, %12 : vector<24x1xi32>
    %cst_2 = arith.constant 1.000000e+00 : f32
    %14 = vector.shape_cast %13 : vector<24x1xi1> to vector<24x1xi1>
    %15 = vector.broadcast %14 : vector<24x1xi1> to vector<24x2048xi1>
    %16 = vector.broadcast %cst_2 : f32 to vector<24x2048xf32>
    %17 = arith.select %15, %16, %11 : vector<24x2048xi1>, vector<24x2048xf32>
    %cst_3 = arith.constant 0.628318548 : f32
    %18 = vector.broadcast %cst_3 : f32 to vector<1x2048xf32>
    %19 = arith.mulf %18, %0 : vector<1x2048xf32>
    %20 = math.cos %19 : vector<1x2048xf32>
    %cst_4 = arith.constant 1.000000e+00 : f32
    %21 = vector.broadcast %cst_4 : f32 to vector<1x2048xf32>
    %22 = arith.addf %20, %21 : vector<1x2048xf32>
    %cst_5 = arith.constant 5.000000e-01 : f32
    %23 = vector.broadcast %cst_5 : f32 to vector<1x2048xf32>
    %24 = arith.mulf %23, %22 : vector<1x2048xf32>
    %cst_6 = arith.constant 5.000000e+00 : f32
    %25 = vector.broadcast %cst_6 : f32 to vector<1x2048xf32>
    %26 = arith.cmpf olt, %0, %25 : vector<1x2048xf32>
    %27 = arith.extui %26 : vector<1x2048xi1> to vector<1x2048xi32>
    %28 = arith.sitofp %27 : vector<1x2048xi32> to vector<1x2048xf32>
    %29 = arith.mulf %24, %28 : vector<1x2048xf32>
    %30 = vector.broadcast %29 : vector<1x2048xf32> to vector<24x2048xf32>
    %31 = arith.mulf %17, %30 : vector<24x2048xf32>
    %32 = tpu.transpose %31, [1, 0] : vector<24x2048xf32> -> vector<2048x24xf32>
    %c0_7 = arith.constant 0 : index
    %c0_8 = arith.constant 0 : index
    %33 = vector.load %arg2[%c0_7, %c0_8] : memref<24x24xf32, #tpu.memory_space<vmem>>, vector<24x24xf32>
    %cst_9 = arith.constant dense<0.000000e+00> : vector<2048x24xf32>
    %34 = tpu.matmul %32, %33, %cst_9 {dimension_numbers = #tpu.dot_dimension_numbers<[1], [0], [0], [1], [0, 0, 1, 1], [], []>} : vector<2048x24xf32>, vector<24x24xf32>, vector<2048x24xf32> -> vector<2048x24xf32>
    %c0_10 = arith.constant 0 : index
    %c0_11 = arith.constant 0 : index
    %35 = vector.load %arg5[%c0_10, %c0_11] : memref<2048x24xf32, #tpu.memory_space<vmem>>, vector<2048x24xf32>
    tpu.vector_store %arg5[%c0_10, %c0_11], %34 {strides = array<i32>} : memref<2048x24xf32, #tpu.memory_space<vmem>>, vector<2048x24xf32>,
    %c0_12 = arith.constant 0 : index
    %c0_13 = arith.constant 0 : index
    %36 = vector.load %arg3[%c0_12, %c0_13] : memref<24x24xf32, #tpu.memory_space<vmem>>, vector<24x24xf32>
    %cst_14 = arith.constant dense<0.000000e+00> : vector<2048x24xf32>
    %37 = tpu.matmul %32, %36, %cst_14 {dimension_numbers = #tpu.dot_dimension_numbers<[1], [0], [0], [1], [0, 0, 1, 1], [], []>} : vector<2048x24xf32>, vector<24x24xf32>, vector<2048x24xf32> -> vector<2048x24xf32>
    %c0_15 = arith.constant 0 : index
    %c0_16 = arith.constant 0 : index
    %38 = vector.load %arg6[%c0_15, %c0_16] : memref<2048x24xf32, #tpu.memory_space<vmem>>, vector<2048x24xf32>
    tpu.vector_store %arg6[%c0_15, %c0_16], %37 {strides = array<i32>} : memref<2048x24xf32, #tpu.memory_space<vmem>>, vector<2048x24xf32>,
    %c0_17 = arith.constant 0 : index
    %c0_18 = arith.constant 0 : index
    %39 = vector.load %arg4[%c0_17, %c0_18] : memref<24x24xf32, #tpu.memory_space<vmem>>, vector<24x24xf32>
    %cst_19 = arith.constant dense<0.000000e+00> : vector<2048x24xf32>
    %40 = tpu.matmul %32, %39, %cst_19 {dimension_numbers = #tpu.dot_dimension_numbers<[1], [0], [0], [1], [0, 0, 1, 1], [], []>} : vector<2048x24xf32>, vector<24x24xf32>, vector<2048x24xf32> -> vector<2048x24xf32>
    %c0_20 = arith.constant 0 : index
    %c0_21 = arith.constant 0 : index
    %41 = vector.load %arg7[%c0_20, %c0_21] : memref<2048x24xf32, #tpu.memory_space<vmem>>, vector<2048x24xf32>
    tpu.vector_store %arg7[%c0_20, %c0_21], %40 {strides = array<i32>} : memref<2048x24xf32, #tpu.memory_space<vmem>>, vector<2048x24xf32>,
    return
  }
  func.func @transform_0(%arg0: i32) -> (i32, i32) {
    %c0_i32 = arith.constant 0 : i32
    %c0_i32_0 = arith.constant 0 : i32
    return %c0_i32, %arg0 : i32, i32
  }
  func.func @transform_1(%arg0: i32) -> (i32, i32) {
    %c0_i32 = arith.constant 0 : i32
    %c0_i32_0 = arith.constant 0 : i32
    %c0_i32_1 = arith.constant 0 : i32
    return %c0_i32, %c0_i32_0 : i32, i32
  }
  func.func @transform_2(%arg0: i32) -> (i32, i32) {
    %c0_i32 = arith.constant 0 : i32
    %c0_i32_0 = arith.constant 0 : i32
    %c0_i32_1 = arith.constant 0 : i32
    return %c0_i32, %c0_i32_0 : i32, i32
  }
  func.func @transform_3(%arg0: i32) -> (i32, i32) {
    %c0_i32 = arith.constant 0 : i32
    %c0_i32_0 = arith.constant 0 : i32
    %c0_i32_1 = arith.constant 0 : i32
    return %c0_i32, %c0_i32_0 : i32, i32
  }
  func.func @transform_4(%arg0: i32) -> (i32, i32) {
    %c0_i32 = arith.constant 0 : i32
    %c0_i32_0 = arith.constant 0 : i32
    return %arg0, %c0_i32 : i32, i32
  }
  func.func @transform_5(%arg0: i32) -> (i32, i32) {
    %c0_i32 = arith.constant 0 : i32
    %c0_i32_0 = arith.constant 0 : i32
    return %arg0, %c0_i32 : i32, i32
  }
  func.func @transform_6(%arg0: i32) -> (i32, i32) {
    %c0_i32 = arith.constant 0 : i32
    %c0_i32_0 = arith.constant 0 : i32
    return %arg0, %c0_i32 : i32, i32
  }
}

</mosaic_0001>

<bundles_post_ra>
// kernel: tpu_custom_call.1
= control target key start
LH: loop header
LB: loop body
LE: loop exit
PB: predicated region body
PF: predicated region fallthrough
CT: control target
= control target key end

     0   :  { %12 = vsyncpa [#allocation3], 0  ;;  %s16852_s0 = inlined_call_operand.hbm [shape: f32[1,4096], index: 0, kind: input, shape index: {}]   ;;  %s16853_s1 = inlined_call_operand.hbm [shape: f32[24,24], index: 1, kind: input, shape index: {}]   ;;  %s16854_s2 = inlined_call_operand.hbm [shape: f32[24,24], index: 2, kind: input, shape index: {}]   ;;  %s16855_s3 = inlined_call_operand.hbm [shape: f32[24,24], index: 3, kind: input, shape index: {}]   ;;  %s16856_s4 = inlined_call_operand.vmem [shape: f32[2500,24], index: 4, kind: output, shape index: {0}]   ;;  %s16857_s5 = inlined_call_operand.vmem [shape: f32[2500,24], index: 5, kind: output, shape index: {1}]   ;;  %s16858_s6 = inlined_call_operand.vmem [shape: f32[2500,24], index: 6, kind: output, shape index: {2}]  }
   0x1   :  { %14 = vsyncpa [#allocation3 + $0x1], 0 }
   0x2   :  { %15 = vsyncpa [#allocation5], 0 }
   0x3   :  { %16 = vsyncpa [#allocation8], 0  ;;  %s12164_s21 = smov 0   ;;  %s12166_s22 = smov 0  }
   0x4   :  { %s12168_s23 = smov 0   ;;  %s12170_s24 = smov 0  }
   0x5 LB: > { %s12183_s25 = sadd.s32 4294967295, %s12018_s24   ;;  %p42_p0 = scmp.ne.s32.totalorder %s12010_s22, %s12006_s21  ;;  %s12018_s24 = sphi %s12170_s24, %s17681_s24   ;;  %s12014_s23 = sphi %s12168_s23, %s17680_s23   ;;  %s12010_s22 = sphi %s12166_s22, %s17679_s22   ;;  %s12006_s21 = sphi %s12164_s21, %s17678_s21  }
   0x6   : > { %p16859_p1 = scmp.eq.s32.totalorder %s12183_s25, 0  ;;  %p8567_p3 = scmp.ge.s32.totalorder %s12018_s24, 1 }
   0x7   : > { %p194_p4 = scmp.lt.s32.totalorder %s12018_s24, 3  ;;  %s12116_s28 = smov [#allocation4]  }
   0x8   : > { %p12192_p5 = por %p16859_p1, %p42_p0  ;;  %s206_s29 = sshll.u32 %s12116_s28, 4  ;;  %s207_s29 = int_to_ptr.vmem [resolvable:$true] %s206_s29 }
   0x9   : > { %p12196_p6 = pnand %p8567_p3, %p194_p4  ;;  %s12117_s7 = smov [#allocation6]  }
   0xa   : > { %s17254_s26 = scalar_select %p12192_p5, 1, 0 }
   0xb   : > { %s17255_s27 = scalar_select %p12196_p6, 1, 0 }
   0xc   : > { %p11403_p7 = pneg %p12196_p6  ;;  %s219_s8 = sshll.u32 %s12117_s7, 4  ;;  %s12208_s8 = int_to_ptr.vmem [resolvable:$true] %s219_s8 }
   0xd   : > { %s11766_s11 = scalar_lea.hbm %s16853_s1, 384 }
   0xe   : > { %p12204_p8 = pnand %p11403_p7, %p16859_p1  ;;  %p11767_p9 = scmp.ne.s32.totalorder %s16853_s1, %s11766_s11 }
   0xf   : > { %p11773_p13 = scmp.lt.u32.totalorder %s11766_s11, %s16853_s1 }
  0x10   : > { %p12218_p10 = pneg %p12204_p8 }
  0x12   : > { %p11769_p11 = pnand %p12218_p10, %p11767_p9 }
  0x14   : > { %p11770_p12 = pneg %p11769_p11 }
  0x16   : > { %p11775_p0 = pnand %p11773_p13, %p11770_p12 }
  0x18   : > { %11778 = shalt.err (!%p11775_p0)
}
  0x19   : > { %s11779_s17 = scalar_lea.vmem %s207_s29, 384  ;;  %p11787_p1 = scmp.lt.s32.totalorder %s207_s29, %s207_s29 }
  0x1a   : > { %p11780_p3 = scmp.ne.s32.totalorder %s207_s29, %s11779_s17  ;;  %p11788_p2 = scmp.lt.s32.totalorder %s11779_s17, %s11779_s17 }
  0x1c   : > { %p11782_p4 = pnand %p11780_p3, %p12218_p10  ;;  %p11789_p5 = por %p11788_p2, %p11787_p1 }
  0x1e   : > { %p11783_p7 = pneg %p11782_p4 }
  0x20   : > { %p11790_p6 = pnand %p11789_p5, %p11783_p7 }
  0x22   : > { %11793 = shalt.err (!%p11790_p6)
}
  0x23   : > { %s12118_s18 = smov 128   ;;  %s12119_s19 = smov 8  }
  0x24   : > { %11406 = dma.hbm_to_vmem [thread:$0]  (!%p12204_p8), %s16853_s1, 384, %s207_s29, [#allocation5], %s12118_s18, %s12118_s18, %s12119_s19  }
  0x25   : > { %s11794_s9 = scalar_lea.hbm %s16854_s2, 384 }
  0x26   : > { %p11795_p1 = scmp.ne.s32.totalorder %s16854_s2, %s11794_s9  ;;  %p11801_p6 = scmp.lt.u32.totalorder %s11794_s9, %s16854_s2 }
  0x28   : > { %p11797_p2 = pnand %p11795_p1, %p12218_p10 }
  0x2a   : > { %p11798_p5 = pneg %p11797_p2 }
  0x2c   : > { %p11803_p9 = pnand %p11801_p6, %p11798_p5 }
  0x2e   : > { %11806 = shalt.err (!%p11803_p9)
}
  0x2f   : > { %s11807_s29 = scalar_lea.vmem %s12208_s8, 384  ;;  %p11815_p0 = scmp.lt.s32.totalorder %s12208_s8, %s12208_s8 }
  0x30   : > { %p11808_p11 = scmp.ne.s32.totalorder %s12208_s8, %s11807_s29  ;;  %p11816_p3 = scmp.lt.s32.totalorder %s11807_s29, %s11807_s29 }
  0x32   : > { %p11810_p12 = pnand %p11808_p11, %p12218_p10  ;;  %p11817_p4 = por %p11816_p3, %p11815_p0 }
  0x34   : > { %p11811_p13 = pneg %p11810_p12 }
  0x36   : > { %p11818_p7 = pnand %p11817_p4, %p11811_p13 }
  0x38   : > { %11821 = shalt.err (!%p11818_p7)
}
  0x39   : > { %11409 = dma.hbm_to_vmem [thread:$0]  (!%p12204_p8), %s16854_s2, 384, %s12208_s8, [#allocation5], %s12118_s18, %s12118_s18, %s12119_s19  }
  0x3a   : > { %s12120_s17 = smov [#allocation7]   ;;  %s11822_s7 = scalar_lea.hbm %s16855_s3, 384 }
  0x3b   : > { %s232_s20 = sshll.u32 %s12120_s17, 4  ;;  %p11823_p1 = scmp.ne.s32.totalorder %s16855_s3, %s11822_s7  ;;  %s233_s20 = int_to_ptr.vmem [resolvable:$true] %s232_s20 }
  0x3c   : > { %p11829_p6 = scmp.lt.u32.totalorder %s11822_s7, %s16855_s3 }
  0x3d   : > { %p11825_p2 = pnand %p11823_p1, %p12218_p10 }
  0x3f   : > { %p11826_p5 = pneg %p11825_p2 }
  0x41   : > { %p11831_p9 = pnand %p11829_p6, %p11826_p5 }
  0x43   : > { %11834 = shalt.err (!%p11831_p9)
}
  0x44   : > { %s11835_s8 = scalar_lea.vmem %s233_s20, 384  ;;  %p11843_p0 = scmp.lt.s32.totalorder %s233_s20, %s233_s20 }
  0x45   : > { %p11836_p11 = scmp.ne.s32.totalorder %s233_s20, %s11835_s8  ;;  %p11844_p3 = scmp.lt.s32.totalorder %s11835_s8, %s11835_s8 }
  0x47   : > { %p11838_p12 = pnand %p11836_p11, %p12218_p10  ;;  %p11845_p4 = por %p11844_p3, %p11843_p0 }
  0x49   : > { %p11839_p13 = pneg %p11838_p12 }
  0x4b   : > { %p11846_p7 = pnand %p11845_p4, %p11839_p13 }
  0x4d   : > { %11849 = shalt.err (!%p11846_p7)
}
  0x4e   : > { %11412 = dma.hbm_to_vmem [thread:$0]  (!%p12204_p8), %s16855_s3, 384, %s233_s20, [#allocation8], %s12118_s18, %s12118_s18, %s12119_s19  }
  0x4f   : > { %s12285_s14 = sadd.s32 1, %s12018_s24   ;;  %s29_s30 = sadd.s32 1, %s12014_s23 }
  0x50   : > { %s26_s15 = ssub.s32 %s12018_s24, %s12285_s14  ;;  %p36_p10 = scmp.ne.s32.totalorder %s12014_s23, %s12010_s22 }
  0x51   : > { %p27_p1 = scmp.eq.s32.totalorder %s26_s15, 0  ;;  %p37_p2 = scmp.eq.s32.totalorder %s12018_s24, 0 }
  0x52   : > { %p17258_p5 = scmp.eq.s32.totalorder %s12183_s25, 1  ;;  %p11420_p9 = scmp.lt.s32.totalorder %s12018_s24, 2 }
  0x53   : > { %s12301_s17 = scalar_select %p27_p1, %s12014_s23, %s29_s30  }
  0x54   : > { %p12295_p6 = por %p17258_p5, %p36_p10  ;;  %p38_p11 = por %p37_p2, %p36_p10 }
  0x55   : > { %s246_s21 = sand.u32 1, %s12014_s23   ;;  %s9408_s18 = sshll.u32 %s12018_s24, 8 }
  0x56   : > { %s8572_s28 = sshll.u32 %s246_s21, 4  ;;  %s12308_s7 = scalar_lea.hbm %s16852_s0, %s9408_s18 }
  0x57   : > { %s250_s9 = scalar_lea.vmem [#allocation2], %s8572_s28  ;;  %p12312_p8 = pnand %p11420_p9, %p38_p11 }
  0x58   : > { %s258_s10 = sshll.u32 %s250_s9, 4  ;;  %s247_s24 = scalar_lea.sflag [#allocation3], %s246_s21  ;;  %s12310_s10 = int_to_ptr.vmem [resolvable:$true] %s258_s10 }
  0x59   : > { %s11850_s12 = scalar_lea.hbm %s12308_s7, 256  ;;  %p11852_p13 = pneg %p12312_p8 }
  0x5a   : > { %p11851_p12 = scmp.ne.s32.totalorder %s12308_s7, %s11850_s12  ;;  %s11855_s29 = scalar_lea.hbm %s16852_s0, 512 }
  0x5b   : > { %p11856_p4 = scmp.lt.u32.totalorder %s12308_s7, %s16852_s0  ;;  %p11857_p7 = scmp.lt.u32.totalorder %s11855_s29, %s11850_s12 }
  0x5c   : > { %p11853_p0 = pnand %p11852_p13, %p11851_p12  ;;  %p11859_p1 = scmp.lt.u32.totalorder %s11850_s12, %s12308_s7 }
  0x5d   : > { %p11858_p10 = por %p11857_p7, %p11856_p4 }
  0x5e   : > { %p11854_p3 = pneg %p11853_p0 }
  0x5f   : > { %p11860_p2 = por %p11859_p1, %p11858_p10 }
  0x61   : > { %p11861_p5 = pnand %p11860_p2, %p11854_p3 }
  0x63   : > { %11864 = shalt.err (!%p11861_p5)
}
  0x64   : > { %s11865_s21 = scalar_lea.vmem %s12310_s10, 256  ;;  %s12121_s28 = smov [#allocation2]  }
  0x65   : > { %p11866_p9 = scmp.ne.s32.totalorder %s12310_s10, %s11865_s21  ;;  %s11870_s18 = sshll.u32 %s12121_s28, 4  ;;  %s11871_s18 = int_to_ptr.vmem [resolvable:$false] %s11870_s18 }
  0x66   : > { %s11872_s19 = scalar_lea.vmem %s11871_s18, 512  ;;  %p11873_p0 = scmp.lt.s32.totalorder %s12310_s10, %s11871_s18 }
  0x67   : > { %p11868_p11 = pnand %p11866_p9, %p11852_p13  ;;  %p11874_p4 = scmp.lt.s32.totalorder %s11872_s19, %s11865_s21 }
  0x69   : > { %p11869_p12 = pneg %p11868_p11  ;;  %p11875_p7 = por %p11874_p4, %p11873_p0 }
  0x6b   : > { %p11876_p10 = pnand %p11875_p7, %p11869_p12 }
  0x6d   : > { %11879 = shalt.err (!%p11876_p10)
}
  0x6e   : > { %11416 = dma.hbm_to_vmem [thread:$0]  (!%p12312_p8), %s12308_s7, 256, %s12310_s10, %s247_s24  }
  0x6f   : > { %p17261_p3 = scmp.ne.s32.totalorder %s17255_s27, 0 }
  0x71   : > { %267 = sbr.rel (%p17261_p3) target bundleno = 1828 (0x724), region = 36 }
  0x78   : > { %s12344_s20 = sand.u32 1, %s12010_s22   ;;  %p17262_p13 = scmp.ne.s32.totalorder %s17254_s26, 0 }
  0x79   : > { %s8576_s9 = sshll.u32 %s12344_s20, 4  ;;  %s270_s12 = scalar_lea.sflag [#allocation3], %s12344_s20 }
  0x7a   : > { %s12348_s8 = scalar_lea.vmem [#allocation2], %s8576_s9 }
  0x7b   : > { %11993 = dma.done.wait (%p17262_p13), %s270_s12, 256  }
  0x7c   : > { %11995 = vsyncadd (%p17262_p13), %s270_s12, 4294967040  ;;  %p17263_p8 = scmp.eq.s32.totalorder %s12183_s25, 0 }
  0x7e   : > { %11997 = dma.done.wait (%p17263_p8), [#allocation5], 768   ;;  %p17264_p1 = pmov %p17263_p8 }
  0x80   : > { %11999 = vsyncadd (%p17264_p1), [#allocation5], 4294966528  ;;  %p17265_p2 = pmov %p17264_p1 }
  0x81   : > { %p17266_p5 = pmov %p17264_p1 }
  0x82   : > { %12001 = dma.done.wait (%p17265_p2), [#allocation8], 384  }
  0x83   : > { %12003 = vsyncadd (%p17266_p5), [#allocation8], 4294966912  ;;  %v12363_v0 = vld [vmem:[%s12348_s8 + $0x8] sm:$0xff]  ;;  %v12366_v1 = vld [vmem:[%s12348_s8] sm:$0xff]  ;;  %v12122_v23 = vmov 683565275  }
  0x84   : > { %v12369_v2 = vmul.f32 0.62831855, %v12363_v0  ;;  %v12372_v3 = vmul.f32 0.62831855, %v12366_v1  ;;  %v12123_v25 = vmov 2475754826  }
  0x85   : > { %v12124_v27 = vmov 2131351028   ;;  %v12125_v29 = vmov 2102212464   ;;  %v12126_v31 = vmov 920167782  }
  0x86   : > { %v833_v4 = vand.u32 2147483647, %v12369_v2  ;;  %v836_v5 = vand.u32 2139095040, %v12369_v2  ;;  %v730_v8 = vand.u32 2147483647, %v12372_v3  ;;  %v733_v9 = vand.u32 2139095040, %v12372_v3 }
  0x87   : > { %v12127_v38 = vmov 1326507024   ;;  %vm835_vm14 = vcmp.lt.s32.totalorder %v12369_v2, 0  ;;  %s13031_s26 = sshll.u32 %s12344_s20, 11  ;;  %s9364_s11 = sshll.u32 (%p12295_p6), %s12183_s25, 8 }
  0x88   : > { %v837_v6 = vshrl.u32 %v836_v5, 23  ;;  %v840_v7 = vand.u32 8388607, %v833_v4  ;;  %v734_v11 = vshrl.u32 %v733_v9, 23  ;;  %v12382_v15 = vand.u32 8388607, %v730_v8 }
  0x89   : > { %vm12457_vm15 = vcmp.le.f32.partialorder %v833_v4, 0.7853982  ;;  %s13049_s27 = scalar_lea.vmem [#allocation9], %s13031_s26   ;;  %s14614_s7 = scalar_lea.vmem [#allocation10], %s13031_s26  }
  0x8a   : > { %v8587_v10 = vadd.s32 4294967169, %v837_v6  ;;  %v841_v13 = vor.u32 8388608, %v840_v7  ;;  %v8583_v14 = vadd.s32 4294967169, %v734_v11  ;;  %v738_v21 = vor.u32 8388608, %v12382_v15  ;;  %s14653_s10 = scalar_lea.vmem [#allocation11], %s13031_s26   ;;  %s9409_s24 = sshll.u32 (%p12295_p6), %s12183_s25, 11 }
  0x8b   : > { %s7187_s13 = ssub.s32 (%p12295_p6), 313, %s9364_s11  ;;  %s16258_s15 = scalar_lea.vmem (%p12295_p6), %s16856_s4, %s9409_s24  }
  0x8c   : > { %v843_v12 = vadd.s32 1, %v8587_v10  ;;  %v740_v17 = vadd.s32 1, %v8583_v14  ;;  %v12384_v20 = vshll.u32 %v841_v13, 8  ;;  %p7188_p9 = scmp.lt.s32.totalorder (%p12295_p6), %s7187_s13, 256 }
  0x8e   : > { %vm844_vm0 = vcmp.gt.s32.totalorder %v843_v12, 0  ;;  %vm741_vm1 = vcmp.gt.s32.totalorder %v740_v17, 0 }
  0x8f   : > { %v845_v16 = vsel %vm844_vm0, %v843_v12, 0  ;;  %v742_v43 = vsel %vm741_vm1, %v740_v17, 0  ;;  %vm732_vm0 = vcmp.lt.s32.totalorder %v12372_v3, 0  ;;  %vm12480_vm1 = vcmp.le.f32.partialorder %v730_v8, 0.7853982 }
  0x90   : > { %v846_v18 = vshrl.u32 %v845_v16, 5  ;;  %v847_v19 = vand.u32 31, %v845_v16  ;;  %v743_v46 = vshrl.u32 %v742_v43, 5  ;;  %v744_v47 = vand.u32 31, %v742_v43 }
  0x92   : > { %v848_v22 = vsub.s32 32, %v847_v19  ;;  %v850_v24 = vshll.u32 %v12122_v23, %v847_v19  ;;  %v853_v26 = vshll.u32 %v12123_v25, %v847_v19  ;;  %v856_v28 = vshll.u32 %v12124_v27, %v847_v19 }
  0x93   : > { %v859_v30 = vshll.u32 %v12125_v29, %v847_v19  ;;  %v862_v32 = vshll.u32 %v12126_v31, %v847_v19  ;;  %vm865_vm2 = vcmp.lt.s32.totalorder %v846_v18, 1  ;;  %vm866_vm3 = vcmp.lt.s32.totalorder %v846_v18, 2 }
  0x94   : > { %v849_v33 = vshrl.u32 %v12122_v23, %v848_v22  ;;  %v851_v34 = vshrl.u32 %v12123_v25, %v848_v22  ;;  %v854_v35 = vshrl.u32 %v12124_v27, %v848_v22  ;;  %v857_v36 = vshrl.u32 %v12125_v29, %v848_v22 }
  0x95   : > { %v860_v37 = vshrl.u32 %v12126_v31, %v848_v22  ;;  %v863_v39 = vshrl.u32 %v12127_v38, %v848_v22  ;;  %vm867_vm4 = vcmp.lt.s32.totalorder %v846_v18, 3  ;;  %vm868_vm5 = vcmp.lt.s32.totalorder %v846_v18, 4 }
  0x96   : > { %v852_v40 = vor.u32 %v851_v34, %v850_v24  ;;  %v855_v41 = vor.u32 %v854_v35, %v853_v26  ;;  %v858_v42 = vor.u32 %v857_v36, %v856_v28  ;;  %v745_v55 = vsub.s32 32, %v744_v47 }
  0x97   : > { %v861_v44 = vor.u32 %v860_v37, %v859_v30  ;;  %v864_v45 = vor.u32 %v863_v39, %v862_v32  ;;  %v747_v59 = vshll.u32 %v12122_v23, %v744_v47  ;;  %v750_v11 = vshll.u32 %v12123_v25, %v744_v47 }
  0x98   : > { %v869_v48 = vsel %vm865_vm2, %v849_v33, %v852_v40  ;;  %v870_v49 = vsel %vm868_vm5, %v858_v42, 2102212464  ;;  %v873_v50 = vsel %vm865_vm2, %v852_v40, %v855_v41  ;;  %v877_v51 = vsel %vm865_vm2, %v855_v41, %v858_v42 }
  0x99   : > { %v871_v52 = vsel %vm867_vm4, %v855_v41, %v870_v49  ;;  %v874_v53 = vsel %vm868_vm5, %v861_v44, 920167782  ;;  %v878_v54 = vsel %vm868_vm5, %v864_v45, 1326507024  ;;  %v746_v63 = vshrl.u32 %v12122_v23, %v745_v55 }
  0x9a   : > { %v872_v56 = vsel %vm866_vm3, %v869_v48, %v871_v52  ;;  %v875_v57 = vsel %vm867_vm4, %v858_v42, %v874_v53  ;;  %v879_v58 = vsel %vm867_vm4, %v861_v44, %v878_v54  ;;  %v748_v10 = vshrl.u32 %v12123_v25, %v745_v55 }
  0x9b   : > { %v876_v60 = vsel %vm866_vm3, %v873_v50, %v875_v57  ;;  %v880_v61 = vsel %vm866_vm3, %v877_v51, %v879_v58  ;;  %v888_v62 = vmul.u32 %v12384_v20, %v872_v56  ;;  %v751_v12 = vshrl.u32 %v12124_v27, %v745_v55 }
  0x9c   : > { %v12399_v5 = vmul.u32.u64.low %v12384_v20, %v880_v61  ;;  %v12400_v6 = vmul.u32.u64.high %v12384_v20, %v880_v61, %v12399_v5  ;;  %v12403_v7 = vmul.u32.u64.low %v12384_v20, %v876_v60  ;;  %v12404_v9 = vmul.u32.u64.high %v12384_v20, %v876_v60, %v12403_v7 }
  0x9d   : > { %v753_v13 = vshll.u32 %v12124_v27, %v744_v47  ;;  %v754_v14 = vshrl.u32 %v12125_v29, %v745_v55  ;;  %v756_v16 = vshll.u32 %v12125_v29, %v744_v47  ;;  %v757_v17 = vshrl.u32 %v12126_v31, %v745_v55 }
  0x9e   : > { %v759_v18 = vshll.u32 %v12126_v31, %v744_v47  ;;  %v749_v19 = vor.u32 %v748_v10, %v747_v59  ;;  %v752_v22 = vor.u32 %v751_v12, %v750_v11  ;;  %v760_v24 = vshrl.u32 %v12127_v38, %v745_v55 }
  0x9f   : > { %vm762_vm6 = vcmp.lt.s32.totalorder %v743_v46, 1  ;;  %vm890_vm7 = vc.u32 %v12400_v6, %v12403_v7  ;;  %v891_v23 = vadd.s32 1, %v12404_v9  ;;  %v755_v26 = vor.u32 %v754_v14, %v753_v13 }
  0xa0   : > { %v778_v20 = vshll.u32 %v738_v21, 8  ;;  %v758_v28 = vor.u32 %v757_v17, %v756_v16  ;;  %v761_v25 = vor.u32 %v760_v24, %v759_v18  ;;  %vm763_vm8 = vcmp.lt.s32.totalorder %v743_v46, 2 }
  0xa1   : > { %vm764_vm9 = vcmp.lt.s32.totalorder %v743_v46, 3  ;;  %v892_v27 = vsel %vm890_vm7, %v891_v23, %v12404_v9  ;;  %vm765_vm10 = vcmp.lt.s32.totalorder %v743_v46, 4  ;;  %v766_v29 = vsel %vm762_vm6, %v746_v63, %v749_v19 }
  0xa2   : > { %v770_v30 = vsel %vm762_vm6, %v749_v19, %v752_v22  ;;  %v893_v31 = vadd.s32 %v892_v27, %v888_v62  ;;  %v767_v32 = vsel %vm765_vm10, %v755_v26, 2102212464  ;;  %v771_v33 = vsel %vm765_vm10, %v758_v28, 920167782 }
  0xa3   : > { %v774_v34 = vsel %vm762_vm6, %v752_v22, %v755_v26  ;;  %v768_v35 = vsel %vm764_vm9, %v752_v22, %v767_v32  ;;  %v772_v36 = vsel %vm764_vm9, %v755_v26, %v771_v33  ;;  %v775_v15 = vsel %vm765_vm10, %v761_v25, 1326507024 }
  0xa4   : > { %v894_v21 = vadd.s32 536870912, %v893_v31  ;;  %v773_v37 = vsel %vm763_vm8, %v770_v30, %v772_v36  ;;  %v776_v38 = vsel %vm764_vm9, %v758_v28, %v775_v15  ;;  %v769_v39 = vsel %vm763_vm8, %v766_v29, %v768_v35 }
  0xa5   : > { %v777_v40 = vsel %vm763_vm8, %v774_v34, %v776_v38  ;;  %v12417_v41 = vmul.u32.u64.low %v778_v20, %v773_v37  ;;  %v12418_v42 = vmul.u32.u64.high %v778_v20, %v773_v37, %v12417_v41  ;;  %v785_v48 = vmul.u32 %v778_v20, %v769_v39 }
  0xa6   : > { %v12420_v43 = vshrl.u32 %v894_v21, 30  ;;  %v12422_v44 = vmul.u32.u64.low %v778_v20, %v777_v40  ;;  %v12423_v45 = vmul.u32.u64.high %v778_v20, %v777_v40, %v12422_v44  ;;  %v339_v54 = vlaneseq }
  0xa7   : > { %v788_v49 = vadd.s32 1, %v12418_v42  ;;  %v889_v61 = vadd.s32 %v12403_v7, %v12400_v6  ;;  %v1590_v6 = vld [vmem:[#allocation4] sm:$0xff]  ;;  %v1591_v7 = vld [vmem:[#allocation4 + $0x8] sm:$0xff]  ;;  %vm925_vm5 = vweird.f32 %v12369_v2  ;;  %vm941_vm6 = vcmp.lt.f32.partialorder %v12363_v0, 5.0 }
  0xa8   : > { %v896_v47 = vshll.u32 %v12420_v43, 30  ;;  %vm787_vm11 = vc.u32 %v12423_v45, %v12417_v41  ;;  %v12431_v59 = vshrl.u32 %v339_v54, 7  ;;  %v11365_v28 = vpack.c.bf16 %v1591_v7, %v1590_v6 }
  0xa9   : > { %v789_v51 = vsel %vm787_vm11, %v788_v49, %v12418_v42  ;;  %v786_v34 = vadd.s32 %v12417_v41, %v12423_v45  ;;  %v919_v41 = vsub.s32 4, %v12420_v43  ;;  %vm822_vm10 = vweird.f32 %v12372_v3 }
  0xaa   : > { %v897_v50 = vsub.s32 %v893_v31, %v896_v47  ;;  %v790_v52 = vadd.s32 %v789_v51, %v785_v48  ;;  %v343_v11 = vcvt.s32.f32 %v12431_v59  ;;  %v12437_v12 = vsub.s32 0, %v12431_v59  ;;  %11366 = vmatprep.subr.bf16.mxu0 %v11365_v28  ;;  %11377 = vmatprep.subr.bf16.mxu1 %v11365_v28 }
  0xab   : > { %v341_v14 = vadd.s32 8, %v12431_v59  ;;  %v12441_v18 = vadd.s32 16, %v12431_v59  ;;  %11368 = vmatpush3.bf16.msra.mxu0 %v11365_v28  ;;  %11379 = vmatpush3.bf16.msra.mxu1 %v11365_v28 }
  0xac   : > { %v899_v46 = vsub.s32 0, %v897_v50  ;;  %v791_v55 = vadd.s32 536870912, %v790_v52  ;;  %v12443_v23 = vmul.f32 0.33333334, %v343_v11  ;;  %v386_v26 = vrot.slane %v12363_v0, %v12437_v12 }
  0xad   : > { %v344_v25 = vcvt.s32.f32 %v341_v14  ;;  %v345_v30 = vcvt.s32.f32 %v12441_v18  ;;  %vm673_vm11 = vcmp.eq.s32.totalorder %v12441_v18, 16 }
  0xae   : > { %v8588_v53 = vmin.u32 %v899_v46, %v897_v50  ;;  %v12429_v57 = vshrl.u32 %v791_v55, 30  ;;  %v439_v33 = vsub.f32 %v386_v26, %v12443_v23 }
  0xaf   : > { %v12450_v35 = vmul.f32 0.33333334, %v344_v25  ;;  %v12452_v21 = vmul.f32 0.33333334, %v345_v30 }
  0xb0   : > { %v901_v56 = vclz %v8588_v53  ;;  %v793_v60 = vshll.u32 %v12429_v57, 30  ;;  %v487_v44 = vmul.f32 -4.5, %v439_v33  ;;  %v354_v53 = vrot.slane %v12366_v1, %v12437_v12 }
  0xb1   : > { %v455_v49 = vsub.f32 %v386_v26, %v12450_v35 }
  0xb2   : > { %v8589_v58 = vadd.s32 4294967294, %v901_v56  ;;  %v794_v63 = vsub.s32 %v790_v52, %v793_v60  ;;  %v920_v52 = vsel %vm835_vm14, %v919_v41, %v12420_v43  ;;  %v535_v54 = vmul.f32 %v487_v44, %v439_v33 }
  0xb3   : > { %v447_v7 = vsub.f32 %v354_v53, %v12450_v35 }
  0xb4   : > { %vm8590_vm12 = vcmp.lt.s32.totalorder %v8589_v58, 0  ;;  %v796_v13 = vsub.s32 0, %v794_v63 }
  0xb5   : > { %v904_v62 = vsel %vm8590_vm12, 0, %v8589_v58  ;;  %v503_v58 = vmul.f32 -4.5, %v455_v49  ;;  %v495_v30 = vmul.f32 -4.5, %v447_v7  ;;  %vm940_vm12 = vcmp.lt.f32.partialorder %v12366_v1, 5.0 }
  0xb6   : > { %v905_v5 = vsub.s32 32, %v904_v62  ;;  %v906_v9 = vshll.u32 %v897_v50, %v904_v62  ;;  %v909_v10 = vsub.s32 4294967266, %v904_v62  ;;  %v8584_v19 = vmin.u32 %v796_v13, %v794_v63 }
  0xb7   : > { %v471_v50 = vsub.f32 %v386_v26, %v12452_v21  ;;  %v551_v43 = vmul.f32 %v503_v58, %v455_v49 }
  0xb8   : > { %v907_v16 = vshrl.u32 %v889_v61, %v905_v5  ;;  %v910_v17 = vadd.s32 127, %v909_v10  ;;  %v798_v20 = vclz %v8584_v19  ;;  %v922_v61 = vsel %vm12457_vm15, 0, %v920_v52 }
  0xb9   : > { %v519_v60 = vmul.f32 -4.5, %v471_v50  ;;  %v591_v5 = vmul.f32 1.442695, %v535_v54  ;;  %v926_v10 = vand.u32 3, %v922_v61  ;;  %v463_v19 = vsub.f32 %v354_v53, %v12452_v21 }
  0xba   : > { %v908_v22 = vor.u32 %v907_v16, %v906_v9  ;;  %v911_v24 = vshll.u32 %v910_v17, 23  ;;  %v8585_v31 = vadd.s32 4294967294, %v798_v20  ;;  %v816_v16 = vsub.s32 4, %v12429_v57 }
  0xbb   : > { %v567_v11 = vmul.f32 %v519_v60, %v471_v50  ;;  %vm931_vm2 = vcmp.eq.s32.totalorder %v926_v10, 2  ;;  %vm928_vm3 = vcmp.eq.s32.totalorder %v926_v10, 0  ;;  %vm927_vm4 = vcmp.lt.s32.totalorder %v926_v10, 2 }
  0xbc   : > { %v912_v27 = vor.u32 4788187, %v911_v24  ;;  %v915_v29 = vcvt.s32.f32 %v908_v22  ;;  %vm8586_vm13 = vcmp.lt.s32.totalorder %v8585_v31, 0  ;;  %v623_v24 = vmul.f32 1.442695, %v551_v43 }
  0xbd   : > { %v801_v15 = vsel %vm8586_vm13, 0, %v8585_v31  ;;  %v655_v26 = vmul.f32 1.442695, %v567_v11  ;;  %v817_v25 = vsel %vm732_vm0, %v816_v16, %v12429_v57  ;;  %v511_v33 = vmul.f32 -4.5, %v463_v19 }
  0xbe   : > { %v913_v32 = vand.u32 2147483647, %v912_v27  ;;  %v802_v37 = vsub.s32 32, %v801_v15  ;;  %v803_v38 = vshll.u32 %v794_v63, %v801_v15  ;;  %v806_v39 = vsub.s32 4294967266, %v801_v15 }
  0xbf   : > { %v431_v63 = vsub.f32 %v354_v53, %v12443_v23  ;;  %vm1593_vm13 = vcmask 195584  }
  0xc0   : > { %v916_v36 = vmul.f32 %v915_v29, %v913_v32  ;;  %v804_v45 = vshrl.u32 %v786_v34, %v802_v37  ;;  %v807_v47 = vadd.s32 127, %v806_v39  ;;  %v819_v32 = vsel %vm12480_vm1, 0, %v817_v25 }
  0xc1   : > { %v479_v17 = vmul.f32 -4.5, %v431_v63  ;;  %v823_v37 = vand.u32 3, %v819_v32  ;;  %v12128_v39 = vmov 0.0  }
  0xc2   : > { %v917_v42 = vxor.u32 2147483648, %v916_v36  ;;  %v805_v51 = vor.u32 %v804_v45, %v803_v38  ;;  %v808_v46 = vshll.u32 %v807_v47, 23  ;;  %v543_v38 = vmul.f32 %v495_v30, %v447_v7  ;;  %v1592_v7 = vld [vmem:[#allocation4 + $0x10] sm:$0xff] }
  0xc3   : > { %v8592_v40 = vsel %vm941_vm6, 1.0, %v12128_v39  ;;  %vm828_vm7 = vcmp.eq.s32.totalorder %v823_v37, 2  ;;  %vm825_vm8 = vcmp.eq.s32.totalorder %v823_v37, 0  ;;  %vm824_vm9 = vcmp.lt.s32.totalorder %v823_v37, 2  ;;  %10199 = vmatprep.subr.mxu0 %v1592_v7  ;;  %11378 = vmatprep.subr.mxu1 %v1592_v7 }
  0xc4   : > { %v918_v48 = vsel %vm835_vm14, %v917_v42, %v916_v36  ;;  %v809_v55 = vor.u32 4788187, %v808_v46  ;;  %v812_v56 = vcvt.s32.f32 %v805_v51  ;;  %v527_v36 = vmul.f32 %v479_v17, %v431_v63  ;;  %10200 = vmatpush3.msra.mxu0 %v1592_v7  ;;  %11380 = vmatpush3.msra.mxu1 %v1592_v7 }
  0xc5   : > { %v921_v4 = vsel %vm12457_vm15, %v12369_v2, %v918_v48  ;;  %v559_v2 = vmul.f32 %v511_v33, %v463_v19  ;;  %v607_v48 = vmul.f32 1.442695, %v543_v38 }
  0xc6   : > { %11660 = vcosq.f32 %v921_v4  ;;  %v810_v62 = vand.u32 2147483647, %v809_v55  ;;  %v575_v44 = vmul.f32 1.442695, %v527_v36 }
  0xc7   : > { %11662 = vsinq.f32 %v921_v4  ;;  %v639_v4 = vmul.f32 1.442695, %v559_v2 }
  0xc8   : > { %v813_v9 = vmul.f32 %v812_v56, %v810_v62  ;;  %11664 = vpow2.f32 %v591_v5  ;;  %v8591_v5 = vsel %vm940_vm12, 1.0, %v12128_v39 }
  0xca   : > { %v814_v14 = vxor.u32 2147483648, %v813_v9 }
  0xcc   : > { %v815_v6 = vsel %vm732_vm0, %v814_v14, %v813_v9 }
  0xcd   : > { %v818_v8 = vsel %vm12480_vm1, %v12372_v3, %v815_v6 }
  0xce   : > { %11666 = vcosq.f32 %v818_v8 }
  0xcf   : > { %11668 = vsinq.f32 %v818_v8 }
  0xd0   : > { %v11661_v22 = vpop.eup %11660  ;;  %11670 = vpow2.f32 %v623_v24 }
  0xd1   : > { %v11663_v20 = vpop.eup %11662  ;;  %v932_v28 = vxor.u32 2147483648, %v11661_v22  ;;  %11672 = vpow2.f32 %v655_v26 }
  0xd2   : > { %v929_v27 = vxor.u32 2147483648, %v11663_v20  ;;  %v11665_v42 = vpop.eup %11664  ;;  %11674 = vpow2.f32 %v575_v44 }
  0xd3   : > { %v933_v29 = vsel %vm931_vm2, %v932_v28, %v11663_v20  ;;  %11676 = vpow2.f32 %v607_v48 }
  0xd4   : > { %v930_v31 = vsel %vm928_vm3, %v11661_v22, %v929_v27  ;;  %11678 = vpow2.f32 %v639_v4  ;;  %v357_v22 = vsub.s32 1, %v12431_v59 }
  0xd5   : > { %v934_v34 = vsel %vm927_vm4, %v930_v31, %v933_v29 }
  0xd6   : > { %v935_v57 = vsel %vm925_vm5, nan, %v934_v34  ;;  %v358_v28 = vrot.slane %v12366_v1, %v357_v22 }
  0xd7   : > { %v937_v15 = vadd.f32 1.0, %v935_v57 }
  0xd8   : > { %v11667_v45 = vpop.eup %11666  ;;  %v432_v30 = vsub.f32 %v358_v28, %v12443_v23  ;;  %v448_v36 = vsub.f32 %v358_v28, %v12450_v35 }
  0xd9   : > { %v939_v41 = vmul.f32 0.5, %v937_v15  ;;  %v11669_v49 = vpop.eup %11668  ;;  %v829_v50 = vxor.u32 2147483648, %v11667_v45  ;;  %v464_v15 = vsub.f32 %v358_v28, %v12452_v21 }
  0xda   : > { %v826_v46 = vxor.u32 2147483648, %v11669_v49  ;;  %v11671_v52 = vpop.eup %11670  ;;  %v480_v34 = vmul.f32 -4.5, %v432_v30  ;;  %v496_v39 = vmul.f32 -4.5, %v448_v36 }
  0xdb   : > { %v12499_v47 = vmul.f32 %v8592_v40, %v939_v41  ;;  %v830_v53 = vsel %vm828_vm7, %v829_v50, %v11669_v49  ;;  %v11673_v54 = vpop.eup %11672  ;;  %v512_v40 = vmul.f32 -4.5, %v464_v15 }
  0xdc   : > { %v827_v56 = vsel %vm825_vm8, %v11667_v45, %v826_v46  ;;  %v720_v63 = vsel %vm673_vm11, 1.0, %v11673_v54  ;;  %v11675_v43 = vpop.eup %11674  ;;  %v528_v38 = vmul.f32 %v480_v34, %v432_v30 }
  0xdd   : > { %v985_v51 = vrot.slane %v12499_v47, %v12437_v12  ;;  %v831_v58 = vsel %vm824_vm9, %v827_v56, %v830_v53  ;;  %v11677_v13 = vpop.eup %11676  ;;  %v560_v41 = vmul.f32 %v512_v40, %v464_v15  ;;  %v989_v44 = vrot.slane %v12499_v47, %v357_v22 }
  0xde   : > { %v832_v60 = vsel %vm822_vm10, nan, %v831_v58  ;;  %v11679_v14 = vpop.eup %11678  ;;  %v577_v2 = vmul.f32 1.442695, %v528_v38 }
  0xdf   : > { %v1038_v55 = vmul.f32 %v11665_v42, %v985_v51  ;;  %v1054_v61 = vmul.f32 %v11671_v52, %v985_v51  ;;  %v936_v62 = vadd.f32 1.0, %v832_v60  ;;  %v1070_v9 = vmul.f32 %v985_v51, %v720_v63 }
  0xe0   : > { %v712_v6 = vsel %vm673_vm11, 1.0, %v11679_v14  ;;  %v544_v42 = vmul.f32 %v496_v39, %v448_v36  ;;  %v641_v49 = vmul.f32 1.442695, %v560_v41 }
  0xe1   : > { %1334 = vxpose.xlu1.b32.start [1/3] (short) %v1038_v55, 128  ;;  %v938_v3 = vmul.f32 0.5, %v936_v62 }
  0xe2   : > { %v609_v48 = vmul.f32 1.442695, %v544_v42 }
  0xe3   : > { %v12508_v10 = vmul.f32 %v8591_v5, %v938_v3  ;;  %v361_v5 = vsub.s32 2, %v12431_v59 }
  0xe5   : > { %1335 = vxpose.xlu1.b32.cont [2/3] (short) %v1054_v61, 128  ;;  %v953_v11 = vrot.slane %v12508_v10, %v12437_v12  ;;  %v390_v12 = vrot.slane %v12363_v0, %v357_v22  ;;  %v957_v53 = vrot.slane %v12508_v10, %v357_v22  ;;  %v394_v3 = vrot.slane %v12363_v0, %v361_v5 }
  0xe6   : > { %v362_v14 = vrot.slane %v12366_v1, %v361_v5 }
  0xe7   : > { %v1030_v16 = vmul.f32 %v11675_v43, %v953_v11  ;;  %v1046_v17 = vmul.f32 %v11677_v13, %v953_v11  ;;  %v1062_v19 = vmul.f32 %v953_v11, %v712_v6  ;;  %v440_v8 = vsub.f32 %v390_v12, %v12443_v23 }
  0xe8   : > { %v456_v26 = vsub.f32 %v390_v12, %v12450_v35  ;;  %v472_v20 = vsub.f32 %v390_v12, %v12452_v21  ;;  %v457_v11 = vsub.f32 %v394_v3, %v12450_v35  ;;  %v473_v13 = vsub.f32 %v394_v3, %v12452_v21 }
  0xe9   : > { %1336 = vxpose.xlu1.b32.end [3/3] (short) %v1070_v9, 128  ;;  %1078 = vxpose.xlu0.b32.start [1/3] (short) %v1030_v16, 128  ;;  %v488_v24 = vmul.f32 -4.5, %v440_v8  ;;  %v441_v9 = vsub.f32 %v394_v3, %v12443_v23  ;;  %v433_v7 = vsub.f32 %v362_v14, %v12443_v23 }
  0xea   : > { %v504_v27 = vmul.f32 -4.5, %v456_v26  ;;  %v520_v29 = vmul.f32 -4.5, %v472_v20  ;;  %v521_v6 = vmul.f32 -4.5, %v473_v13 }
  0xeb   : > { %v536_v25 = vmul.f32 %v488_v24, %v440_v8  ;;  %v489_v43 = vmul.f32 -4.5, %v441_v9  ;;  %v481_v8 = vmul.f32 -4.5, %v433_v7  ;;  %v449_v24 = vsub.f32 %v362_v14, %v12450_v35 }
  0xec   : > { %v552_v32 = vmul.f32 %v504_v27, %v456_v26  ;;  %v568_v33 = vmul.f32 %v520_v29, %v472_v20  ;;  %v569_v12 = vmul.f32 %v521_v6, %v473_v13  ;;  %v465_v20 = vsub.f32 %v362_v14, %v12452_v21 }
  0xed   : > { %1079 = vxpose.xlu0.b32.cont [2/3] (short) %v1046_v17, 128  ;;  %v593_v31 = vmul.f32 1.442695, %v536_v25  ;;  %v537_v16 = vmul.f32 %v489_v43, %v441_v9  ;;  %v505_v17 = vmul.f32 -4.5, %v457_v11  ;;  %v529_v25 = vmul.f32 %v481_v8, %v433_v7 }
  0xee   : > { %v625_v57 = vmul.f32 1.442695, %v552_v32  ;;  %v657_v37 = vmul.f32 1.442695, %v568_v33  ;;  %v659_v28 = vmul.f32 1.442695, %v569_v12  ;;  %v993_v33 = vrot.slane %v12499_v47, %v361_v5 }
  0xef   : > { %11680 = vpow2.f32 %v593_v31  ;;  %v553_v22 = vmul.f32 %v505_v17, %v457_v11  ;;  %v497_v27 = vmul.f32 -4.5, %v449_v24  ;;  %v513_v29 = vmul.f32 -4.5, %v465_v20 }
  0xf0   : > { %11682 = vpow2.f32 %v625_v57  ;;  %v579_v30 = vmul.f32 1.442695, %v529_v25 }
  0xf1   : > { %1080 = vxpose.xlu0.b32.end [3/3] (short) %v1062_v19, 128  ;;  %11684 = vpow2.f32 %v657_v37  ;;  %v595_v19 = vmul.f32 1.442695, %v537_v16  ;;  %v627_v26 = vmul.f32 1.442695, %v553_v22  ;;  %v545_v31 = vmul.f32 %v497_v27, %v449_v24 }
  0xf2   : > { %11686 = vpow2.f32 %v577_v2  ;;  %v561_v32 = vmul.f32 %v513_v29, %v465_v20  ;;  %v961_v2 = vrot.slane %v12508_v10, %v361_v5 }
  0xf3   : > { %11688 = vpow2.f32 %v609_v48  ;;  %v611_v36 = vmul.f32 1.442695, %v545_v31 }
  0xf4   : > { %11690 = vpow2.f32 %v641_v49  ;;  %v643_v57 = vmul.f32 1.442695, %v561_v32 }
  0xf5   : > { %11692 = vpow2.f32 %v595_v19 }
  0xf6   : > { %11694 = vpow2.f32 %v627_v26 }
  0xf7   : > { %11696 = vpow2.f32 %v659_v28 }
  0xf8   : > { %11698 = vpow2.f32 %v579_v30 }
  0xf9   : > { %v11681_v45 = vpop.eup %11680  ;;  %11700 = vpow2.f32 %v611_v36 }
  0xfa   : > { %v1039_v50 = vmul.f32 %v11681_v45, %v989_v44  ;;  %v11683_v4 = vpop.eup %11682  ;;  %11702 = vpow2.f32 %v643_v57 }
  0xfb   : > { %v11685_v51 = vpop.eup %11684  ;;  %v1055_v46 = vmul.f32 %v11683_v4, %v989_v44 }
  0xfc   : > { %v721_v52 = vsel %vm673_vm11, 1.0, %v11685_v51  ;;  %v11687_v54 = vpop.eup %11686 }
  0xfd   : > { %v1071_v55 = vmul.f32 %v989_v44, %v721_v52  ;;  %v1031_v56 = vmul.f32 %v11687_v54, %v957_v53  ;;  %v11689_v58 = vpop.eup %11688 }
  0xfe   : > { %v11691_v60 = vpop.eup %11690  ;;  %v1047_v61 = vmul.f32 %v11689_v58, %v957_v53 }
  0xff   : > { %v713_v62 = vsel %vm673_vm11, 1.0, %v11691_v60  ;;  %v11693_v34 = vpop.eup %11692 }
 0x100   : > { %v1063_v63 = vmul.f32 %v957_v53, %v713_v62  ;;  %v1040_v15 = vmul.f32 %v11693_v34, %v993_v33  ;;  %v11695_v37 = vpop.eup %11694 }
 0x101   : > { %v11697_v38 = vpop.eup %11696  ;;  %v1056_v39 = vmul.f32 %v11695_v37, %v993_v33 }
 0x102   : > { %v722_v40 = vsel %vm673_vm11, 1.0, %v11697_v38  ;;  %v11699_v42 = vpop.eup %11698 }
 0x103   : > { %v1072_v41 = vmul.f32 %v993_v33, %v722_v40  ;;  %v1032_v45 = vmul.f32 %v11699_v42, %v961_v2  ;;  %v11701_v48 = vpop.eup %11700 }
 0x104   : > { %v11703_v49 = vpop.eup %11702  ;;  %v1048_v4 = vmul.f32 %v11701_v48, %v961_v2 }
 0x105   : > { %v714_v51 = vsel %vm673_vm11, 1.0, %v11703_v49 }
 0x106   : > { %v1064_v52 = vmul.f32 %v961_v2, %v714_v51 }
 0x11e   : > { %1366 = vxpose.xlu1.b32.start [1/3] (short) %v1039_v50, 128 }
 0x122   : > { %1367 = vxpose.xlu1.b32.cont [2/3] (short) %v1055_v46, 128 }
 0x126   : > { %1368 = vxpose.xlu1.b32.end [3/3] (short) %v1071_v55, 128  ;;  %1110 = vxpose.xlu0.b32.start [1/3] (short) %v1031_v56, 128  ;;  %v12567_v56 = vsub.s32 3, %v12431_v59 }
 0x128   : > { %v366_v14 = vrot.slane %v12366_v1, %v12567_v56  ;;  %v997_v2 = vrot.slane %v12499_v47, %v12567_v56 }
 0x12a   : > { %1111 = vxpose.xlu0.b32.cont [2/3] (short) %v1047_v61, 128  ;;  %v398_v61 = vrot.slane %v12363_v0, %v12567_v56  ;;  %v434_v22 = vsub.f32 %v366_v14, %v12443_v23  ;;  %v450_v28 = vsub.f32 %v366_v14, %v12450_v35  ;;  %v466_v29 = vsub.f32 %v366_v14, %v12452_v21 }
 0x12b   : > { %v965_v14 = vrot.slane %v12508_v10, %v12567_v56 }
 0x12c   : > { %v442_v5 = vsub.f32 %v398_v61, %v12443_v23  ;;  %v458_v43 = vsub.f32 %v398_v61, %v12450_v35  ;;  %v474_v13 = vsub.f32 %v398_v61, %v12452_v21  ;;  %v482_v20 = vmul.f32 -4.5, %v434_v22 }
 0x12d   : > { %v498_v33 = vmul.f32 -4.5, %v450_v28  ;;  %v514_v36 = vmul.f32 -4.5, %v466_v29 }
 0x12e   : > { %1112 = vxpose.xlu0.b32.end [3/3] (short) %v1063_v63, 128  ;;  %v490_v9 = vmul.f32 -4.5, %v442_v5  ;;  %v506_v6 = vmul.f32 -4.5, %v458_v43  ;;  %v522_v19 = vmul.f32 -4.5, %v474_v13  ;;  %v530_v32 = vmul.f32 %v482_v20, %v434_v22 }
 0x12f   : > { %v546_v37 = vmul.f32 %v498_v33, %v450_v28 }
 0x130   : > { %v538_v17 = vmul.f32 %v490_v9, %v442_v5  ;;  %v554_v24 = vmul.f32 %v506_v6, %v458_v43  ;;  %v570_v26 = vmul.f32 %v522_v19, %v474_v13 }
 0x132   : > { %v597_v8 = vmul.f32 1.442695, %v538_v17  ;;  %v629_v27 = vmul.f32 1.442695, %v554_v24  ;;  %v661_v31 = vmul.f32 1.442695, %v570_v26 }
 0x134   : > { %11704 = vpow2.f32 %v597_v8 }
 0x135   : > { %11706 = vpow2.f32 %v629_v27 }
 0x136   : > { %11708 = vpow2.f32 %v661_v31 }
 0x13e   : > { %v11705_v42 = vpop.eup %11704 }
 0x13f   : > { %v11707_v51 = vpop.eup %11706 }
 0x140   : > { %v1057_v9 = vmul.f32 %v11707_v51, %v997_v2 }
 0x15b   : > { %1398 = vxpose.xlu1.b32.start [1/3] (short) %v1040_v15, 128  ;;  %v581_v15 = vmul.f32 1.442695, %v530_v32 }
 0x15d   : > { %11710 = vpow2.f32 %v581_v15 }
 0x15f   : > { %1399 = vxpose.xlu1.b32.cont [2/3] (short) %v1056_v39, 128  ;;  %v562_v39 = vmul.f32 %v514_v36, %v466_v29 }
 0x161   : > { %v12542_v44 = vpop.trf.xlu1  ;;  %v645_v48 = vmul.f32 1.442695, %v562_v39  ;;  %v12716_v39 = vsub.s32 4, %v12431_v59 }
 0x162   : > { %17271 = vst [vmem:[#allocation15_spill] sm:$0xff] %v12542_v44  ;;  %10393 = vmatprep.mubr.msk.f32.mxu1 %vm1593_vm13, %v12542_v44 }
 0x163   : > { %1400 = vxpose.xlu1.b32.end [3/3] (short) %v1072_v41, 128  ;;  %1142 = vxpose.xlu0.b32.start [1/3] (short) %v1032_v45, 128  ;;  %v613_v41 = vmul.f32 1.442695, %v546_v37 }
 0x165   : > { %v12546_v50 = vpop.trf.xlu1  ;;  %11712 = vpow2.f32 %v613_v41  ;;  %v12727_v41 = vld [vmem:[%s12348_s8 + $0x8] sm:$0xff] }
 0x166   : > { %17272 = vst [vmem:[#allocation16_spill] sm:$0xff] %v12546_v50  ;;  %10394 = vmatmul.mubr.msk.f32.vlgmr.msra.gmra.mrb[0].mxu1 %vm1593_vm13, %v12546_v50  ;;  %11714 = vpow2.f32 %v645_v48  ;;  %v402_v48 = vrot.slane %v12727_v41, %v12716_v39 }
 0x167   : > { %1143 = vxpose.xlu0.b32.cont [2/3] (short) %v1048_v4, 128  ;;  %v1041_v4 = vmul.f32 %v11705_v42, %v997_v2 }
 0x169   : > { %v12552_v46 = vpop.trf.xlu1  ;;  %v12556_v53 = vpop.trf.xlu0 }
 0x16a   : > { %17273 = vst [vmem:[#allocation17_spill] sm:$0xff] %v12552_v46  ;;  %10396 = vmatprep.mubr.msk.f32.mxu1 %vm1593_vm13, %v12552_v46  ;;  %10201 = vmatprep.mubr.msk.f32.mxu0 %vm1593_vm13, %v12556_v53 }
 0x16b   : > { %1144 = vxpose.xlu0.b32.end [3/3] (short) %v1064_v52, 128  ;;  %v11709_v52 = vpop.eup %11708 }
 0x16c   : > { %v723_v43 = vsel %vm673_vm11, 1.0, %v11709_v52  ;;  %v11711_v17 = vpop.eup %11710  ;;  %v443_v52 = vsub.f32 %v402_v48, %v12443_v23 }
 0x16d   : > { %v12560_v54 = vpop.trf.xlu1  ;;  %v12564_v55 = vpop.trf.xlu0  ;;  %v1073_v19 = vmul.f32 %v997_v2, %v723_v43  ;;  %v1033_v8 = vmul.f32 %v11711_v17, %v965_v14  ;;  %v459_v17 = vsub.f32 %v402_v48, %v12450_v35 }
 0x16e   : > { %17274 = vst [vmem:[#allocation18_spill] sm:$0xff] %v12560_v54  ;;  %10397 = vmatmul.mubr.msk.f32.gmra.mrb[2].mxu1 %vm1593_vm13, %v12560_v54  ;;  %10202 = vmatmul.mubr.msk.f32.vlgmr.msra.gmra.mrb[0].mxu0 %vm1593_vm13, %v12564_v55 }
 0x16f   : > { %v11713_v24 = vpop.eup %11712 }
 0x170   : > { %v11715_v56 = vpop.eup %11714  ;;  %v1049_v28 = vmul.f32 %v11713_v24, %v965_v14  ;;  %v12757_v24 = vld [vmem:[%s12348_s8] sm:$0xff] }
 0x171   : > { %v12571_v58 = vpop.trf.xlu1  ;;  %v12575_v60 = vpop.trf.xlu0  ;;  %v715_v29 = vsel %vm673_vm11, 1.0, %v11715_v56  ;;  %v370_v56 = vrot.slane %v12757_v24, %v12716_v39 }
 0x172   : > { %17275 = vst [vmem:[#allocation19_spill] sm:$0xff] %v12571_v58  ;;  %10399 = vmatprep.mubr.msk.f32.mxu1 %vm1593_vm13, %v12571_v58  ;;  %10204 = vmatprep.mubr.msk.f32.mxu0 %vm1593_vm13, %v12575_v60  ;;  %v1065_v32 = vmul.f32 %v965_v14, %v715_v29  ;;  %v491_v14 = vmul.f32 -4.5, %v443_v52 }
 0x174   : > { %v539_v29 = vmul.f32 %v491_v14, %v443_v52 }
 0x175   : > { %v12581_v62 = vpop.trf.xlu1  ;;  %v12585_v63 = vpop.trf.xlu0 }
 0x176   : > { %17276 = vst [vmem:[#allocation20_spill] sm:$0xff] %v12581_v62  ;;  %10400 = vmatmul.mubr.msk.f32.gmra.mrb[4].mxu1 %vm1593_vm13, %v12581_v62  ;;  %10205 = vmatmul.mubr.msk.f32.gmra.mrb[2].mxu0 %vm1593_vm13, %v12585_v63 }
 0x179   : > { %v12590_v3 = vpop.trf.xlu1  ;;  %v12594_v0 = vpop.trf.xlu0 }
 0x17a   : > { %17277 = vst [vmem:[#allocation21_spill] sm:$0xff] %v12590_v3  ;;  %10402 = vmatprep.mubr.msk.f32.mxu1 %vm1593_vm13, %v12590_v3  ;;  %10207 = vmatprep.mubr.msk.f32.mxu0 %vm1593_vm13, %v12594_v0 }
 0x17d   : > { %v12599_v11 = vpop.trf.xlu1  ;;  %v12606_v16 = vpop.trf.xlu0 }
 0x17e   : > { %17278 = vst [vmem:[#allocation22_spill] sm:$0xff] %v12599_v11  ;;  %10403 = vmatmul.mubr.msk.f32.gmra.mrb[6].mxu1 %vm1593_vm13, %v12599_v11  ;;  %10208 = vmatmul.mubr.msk.f32.gmra.mrb[4].mxu0 %vm1593_vm13, %v12606_v16 }
 0x181   : > { %v12610_v7 = vpop.trf.xlu1  ;;  %v12615_v12 = vpop.trf.xlu0 }
 0x182   : > { %17279 = vst [vmem:[#allocation23_spill] sm:$0xff] %v12610_v7  ;;  %10405 = vmatprep.mubr.msk.f32.mxu1 %vm1593_vm13, %v12610_v7  ;;  %10210 = vmatprep.mubr.msk.f32.mxu0 %vm1593_vm13, %v12615_v12 }
 0x185   : > { %v12619_v1 = vpop.trf.xlu1  ;;  %v12624_v25 = vpop.trf.xlu0 }
 0x186   : > { %17280 = vst [vmem:[#allocation24_spill] sm:$0xff] %v12619_v1  ;;  %10406 = vmatmul.mubr.msk.f32.gmra.mrb[8].mxu1 %vm1593_vm13, %v12619_v1  ;;  %10211 = vmatmul.mubr.msk.f32.gmra.mrb[6].mxu0 %vm1593_vm13, %v12624_v25 }
 0x189   : > { %v12629_v30 = vpop.trf.xlu1  ;;  %v12633_v34 = vpop.trf.xlu0 }
 0x18a   : > { %17281 = vst [vmem:[#allocation25_spill] sm:$0xff] %v12629_v30  ;;  %10408 = vmatprep.mubr.msk.f32.mxu1 %vm1593_vm13, %v12629_v30  ;;  %10213 = vmatprep.mubr.msk.f32.mxu0 %vm1593_vm13, %v12633_v34 }
 0x18d   : > { %v12637_v57 = vpop.trf.xlu1  ;;  %v12641_v38 = vpop.trf.xlu0 }
 0x18e   : > { %17282 = vst [vmem:[#allocation26_spill] sm:$0xff] %v12637_v57  ;;  %10409 = vmatmul.mubr.msk.f32.gmra.mrb[10].mxu1 %vm1593_vm13, %v12637_v57  ;;  %10214 = vmatmul.mubr.msk.f32.gmra.mrb[8].mxu0 %vm1593_vm13, %v12641_v38 }
 0x191   : > { %v12645_v40 = vpop.trf.xlu1  ;;  %v12651_v45 = vpop.trf.xlu0 }
 0x192   : > { %17283 = vst [vmem:[#allocation27_spill] sm:$0xff] %v12645_v40  ;;  %10411 = vmatprep.mubr.msk.f32.mxu1 %vm1593_vm13, %v12645_v40  ;;  %10216 = vmatprep.mubr.msk.f32.mxu0 %vm1593_vm13, %v12651_v45 }
 0x195   : > { %v12655_v49 = vpop.trf.xlu1  ;;  %v12659_v61 = vpop.trf.xlu0 }
 0x196   : > { %17284 = vst [vmem:[#allocation28_spill] sm:$0xff] %v12655_v49  ;;  %10412 = vmatmul.mubr.msk.f32.gmra.mrb[12].mxu1 %vm1593_vm13, %v12655_v49  ;;  %10217 = vmatmul.mubr.msk.f32.gmra.mrb[10].mxu0 %vm1593_vm13, %v12659_v61 }
 0x199   : > { %v12663_v5 = vpop.trf.xlu1  ;;  %1430 = vxpose.xlu1.b32.start [1/3] (short) %v1041_v4, 128  ;;  %v12669_v13 = vpop.trf.xlu0 }
 0x19a   : > { %17285 = vst [vmem:[#allocation29_spill] sm:$0xff] %v12663_v5  ;;  %10414 = vmatprep.mubr.msk.f32.mxu1 %vm1593_vm13, %v12663_v5  ;;  %10219 = vmatprep.mubr.msk.f32.mxu0 %vm1593_vm13, %v12669_v13 }
 0x19d   : > { %v12675_v6 = vpop.trf.xlu1  ;;  %1431 = vxpose.xlu1.b32.cont [2/3] (short) %v1057_v9, 128  ;;  %v12679_v22 = vpop.trf.xlu0 }
 0x19e   : > { %17286 = vst [vmem:[#allocation30_spill] sm:$0xff] %v12675_v6  ;;  %10415 = vmatmul.mubr.msk.f32.gmra.mrb[14].mxu1 %vm1593_vm13, %v12675_v6  ;;  %10220 = vmatmul.mubr.msk.f32.gmra.mrb[12].mxu0 %vm1593_vm13, %v12679_v22  ;;  %v467_v6 = vsub.f32 %v370_v56, %v12452_v21 }
 0x1a1   : > { %v12683_v26 = vpop.trf.xlu1  ;;  %1432 = vxpose.xlu1.b32.end [3/3] (short) %v1073_v19, 128  ;;  %v12687_v20 = vpop.trf.xlu0  ;;  %1174 = vxpose.xlu0.b32.start [1/3] (short) %v1033_v8, 128  ;;  %v475_v8 = vsub.f32 %v402_v48, %v12452_v21  ;;  %v435_v48 = vsub.f32 %v370_v56, %v12443_v23 }
 0x1a2   : > { %17287 = vst [vmem:[#allocation31_spill] sm:$0xff] %v12683_v26  ;;  %10417 = vmatprep.mubr.msk.f32.mxu1 %vm1593_vm13, %v12683_v26  ;;  %10222 = vmatprep.mubr.msk.f32.mxu0 %vm1593_vm13, %v12687_v20 }
 0x1a5   : > { %v12691_v27 = vpop.trf.xlu1  ;;  %v12697_v31 = vpop.trf.xlu0  ;;  %1175 = vxpose.xlu0.b32.cont [2/3] (short) %v1049_v28, 128 }
 0x1a6   : > { %17288 = vst [vmem:[#allocation32_spill] sm:$0xff] %v12691_v27  ;;  %10418 = vmatmul.mubr.msk.f32.gmra.mrb[16].mxu1 %vm1593_vm13, %v12691_v27  ;;  %10223 = vmatmul.mubr.msk.f32.gmra.mrb[14].mxu0 %vm1593_vm13, %v12697_v31  ;;  %v451_v27 = vsub.f32 %v370_v56, %v12450_v35 }
 0x1a9   : > { %v12701_v33 = vpop.trf.xlu1  ;;  %v12705_v36 = vpop.trf.xlu0  ;;  %1176 = vxpose.xlu0.b32.end [3/3] (short) %v1065_v32, 128  ;;  %v507_v32 = vmul.f32 -4.5, %v459_v17 }
 0x1aa   : > { %17289 = vst [vmem:[#allocation33_spill] sm:$0xff] %v12701_v33  ;;  %10420 = vmatprep.mubr.msk.f32.mxu1 %vm1593_vm13, %v12701_v33  ;;  %10225 = vmatprep.mubr.msk.f32.mxu0 %vm1593_vm13, %v12705_v36  ;;  %v483_v33 = vmul.f32 -4.5, %v435_v48 }
 0x1ad   : > { %v12709_v15 = vpop.trf.xlu1  ;;  %v12713_v37 = vpop.trf.xlu0 }
 0x1ae   : > { %17290 = vst [vmem:[#allocation34_spill] sm:$0xff] %v12709_v15  ;;  %10421 = vmatmul.mubr.msk.f32.gmra.mrb[18].mxu1 %vm1593_vm13, %v12709_v15  ;;  %10226 = vmatmul.mubr.msk.f32.gmra.mrb[16].mxu0 %vm1593_vm13, %v12713_v37  ;;  %v555_v15 = vmul.f32 %v507_v32, %v459_v17 }
 0x1b1   : > { %v12720_v2 = vpop.trf.xlu1  ;;  %v12724_v42 = vpop.trf.xlu0 }
 0x1b2   : > { %17291 = vst [vmem:[#allocation35_spill] sm:$0xff] %v12720_v2  ;;  %10423 = vmatprep.mubr.msk.f32.mxu1 %vm1593_vm13, %v12720_v2  ;;  %10228 = vmatprep.mubr.msk.f32.mxu0 %vm1593_vm13, %v12724_v42  ;;  %v599_v2 = vmul.f32 1.442695, %v539_v29 }
 0x1b4   : > { %11716 = vpow2.f32 %v599_v2 }
 0x1b5   : > { %v12733_v4 = vpop.trf.xlu1  ;;  %v12737_v51 = vpop.trf.xlu0 }
 0x1b6   : > { %17292 = vst [vmem:[#allocation36_spill] sm:$0xff] %v12733_v4  ;;  %10424 = vmatmul.mubr.msk.f32.gmra.mrb[20].mxu1 %vm1593_vm13, %v12733_v4  ;;  %10229 = vmatmul.mubr.msk.f32.gmra.mrb[18].mxu0 %vm1593_vm13, %v12737_v51  ;;  %v523_v4 = vmul.f32 -4.5, %v475_v8 }
 0x1b8   : > { %v571_v14 = vmul.f32 %v523_v4, %v475_v8  ;;  %v531_v4 = vmul.f32 %v483_v33, %v435_v48  ;;  %v499_v8 = vmul.f32 -4.5, %v451_v27 }
 0x1b9   : > { %v12742_v9 = vpop.trf.xlu1  ;;  %v12746_v43 = vpop.trf.xlu0 }
 0x1ba   : > { %17293 = vst [vmem:[#allocation37_spill] sm:$0xff] %v12742_v9  ;;  %10426 = vmatprep.mubr.msk.f32.mxu1 %vm1593_vm13, %v12742_v9  ;;  %10231 = vmatprep.mubr.msk.f32.mxu0 %vm1593_vm13, %v12746_v43  ;;  %v663_v29 = vmul.f32 1.442695, %v571_v14  ;;  %v583_v2 = vmul.f32 1.442695, %v531_v4  ;;  %v547_v56 = vmul.f32 %v499_v8, %v451_v27 }
 0x1bd   : > { %v12751_v19 = vpop.trf.xlu1  ;;  %v12761_v28 = vpop.trf.xlu0 }
 0x1be   : > { %17294 = vst [vmem:[#allocation38_spill] sm:$0xff] %v12751_v19  ;;  %10427 = vmatmul.mubr.msk.f32.gmra.mrb[22].mxu1 %vm1593_vm13, %v12751_v19  ;;  %10232 = vmatmul.mubr.msk.f32.gmra.mrb[20].mxu0 %vm1593_vm13, %v12761_v28  ;;  %v11717_v48 = vpop.eup %11716 }
 0x1c1   : > { %v12765_v9 = vpop.trf.xlu1  ;;  %v12770_v19 = vpop.trf.xlu0 }
 0x1c2   : > { %17295 = vst [vmem:[#allocation39_spill] sm:$0xff] %v12765_v9  ;;  %10429 = vmatprep.mubr.msk.f32.mxu1 %vm1593_vm13, %v12765_v9  ;;  %10234 = vmatprep.mubr.msk.f32.mxu0 %vm1593_vm13, %v12770_v19  ;;  %v631_v9 = vmul.f32 1.442695, %v555_v15 }
 0x1c4   : > { %11718 = vpow2.f32 %v631_v9  ;;  %v1001_v9 = vrot.slane %v12499_v47, %v12716_v39 }
 0x1c5   : > { %v12774_v52 = vpop.trf.xlu1  ;;  %v12779_v26 = vpop.trf.xlu0  ;;  %11720 = vpow2.f32 %v663_v29  ;;  %v615_v29 = vmul.f32 1.442695, %v547_v56 }
 0x1c6   : > { %17296 = vst [vmem:[#allocation40_spill] sm:$0xff] %v12774_v52  ;;  %10430 = vmatmul.mubr.msk.f32.gmra.mrb[24].mxu1 %vm1593_vm13, %v12774_v52  ;;  %10235 = vmatmul.mubr.msk.f32.gmra.mrb[22].mxu0 %vm1593_vm13, %v12779_v26  ;;  %v515_v52 = vmul.f32 -4.5, %v467_v6  ;;  %11722 = vpow2.f32 %v583_v2 }
 0x1c7   : > { %11724 = vpow2.f32 %v615_v29  ;;  %v969_v29 = vrot.slane %v12508_v10, %v12716_v39 }
 0x1c9   : > { %v12784_v17 = vpop.trf.xlu1  ;;  %v12788_v32 = vpop.trf.xlu0 }
 0x1ca   : > { %17297 = vst [vmem:[#allocation41_spill] sm:$0xff] %v12784_v17  ;;  %10432 = vmatprep.mubr.msk.f32.mxu1 %vm1593_vm13, %v12784_v17  ;;  %10237 = vmatprep.mubr.msk.f32.mxu0 %vm1593_vm13, %v12788_v32  ;;  %v563_v17 = vmul.f32 %v515_v52, %v467_v6  ;;  %v1042_v52 = vmul.f32 %v11717_v48, %v1001_v9 }
 0x1cc   : > { %v647_v27 = vmul.f32 1.442695, %v563_v17 }
 0x1cd   : > { %v12792_v15 = vpop.trf.xlu1  ;;  %v12796_v14 = vpop.trf.xlu0 }
 0x1ce   : > { %17298 = vst [vmem:[#allocation42_spill] sm:$0xff] %v12792_v15  ;;  %10433 = vmatmul.mubr.msk.f32.gmra.mrb[26].mxu1 %vm1593_vm13, %v12792_v15  ;;  %10238 = vmatmul.mubr.msk.f32.gmra.mrb[24].mxu0 %vm1593_vm13, %v12796_v14  ;;  %v11719_v4 = vpop.eup %11718  ;;  %11726 = vpow2.f32 %v647_v27 }
 0x1cf   : > { %v11721_v8 = vpop.eup %11720  ;;  %v1058_v17 = vmul.f32 %v11719_v4, %v1001_v9 }
 0x1d0   : > { %v724_v56 = vsel %vm673_vm11, 1.0, %v11721_v8 }
 0x1d1   : > { %v12800_v33 = vpop.trf.xlu1  ;;  %v12806_v15 = vpop.trf.xlu0 }
 0x1d2   : > { %17299 = vst [vmem:[#allocation43_spill] sm:$0xff] %v12800_v33  ;;  %10435 = vmatprep.mubr.msk.f32.mxu1 %vm1593_vm13, %v12800_v33  ;;  %10240 = vmatprep.mubr.msk.f32.mxu0 %vm1593_vm13, %v12806_v15 }
 0x1d5   : > { %v12810_v6 = vpop.trf.xlu1  ;;  %v12814_v5 = vpop.trf.xlu0 }
 0x1d6   : > { %17300 = vst [vmem:[#allocation44_spill] sm:$0xff] %v12810_v6  ;;  %10436 = vmatmul.mubr.msk.f32.gmra.mrb[28].mxu1 %vm1593_vm13, %v12810_v6  ;;  %10241 = vmatmul.mubr.msk.f32.gmra.mrb[26].mxu0 %vm1593_vm13, %v12814_v5  ;;  %v11723_v6 = vpop.eup %11722 }
 0x1d7   : > { %v11725_v8 = vpop.eup %11724 }
 0x1d8   : > { %v11727_v39 = vpop.eup %11726 }
 0x1d9   : > { %v12818_v2 = vpop.trf.xlu1  ;;  %1462 = vxpose.xlu1.b32.start [1/3] (short) %v1042_v52, 128  ;;  %v12824_v48 = vpop.trf.xlu0  ;;  %v1074_v52 = vmul.f32 %v1001_v9, %v724_v56  ;;  %v1050_v9 = vmul.f32 %v11725_v8, %v969_v29  ;;  %v3963_v8 = vld [vmem:[#allocation6] sm:$0xff] }
 0x1da   : > { %17301 = vst [vmem:[#allocation45_spill] sm:$0xff] %v12818_v2  ;;  %10438 = vmatprep.mubr.msk.f32.mxu1 %vm1593_vm13, %v12818_v2  ;;  %10243 = vmatprep.mubr.msk.f32.mxu0 %vm1593_vm13, %v12824_v48  ;;  %v1034_v2 = vmul.f32 %v11723_v6, %v969_v29  ;;  %v716_v6 = vsel %vm673_vm11, 1.0, %v11727_v39  ;;  %v5568_v39 = vld [vmem:[#allocation7 + $0x8] sm:$0xff] }
 0x1dd   : > { %v12830_v27 = vpop.trf.xlu1  ;;  %1463 = vxpose.xlu1.b32.cont [2/3] (short) %v1058_v17, 128  ;;  %v12834_v4 = vpop.trf.xlu0 }
 0x1de   : > { %17302 = vst [vmem:[#allocation46_spill] sm:$0xff] %v12830_v27  ;;  %10439 = vmatmul.mubr.msk.f32.gmra.mrb[30].mxu1 %vm1593_vm13, %v12830_v27  ;;  %10244 = vmatmul.mubr.msk.f32.gmra.mrb[28].mxu0 %vm1593_vm13, %v12834_v4  ;;  %v5567_v27 = vld [vmem:[#allocation7] sm:$0xff] }
 0x1df   : > { %v11373_v57 = vpack.c.bf16 %v5568_v39, %v5567_v27 }
 0x1e1   : > { %v12838_v33 = vpop.trf.xlu1  ;;  %1464 = vxpose.xlu1.b32.end [3/3] (short) %v1074_v52, 128  ;;  %v12842_v49 = vpop.trf.xlu0  ;;  %1206 = vxpose.xlu0.b32.start [1/3] (short) %v1034_v2, 128  ;;  %v1066_v52 = vmul.f32 %v969_v29, %v716_v6 }
 0x1e2   : > { %17303 = vst [vmem:[#allocation47_spill] sm:$0xff] %v12838_v33  ;;  %10441 = vmatprep.mubr.msk.f32.mxu1 %vm1593_vm13, %v12838_v33  ;;  %10246 = vmatprep.mubr.msk.f32.mxu0 %vm1593_vm13, %v12842_v49  ;;  %v3964_v33 = vld [vmem:[#allocation6 + $0x8] sm:$0xff] }
 0x1e3   : > { %v11369_v40 = vpack.c.bf16 %v3964_v33, %v3963_v8  ;;  %11374 = vmatprep.subr.bf16.mxu0 %v11373_v57  ;;  %v12871_v33 = vsub.s32 5, %v12431_v59 }
 0x1e4   : > { %11376 = vmatpush3.bf16.msra.mxu0 %v11373_v57 }
 0x1e5   : > { %v12846_v17 = vpop.trf.xlu1  ;;  %v12852_v56 = vpop.trf.xlu0  ;;  %1207 = vxpose.xlu0.b32.cont [2/3] (short) %v1050_v9, 128  ;;  %11370 = vmatprep.subr.bf16.mxu1 %v11369_v40  ;;  %v374_v1 = vrot.slane %v12757_v24, %v12871_v33 }
 0x1e6   : > { %17304 = vst [vmem:[#allocation48_spill] sm:$0xff] %v12846_v17  ;;  %10442 = vmatmul.mubr.msk.f32.gmra.mrb[32].mxu1 %vm1593_vm13, %v12846_v17  ;;  %10247 = vmatmul.mubr.msk.f32.gmra.mrb[30].mxu0 %vm1593_vm13, %v12852_v56 }
 0x1e7   : > { %11372 = vmatpush3.bf16.msra.mxu1 %v11369_v40  ;;  %v452_v50 = vsub.f32 %v374_v1, %v12450_v35 }
 0x1e9   : > { %v12856_v2 = vpop.trf.xlu1  ;;  %v12860_v30 = vpop.trf.xlu0  ;;  %1208 = vxpose.xlu0.b32.end [3/3] (short) %v1066_v52, 128  ;;  %v406_v52 = vrot.slane %v12727_v41, %v12871_v33 }
 0x1ea   : > { %17305 = vst [vmem:[#allocation49_spill] sm:$0xff] %v12856_v2  ;;  %10444 = vmatprep.mubr.msk.f32.mxu1 %vm1593_vm13, %v12856_v2  ;;  %10249 = vmatprep.mubr.msk.f32.mxu0 %vm1593_vm13, %v12860_v30 }
 0x1eb   : > { %v444_v8 = vsub.f32 %v406_v52, %v12443_v23  ;;  %v460_v2 = vsub.f32 %v406_v52, %v12450_v35  ;;  %v476_v17 = vsub.f32 %v406_v52, %v12452_v21  ;;  %v436_v52 = vsub.f32 %v374_v1, %v12443_v23 }
 0x1ed   : > { %v12864_v29 = vpop.trf.xlu1  ;;  %v12868_v9 = vpop.trf.xlu0  ;;  %v508_v11 = vmul.f32 -4.5, %v460_v2  ;;  %v524_v62 = vmul.f32 -4.5, %v476_v17  ;;  %v484_v46 = vmul.f32 -4.5, %v436_v52 }
 0x1ee   : > { %17306 = vst [vmem:[#allocation50_spill] sm:$0xff] %v12864_v29  ;;  %10445 = vmatmul.mubr.msk.f32.gmra.mrb[34].mxu1 %vm1593_vm13, %v12864_v29  ;;  %10250 = vmatmul.mubr.msk.f32.gmra.mrb[32].mxu0 %vm1593_vm13, %v12868_v9  ;;  %v492_v29 = vmul.f32 -4.5, %v444_v8 }
 0x1ef   : > { %v556_v54 = vmul.f32 %v508_v11, %v460_v2 }
 0x1f1   : > { %v12875_v27 = vpop.trf.xlu1  ;;  %v12879_v6 = vpop.trf.xlu0 }
 0x1f2   : > { %17307 = vst [vmem:[#allocation51_spill] sm:$0xff] %v12875_v27  ;;  %10447 = vmatprep.mubr.msk.f32.mxu1 %vm1593_vm13, %v12875_v27  ;;  %10252 = vmatprep.mubr.msk.f32.mxu0 %vm1593_vm13, %v12879_v6 }
 0x1f5   : > { %v12885_v57 = vpop.trf.xlu1  ;;  %v12889_v40 = vpop.trf.xlu0 }
 0x1f6   : > { %17308 = vst [vmem:[#allocation52_spill] sm:$0xff] %v12885_v57  ;;  %10448 = vmatmul.mubr.msk.f32.gmra.mrb[36].mxu1 %vm1593_vm13, %v12885_v57  ;;  %10253 = vmatmul.mubr.msk.f32.gmra.mrb[34].mxu0 %vm1593_vm13, %v12889_v40 }
 0x1f9   : > { %v12894_v39 = vpop.trf.xlu1  ;;  %v12898_v27 = vpop.trf.xlu0 }
 0x1fa   : > { %17309 = vst [vmem:[#allocation53_spill] sm:$0xff] %v12894_v39  ;;  %10450 = vmatprep.mubr.msk.f32.mxu1 %vm1593_vm13, %v12894_v39  ;;  %10255 = vmatprep.mubr.msk.f32.mxu0 %vm1593_vm13, %v12898_v27  ;;  %v540_v39 = vmul.f32 %v492_v29, %v444_v8  ;;  %v572_v8 = vmul.f32 %v524_v62, %v476_v17  ;;  %v500_v17 = vmul.f32 -4.5, %v452_v50 }
 0x1fb   : > { %v532_v62 = vmul.f32 %v484_v46, %v436_v52 }
 0x1fc   : > { %v665_v2 = vmul.f32 1.442695, %v572_v8 }
 0x1fd   : > { %v12903_v57 = vpop.trf.xlu1  ;;  %v12910_v7 = vpop.trf.xlu0 }
 0x1fe   : > { %17310 = vst [vmem:[#allocation54_spill] sm:$0xff] %v12903_v57  ;;  %10451 = vmatmul.mubr.msk.f32.gmra.mrb[38].mxu1 %vm1593_vm13, %v12903_v57  ;;  %17311 = vst [vmem:[#allocation55_spill] sm:$0xff] %v12910_v7  ;;  %10256 = vmatmul.mubr.msk.f32.gmra.mrb[36].mxu0 %vm1593_vm13, %v12910_v7  ;;  %v601_v57 = vmul.f32 1.442695, %v540_v39  ;;  %v468_v7 = vsub.f32 %v374_v1, %v12452_v21  ;;  %v585_v1 = vmul.f32 1.442695, %v532_v62 }
 0x200   : > { %11728 = vpow2.f32 %v601_v57  ;;  %v548_v57 = vmul.f32 %v500_v17, %v452_v50 }
 0x201   : > { %v12914_v3 = vpop.trf.xlu1  ;;  %v12919_v58 = vpop.trf.xlu0 }
 0x202   : > { %17312 = vst [vmem:[#allocation56_spill] sm:$0xff] %v12914_v3  ;;  %10453 = vmatprep.mubr.msk.f32.mxu1 %vm1593_vm13, %v12914_v3  ;;  %10258 = vmatprep.mubr.msk.f32.mxu0 %vm1593_vm13, %v12919_v58  ;;  %v633_v3 = vmul.f32 1.442695, %v556_v54 }
 0x204   : > { %11730 = vpow2.f32 %v633_v3  ;;  %v1005_v3 = vrot.slane %v12499_v47, %v12871_v33 }
 0x205   : > { %v12923_v29 = vpop.trf.xlu1  ;;  %v12928_v44 = vpop.trf.xlu0  ;;  %11732 = vpow2.f32 %v665_v2  ;;  %v617_v2 = vmul.f32 1.442695, %v548_v57 }
 0x206   : > { %17313 = vst [vmem:[#allocation57_spill] sm:$0xff] %v12923_v29  ;;  %10454 = vmatmul.mubr.msk.f32.gmra.mrb[40].mxu1 %vm1593_vm13, %v12923_v29  ;;  %17314 = vst [vmem:[#allocation58_spill] sm:$0xff] %v12928_v44  ;;  %10259 = vmatmul.mubr.msk.f32.gmra.mrb[38].mxu0 %vm1593_vm13, %v12928_v44  ;;  %v516_v29 = vmul.f32 -4.5, %v468_v7  ;;  %11734 = vpow2.f32 %v585_v1 }
 0x207   : > { %11736 = vpow2.f32 %v617_v2  ;;  %v973_v2 = vrot.slane %v12508_v10, %v12871_v33 }
 0x209   : > { %v12933_v11 = vpop.trf.xlu1  ;;  %v12937_v39 = vpop.trf.xlu0 }
 0x20a   : > { %17315 = vst [vmem:[#allocation59_spill] sm:$0xff] %v12933_v11  ;;  %10456 = vmatprep.mubr.msk.f32.mxu1 %vm1593_vm13, %v12933_v11  ;;  %17316 = vst [vmem:[#allocation60_spill] sm:$0xff] %v12937_v39  ;;  %10261 = vmatprep.mubr.msk.f32.mxu0 %vm1593_vm13, %v12937_v39  ;;  %v564_v11 = vmul.f32 %v516_v29, %v468_v7  ;;  %v11729_v52 = vpop.eup %11728 }
 0x20b   : > { %v1043_v29 = vmul.f32 %v11729_v52, %v1005_v3 }
 0x20c   : > { %v649_v50 = vmul.f32 1.442695, %v564_v11 }
 0x20d   : > { %v12941_v54 = vpop.trf.xlu1  ;;  %v12945_v8 = vpop.trf.xlu0 }
 0x20e   : > { %17317 = vst [vmem:[#allocation61_spill] sm:$0xff] %v12941_v54  ;;  %10457 = vmatmul.mubr.msk.f32.gmra.mrb[42].mxu1 %vm1593_vm13, %v12941_v54  ;;  %17318 = vst [vmem:[#allocation62_spill] sm:$0xff] %v12945_v8  ;;  %10262 = vmatmul.mubr.msk.f32.gmra.mrb[40].mxu0 %vm1593_vm13, %v12945_v8  ;;  %v11731_v62 = vpop.eup %11730  ;;  %11738 = vpow2.f32 %v649_v50 }
 0x20f   : > { %v11733_v17 = vpop.eup %11732  ;;  %v1059_v11 = vmul.f32 %v11731_v62, %v1005_v3 }
 0x210   : > { %v725_v57 = vsel %vm673_vm11, 1.0, %v11733_v17 }
 0x211   : > { %v12949_v46 = vpop.trf.xlu1  ;;  %v12955_v54 = vpop.trf.xlu0 }
 0x212   : > { %17319 = vst [vmem:[#allocation63_spill] sm:$0xff] %v12949_v46  ;;  %10459 = vmatprep.mubr.msk.f32.mxu1 %vm1593_vm13, %v12949_v46  ;;  %17320 = vst [vmem:[#allocation64_spill] sm:$0xff] %v12955_v54  ;;  %10264 = vmatprep.mubr.msk.f32.mxu0 %vm1593_vm13, %v12955_v54 }
 0x215   : > { %v12959_v7 = vpop.trf.xlu1  ;;  %v12963_v8 = vpop.trf.xlu0 }
 0x216   : > { %17321 = vst [vmem:[#allocation65_spill] sm:$0xff] %v12959_v7  ;;  %10460 = vmatmul.mubr.msk.f32.gmra.mrb[44].mxu1 %vm1593_vm13, %v12959_v7  ;;  %17322 = vst [vmem:[#allocation66_spill] sm:$0xff] %v12963_v8  ;;  %10265 = vmatmul.mubr.msk.f32.gmra.mrb[42].mxu0 %vm1593_vm13, %v12963_v8  ;;  %v11735_v7 = vpop.eup %11734 }
 0x217   : > { %v11737_v17 = vpop.eup %11736 }
 0x218   : > { %v11739_v33 = vpop.eup %11738 }
 0x219   : > { %v12967_v1 = vpop.trf.xlu1  ;;  %1494 = vxpose.xlu1.b32.start [1/3] (short) %v1043_v29, 128  ;;  %v12973_v52 = vpop.trf.xlu0  ;;  %v1075_v29 = vmul.f32 %v1005_v3, %v725_v57  ;;  %v1051_v3 = vmul.f32 %v11737_v17, %v973_v2 }
 0x21a   : > { %17323 = vst [vmem:[#allocation67_spill] sm:$0xff] %v12967_v1  ;;  %10462 = vmatprep.mubr.msk.f32.mxu1 %vm1593_vm13, %v12967_v1  ;;  %17324 = vst [vmem:[#allocation68_spill] sm:$0xff] %v12973_v52  ;;  %10267 = vmatprep.mubr.msk.f32.mxu0 %vm1593_vm13, %v12973_v52  ;;  %v1035_v1 = vmul.f32 %v11735_v7, %v973_v2  ;;  %v717_v7 = vsel %vm673_vm11, 1.0, %v11739_v33 }
 0x21d   : > { %v12979_v50 = vpop.trf.xlu1  ;;  %1495 = vxpose.xlu1.b32.cont [2/3] (short) %v1059_v11, 128  ;;  %v12983_v62 = vpop.trf.xlu0 }
 0x21e   : > { %17325 = vst [vmem:[#allocation69_spill] sm:$0xff] %v12979_v50  ;;  %10463 = vmatmul.mubr.msk.f32.gmra.mrb[46].mxu1 %vm1593_vm13, %v12979_v50  ;;  %17326 = vst [vmem:[#allocation70_spill] sm:$0xff] %v12983_v62  ;;  %10268 = vmatmul.mubr.msk.f32.gmra.mrb[44].mxu0 %vm1593_vm13, %v12983_v62 }
 0x221   : > { %v12987_v46 = vpop.trf.xlu1  ;;  %1496 = vxpose.xlu1.b32.end [3/3] (short) %v1075_v29, 128  ;;  %v12991_v52 = vpop.trf.xlu0  ;;  %1238 = vxpose.xlu0.b32.start [1/3] (short) %v1035_v1, 128  ;;  %v1067_v29 = vmul.f32 %v973_v2, %v717_v7 }
 0x222   : > { %17327 = vst [vmem:[#allocation71_spill] sm:$0xff] %v12987_v46  ;;  %10465 = vmatprep.mubr.msk.f32.mxu1 %vm1593_vm13, %v12987_v46  ;;  %17328 = vst [vmem:[#allocation72_spill] sm:$0xff] %v12991_v52  ;;  %10270 = vmatprep.mubr.msk.f32.mxu0 %vm1593_vm13, %v12991_v52 }
 0x225   : > { %v12995_v11 = vpop.trf.xlu1  ;;  %v13001_v57 = vpop.trf.xlu0  ;;  %1239 = vxpose.xlu0.b32.cont [2/3] (short) %v1051_v3, 128  ;;  %v13020_v3 = vsub.s32 6, %v12431_v59 }
 0x226   : > { %17329 = vst [vmem:[#allocation73_spill] sm:$0xff] %v12995_v11  ;;  %10466 = vmatmul.mubr.msk.f32.gmra.mrb[48].mxu1 %vm1593_vm13, %v12995_v11  ;;  %17330 = vst [vmem:[#allocation74_spill] sm:$0xff] %v13001_v57  ;;  %10271 = vmatmul.mubr.msk.f32.gmra.mrb[46].mxu0 %vm1593_vm13, %v13001_v57 }
 0x229   : > { %v13005_v1 = vpop.trf.xlu1  ;;  %v13009_v17 = vpop.trf.xlu0  ;;  %1240 = vxpose.xlu0.b32.end [3/3] (short) %v1067_v29, 128 }
 0x22a   : > { %17331 = vst [vmem:[#allocation75_spill] sm:$0xff] %v13005_v1  ;;  %10468 = vmatprep.mubr.msk.f32.mxu1 %vm1593_vm13, %v13005_v1  ;;  %17332 = vst [vmem:[#allocation76_spill] sm:$0xff] %v13009_v17  ;;  %10273 = vmatprep.mubr.msk.f32.mxu0 %vm1593_vm13, %v13009_v17 }
 0x22d   : > { %v13013_v33 = vpop.trf.xlu1  ;;  %v13017_v2 = vpop.trf.xlu0 }
 0x22e   : > { %17333 = vst [vmem:[#allocation77_spill] sm:$0xff] %v13013_v33  ;;  %10469 = vmatmul.mubr.msk.f32.gmra.mrb[50].mxu1 %vm1593_vm13, %v13013_v33  ;;  %17334 = vst [vmem:[#allocation78_spill] sm:$0xff] %v13017_v2  ;;  %10274 = vmatmul.mubr.msk.f32.gmra.mrb[48].mxu0 %vm1593_vm13, %v13017_v2  ;;  %v410_v33 = vrot.slane %v12727_v41, %v13020_v3 }
 0x231   : > { %v13024_v7 = vpop.trf.xlu1  ;;  %v13028_v29 = vpop.trf.xlu0 }
 0x232   : > { %17335 = vst [vmem:[#allocation79_spill] sm:$0xff] %v13024_v7  ;;  %10471 = vmatprep.mubr.msk.f32.mxu1 %vm1593_vm13, %v13024_v7  ;;  %17336 = vst [vmem:[#allocation80_spill] sm:$0xff] %v13028_v29  ;;  %10276 = vmatprep.mubr.msk.f32.mxu0 %vm1593_vm13, %v13028_v29  ;;  %v445_v7 = vsub.f32 %v410_v33, %v12443_v23 }
 0x234   : > { %v493_v2 = vmul.f32 -4.5, %v445_v7 }
 0x235   : > { %v13037_v1 = vpop.trf.xlu1  ;;  %v13041_v11 = vpop.trf.xlu0 }
 0x236   : > { %17337 = vst [vmem:[#allocation81_spill] sm:$0xff] %v13037_v1  ;;  %10472 = vmatmul.mubr.msk.f32.gmra.mrb[52].mxu1 %vm1593_vm13, %v13037_v1  ;;  %17338 = vst [vmem:[#allocation82_spill] sm:$0xff] %v13041_v11  ;;  %10277 = vmatmul.mubr.msk.f32.gmra.mrb[50].mxu0 %vm1593_vm13, %v13041_v11  ;;  %v461_v11 = vsub.f32 %v410_v33, %v12450_v35  ;;  %v541_v57 = vmul.f32 %v493_v2, %v445_v7 }
 0x238   : > { %v509_v52 = vmul.f32 -4.5, %v461_v11  ;;  %v603_v54 = vmul.f32 1.442695, %v541_v57 }
 0x239   : > { %v10395_v46 = vpop.f32.mrb[0].mxu1  ;;  %v13046_v50 = vpop.trf.xlu1 }
 0x23a   : > { %17339 = vst [vmem:[#allocation83_spill] sm:$0xff] %v13046_v50  ;;  %3836 = vst.msk [vmem:[%s13049_s27 + $0x408] sm:$0xff] %vm1593_vm13, %v10395_v46  ;;  %v3068_v29 = vpop.f32.mrb[1].mxu1  ;;  %10474 = vmatprep.mubr.msk.f32.mxu1 %vm1593_vm13, %v13046_v50  ;;  %v13057_v1 = vpop.trf.xlu0  ;;  %v477_v46 = vsub.f32 %v410_v33, %v12452_v21  ;;  %11740 = vpow2.f32 %v603_v54 }
 0x23b   : > { %3835 = vst.msk [vmem:[%s13049_s27 + $0x400] sm:$0xff] %vm1593_vm13, %v3068_v29  ;;  %17340 = vst [vmem:[#allocation84_spill] sm:$0xff] %v13057_v1  ;;  %10279 = vmatprep.mubr.msk.f32.mxu0 %vm1593_vm13, %v13057_v1  ;;  %v378_v29 = vrot.slane %v12757_v24, %v13020_v3 }
 0x23c   : > { %v525_v8 = vmul.f32 -4.5, %v477_v46 }
 0x23d   : > { %v13062_v17 = vpop.trf.xlu1  ;;  %v453_v57 = vsub.f32 %v378_v29, %v12450_v35 }
 0x23e   : > { %17341 = vst [vmem:[#allocation85_spill] sm:$0xff] %v13062_v17  ;;  %10475 = vmatmul.mubr.msk.f32.gmra.mrb[54].mxu1 %vm1593_vm13, %v13062_v17  ;;  %v13069_v50 = vpop.trf.xlu0  ;;  %v437_v17 = vsub.f32 %v378_v29, %v12443_v23  ;;  %v573_v44 = vmul.f32 %v525_v8, %v477_v46 }
 0x23f   : > { %17342 = vst [vmem:[#allocation86_spill] sm:$0xff] %v13069_v50  ;;  %10280 = vmatmul.mubr.msk.f32.gmra.mrb[52].mxu0 %vm1593_vm13, %v13069_v50  ;;  %v557_v50 = vmul.f32 %v509_v52, %v461_v11 }
 0x241   : > { %v10398_v62 = vpop.f32.mrb[2].mxu1  ;;  %v13073_v1 = vpop.trf.xlu1  ;;  %v635_v11 = vmul.f32 1.442695, %v557_v50  ;;  %v501_v50 = vmul.f32 -4.5, %v453_v57 }
 0x242   : > { %17343 = vst [vmem:[#allocation87_spill] sm:$0xff] %v13073_v1  ;;  %3838 = vst.msk [vmem:[%s13049_s27 + $0x418] sm:$0xff] %vm1593_vm13, %v10398_v62  ;;  %v3078_v33 = vpop.f32.mrb[3].mxu1  ;;  %10477 = vmatprep.mubr.msk.f32.mxu1 %vm1593_vm13, %v13073_v1  ;;  %v10203_v2 = vpop.f32.mrb[0].mxu0 }
 0x243   : > { %3837 = vst.msk [vmem:[%s13049_s27 + $0x410] sm:$0xff] %vm1593_vm13, %v3078_v33  ;;  %v13082_v7 = vpop.trf.xlu0  ;;  %3708 = vst.msk [vmem:[%s13049_s27 + $0x8] sm:$0xff] %vm1593_vm13, %v10203_v2  ;;  %v2428_v39 = vpop.f32.mrb[1].mxu0  ;;  %v485_v33 = vmul.f32 -4.5, %v437_v17  ;;  %v469_v2 = vsub.f32 %v378_v29, %v12452_v21  ;;  %11742 = vpow2.f32 %v635_v11 }
 0x244   : > { %10282 = vmatprep.mubr.msk.f32.mxu0 %vm1593_vm13, %v13082_v7  ;;  %3707 = vst.msk [vmem:[%s13049_s27] sm:$0xff] %vm1593_vm13, %v2428_v39  ;;  %v667_v39 = vmul.f32 1.442695, %v573_v44 }
 0x245   : > { %v13088_v62 = vpop.trf.xlu1  ;;  %v533_v54 = vmul.f32 %v485_v33, %v437_v17 }
 0x246   : > { %17344 = vst [vmem:[#allocation88_spill] sm:$0xff] %v13088_v62  ;;  %10478 = vmatmul.mubr.msk.f32.gmra.mrb[56].mxu1 %vm1593_vm13, %v13088_v62  ;;  %11744 = vpow2.f32 %v667_v39  ;;  %v1009_v39 = vrot.slane %v12499_v47, %v13020_v3 }
 0x247   : > { %v13095_v52 = vpop.trf.xlu0  ;;  %v587_v17 = vmul.f32 1.442695, %v533_v54 }
 0x248   : > { %17345 = vst [vmem:[#allocation89_spill] sm:$0xff] %v13095_v52  ;;  %10283 = vmatmul.mubr.msk.f32.gmra.mrb[54].mxu0 %vm1593_vm13, %v13095_v52  ;;  %v517_v52 = vmul.f32 -4.5, %v469_v2 }
 0x249   : > { %v10401_v8 = vpop.f32.mrb[4].mxu1  ;;  %v13100_v46 = vpop.trf.xlu1  ;;  %11746 = vpow2.f32 %v587_v17 }
 0x24a   : > { %17346 = vst [vmem:[#allocation90_spill] sm:$0xff] %v13100_v46  ;;  %3840 = vst.msk [vmem:[%s13049_s27 + $0x428] sm:$0xff] %vm1593_vm13, %v10401_v8  ;;  %v3088_v62 = vpop.f32.mrb[5].mxu1  ;;  %10480 = vmatprep.mubr.msk.f32.mxu1 %vm1593_vm13, %v13100_v46  ;;  %v10206_v1 = vpop.f32.mrb[2].mxu0 }
 0x24b   : > { %3839 = vst.msk [vmem:[%s13049_s27 + $0x420] sm:$0xff] %vm1593_vm13, %v3088_v62  ;;  %v13108_v29 = vpop.trf.xlu0  ;;  %3710 = vst.msk [vmem:[%s13049_s27 + $0x18] sm:$0xff] %vm1593_vm13, %v10206_v1  ;;  %v2438_v44 = vpop.f32.mrb[3].mxu0  ;;  %v549_v62 = vmul.f32 %v501_v50, %v453_v57  ;;  %v565_v1 = vmul.f32 %v517_v52, %v469_v2 }
 0x24c   : > { %17347 = vst [vmem:[#allocation91_spill] sm:$0xff] %v13108_v29  ;;  %10285 = vmatprep.mubr.msk.f32.mxu0 %vm1593_vm13, %v13108_v29  ;;  %3709 = vst.msk [vmem:[%s13049_s27 + $0x10] sm:$0xff] %vm1593_vm13, %v2438_v44  ;;  %v11741_v29 = vpop.eup %11740 }
 0x24d   : > { %v13114_v8 = vpop.trf.xlu1  ;;  %v619_v57 = vmul.f32 1.442695, %v549_v62  ;;  %v651_v54 = vmul.f32 1.442695, %v565_v1 }
 0x24e   : > { %17348 = vst [vmem:[#allocation92_spill] sm:$0xff] %v13114_v8  ;;  %10481 = vmatmul.mubr.msk.f32.gmra.mrb[58].mxu1 %vm1593_vm13, %v13114_v8  ;;  %v1044_v8 = vmul.f32 %v11741_v29, %v1009_v39 }
 0x24f   : > { %v13120_v33 = vpop.trf.xlu0  ;;  %11748 = vpow2.f32 %v619_v57 }
 0x250   : > { %17349 = vst [vmem:[#allocation93_spill] sm:$0xff] %v13120_v33  ;;  %10286 = vmatmul.mubr.msk.f32.gmra.mrb[56].mxu0 %vm1593_vm13, %v13120_v33  ;;  %v11743_v33 = vpop.eup %11742  ;;  %11750 = vpow2.f32 %v651_v54 }
 0x251   : > { %v10404_v11 = vpop.f32.mrb[6].mxu1  ;;  %v13124_v46 = vpop.trf.xlu1  ;;  %v1060_v29 = vmul.f32 %v11743_v33, %v1009_v39 }
 0x252   : > { %17350 = vst [vmem:[#allocation94_spill] sm:$0xff] %v13124_v46  ;;  %3842 = vst.msk [vmem:[%s13049_s27 + $0x438] sm:$0xff] %vm1593_vm13, %v10404_v11  ;;  %v3098_v44 = vpop.f32.mrb[7].mxu1  ;;  %10483 = vmatprep.mubr.msk.f32.mxu1 %vm1593_vm13, %v13124_v46  ;;  %v10209_v52 = vpop.f32.mrb[4].mxu0 }
 0x253   : > { %3841 = vst.msk [vmem:[%s13049_s27 + $0x430] sm:$0xff] %vm1593_vm13, %v3098_v44  ;;  %v13134_v2 = vpop.trf.xlu0  ;;  %3712 = vst.msk [vmem:[%s13049_s27 + $0x28] sm:$0xff] %vm1593_vm13, %v10209_v52  ;;  %v2448_v50 = vpop.f32.mrb[5].mxu0 }
 0x254   : > { %10288 = vmatprep.mubr.msk.f32.mxu0 %vm1593_vm13, %v13134_v2  ;;  %3711 = vst.msk [vmem:[%s13049_s27 + $0x20] sm:$0xff] %vm1593_vm13, %v2448_v50  ;;  %v11745_v17 = vpop.eup %11744 }
 0x255   : > { %v13140_v11 = vpop.trf.xlu1  ;;  %v726_v57 = vsel %vm673_vm11, 1.0, %v11745_v17 }
 0x256   : > { %17351 = vst [vmem:[#allocation95_spill] sm:$0xff] %v13140_v11  ;;  %10484 = vmatmul.mubr.msk.f32.gmra.mrb[60].mxu1 %vm1593_vm13, %v13140_v11  ;;  %v977_v11 = vrot.slane %v12508_v10, %v13020_v3  ;;  %v1076_v17 = vmul.f32 %v1009_v39, %v726_v57 }
 0x257   : > { %v13146_v62 = vpop.trf.xlu0 }
 0x258   : > { %10289 = vmatmul.mubr.msk.f32.gmra.mrb[58].mxu0 %vm1593_vm13, %v13146_v62 }
 0x259   : > { %v10407_v1 = vpop.f32.mrb[8].mxu1  ;;  %v13150_v44 = vpop.trf.xlu1  ;;  %1526 = vxpose.xlu1.b32.start [1/3] (short) %v1044_v8, 128 }
 0x25a   : > { %17352 = vst [vmem:[#allocation96_spill] sm:$0xff] %v13150_v44  ;;  %3844 = vst.msk [vmem:[%s13049_s27 + $0x448] sm:$0xff] %vm1593_vm13, %v10407_v1  ;;  %v3108_v52 = vpop.f32.mrb[9].mxu1  ;;  %10486 = vmatprep.mubr.msk.f32.mxu1 %vm1593_vm13, %v13150_v44  ;;  %v10212_v54 = vpop.f32.mrb[6].mxu0 }
 0x25b   : > { %3843 = vst.msk [vmem:[%s13049_s27 + $0x440] sm:$0xff] %vm1593_vm13, %v3108_v52  ;;  %v13160_v50 = vpop.trf.xlu0  ;;  %v11747_v8 = vpop.eup %11746  ;;  %3714 = vst.msk [vmem:[%s13049_s27 + $0x38] sm:$0xff] %vm1593_vm13, %v10212_v54 }
 0x25c   : > { %17353 = vst [vmem:[#allocation97_spill] sm:$0xff] %v13160_v50  ;;  %v2458_v33 = vpop.f32.mrb[7].mxu0  ;;  %10291 = vmatprep.mubr.msk.f32.mxu0 %vm1593_vm13, %v13160_v50  ;;  %v1036_v3 = vmul.f32 %v11747_v8, %v977_v11  ;;  %v11749_v54 = vpop.eup %11748 }
 0x25d   : > { %v13168_v1 = vpop.trf.xlu1  ;;  %1527 = vxpose.xlu1.b32.cont [2/3] (short) %v1060_v29, 128  ;;  %3713 = vst.msk [vmem:[%s13049_s27 + $0x30] sm:$0xff] %vm1593_vm13, %v2458_v33  ;;  %v11751_v29 = vpop.eup %11750  ;;  %v1052_v33 = vmul.f32 %v11749_v54, %v977_v11 }
 0x25e   : > { %17354 = vst [vmem:[#allocation98_spill] sm:$0xff] %v13168_v1  ;;  %10487 = vmatmul.mubr.msk.f32.gmra.mrb[62].mxu1 %vm1593_vm13, %v13168_v1 }
 0x25f   : > { %v13174_v52 = vpop.trf.xlu0 }
 0x260   : > { %17355 = vst [vmem:[#allocation99_spill] sm:$0xff] %v13174_v52  ;;  %10292 = vmatmul.mubr.msk.f32.gmra.mrb[60].mxu0 %vm1593_vm13, %v13174_v52 }
 0x261   : > { %v10410_v44 = vpop.f32.mrb[10].mxu1  ;;  %v13178_v46 = vpop.trf.xlu1  ;;  %1528 = vxpose.xlu1.b32.end [3/3] (short) %v1076_v17, 128  ;;  %v718_v17 = vsel %vm673_vm11, 1.0, %v11751_v29 }
 0x262   : > { %17356 = vst [vmem:[#allocation100_spill] sm:$0xff] %v13178_v46  ;;  %3846 = vst.msk [vmem:[%s13049_s27 + $0x458] sm:$0xff] %vm1593_vm13, %v10410_v44  ;;  %v3118_v39 = vpop.f32.mrb[11].mxu1  ;;  %10489 = vmatprep.mubr.msk.f32.mxu1 %vm1593_vm13, %v13178_v46  ;;  %v10215_v57 = vpop.f32.mrb[8].mxu0  ;;  %v1068_v54 = vmul.f32 %v977_v11, %v718_v17  ;;  %v3965_v46 = vld [vmem:[#allocation6 + $0x10] sm:$0xff] }
 0x263   : > { %3845 = vst.msk [vmem:[%s13049_s27 + $0x450] sm:$0xff] %vm1593_vm13, %v3118_v39  ;;  %v13186_v8 = vpop.trf.xlu0  ;;  %1270 = vxpose.xlu0.b32.start [1/3] (short) %v1036_v3, 128  ;;  %3716 = vst.msk [vmem:[%s13049_s27 + $0x48] sm:$0xff] %vm1593_vm13, %v10215_v57  ;;  %v2468_v1 = vpop.f32.mrb[9].mxu0  ;;  %10589 = vmatprep.subr.mxu1 %v3965_v46 }
 0x264   : > { %17357 = vst [vmem:[#allocation101_spill] sm:$0xff] %v13186_v8  ;;  %10294 = vmatprep.mubr.msk.f32.mxu0 %vm1593_vm13, %v13186_v8  ;;  %3715 = vst.msk [vmem:[%s13049_s27 + $0x40] sm:$0xff] %vm1593_vm13, %v2468_v1  ;;  %10590 = vmatpush3.msra.mxu1 %v3965_v46 }
 0x265   : > { %v13192_v44 = vpop.trf.xlu1 }
 0x266   : > { %17358 = vst [vmem:[#allocation102_spill] sm:$0xff] %v13192_v44  ;;  %10490 = vmatmul.mubr.msk.f32.gmra.mrb[64].mxu1 %vm1593_vm13, %v13192_v44 }
 0x267   : > { %v13200_v3 = vpop.trf.xlu0  ;;  %1271 = vxpose.xlu0.b32.cont [2/3] (short) %v1052_v33, 128 }
 0x268   : > { %17359 = vst [vmem:[#allocation103_spill] sm:$0xff] %v13200_v3  ;;  %10295 = vmatmul.mubr.msk.f32.gmra.mrb[62].mxu0 %vm1593_vm13, %v13200_v3 }
 0x269   : > { %v10413_v39 = vpop.f32.mrb[12].mxu1  ;;  %v13204_v57 = vpop.trf.xlu1 }
 0x26a   : > { %17360 = vst [vmem:[#allocation104_spill] sm:$0xff] %v13204_v57  ;;  %3848 = vst.msk [vmem:[%s13049_s27 + $0x468] sm:$0xff] %vm1593_vm13, %v10413_v39  ;;  %v3128_v29 = vpop.f32.mrb[13].mxu1  ;;  %10492 = vmatprep.mubr.msk.f32.mxu1 %vm1593_vm13, %v13204_v57  ;;  %v10218_v1 = vpop.f32.mrb[10].mxu0  ;;  %v5569_v39 = vld [vmem:[#allocation7 + $0x10] sm:$0xff] }
 0x26b   : > { %3847 = vst.msk [vmem:[%s13049_s27 + $0x460] sm:$0xff] %vm1593_vm13, %v3128_v29  ;;  %v13212_v11 = vpop.trf.xlu0  ;;  %1272 = vxpose.xlu0.b32.end [3/3] (short) %v1068_v54, 128  ;;  %3718 = vst.msk [vmem:[%s13049_s27 + $0x58] sm:$0xff] %vm1593_vm13, %v10218_v1  ;;  %v2478_v33 = vpop.f32.mrb[11].mxu0  ;;  %10979 = vmatprep.subr.mxu0 %v5569_v39  ;;  %v13227_v54 = vsub.s32 7, %v12431_v59 }
 0x26c   : > { %17361 = vst [vmem:[#allocation105_spill] sm:$0xff] %v13212_v11  ;;  %10297 = vmatprep.mubr.msk.f32.mxu0 %vm1593_vm13, %v13212_v11  ;;  %3717 = vst.msk [vmem:[%s13049_s27 + $0x50] sm:$0xff] %vm1593_vm13, %v2478_v33  ;;  %10980 = vmatpush3.msra.mxu0 %v5569_v39 }
 0x26d   : > { %v13218_v17 = vpop.trf.xlu1  ;;  %v414_v59 = vrot.slane %v12727_v41, %v13227_v54 }
 0x26e   : > { %17362 = vst [vmem:[#allocation106_spill] sm:$0xff] %v13218_v17  ;;  %10493 = vmatmul.mubr.msk.f32.gmra.mrb[66].mxu1 %vm1593_vm13, %v13218_v17 }
 0x26f   : > { %v13224_v46 = vpop.trf.xlu0 }
 0x270   : > { %17363 = vst [vmem:[#allocation107_spill] sm:$0xff] %v13224_v46  ;;  %10298 = vmatmul.mubr.msk.f32.gmra.mrb[64].mxu0 %vm1593_vm13, %v13224_v46  ;;  %v462_v46 = vsub.f32 %v414_v59, %v12450_v35 }
 0x271   : > { %v10416_v29 = vpop.f32.mrb[14].mxu1  ;;  %v13231_v1 = vpop.trf.xlu1 }
 0x272   : > { %17364 = vst [vmem:[#allocation108_spill] sm:$0xff] %v13231_v1  ;;  %3850 = vst.msk [vmem:[%s13049_s27 + $0x478] sm:$0xff] %vm1593_vm13, %v10416_v29  ;;  %v3138_v33 = vpop.f32.mrb[15].mxu1  ;;  %10495 = vmatprep.mubr.msk.f32.mxu1 %vm1593_vm13, %v13231_v1  ;;  %v10221_v39 = vpop.f32.mrb[12].mxu0  ;;  %v446_v1 = vsub.f32 %v414_v59, %v12443_v23  ;;  %v510_v3 = vmul.f32 -4.5, %v462_v46 }
 0x273   : > { %3849 = vst.msk [vmem:[%s13049_s27 + $0x470] sm:$0xff] %vm1593_vm13, %v3138_v33  ;;  %v13239_v17 = vpop.trf.xlu0  ;;  %3720 = vst.msk [vmem:[%s13049_s27 + $0x68] sm:$0xff] %vm1593_vm13, %v10221_v39  ;;  %v2488_v57 = vpop.f32.mrb[13].mxu0 }
 0x274   : > { %17365 = vst [vmem:[#allocation109_spill] sm:$0xff] %v13239_v17  ;;  %10300 = vmatprep.mubr.msk.f32.mxu0 %vm1593_vm13, %v13239_v17  ;;  %3719 = vst.msk [vmem:[%s13049_s27 + $0x60] sm:$0xff] %vm1593_vm13, %v2488_v57  ;;  %v494_v17 = vmul.f32 -4.5, %v446_v1 }
 0x275   : > { %v13247_v29 = vpop.trf.xlu1 }
 0x276   : > { %17366 = vst [vmem:[#allocation110_spill] sm:$0xff] %v13247_v29  ;;  %10496 = vmatmul.mubr.msk.f32.gmra.mrb[68].mxu1 %vm1593_vm13, %v13247_v29 }
 0x277   : > { %v13253_v33 = vpop.trf.xlu0 }
 0x278   : > { %17367 = vst [vmem:[#allocation111_spill] sm:$0xff] %v13253_v33  ;;  %10301 = vmatmul.mubr.msk.f32.gmra.mrb[66].mxu0 %vm1593_vm13, %v13253_v33 }
 0x279   : > { %v10419_v41 = vpop.f32.mrb[16].mxu1  ;;  %v13258_v39 = vpop.trf.xlu1 }
 0x27a   : > { %17368 = vst [vmem:[#allocation112_spill] sm:$0xff] %v13258_v39  ;;  %3852 = vst.msk [vmem:[%s13049_s27 + $0x488] sm:$0xff] %vm1593_vm13, %v10419_v41  ;;  %v3148_v44 = vpop.f32.mrb[17].mxu1  ;;  %10498 = vmatprep.mubr.msk.f32.mxu1 %vm1593_vm13, %v13258_v39  ;;  %v10224_v57 = vpop.f32.mrb[14].mxu0  ;;  %v478_v39 = vsub.f32 %v414_v59, %v12452_v21 }
 0x27b   : > { %3851 = vst.msk [vmem:[%s13049_s27 + $0x480] sm:$0xff] %vm1593_vm13, %v3148_v44  ;;  %v13266_v29 = vpop.trf.xlu0  ;;  %3722 = vst.msk [vmem:[%s13049_s27 + $0x78] sm:$0xff] %vm1593_vm13, %v10224_v57  ;;  %v2498_v33 = vpop.f32.mrb[15].mxu0  ;;  %v382_v44 = vrot.slane %v12757_v24, %v13227_v54  ;;  %v542_v57 = vmul.f32 %v494_v17, %v446_v1 }
 0x27c   : > { %17369 = vst [vmem:[#allocation113_spill] sm:$0xff] %v13266_v29  ;;  %10303 = vmatprep.mubr.msk.f32.mxu0 %vm1593_vm13, %v13266_v29  ;;  %3721 = vst.msk [vmem:[%s13049_s27 + $0x70] sm:$0xff] %vm1593_vm13, %v2498_v33  ;;  %v526_v59 = vmul.f32 -4.5, %v478_v39 }
 0x27d   : > { %v13273_v41 = vpop.trf.xlu1  ;;  %v438_v24 = vsub.f32 %v382_v44, %v12443_v23 }
 0x27e   : > { %17370 = vst [vmem:[#allocation114_spill] sm:$0xff] %v13273_v41  ;;  %10499 = vmatmul.mubr.msk.f32.gmra.mrb[70].mxu1 %vm1593_vm13, %v13273_v41  ;;  %v605_v41 = vmul.f32 1.442695, %v542_v57  ;;  %v574_v50 = vmul.f32 %v526_v59, %v478_v39  ;;  %v454_v57 = vsub.f32 %v382_v44, %v12450_v35 }
 0x27f   : > { %v13282_v11 = vpop.trf.xlu0  ;;  %v486_v23 = vmul.f32 -4.5, %v438_v24 }
 0x280   : > { %17371 = vst [vmem:[#allocation115_spill] sm:$0xff] %v13282_v11  ;;  %10304 = vmatmul.mubr.msk.f32.gmra.mrb[68].mxu0 %vm1593_vm13, %v13282_v11  ;;  %v558_v11 = vmul.f32 %v510_v3, %v462_v46  ;;  %11752 = vpow2.f32 %v605_v41 }
 0x281   : > { %v10422_v29 = vpop.f32.mrb[18].mxu1  ;;  %v13286_v8 = vpop.trf.xlu1  ;;  %v534_v35 = vmul.f32 %v486_v23, %v438_v24 }
 0x282   : > { %17372 = vst [vmem:[#allocation116_spill] sm:$0xff] %v13286_v8  ;;  %3854 = vst.msk [vmem:[%s13049_s27 + $0x498] sm:$0xff] %vm1593_vm13, %v10422_v29  ;;  %v3158_v33 = vpop.f32.mrb[19].mxu1  ;;  %10501 = vmatprep.mubr.msk.f32.mxu1 %vm1593_vm13, %v13286_v8  ;;  %v10227_v17 = vpop.f32.mrb[16].mxu0  ;;  %v637_v46 = vmul.f32 1.442695, %v558_v11 }
 0x283   : > { %3853 = vst.msk [vmem:[%s13049_s27 + $0x490] sm:$0xff] %vm1593_vm13, %v3158_v33  ;;  %v13295_v1 = vpop.trf.xlu0  ;;  %3724 = vst.msk [vmem:[%s13049_s27 + $0x88] sm:$0xff] %vm1593_vm13, %v10227_v17  ;;  %v2508_v52 = vpop.f32.mrb[17].mxu0  ;;  %v470_v33 = vsub.f32 %v382_v44, %v12452_v21  ;;  %v502_v11 = vmul.f32 -4.5, %v454_v57  ;;  %v589_v24 = vmul.f32 1.442695, %v534_v35 }
 0x284   : > { %10306 = vmatprep.mubr.msk.f32.mxu0 %vm1593_vm13, %v13295_v1  ;;  %3723 = vst.msk [vmem:[%s13049_s27 + $0x80] sm:$0xff] %vm1593_vm13, %v2508_v52  ;;  %v669_v52 = vmul.f32 1.442695, %v574_v50  ;;  %11754 = vpow2.f32 %v637_v46 }
 0x285   : > { %v13301_v29 = vpop.trf.xlu1  ;;  %v518_v44 = vmul.f32 -4.5, %v470_v33  ;;  %v550_v23 = vmul.f32 %v502_v11, %v454_v57 }
 0x286   : > { %17373 = vst [vmem:[#allocation117_spill] sm:$0xff] %v13301_v29  ;;  %10502 = vmatmul.mubr.msk.f32.gmra.mrb[72].mxu1 %vm1593_vm13, %v13301_v29  ;;  %11756 = vpow2.f32 %v669_v52  ;;  %v1013_v52 = vrot.slane %v12499_v47, %v13227_v54 }
 0x287   : > { %v13308_v3 = vpop.trf.xlu0  ;;  %11758 = vpow2.f32 %v589_v24  ;;  %v621_v57 = vmul.f32 1.442695, %v550_v23 }
 0x288   : > { %10307 = vmatmul.mubr.msk.f32.gmra.mrb[70].mxu0 %vm1593_vm13, %v13308_v3 }
 0x289   : > { %v10425_v39 = vpop.f32.mrb[20].mxu1  ;;  %v13313_v59 = vpop.trf.xlu1  ;;  %11760 = vpow2.f32 %v621_v57 }
 0x28a   : > { %17374 = vst [vmem:[#allocation118_spill] sm:$0xff] %v13313_v59  ;;  %3856 = vst.msk [vmem:[%s13049_s27 + $0x4a8] sm:$0xff] %vm1593_vm13, %v10425_v39  ;;  %v3168_v17 = vpop.f32.mrb[21].mxu1  ;;  %10504 = vmatprep.mubr.msk.f32.mxu1 %vm1593_vm13, %v13313_v59  ;;  %v10230_v41 = vpop.f32.mrb[18].mxu0 }
 0x28b   : > { %3855 = vst.msk [vmem:[%s13049_s27 + $0x4a0] sm:$0xff] %vm1593_vm13, %v3168_v17  ;;  %v13321_v21 = vpop.trf.xlu0  ;;  %3726 = vst.msk [vmem:[%s13049_s27 + $0x98] sm:$0xff] %vm1593_vm13, %v10230_v41  ;;  %v2518_v50 = vpop.f32.mrb[19].mxu0  ;;  %v566_v17 = vmul.f32 %v518_v44, %v470_v33 }
 0x28c   : > { %10309 = vmatprep.mubr.msk.f32.mxu0 %vm1593_vm13, %v13321_v21  ;;  %3725 = vst.msk [vmem:[%s13049_s27 + $0x90] sm:$0xff] %vm1593_vm13, %v2518_v50  ;;  %v11753_v29 = vpop.eup %11752 }
 0x28d   : > { %v13327_v39 = vpop.trf.xlu1  ;;  %v653_v11 = vmul.f32 1.442695, %v566_v17 }
 0x28e   : > { %17375 = vst [vmem:[#allocation119_spill] sm:$0xff] %v13327_v39  ;;  %10505 = vmatmul.mubr.msk.f32.gmra.mrb[74].mxu1 %vm1593_vm13, %v13327_v39  ;;  %v11755_v39 = vpop.eup %11754 }
 0x28f   : > { %v13333_v46 = vpop.trf.xlu0  ;;  %11762 = vpow2.f32 %v653_v11 }
 0x290   : > { %10310 = vmatmul.mubr.msk.f32.gmra.mrb[72].mxu0 %vm1593_vm13, %v13333_v46  ;;  %v11757_v24 = vpop.eup %11756 }
 0x291   : > { %v10428_v41 = vpop.f32.mrb[22].mxu1  ;;  %v13337_v59 = vpop.trf.xlu1  ;;  %v727_v57 = vsel %vm673_vm11, 1.0, %v11757_v24 }
 0x292   : > { %17376 = vst [vmem:[#allocation120_spill] sm:$0xff] %v13337_v59  ;;  %3858 = vst.msk [vmem:[%s13049_s27 + $0x4b8] sm:$0xff] %vm1593_vm13, %v10428_v41  ;;  %v3178_v50 = vpop.f32.mrb[23].mxu1  ;;  %10507 = vmatprep.mubr.msk.f32.mxu1 %vm1593_vm13, %v13337_v59  ;;  %v10233_v33 = vpop.f32.mrb[20].mxu0  ;;  %v1045_v41 = vmul.f32 %v11753_v29, %v1013_v52  ;;  %v1061_v29 = vmul.f32 %v11755_v39, %v1013_v52  ;;  %v1077_v24 = vmul.f32 %v1013_v52, %v727_v57 }
 0x293   : > { %3857 = vst.msk [vmem:[%s13049_s27 + $0x4b0] sm:$0xff] %vm1593_vm13, %v3178_v50  ;;  %v13347_v35 = vpop.trf.xlu0  ;;  %3728 = vst.msk [vmem:[%s13049_s27 + $0xa8] sm:$0xff] %vm1593_vm13, %v10233_v33  ;;  %v2528_v44 = vpop.f32.mrb[21].mxu0 }
 0x294   : > { %10312 = vmatprep.mubr.msk.f32.mxu0 %vm1593_vm13, %v13347_v35  ;;  %3727 = vst.msk [vmem:[%s13049_s27 + $0xa0] sm:$0xff] %vm1593_vm13, %v2528_v44 }
 0x295   : > { %v13353_v47 = vpop.trf.xlu1 }
 0x296   : > { %17377 = vst [vmem:[#allocation121_spill] sm:$0xff] %v13353_v47  ;;  %10508 = vmatmul.mubr.msk.f32.gmra.mrb[76].mxu1 %vm1593_vm13, %v13353_v47  ;;  %v981_v47 = vrot.slane %v12508_v10, %v13227_v54 }
 0x297   : > { %v13359_v23 = vpop.trf.xlu0 }
 0x298   : > { %10313 = vmatmul.mubr.msk.f32.gmra.mrb[74].mxu0 %vm1593_vm13, %v13359_v23 }
 0x299   : > { %v10431_v17 = vpop.f32.mrb[24].mxu1  ;;  %v13363_v50 = vpop.trf.xlu1  ;;  %1558 = vxpose.xlu1.b32.start [1/3] (short) %v1045_v41, 128 }
 0x29a   : > { %17378 = vst [vmem:[#allocation122_spill] sm:$0xff] %v13363_v50  ;;  %3860 = vst.msk [vmem:[%s13049_s27 + $0x4c8] sm:$0xff] %vm1593_vm13, %v10431_v17  ;;  %v3188_v33 = vpop.f32.mrb[25].mxu1  ;;  %10510 = vmatprep.mubr.msk.f32.mxu1 %vm1593_vm13, %v13363_v50  ;;  %v10236_v11 = vpop.f32.mrb[22].mxu0 }
 0x29b   : > { %3859 = vst.msk [vmem:[%s13049_s27 + $0x4c0] sm:$0xff] %vm1593_vm13, %v3188_v33  ;;  %v13373_v44 = vpop.trf.xlu0  ;;  %v11759_v41 = vpop.eup %11758  ;;  %3730 = vst.msk [vmem:[%s13049_s27 + $0xb8] sm:$0xff] %vm1593_vm13, %v10236_v11 }
 0x29c   : > { %v2538_v39 = vpop.f32.mrb[23].mxu0  ;;  %10315 = vmatprep.mubr.msk.f32.mxu0 %vm1593_vm13, %v13373_v44  ;;  %v1037_v10 = vmul.f32 %v11759_v41, %v981_v47  ;;  %v11761_v54 = vpop.eup %11760 }
 0x29d   : > { %v13381_v17 = vpop.trf.xlu1  ;;  %1559 = vxpose.xlu1.b32.cont [2/3] (short) %v1061_v29, 128  ;;  %3729 = vst.msk [vmem:[%s13049_s27 + $0xb0] sm:$0xff] %vm1593_vm13, %v2538_v39  ;;  %v11763_v29 = vpop.eup %11762  ;;  %v1053_v39 = vmul.f32 %v11761_v54, %v981_v47 }
 0x29e   : > { %17379 = vst [vmem:[#allocation123_spill] sm:$0xff] %v13381_v17  ;;  %10511 = vmatmul.mubr.msk.f32.gmra.mrb[78].mxu1 %vm1593_vm13, %v13381_v17 }
 0x29f   : > { %v13387_v33 = vpop.trf.xlu0 }
 0x2a0   : > { %10316 = vmatmul.mubr.msk.f32.gmra.mrb[76].mxu0 %vm1593_vm13, %v13387_v33 }
 0x2a1   : > { %v10434_v11 = vpop.f32.mrb[26].mxu1  ;;  %v13391_v50 = vpop.trf.xlu1  ;;  %1560 = vxpose.xlu1.b32.end [3/3] (short) %v1077_v24, 128 }
 0x2a2   : > { %17380 = vst [vmem:[#allocation124_spill] sm:$0xff] %v13391_v50  ;;  %3862 = vst.msk [vmem:[%s13049_s27 + $0x4d8] sm:$0xff] %vm1593_vm13, %v10434_v11  ;;  %v3198_v52 = vpop.f32.mrb[27].mxu1  ;;  %10513 = vmatprep.mubr.msk.f32.mxu1 %vm1593_vm13, %v13391_v50  ;;  %v10239_v57 = vpop.f32.mrb[24].mxu0  ;;  %v719_v11 = vsel %vm673_vm11, 1.0, %v11763_v29 }
 0x2a3   : > { %3861 = vst.msk [vmem:[%s13049_s27 + $0x4d0] sm:$0xff] %vm1593_vm13, %v3198_v52  ;;  %v13399_v41 = vpop.trf.xlu0  ;;  %1302 = vxpose.xlu0.b32.start [1/3] (short) %v1037_v10, 128  ;;  %3732 = vst.msk [vmem:[%s13049_s27 + $0xc8] sm:$0xff] %vm1593_vm13, %v10239_v57  ;;  %v2548_v17 = vpop.f32.mrb[25].mxu0  ;;  %v1069_v54 = vmul.f32 %v981_v47, %v719_v11 }
 0x2a4   : > { %10318 = vmatprep.mubr.msk.f32.mxu0 %vm1593_vm13, %v13399_v41  ;;  %3731 = vst.msk [vmem:[%s13049_s27 + $0xc0] sm:$0xff] %vm1593_vm13, %v2548_v17 }
 0x2a5   : > { %v13405_v24 = vpop.trf.xlu1 }
 0x2a6   : > { %17381 = vst [vmem:[#allocation125_spill] sm:$0xff] %v13405_v24  ;;  %10514 = vmatmul.mubr.msk.f32.gmra.mrb[80].mxu1 %vm1593_vm13, %v13405_v24 }
 0x2a7   : > { %v13413_v10 = vpop.trf.xlu0  ;;  %1303 = vxpose.xlu0.b32.cont [2/3] (short) %v1053_v39, 128 }
 0x2a8   : > { %10319 = vmatmul.mubr.msk.f32.gmra.mrb[78].mxu0 %vm1593_vm13, %v13413_v10 }
 0x2a9   : > { %v10437_v52 = vpop.f32.mrb[28].mxu1  ;;  %v13417_v57 = vpop.trf.xlu1 }
 0x2aa   : > { %17382 = vst [vmem:[#allocation126_spill] sm:$0xff] %v13417_v57  ;;  %3864 = vst.msk [vmem:[%s13049_s27 + $0x4e8] sm:$0xff] %vm1593_vm13, %v10437_v52  ;;  %v3208_v18 = vpop.f32.mrb[29].mxu1  ;;  %10516 = vmatprep.mubr.msk.f32.mxu1 %vm1593_vm13, %v13417_v57  ;;  %v10242_v17 = vpop.f32.mrb[26].mxu0 }
 0x2ab   : > { %3863 = vst.msk [vmem:[%s13049_s27 + $0x4e0] sm:$0xff] %vm1593_vm13, %v3208_v18  ;;  %v13425_v29 = vpop.trf.xlu0  ;;  %1304 = vxpose.xlu0.b32.end [3/3] (short) %v1069_v54, 128  ;;  %3734 = vst.msk [vmem:[%s13049_s27 + $0xd8] sm:$0xff] %vm1593_vm13, %v10242_v17  ;;  %v2558_v47 = vpop.f32.mrb[27].mxu0 }
 0x2ac   : > { %10321 = vmatprep.mubr.msk.f32.mxu0 %vm1593_vm13, %v13425_v29  ;;  %3733 = vst.msk [vmem:[%s13049_s27 + $0xd0] sm:$0xff] %vm1593_vm13, %v2558_v47 }
 0x2ad   : > { %v13431_v39 = vpop.trf.xlu1 }
 0x2ae   : > { %17383 = vst [vmem:[#allocation127_spill] sm:$0xff] %v13431_v39  ;;  %10517 = vmatmul.mubr.msk.f32.gmra.mrb[82].mxu1 %vm1593_vm13, %v13431_v39 }
 0x2af   : > { %v13437_v11 = vpop.trf.xlu0 }
 0x2b0   : > { %10322 = vmatmul.mubr.msk.f32.gmra.mrb[80].mxu0 %vm1593_vm13, %v13437_v11 }
 0x2b1   : > { %v10440_v54 = vpop.f32.mrb[30].mxu1  ;;  %v13441_v52 = vpop.trf.xlu1 }
 0x2b2   : > { %17384 = vst [vmem:[#allocation128_spill] sm:$0xff] %v13441_v52  ;;  %3866 = vst.msk [vmem:[%s13049_s27 + $0x4f8] sm:$0xff] %vm1593_vm13, %v10440_v54  ;;  %v3218_v18 = vpop.f32.mrb[31].mxu1  ;;  %10519 = vmatprep.mubr.msk.f32.mxu1 %vm1593_vm13, %v13441_v52  ;;  %v10245_v17 = vpop.f32.mrb[28].mxu0 }
 0x2b3   : > { %3865 = vst.msk [vmem:[%s13049_s27 + $0x4f0] sm:$0xff] %vm1593_vm13, %v3218_v18  ;;  %v13449_v47 = vpop.trf.xlu0  ;;  %3736 = vst.msk [vmem:[%s13049_s27 + $0xe8] sm:$0xff] %vm1593_vm13, %v10245_v17  ;;  %v2568_v39 = vpop.f32.mrb[29].mxu0 }
 0x2b4   : > { %10324 = vmatprep.mubr.msk.f32.mxu0 %vm1593_vm13, %v13449_v47  ;;  %3735 = vst.msk [vmem:[%s13049_s27 + $0xe0] sm:$0xff] %vm1593_vm13, %v2568_v39 }
 0x2b5   : > { %v13455_v57 = vpop.trf.xlu1 }
 0x2b6   : > { %17385 = vst [vmem:[#allocation129_spill] sm:$0xff] %v13455_v57  ;;  %10520 = vmatmul.mubr.msk.f32.gmra.mrb[84].mxu1 %vm1593_vm13, %v13455_v57 }
 0x2b7   : > { %v13461_v54 = vpop.trf.xlu0 }
 0x2b8   : > { %10325 = vmatmul.mubr.msk.f32.gmra.mrb[82].mxu0 %vm1593_vm13, %v13461_v54 }
 0x2b9   : > { %v10443_v18 = vpop.f32.mrb[32].mxu1  ;;  %v13465_v17 = vpop.trf.xlu1 }
 0x2ba   : > { %17386 = vst [vmem:[#allocation130_spill] sm:$0xff] %v13465_v17  ;;  %3868 = vst.msk [vmem:[%s13049_s27 + $0x508] sm:$0xff] %vm1593_vm13, %v10443_v18  ;;  %v3228_v52 = vpop.f32.mrb[33].mxu1  ;;  %10522 = vmatprep.mubr.msk.f32.mxu1 %vm1593_vm13, %v13465_v17  ;;  %v10248_v39 = vpop.f32.mrb[30].mxu0 }
 0x2bb   : > { %3867 = vst.msk [vmem:[%s13049_s27 + $0x500] sm:$0xff] %vm1593_vm13, %v3228_v52  ;;  %v13473_v57 = vpop.trf.xlu0  ;;  %3738 = vst.msk [vmem:[%s13049_s27 + $0xf8] sm:$0xff] %vm1593_vm13, %v10248_v39  ;;  %v2578_v24 = vpop.f32.mrb[31].mxu0 }
 0x2bc   : > { %10327 = vmatprep.mubr.msk.f32.mxu0 %vm1593_vm13, %v13473_v57  ;;  %3737 = vst.msk [vmem:[%s13049_s27 + $0xf0] sm:$0xff] %vm1593_vm13, %v2578_v24 }
 0x2bd   : > { %v13479_v50 = vpop.trf.xlu1 }
 0x2be   : > { %17387 = vst [vmem:[#allocation131_spill] sm:$0xff] %v13479_v50  ;;  %10523 = vmatmul.mubr.msk.f32.gmra.mrb[86].mxu1 %vm1593_vm13, %v13479_v50 }
 0x2bf   : > { %v13485_v52 = vpop.trf.xlu0 }
 0x2c0   : > { %10328 = vmatmul.mubr.msk.f32.gmra.mrb[84].mxu0 %vm1593_vm13, %v13485_v52 }
 0x2c1   : > { %v10446_v18 = vpop.f32.mrb[34].mxu1  ;;  %v13489_v39 = vpop.trf.xlu1 }
 0x2c2   : > { %17388 = vst [vmem:[#allocation132_spill] sm:$0xff] %v13489_v39  ;;  %3870 = vst.msk [vmem:[%s13049_s27 + $0x518] sm:$0xff] %vm1593_vm13, %v10446_v18  ;;  %v3238_v17 = vpop.f32.mrb[35].mxu1  ;;  %10525 = vmatprep.mubr.msk.f32.mxu1 %vm1593_vm13, %v13489_v39  ;;  %v10251_v24 = vpop.f32.mrb[32].mxu0 }
 0x2c3   : > { %3869 = vst.msk [vmem:[%s13049_s27 + $0x510] sm:$0xff] %vm1593_vm13, %v3238_v17  ;;  %v13497_v50 = vpop.trf.xlu0  ;;  %3740 = vst.msk [vmem:[%s13049_s27 + $0x108] sm:$0xff] %vm1593_vm13, %v10251_v24  ;;  %v2588_v59 = vpop.f32.mrb[33].mxu0 }
 0x2c4   : > { %17389 = vst [vmem:[#allocation133_spill] sm:$0xff] %v13497_v50  ;;  %10330 = vmatprep.mubr.msk.f32.mxu0 %vm1593_vm13, %v13497_v50  ;;  %3739 = vst.msk [vmem:[%s13049_s27 + $0x100] sm:$0xff] %vm1593_vm13, %v2588_v59 }
 0x2c5   : > { %v13503_v8 = vpop.trf.xlu1 }
 0x2c6   : > { %17390 = vst [vmem:[#allocation134_spill] sm:$0xff] %v13503_v8  ;;  %10526 = vmatmul.mubr.msk.f32.gmra.mrb[88].mxu1 %vm1593_vm13, %v13503_v8 }
 0x2c7   : > { %v13509_v17 = vpop.trf.xlu0 }
 0x2c8   : > { %17391 = vst [vmem:[#allocation135_spill] sm:$0xff] %v13509_v17  ;;  %10331 = vmatmul.mubr.msk.f32.gmra.mrb[86].mxu0 %vm1593_vm13, %v13509_v17 }
 0x2c9   : > { %v10449_v18 = vpop.f32.mrb[36].mxu1  ;;  %v13513_v24 = vpop.trf.xlu1 }
 0x2ca   : > { %17392 = vst [vmem:[#allocation136_spill] sm:$0xff] %v13513_v24  ;;  %3872 = vst.msk [vmem:[%s13049_s27 + $0x528] sm:$0xff] %vm1593_vm13, %v10449_v18  ;;  %v3248_v39 = vpop.f32.mrb[37].mxu1  ;;  %10528 = vmatprep.mubr.msk.f32.mxu1 %vm1593_vm13, %v13513_v24  ;;  %v10254_v59 = vpop.f32.mrb[34].mxu0 }
 0x2cb   : > { %3871 = vst.msk [vmem:[%s13049_s27 + $0x520] sm:$0xff] %vm1593_vm13, %v3248_v39  ;;  %v13521_v8 = vpop.trf.xlu0  ;;  %3742 = vst.msk [vmem:[%s13049_s27 + $0x118] sm:$0xff] %vm1593_vm13, %v10254_v59  ;;  %v2598_v17 = vpop.f32.mrb[35].mxu0 }
 0x2cc   : > { %17393 = vst [vmem:[#allocation137_spill] sm:$0xff] %v13521_v8  ;;  %10333 = vmatprep.mubr.msk.f32.mxu0 %vm1593_vm13, %v13521_v8  ;;  %3741 = vst.msk [vmem:[%s13049_s27 + $0x110] sm:$0xff] %vm1593_vm13, %v2598_v17 }
 0x2cd   : > { %v13527_v50 = vpop.trf.xlu1 }
 0x2ce   : > { %17394 = vst [vmem:[#allocation138_spill] sm:$0xff] %v13527_v50  ;;  %10529 = vmatmul.mubr.msk.f32.gmra.mrb[90].mxu1 %vm1593_vm13, %v13527_v50 }
 0x2cf   : > { %v13533_v39 = vpop.trf.xlu0 }
 0x2d0   : > { %17395 = vst [vmem:[#allocation139_spill] sm:$0xff] %v13533_v39  ;;  %10334 = vmatmul.mubr.msk.f32.gmra.mrb[88].mxu0 %vm1593_vm13, %v13533_v39 }
 0x2d1   : > { %v10452_v18 = vpop.f32.mrb[38].mxu1  ;;  %v13537_v59 = vpop.trf.xlu1 }
 0x2d2   : > { %17396 = vst [vmem:[#allocation140_spill] sm:$0xff] %v13537_v59  ;;  %3874 = vst.msk [vmem:[%s13049_s27 + $0x538] sm:$0xff] %vm1593_vm13, %v10452_v18  ;;  %v3258_v24 = vpop.f32.mrb[39].mxu1  ;;  %10531 = vmatprep.mubr.msk.f32.mxu1 %vm1593_vm13, %v13537_v59  ;;  %v10257_v17 = vpop.f32.mrb[36].mxu0 }
 0x2d3   : > { %3873 = vst.msk [vmem:[%s13049_s27 + $0x530] sm:$0xff] %vm1593_vm13, %v3258_v24  ;;  %v13545_v50 = vpop.trf.xlu0  ;;  %3744 = vst.msk [vmem:[%s13049_s27 + $0x128] sm:$0xff] %vm1593_vm13, %v10257_v17  ;;  %v2608_v39 = vpop.f32.mrb[37].mxu0 }
 0x2d4   : > { %17397 = vst [vmem:[#allocation141_spill] sm:$0xff] %v13545_v50  ;;  %10336 = vmatprep.mubr.msk.f32.mxu0 %vm1593_vm13, %v13545_v50  ;;  %3743 = vst.msk [vmem:[%s13049_s27 + $0x120] sm:$0xff] %vm1593_vm13, %v2608_v39 }
 0x2d5   : > { %v13551_v8 = vpop.trf.xlu1 }
 0x2d6   : > { %17398 = vst [vmem:[#allocation142_spill] sm:$0xff] %v13551_v8  ;;  %10532 = vmatmul.mubr.msk.f32.gmra.mrb[92].mxu1 %vm1593_vm13, %v13551_v8 }
 0x2d7   : > { %v13557_v24 = vpop.trf.xlu0 }
 0x2d8   : > { %17399 = vst [vmem:[#allocation143_spill] sm:$0xff] %v13557_v24  ;;  %10337 = vmatmul.mubr.msk.f32.gmra.mrb[90].mxu0 %vm1593_vm13, %v13557_v24 }
 0x2d9   : > { %v10455_v18 = vpop.f32.mrb[40].mxu1  ;;  %v13561_v17 = vpop.trf.xlu1 }
 0x2da   : > { %17400 = vst [vmem:[#allocation144_spill] sm:$0xff] %v13561_v17  ;;  %3876 = vst.msk [vmem:[%s13049_s27 + $0x548] sm:$0xff] %vm1593_vm13, %v10455_v18  ;;  %v3268_v59 = vpop.f32.mrb[41].mxu1  ;;  %10534 = vmatprep.mubr.msk.f32.mxu1 %vm1593_vm13, %v13561_v17  ;;  %v10260_v39 = vpop.f32.mrb[38].mxu0 }
 0x2db   : > { %3875 = vst.msk [vmem:[%s13049_s27 + $0x540] sm:$0xff] %vm1593_vm13, %v3268_v59  ;;  %v13569_v8 = vpop.trf.xlu0  ;;  %3746 = vst.msk [vmem:[%s13049_s27 + $0x138] sm:$0xff] %vm1593_vm13, %v10260_v39  ;;  %v2618_v24 = vpop.f32.mrb[39].mxu0 }
 0x2dc   : > { %17401 = vst [vmem:[#allocation145_spill] sm:$0xff] %v13569_v8  ;;  %10339 = vmatprep.mubr.msk.f32.mxu0 %vm1593_vm13, %v13569_v8  ;;  %3745 = vst.msk [vmem:[%s13049_s27 + $0x130] sm:$0xff] %vm1593_vm13, %v2618_v24 }
 0x2dd   : > { %v13575_v50 = vpop.trf.xlu1 }
 0x2de   : > { %17402 = vst [vmem:[#allocation146_spill] sm:$0xff] %v13575_v50  ;;  %10535 = vmatmul.mubr.msk.f32.gmra.mrb[94].mxu1 %vm1593_vm13, %v13575_v50 }
 0x2df   : > { %v13581_v59 = vpop.trf.xlu0 }
 0x2e0   : > { %17403 = vst [vmem:[#allocation147_spill] sm:$0xff] %v13581_v59  ;;  %10340 = vmatmul.mubr.msk.f32.gmra.mrb[92].mxu0 %vm1593_vm13, %v13581_v59 }
 0x2e1   : > { %v10458_v18 = vpop.f32.mrb[42].mxu1  ;;  %v13585_v39 = vpop.trf.xlu1 }
 0x2e2   : > { %17404 = vst [vmem:[#allocation148_spill] sm:$0xff] %v13585_v39  ;;  %3878 = vst.msk [vmem:[%s13049_s27 + $0x558] sm:$0xff] %vm1593_vm13, %v10458_v18  ;;  %v3278_v17 = vpop.f32.mrb[43].mxu1  ;;  %10537 = vmatprep.mubr.msk.f32.mxu1 %vm1593_vm13, %v13585_v39  ;;  %v10263_v24 = vpop.f32.mrb[40].mxu0 }
 0x2e3   : > { %3877 = vst.msk [vmem:[%s13049_s27 + $0x550] sm:$0xff] %vm1593_vm13, %v3278_v17  ;;  %v13593_v50 = vpop.trf.xlu0  ;;  %3748 = vst.msk [vmem:[%s13049_s27 + $0x148] sm:$0xff] %vm1593_vm13, %v10263_v24  ;;  %v2628_v59 = vpop.f32.mrb[41].mxu0 }
 0x2e4   : > { %17405 = vst [vmem:[#allocation149_spill] sm:$0xff] %v13593_v50  ;;  %10342 = vmatprep.mubr.msk.f32.mxu0 %vm1593_vm13, %v13593_v50  ;;  %3747 = vst.msk [vmem:[%s13049_s27 + $0x140] sm:$0xff] %vm1593_vm13, %v2628_v59 }
 0x2e5   : > { %v13599_v8 = vpop.trf.xlu1 }
 0x2e6   : > { %17406 = vst [vmem:[#allocation150_spill] sm:$0xff] %v13599_v8  ;;  %10538 = vmatmul.mubr.msk.f32.gmra.mrb[96].mxu1 %vm1593_vm13, %v13599_v8 }
 0x2e7   : > { %v13605_v17 = vpop.trf.xlu0 }
 0x2e8   : > { %17407 = vst [vmem:[#allocation151_spill] sm:$0xff] %v13605_v17  ;;  %10343 = vmatmul.mubr.msk.f32.gmra.mrb[94].mxu0 %vm1593_vm13, %v13605_v17 }
 0x2e9   : > { %v10461_v18 = vpop.f32.mrb[44].mxu1  ;;  %v13609_v24 = vpop.trf.xlu1 }
 0x2ea   : > { %17408 = vst [vmem:[#allocation152_spill] sm:$0xff] %v13609_v24  ;;  %3880 = vst.msk [vmem:[%s13049_s27 + $0x568] sm:$0xff] %vm1593_vm13, %v10461_v18  ;;  %v3288_v39 = vpop.f32.mrb[45].mxu1  ;;  %10540 = vmatprep.mubr.msk.f32.mxu1 %vm1593_vm13, %v13609_v24  ;;  %v10266_v59 = vpop.f32.mrb[42].mxu0 }
 0x2eb   : > { %3879 = vst.msk [vmem:[%s13049_s27 + $0x560] sm:$0xff] %vm1593_vm13, %v3288_v39  ;;  %v13617_v8 = vpop.trf.xlu0  ;;  %3750 = vst.msk [vmem:[%s13049_s27 + $0x158] sm:$0xff] %vm1593_vm13, %v10266_v59  ;;  %v2638_v17 = vpop.f32.mrb[43].mxu0 }
 0x2ec   : > { %17409 = vst [vmem:[#allocation153_spill] sm:$0xff] %v13617_v8  ;;  %10345 = vmatprep.mubr.msk.f32.mxu0 %vm1593_vm13, %v13617_v8  ;;  %3749 = vst.msk [vmem:[%s13049_s27 + $0x150] sm:$0xff] %vm1593_vm13, %v2638_v17 }
 0x2ed   : > { %v13623_v50 = vpop.trf.xlu1 }
 0x2ee   : > { %17410 = vst [vmem:[#allocation154_spill] sm:$0xff] %v13623_v50  ;;  %10541 = vmatmul.mubr.msk.f32.gmra.mrb[98].mxu1 %vm1593_vm13, %v13623_v50 }
 0x2ef   : > { %v13629_v39 = vpop.trf.xlu0 }
 0x2f0   : > { %17411 = vst [vmem:[#allocation155_spill] sm:$0xff] %v13629_v39  ;;  %10346 = vmatmul.mubr.msk.f32.gmra.mrb[96].mxu0 %vm1593_vm13, %v13629_v39 }
 0x2f1   : > { %v10464_v18 = vpop.f32.mrb[46].mxu1  ;;  %v13633_v59 = vpop.trf.xlu1 }
 0x2f2   : > { %17412 = vst [vmem:[#allocation156_spill] sm:$0xff] %v13633_v59  ;;  %3882 = vst.msk [vmem:[%s13049_s27 + $0x578] sm:$0xff] %vm1593_vm13, %v10464_v18  ;;  %v3298_v24 = vpop.f32.mrb[47].mxu1  ;;  %10543 = vmatprep.mubr.msk.f32.mxu1 %vm1593_vm13, %v13633_v59  ;;  %v10269_v17 = vpop.f32.mrb[44].mxu0 }
 0x2f3   : > { %3881 = vst.msk [vmem:[%s13049_s27 + $0x570] sm:$0xff] %vm1593_vm13, %v3298_v24  ;;  %v13641_v50 = vpop.trf.xlu0  ;;  %3752 = vst.msk [vmem:[%s13049_s27 + $0x168] sm:$0xff] %vm1593_vm13, %v10269_v17  ;;  %v2648_v39 = vpop.f32.mrb[45].mxu0 }
 0x2f4   : > { %17413 = vst [vmem:[#allocation157_spill] sm:$0xff] %v13641_v50  ;;  %10348 = vmatprep.mubr.msk.f32.mxu0 %vm1593_vm13, %v13641_v50  ;;  %3751 = vst.msk [vmem:[%s13049_s27 + $0x160] sm:$0xff] %vm1593_vm13, %v2648_v39 }
 0x2f5   : > { %v13647_v8 = vpop.trf.xlu1 }
 0x2f6   : > { %17414 = vst [vmem:[#allocation158_spill] sm:$0xff] %v13647_v8  ;;  %10544 = vmatmul.mubr.msk.f32.gmra.mrb[100].mxu1 %vm1593_vm13, %v13647_v8 }
 0x2f7   : > { %v13653_v24 = vpop.trf.xlu0 }
 0x2f8   : > { %17415 = vst [vmem:[#allocation159_spill] sm:$0xff] %v13653_v24  ;;  %10349 = vmatmul.mubr.msk.f32.gmra.mrb[98].mxu0 %vm1593_vm13, %v13653_v24 }
 0x2f9   : > { %v10467_v18 = vpop.f32.mrb[48].mxu1  ;;  %v13657_v17 = vpop.trf.xlu1 }
 0x2fa   : > { %17416 = vst [vmem:[#allocation160_spill] sm:$0xff] %v13657_v17  ;;  %3884 = vst.msk [vmem:[%s13049_s27 + $0x588] sm:$0xff] %vm1593_vm13, %v10467_v18  ;;  %v3308_v59 = vpop.f32.mrb[49].mxu1  ;;  %10546 = vmatprep.mubr.msk.f32.mxu1 %vm1593_vm13, %v13657_v17  ;;  %v10272_v39 = vpop.f32.mrb[46].mxu0 }
 0x2fb   : > { %3883 = vst.msk [vmem:[%s13049_s27 + $0x580] sm:$0xff] %vm1593_vm13, %v3308_v59  ;;  %v13665_v8 = vpop.trf.xlu0  ;;  %3754 = vst.msk [vmem:[%s13049_s27 + $0x178] sm:$0xff] %vm1593_vm13, %v10272_v39  ;;  %v2658_v24 = vpop.f32.mrb[47].mxu0 }
 0x2fc   : > { %17417 = vst [vmem:[#allocation161_spill] sm:$0xff] %v13665_v8  ;;  %10351 = vmatprep.mubr.msk.f32.mxu0 %vm1593_vm13, %v13665_v8  ;;  %3753 = vst.msk [vmem:[%s13049_s27 + $0x170] sm:$0xff] %vm1593_vm13, %v2658_v24 }
 0x2fd   : > { %v13671_v50 = vpop.trf.xlu1 }
 0x2fe   : > { %17418 = vst [vmem:[#allocation162_spill] sm:$0xff] %v13671_v50  ;;  %10547 = vmatmul.mubr.msk.f32.gmra.mrb[102].mxu1 %vm1593_vm13, %v13671_v50 }
 0x2ff   : > { %v13677_v59 = vpop.trf.xlu0 }
 0x300   : > { %17419 = vst [vmem:[#allocation163_spill] sm:$0xff] %v13677_v59  ;;  %10352 = vmatmul.mubr.msk.f32.gmra.mrb[100].mxu0 %vm1593_vm13, %v13677_v59 }
 0x301   : > { %v10470_v18 = vpop.f32.mrb[50].mxu1  ;;  %v13681_v39 = vpop.trf.xlu1 }
 0x302   : > { %17420 = vst [vmem:[#allocation164_spill] sm:$0xff] %v13681_v39  ;;  %3886 = vst.msk [vmem:[%s13049_s27 + $0x598] sm:$0xff] %vm1593_vm13, %v10470_v18  ;;  %v3318_v17 = vpop.f32.mrb[51].mxu1  ;;  %10549 = vmatprep.mubr.msk.f32.mxu1 %vm1593_vm13, %v13681_v39  ;;  %v10275_v24 = vpop.f32.mrb[48].mxu0 }
 0x303   : > { %3885 = vst.msk [vmem:[%s13049_s27 + $0x590] sm:$0xff] %vm1593_vm13, %v3318_v17  ;;  %v13689_v50 = vpop.trf.xlu0  ;;  %3756 = vst.msk [vmem:[%s13049_s27 + $0x188] sm:$0xff] %vm1593_vm13, %v10275_v24  ;;  %v2668_v59 = vpop.f32.mrb[49].mxu0 }
 0x304   : > { %17421 = vst [vmem:[#allocation165_spill] sm:$0xff] %v13689_v50  ;;  %10354 = vmatprep.mubr.msk.f32.mxu0 %vm1593_vm13, %v13689_v50  ;;  %3755 = vst.msk [vmem:[%s13049_s27 + $0x180] sm:$0xff] %vm1593_vm13, %v2668_v59 }
 0x305   : > { %v13695_v8 = vpop.trf.xlu1 }
 0x306   : > { %17422 = vst [vmem:[#allocation166_spill] sm:$0xff] %v13695_v8  ;;  %10550 = vmatmul.mubr.msk.f32.gmra.mrb[104].mxu1 %vm1593_vm13, %v13695_v8 }
 0x307   : > { %v13701_v17 = vpop.trf.xlu0 }
 0x308   : > { %17423 = vst [vmem:[#allocation167_spill] sm:$0xff] %v13701_v17  ;;  %10355 = vmatmul.mubr.msk.f32.gmra.mrb[102].mxu0 %vm1593_vm13, %v13701_v17 }
 0x309   : > { %v10473_v18 = vpop.f32.mrb[52].mxu1  ;;  %v13705_v24 = vpop.trf.xlu1 }
 0x30a   : > { %17424 = vst [vmem:[#allocation168_spill] sm:$0xff] %v13705_v24  ;;  %3888 = vst.msk [vmem:[%s13049_s27 + $0x5a8] sm:$0xff] %vm1593_vm13, %v10473_v18  ;;  %v3328_v39 = vpop.f32.mrb[53].mxu1  ;;  %10552 = vmatprep.mubr.msk.f32.mxu1 %vm1593_vm13, %v13705_v24  ;;  %v10278_v59 = vpop.f32.mrb[50].mxu0 }
 0x30b   : > { %3887 = vst.msk [vmem:[%s13049_s27 + $0x5a0] sm:$0xff] %vm1593_vm13, %v3328_v39  ;;  %v13713_v8 = vpop.trf.xlu0  ;;  %3758 = vst.msk [vmem:[%s13049_s27 + $0x198] sm:$0xff] %vm1593_vm13, %v10278_v59  ;;  %v2678_v17 = vpop.f32.mrb[51].mxu0 }
 0x30c   : > { %17425 = vst [vmem:[#allocation169_spill] sm:$0xff] %v13713_v8  ;;  %10357 = vmatprep.mubr.msk.f32.mxu0 %vm1593_vm13, %v13713_v8  ;;  %3757 = vst.msk [vmem:[%s13049_s27 + $0x190] sm:$0xff] %vm1593_vm13, %v2678_v17 }
 0x30d   : > { %v13719_v50 = vpop.trf.xlu1 }
 0x30e   : > { %17426 = vst [vmem:[#allocation170_spill] sm:$0xff] %v13719_v50  ;;  %10553 = vmatmul.mubr.msk.f32.gmra.mrb[106].mxu1 %vm1593_vm13, %v13719_v50 }
 0x30f   : > { %v13725_v39 = vpop.trf.xlu0 }
 0x310   : > { %17427 = vst [vmem:[#allocation171_spill] sm:$0xff] %v13725_v39  ;;  %10358 = vmatmul.mubr.msk.f32.gmra.mrb[104].mxu0 %vm1593_vm13, %v13725_v39 }
 0x311   : > { %v10476_v18 = vpop.f32.mrb[54].mxu1  ;;  %v13729_v59 = vpop.trf.xlu1 }
 0x312   : > { %17428 = vst [vmem:[#allocation172_spill] sm:$0xff] %v13729_v59  ;;  %3890 = vst.msk [vmem:[%s13049_s27 + $0x5b8] sm:$0xff] %vm1593_vm13, %v10476_v18  ;;  %v3338_v24 = vpop.f32.mrb[55].mxu1  ;;  %10555 = vmatprep.mubr.msk.f32.mxu1 %vm1593_vm13, %v13729_v59  ;;  %v10281_v17 = vpop.f32.mrb[52].mxu0 }
 0x313   : > { %3889 = vst.msk [vmem:[%s13049_s27 + $0x5b0] sm:$0xff] %vm1593_vm13, %v3338_v24  ;;  %v13737_v50 = vpop.trf.xlu0  ;;  %3760 = vst.msk [vmem:[%s13049_s27 + $0x1a8] sm:$0xff] %vm1593_vm13, %v10281_v17  ;;  %v2688_v39 = vpop.f32.mrb[53].mxu0 }
 0x314   : > { %17429 = vst [vmem:[#allocation173_spill] sm:$0xff] %v13737_v50  ;;  %10360 = vmatprep.mubr.msk.f32.mxu0 %vm1593_vm13, %v13737_v50  ;;  %3759 = vst.msk [vmem:[%s13049_s27 + $0x1a0] sm:$0xff] %vm1593_vm13, %v2688_v39 }
 0x315   : > { %v13743_v8 = vpop.trf.xlu1 }
 0x316   : > { %17430 = vst [vmem:[#allocation174_spill] sm:$0xff] %v13743_v8  ;;  %10556 = vmatmul.mubr.msk.f32.gmra.mrb[108].mxu1 %vm1593_vm13, %v13743_v8 }
 0x317   : > { %v13749_v24 = vpop.trf.xlu0 }
 0x318   : > { %17431 = vst [vmem:[#allocation175_spill] sm:$0xff] %v13749_v24  ;;  %10361 = vmatmul.mubr.msk.f32.gmra.mrb[106].mxu0 %vm1593_vm13, %v13749_v24 }
 0x319   : > { %v10479_v18 = vpop.f32.mrb[56].mxu1  ;;  %v13753_v17 = vpop.trf.xlu1 }
 0x31a   : > { %17432 = vst [vmem:[#allocation176_spill] sm:$0xff] %v13753_v17  ;;  %3892 = vst.msk [vmem:[%s13049_s27 + $0x5c8] sm:$0xff] %vm1593_vm13, %v10479_v18  ;;  %v3348_v59 = vpop.f32.mrb[57].mxu1  ;;  %10558 = vmatprep.mubr.msk.f32.mxu1 %vm1593_vm13, %v13753_v17 }
 0x31b   : > { %3891 = vst.msk [vmem:[%s13049_s27 + $0x5c0] sm:$0xff] %vm1593_vm13, %v3348_v59  ;;  %v10284_v39 = vpop.f32.mrb[54].mxu0  ;;  %v13761_v8 = vpop.trf.xlu0 }
 0x31c   : > { %17433 = vst [vmem:[#allocation177_spill] sm:$0xff] %v13761_v8  ;;  %3762 = vst.msk [vmem:[%s13049_s27 + $0x1b8] sm:$0xff] %vm1593_vm13, %v10284_v39  ;;  %v2698_v24 = vpop.f32.mrb[55].mxu0  ;;  %10363 = vmatprep.mubr.msk.f32.mxu0 %vm1593_vm13, %v13761_v8 }
 0x31d   : > { %v13767_v50 = vpop.trf.xlu1  ;;  %3761 = vst.msk [vmem:[%s13049_s27 + $0x1b0] sm:$0xff] %vm1593_vm13, %v2698_v24 }
 0x31e   : > { %17434 = vst [vmem:[#allocation178_spill] sm:$0xff] %v13767_v50  ;;  %10559 = vmatmul.mubr.msk.f32.gmra.mrb[110].mxu1 %vm1593_vm13, %v13767_v50 }
 0x31f   : > { %v13773_v59 = vpop.trf.xlu0 }
 0x320   : > { %17435 = vst [vmem:[#allocation179_spill] sm:$0xff] %v13773_v59  ;;  %10364 = vmatmul.mubr.msk.f32.gmra.mrb[108].mxu0 %vm1593_vm13, %v13773_v59 }
 0x321   : > { %v10482_v18 = vpop.f32.mrb[58].mxu1  ;;  %v13777_v39 = vpop.trf.xlu1 }
 0x322   : > { %17436 = vst [vmem:[#allocation180_spill] sm:$0xff] %v13777_v39  ;;  %3894 = vst.msk [vmem:[%s13049_s27 + $0x5d8] sm:$0xff] %vm1593_vm13, %v10482_v18  ;;  %v3358_v17 = vpop.f32.mrb[59].mxu1  ;;  %10561 = vmatprep.mubr.msk.f32.mxu1 %vm1593_vm13, %v13777_v39 }
 0x323   : > { %3893 = vst.msk [vmem:[%s13049_s27 + $0x5d0] sm:$0xff] %vm1593_vm13, %v3358_v17  ;;  %v10287_v24 = vpop.f32.mrb[56].mxu0  ;;  %v13785_v50 = vpop.trf.xlu0 }
 0x324   : > { %17437 = vst [vmem:[#allocation181_spill] sm:$0xff] %v13785_v50  ;;  %3764 = vst.msk [vmem:[%s13049_s27 + $0x1c8] sm:$0xff] %vm1593_vm13, %v10287_v24  ;;  %v2708_v59 = vpop.f32.mrb[57].mxu0  ;;  %10366 = vmatprep.mubr.msk.f32.mxu0 %vm1593_vm13, %v13785_v50 }
 0x325   : > { %v13791_v8 = vpop.trf.xlu1  ;;  %3763 = vst.msk [vmem:[%s13049_s27 + $0x1c0] sm:$0xff] %vm1593_vm13, %v2708_v59 }
 0x326   : > { %17438 = vst [vmem:[#allocation182_spill] sm:$0xff] %v13791_v8  ;;  %10562 = vmatmul.mubr.msk.f32.gmra.mrb[112].mxu1 %vm1593_vm13, %v13791_v8 }
 0x327   : > { %v13797_v17 = vpop.trf.xlu0 }
 0x328   : > { %17439 = vst [vmem:[#allocation183_spill] sm:$0xff] %v13797_v17  ;;  %10367 = vmatmul.mubr.msk.f32.gmra.mrb[110].mxu0 %vm1593_vm13, %v13797_v17 }
 0x329   : > { %v10485_v18 = vpop.f32.mrb[60].mxu1  ;;  %v13801_v24 = vpop.trf.xlu1 }
 0x32a   : > { %17440 = vst [vmem:[#allocation184_spill] sm:$0xff] %v13801_v24  ;;  %3896 = vst.msk [vmem:[%s13049_s27 + $0x5e8] sm:$0xff] %vm1593_vm13, %v10485_v18  ;;  %v3368_v39 = vpop.f32.mrb[61].mxu1  ;;  %10564 = vmatprep.mubr.msk.f32.mxu1 %vm1593_vm13, %v13801_v24 }
 0x32b   : > { %3895 = vst.msk [vmem:[%s13049_s27 + $0x5e0] sm:$0xff] %vm1593_vm13, %v3368_v39  ;;  %v10290_v59 = vpop.f32.mrb[58].mxu0  ;;  %v13809_v8 = vpop.trf.xlu0 }
 0x32c   : > { %17441 = vst [vmem:[#allocation185_spill] sm:$0xff] %v13809_v8  ;;  %3766 = vst.msk [vmem:[%s13049_s27 + $0x1d8] sm:$0xff] %vm1593_vm13, %v10290_v59  ;;  %v2718_v17 = vpop.f32.mrb[59].mxu0  ;;  %10369 = vmatprep.mubr.msk.f32.mxu0 %vm1593_vm13, %v13809_v8 }
 0x32d   : > { %v13815_v50 = vpop.trf.xlu1  ;;  %3765 = vst.msk [vmem:[%s13049_s27 + $0x1d0] sm:$0xff] %vm1593_vm13, %v2718_v17 }
 0x32e   : > { %17442 = vst [vmem:[#allocation186_spill] sm:$0xff] %v13815_v50  ;;  %10565 = vmatmul.mubr.msk.f32.gmra.mrb[114].mxu1 %vm1593_vm13, %v13815_v50 }
 0x32f   : > { %v13821_v39 = vpop.trf.xlu0 }
 0x330   : > { %17443 = vst [vmem:[#allocation187_spill] sm:$0xff] %v13821_v39  ;;  %10370 = vmatmul.mubr.msk.f32.gmra.mrb[112].mxu0 %vm1593_vm13, %v13821_v39 }
 0x331   : > { %v10488_v18 = vpop.f32.mrb[62].mxu1  ;;  %v13825_v59 = vpop.trf.xlu1 }
 0x332   : > { %17444 = vst [vmem:[#allocation188_spill] sm:$0xff] %v13825_v59  ;;  %3898 = vst.msk [vmem:[%s13049_s27 + $0x5f8] sm:$0xff] %vm1593_vm13, %v10488_v18  ;;  %v3378_v24 = vpop.f32.mrb[63].mxu1  ;;  %10567 = vmatprep.mubr.msk.f32.mxu1 %vm1593_vm13, %v13825_v59 }
 0x333   : > { %3897 = vst.msk [vmem:[%s13049_s27 + $0x5f0] sm:$0xff] %vm1593_vm13, %v3378_v24  ;;  %v10293_v17 = vpop.f32.mrb[60].mxu0  ;;  %v13833_v50 = vpop.trf.xlu0 }
 0x334   : > { %17445 = vst [vmem:[#allocation189_spill] sm:$0xff] %v13833_v50  ;;  %3768 = vst.msk [vmem:[%s13049_s27 + $0x1e8] sm:$0xff] %vm1593_vm13, %v10293_v17  ;;  %v2728_v39 = vpop.f32.mrb[61].mxu0  ;;  %10372 = vmatprep.mubr.msk.f32.mxu0 %vm1593_vm13, %v13833_v50 }
 0x335   : > { %v13839_v8 = vpop.trf.xlu1  ;;  %3767 = vst.msk [vmem:[%s13049_s27 + $0x1e0] sm:$0xff] %vm1593_vm13, %v2728_v39 }
 0x336   : > { %17446 = vst [vmem:[#allocation190_spill] sm:$0xff] %v13839_v8  ;;  %10568 = vmatmul.mubr.msk.f32.gmra.mrb[116].mxu1 %vm1593_vm13, %v13839_v8 }
 0x337   : > { %v13845_v24 = vpop.trf.xlu0 }
 0x338   : > { %17447 = vst [vmem:[#allocation191_spill] sm:$0xff] %v13845_v24  ;;  %10373 = vmatmul.mubr.msk.f32.gmra.mrb[114].mxu0 %vm1593_vm13, %v13845_v24 }
 0x339   : > { %v10491_v18 = vpop.f32.mrb[64].mxu1  ;;  %v13849_v17 = vpop.trf.xlu1 }
 0x33a   : > { %17448 = vst [vmem:[#allocation192_spill] sm:$0xff] %v13849_v17  ;;  %3900 = vst.msk [vmem:[%s13049_s27 + $0x608] sm:$0xff] %vm1593_vm13, %v10491_v18  ;;  %v3388_v59 = vpop.f32.mrb[65].mxu1  ;;  %10570 = vmatprep.mubr.msk.f32.mxu1 %vm1593_vm13, %v13849_v17 }
 0x33b   : > { %3899 = vst.msk [vmem:[%s13049_s27 + $0x600] sm:$0xff] %vm1593_vm13, %v3388_v59  ;;  %v10296_v39 = vpop.f32.mrb[62].mxu0  ;;  %v13857_v8 = vpop.trf.xlu0 }
 0x33c   : > { %17449 = vst [vmem:[#allocation193_spill] sm:$0xff] %v13857_v8  ;;  %3770 = vst.msk [vmem:[%s13049_s27 + $0x1f8] sm:$0xff] %vm1593_vm13, %v10296_v39  ;;  %v2738_v24 = vpop.f32.mrb[63].mxu0  ;;  %10375 = vmatprep.mubr.msk.f32.mxu0 %vm1593_vm13, %v13857_v8 }
 0x33d   : > { %v13863_v50 = vpop.trf.xlu1  ;;  %3769 = vst.msk [vmem:[%s13049_s27 + $0x1f0] sm:$0xff] %vm1593_vm13, %v2738_v24 }
 0x33e   : > { %17450 = vst [vmem:[#allocation194_spill] sm:$0xff] %v13863_v50  ;;  %10571 = vmatmul.mubr.msk.f32.gmra.mrb[118].mxu1 %vm1593_vm13, %v13863_v50 }
 0x33f   : > { %v13869_v59 = vpop.trf.xlu0 }
 0x340   : > { %17451 = vst [vmem:[#allocation195_spill] sm:$0xff] %v13869_v59  ;;  %10376 = vmatmul.mubr.msk.f32.gmra.mrb[116].mxu0 %vm1593_vm13, %v13869_v59 }
 0x341   : > { %v10494_v18 = vpop.f32.mrb[66].mxu1  ;;  %v13873_v39 = vpop.trf.xlu1 }
 0x342   : > { %17452 = vst [vmem:[#allocation196_spill] sm:$0xff] %v13873_v39  ;;  %3902 = vst.msk [vmem:[%s13049_s27 + $0x618] sm:$0xff] %vm1593_vm13, %v10494_v18  ;;  %v3398_v17 = vpop.f32.mrb[67].mxu1  ;;  %10573 = vmatprep.mubr.msk.f32.mxu1 %vm1593_vm13, %v13873_v39 }
 0x343   : > { %3901 = vst.msk [vmem:[%s13049_s27 + $0x610] sm:$0xff] %vm1593_vm13, %v3398_v17  ;;  %v10299_v24 = vpop.f32.mrb[64].mxu0  ;;  %v13881_v50 = vpop.trf.xlu0 }
 0x344   : > { %17453 = vst [vmem:[#allocation197_spill] sm:$0xff] %v13881_v50  ;;  %3772 = vst.msk [vmem:[%s13049_s27 + $0x208] sm:$0xff] %vm1593_vm13, %v10299_v24  ;;  %v2748_v59 = vpop.f32.mrb[65].mxu0  ;;  %10378 = vmatprep.mubr.msk.f32.mxu0 %vm1593_vm13, %v13881_v50 }
 0x345   : > { %v13887_v8 = vpop.trf.xlu1  ;;  %3771 = vst.msk [vmem:[%s13049_s27 + $0x200] sm:$0xff] %vm1593_vm13, %v2748_v59 }
 0x346   : > { %17454 = vst [vmem:[#allocation198_spill] sm:$0xff] %v13887_v8  ;;  %10574 = vmatmul.mubr.msk.f32.gmra.mrb[120].mxu1 %vm1593_vm13, %v13887_v8 }
 0x347   : > { %v13893_v17 = vpop.trf.xlu0 }
 0x348   : > { %17455 = vst [vmem:[#allocation199_spill] sm:$0xff] %v13893_v17  ;;  %10379 = vmatmul.mubr.msk.f32.gmra.mrb[118].mxu0 %vm1593_vm13, %v13893_v17 }
 0x349   : > { %v10497_v18 = vpop.f32.mrb[68].mxu1  ;;  %v13897_v24 = vpop.trf.xlu1 }
 0x34a   : > { %17456 = vst [vmem:[#allocation200_spill] sm:$0xff] %v13897_v24  ;;  %3904 = vst.msk [vmem:[%s13049_s27 + $0x628] sm:$0xff] %vm1593_vm13, %v10497_v18  ;;  %v3408_v39 = vpop.f32.mrb[69].mxu1  ;;  %10576 = vmatprep.mubr.msk.f32.mxu1 %vm1593_vm13, %v13897_v24 }
 0x34b   : > { %3903 = vst.msk [vmem:[%s13049_s27 + $0x620] sm:$0xff] %vm1593_vm13, %v3408_v39  ;;  %v10302_v59 = vpop.f32.mrb[66].mxu0  ;;  %v13905_v8 = vpop.trf.xlu0 }
 0x34c   : > { %17457 = vst [vmem:[#allocation201_spill] sm:$0xff] %v13905_v8  ;;  %3774 = vst.msk [vmem:[%s13049_s27 + $0x218] sm:$0xff] %vm1593_vm13, %v10302_v59  ;;  %v2758_v17 = vpop.f32.mrb[67].mxu0  ;;  %10381 = vmatprep.mubr.msk.f32.mxu0 %vm1593_vm13, %v13905_v8 }
 0x34d   : > { %v13911_v50 = vpop.trf.xlu1  ;;  %3773 = vst.msk [vmem:[%s13049_s27 + $0x210] sm:$0xff] %vm1593_vm13, %v2758_v17 }
 0x34e   : > { %17458 = vst [vmem:[#allocation202_spill] sm:$0xff] %v13911_v50  ;;  %10577 = vmatmul.mubr.msk.f32.gmra.mrb[122].mxu1 %vm1593_vm13, %v13911_v50 }
 0x34f   : > { %v13917_v39 = vpop.trf.xlu0 }
 0x350   : > { %17459 = vst [vmem:[#allocation203_spill] sm:$0xff] %v13917_v39  ;;  %10382 = vmatmul.mubr.msk.f32.gmra.mrb[120].mxu0 %vm1593_vm13, %v13917_v39 }
 0x351   : > { %v10500_v18 = vpop.f32.mrb[70].mxu1  ;;  %v13921_v59 = vpop.trf.xlu1 }
 0x352   : > { %17460 = vst [vmem:[#allocation204_spill] sm:$0xff] %v13921_v59  ;;  %3906 = vst.msk [vmem:[%s13049_s27 + $0x638] sm:$0xff] %vm1593_vm13, %v10500_v18  ;;  %v3418_v24 = vpop.f32.mrb[71].mxu1  ;;  %10579 = vmatprep.mubr.msk.f32.mxu1 %vm1593_vm13, %v13921_v59 }
 0x353   : > { %3905 = vst.msk [vmem:[%s13049_s27 + $0x630] sm:$0xff] %vm1593_vm13, %v3418_v24  ;;  %v10305_v17 = vpop.f32.mrb[68].mxu0  ;;  %v13929_v50 = vpop.trf.xlu0 }
 0x354   : > { %17461 = vst [vmem:[#allocation205_spill] sm:$0xff] %v13929_v50  ;;  %3776 = vst.msk [vmem:[%s13049_s27 + $0x228] sm:$0xff] %vm1593_vm13, %v10305_v17  ;;  %v2768_v39 = vpop.f32.mrb[69].mxu0  ;;  %10384 = vmatprep.mubr.msk.f32.mxu0 %vm1593_vm13, %v13929_v50 }
 0x355   : > { %v13935_v8 = vpop.trf.xlu1  ;;  %3775 = vst.msk [vmem:[%s13049_s27 + $0x220] sm:$0xff] %vm1593_vm13, %v2768_v39 }
 0x356   : > { %17462 = vst [vmem:[#allocation206_spill] sm:$0xff] %v13935_v8  ;;  %10580 = vmatmul.mubr.msk.f32.gmra.mrb[124].mxu1 %vm1593_vm13, %v13935_v8 }
 0x357   : > { %v13941_v24 = vpop.trf.xlu0 }
 0x358   : > { %17463 = vst [vmem:[#allocation207_spill] sm:$0xff] %v13941_v24  ;;  %10385 = vmatmul.mubr.msk.f32.gmra.mrb[122].mxu0 %vm1593_vm13, %v13941_v24 }
 0x359   : > { %v10503_v18 = vpop.f32.mrb[72].mxu1  ;;  %v13945_v17 = vpop.trf.xlu1 }
 0x35a   : > { %17464 = vst [vmem:[#allocation208_spill] sm:$0xff] %v13945_v17  ;;  %3908 = vst.msk [vmem:[%s13049_s27 + $0x648] sm:$0xff] %vm1593_vm13, %v10503_v18  ;;  %v3428_v59 = vpop.f32.mrb[73].mxu1  ;;  %10582 = vmatprep.mubr.msk.f32.mxu1 %vm1593_vm13, %v13945_v17 }
 0x35b   : > { %3907 = vst.msk [vmem:[%s13049_s27 + $0x640] sm:$0xff] %vm1593_vm13, %v3428_v59  ;;  %v10308_v39 = vpop.f32.mrb[70].mxu0  ;;  %v13953_v8 = vpop.trf.xlu0 }
 0x35c   : > { %3778 = vst.msk [vmem:[%s13049_s27 + $0x238] sm:$0xff] %vm1593_vm13, %v10308_v39  ;;  %v2778_v50 = vpop.f32.mrb[71].mxu0  ;;  %10387 = vmatprep.mubr.msk.f32.mxu0 %vm1593_vm13, %v13953_v8 }
 0x35d   : > { %v13959_v24 = vpop.trf.xlu1  ;;  %3777 = vst.msk [vmem:[%s13049_s27 + $0x230] sm:$0xff] %vm1593_vm13, %v2778_v50 }
 0x35e   : > { %17465 = vst [vmem:[#allocation209_spill] sm:$0xff] %v13959_v24  ;;  %10583 = vmatmul.mubr.msk.f32.gmra.mrb[126].mxu1 %vm1593_vm13, %v13959_v24 }
 0x35f   : > { %10591 = vmatprep.mubr.msk.f32.mxu1 %vm1593_vm13, %v12556_v53  ;;  %v13967_v59 = vpop.trf.xlu0 }
 0x360   : > { %10388 = vmatmul.mubr.msk.f32.gmra.mrb[124].mxu0 %vm1593_vm13, %v13967_v59 }
 0x361   : > { %v10506_v18 = vpop.f32.mrb[74].mxu1 }
 0x362   : > { %3910 = vst.msk [vmem:[%s13049_s27 + $0x658] sm:$0xff] %vm1593_vm13, %v10506_v18  ;;  %v3438_v39 = vpop.f32.mrb[75].mxu1  ;;  %10592 = vmatmul.mubr.msk.f32.vlgmr.msra.gmra.mrb[128].mxu1 %vm1593_vm13, %v12564_v55 }
 0x363   : > { %3909 = vst.msk [vmem:[%s13049_s27 + $0x650] sm:$0xff] %vm1593_vm13, %v3438_v39  ;;  %10594 = vmatprep.mubr.msk.f32.mxu1 %vm1593_vm13, %v12575_v60  ;;  %v10311_v50 = vpop.f32.mrb[72].mxu0  ;;  %v13979_v24 = vpop.trf.xlu0 }
 0x364   : > { %3780 = vst.msk [vmem:[%s13049_s27 + $0x248] sm:$0xff] %vm1593_vm13, %v10311_v50  ;;  %v2788_v17 = vpop.f32.mrb[73].mxu0  ;;  %10390 = vmatprep.mubr.msk.f32.mxu0 %vm1593_vm13, %v13979_v24 }
 0x365   : > { %3779 = vst.msk [vmem:[%s13049_s27 + $0x240] sm:$0xff] %vm1593_vm13, %v2788_v17 }
 0x366   : > { %10595 = vmatmul.mubr.msk.f32.gmra.mrb[130].mxu1 %vm1593_vm13, %v12585_v63 }
 0x367   : > { %10597 = vmatprep.mubr.msk.f32.mxu1 %vm1593_vm13, %v12594_v0  ;;  %v13991_v18 = vpop.trf.xlu0 }
 0x368   : > { %17466 = vst [vmem:[#allocation210_spill] sm:$0xff] %v13991_v18  ;;  %10391 = vmatmul.mubr.msk.f32.gmra.mrb[126].mxu0 %vm1593_vm13, %v13991_v18 }
 0x369   : > { %v10509_v39 = vpop.f32.mrb[76].mxu1  ;;  %10981 = vmatprep.mubr.msk.f32.mxu0 %vm1593_vm13, %v12556_v53 }
 0x36a   : > { %3912 = vst.msk [vmem:[%s13049_s27 + $0x668] sm:$0xff] %vm1593_vm13, %v10509_v39  ;;  %v3448_v17 = vpop.f32.mrb[77].mxu1  ;;  %10598 = vmatmul.mubr.msk.f32.gmra.mrb[132].mxu1 %vm1593_vm13, %v12606_v16  ;;  %v17469_v39 = vld [vmem:[#allocation60_spill] sm:$0xff] }
 0x36b   : > { %3911 = vst.msk [vmem:[%s13049_s27 + $0x660] sm:$0xff] %vm1593_vm13, %v3448_v17  ;;  %10600 = vmatprep.mubr.msk.f32.mxu1 %vm1593_vm13, %v12615_v12  ;;  %v10314_v50 = vpop.f32.mrb[74].mxu0 }
 0x36c   : > { %3782 = vst.msk [vmem:[%s13049_s27 + $0x258] sm:$0xff] %vm1593_vm13, %v10314_v50  ;;  %v2798_v18 = vpop.f32.mrb[75].mxu0  ;;  %10982 = vmatmul.mubr.msk.f32.vlgmr.msra.gmra.mrb[128].mxu0 %vm1593_vm13, %v12564_v55  ;;  %v17470_v50 = vld [vmem:[#allocation62_spill] sm:$0xff] }
 0x36d   : > { %3781 = vst.msk [vmem:[%s13049_s27 + $0x250] sm:$0xff] %vm1593_vm13, %v2798_v18  ;;  %10984 = vmatprep.mubr.msk.f32.mxu0 %vm1593_vm13, %v12575_v60  ;;  %v17467_v18 = vld [vmem:[#allocation55_spill] sm:$0xff] }
 0x36e   : > { %10601 = vmatmul.mubr.msk.f32.gmra.mrb[134].mxu1 %vm1593_vm13, %v12624_v25 }
 0x36f   : > { %10603 = vmatprep.mubr.msk.f32.mxu1 %vm1593_vm13, %v12633_v34 }
 0x370   : > { %10985 = vmatmul.mubr.msk.f32.gmra.mrb[130].mxu0 %vm1593_vm13, %v12585_v63 }
 0x371   : > { %v10512_v53 = vpop.f32.mrb[78].mxu1  ;;  %10987 = vmatprep.mubr.msk.f32.mxu0 %vm1593_vm13, %v12594_v0 }
 0x372   : > { %3914 = vst.msk [vmem:[%s13049_s27 + $0x678] sm:$0xff] %vm1593_vm13, %v10512_v53  ;;  %v3458_v55 = vpop.f32.mrb[79].mxu1  ;;  %10604 = vmatmul.mubr.msk.f32.gmra.mrb[136].mxu1 %vm1593_vm13, %v12641_v38 }
 0x373   : > { %3913 = vst.msk [vmem:[%s13049_s27 + $0x670] sm:$0xff] %vm1593_vm13, %v3458_v55  ;;  %10606 = vmatprep.mubr.msk.f32.mxu1 %vm1593_vm13, %v12651_v45  ;;  %v10317_v60 = vpop.f32.mrb[76].mxu0  ;;  %v17473_v55 = vld [vmem:[#allocation68_spill] sm:$0xff] }
 0x374   : > { %3784 = vst.msk [vmem:[%s13049_s27 + $0x268] sm:$0xff] %vm1593_vm13, %v10317_v60  ;;  %v2808_v63 = vpop.f32.mrb[77].mxu0  ;;  %10988 = vmatmul.mubr.msk.f32.gmra.mrb[132].mxu0 %vm1593_vm13, %v12606_v16 }
 0x375   : > { %3783 = vst.msk [vmem:[%s13049_s27 + $0x260] sm:$0xff] %vm1593_vm13, %v2808_v63  ;;  %10990 = vmatprep.mubr.msk.f32.mxu0 %vm1593_vm13, %v12615_v12 }
 0x376   : > { %10607 = vmatmul.mubr.msk.f32.gmra.mrb[138].mxu1 %vm1593_vm13, %v12659_v61 }
 0x377   : > { %10609 = vmatprep.mubr.msk.f32.mxu1 %vm1593_vm13, %v12669_v13 }
 0x378   : > { %10991 = vmatmul.mubr.msk.f32.gmra.mrb[134].mxu0 %vm1593_vm13, %v12624_v25 }
 0x379   : > { %v10515_v0 = vpop.f32.mrb[80].mxu1  ;;  %10993 = vmatprep.mubr.msk.f32.mxu0 %vm1593_vm13, %v12633_v34 }
 0x37a   : > { %3916 = vst.msk [vmem:[%s13049_s27 + $0x688] sm:$0xff] %vm1593_vm13, %v10515_v0  ;;  %v3468_v16 = vpop.f32.mrb[81].mxu1  ;;  %10610 = vmatmul.mubr.msk.f32.gmra.mrb[140].mxu1 %vm1593_vm13, %v12679_v22  ;;  %v17474_v0 = vld [vmem:[#allocation70_spill] sm:$0xff] }
 0x37b   : > { %3915 = vst.msk [vmem:[%s13049_s27 + $0x680] sm:$0xff] %vm1593_vm13, %v3468_v16  ;;  %10612 = vmatprep.mubr.msk.f32.mxu1 %vm1593_vm13, %v12687_v20  ;;  %v10320_v12 = vpop.f32.mrb[78].mxu0 }
 0x37c   : > { %3786 = vst.msk [vmem:[%s13049_s27 + $0x278] sm:$0xff] %vm1593_vm13, %v10320_v12  ;;  %v2818_v25 = vpop.f32.mrb[79].mxu0  ;;  %10994 = vmatmul.mubr.msk.f32.gmra.mrb[136].mxu0 %vm1593_vm13, %v12641_v38 }
 0x37d   : > { %3785 = vst.msk [vmem:[%s13049_s27 + $0x270] sm:$0xff] %vm1593_vm13, %v2818_v25  ;;  %10996 = vmatprep.mubr.msk.f32.mxu0 %vm1593_vm13, %v12651_v45  ;;  %v17476_v25 = vld [vmem:[#allocation74_spill] sm:$0xff] }
 0x37e   : > { %10613 = vmatmul.mubr.msk.f32.gmra.mrb[142].mxu1 %vm1593_vm13, %v12697_v31 }
 0x37f   : > { %10615 = vmatprep.mubr.msk.f32.mxu1 %vm1593_vm13, %v12705_v36 }
 0x380   : > { %10997 = vmatmul.mubr.msk.f32.gmra.mrb[138].mxu0 %vm1593_vm13, %v12659_v61 }
 0x381   : > { %v10518_v34 = vpop.f32.mrb[82].mxu1  ;;  %10999 = vmatprep.mubr.msk.f32.mxu0 %vm1593_vm13, %v12669_v13 }
 0x382   : > { %3918 = vst.msk [vmem:[%s13049_s27 + $0x698] sm:$0xff] %vm1593_vm13, %v10518_v34  ;;  %v3478_v38 = vpop.f32.mrb[83].mxu1  ;;  %10616 = vmatmul.mubr.msk.f32.gmra.mrb[144].mxu1 %vm1593_vm13, %v12713_v37  ;;  %v17477_v34 = vld [vmem:[#allocation76_spill] sm:$0xff] }
 0x383   : > { %3917 = vst.msk [vmem:[%s13049_s27 + $0x690] sm:$0xff] %vm1593_vm13, %v3478_v38  ;;  %10618 = vmatprep.mubr.msk.f32.mxu1 %vm1593_vm13, %v12724_v42  ;;  %v10323_v45 = vpop.f32.mrb[80].mxu0 }
 0x384   : > { %3788 = vst.msk [vmem:[%s13049_s27 + $0x288] sm:$0xff] %vm1593_vm13, %v10323_v45  ;;  %v2828_v61 = vpop.f32.mrb[81].mxu0  ;;  %11000 = vmatmul.mubr.msk.f32.gmra.mrb[140].mxu0 %vm1593_vm13, %v12679_v22 }
 0x385   : > { %3787 = vst.msk [vmem:[%s13049_s27 + $0x280] sm:$0xff] %vm1593_vm13, %v2828_v61  ;;  %11002 = vmatprep.mubr.msk.f32.mxu0 %vm1593_vm13, %v12687_v20  ;;  %v17478_v61 = vld [vmem:[#allocation78_spill] sm:$0xff] }
 0x386   : > { %10619 = vmatmul.mubr.msk.f32.gmra.mrb[146].mxu1 %vm1593_vm13, %v12737_v51 }
 0x387   : > { %10621 = vmatprep.mubr.msk.f32.mxu1 %vm1593_vm13, %v12746_v43 }
 0x388   : > { %11003 = vmatmul.mubr.msk.f32.gmra.mrb[142].mxu0 %vm1593_vm13, %v12697_v31 }
 0x389   : > { %v10521_v13 = vpop.f32.mrb[84].mxu1  ;;  %11005 = vmatprep.mubr.msk.f32.mxu0 %vm1593_vm13, %v12705_v36 }
 0x38a   : > { %3920 = vst.msk [vmem:[%s13049_s27 + $0x6a8] sm:$0xff] %vm1593_vm13, %v10521_v13  ;;  %v3488_v22 = vpop.f32.mrb[85].mxu1  ;;  %10622 = vmatmul.mubr.msk.f32.gmra.mrb[148].mxu1 %vm1593_vm13, %v12761_v28  ;;  %v17479_v13 = vld [vmem:[#allocation80_spill] sm:$0xff] }
 0x38b   : > { %3919 = vst.msk [vmem:[%s13049_s27 + $0x6a0] sm:$0xff] %vm1593_vm13, %v3488_v22  ;;  %10624 = vmatprep.mubr.msk.f32.mxu1 %vm1593_vm13, %v12770_v19  ;;  %v10326_v20 = vpop.f32.mrb[82].mxu0 }
 0x38c   : > { %3790 = vst.msk [vmem:[%s13049_s27 + $0x298] sm:$0xff] %vm1593_vm13, %v10326_v20  ;;  %v2838_v31 = vpop.f32.mrb[83].mxu0  ;;  %11006 = vmatmul.mubr.msk.f32.gmra.mrb[144].mxu0 %vm1593_vm13, %v12713_v37 }
 0x38d   : > { %3789 = vst.msk [vmem:[%s13049_s27 + $0x290] sm:$0xff] %vm1593_vm13, %v2838_v31  ;;  %11008 = vmatprep.mubr.msk.f32.mxu0 %vm1593_vm13, %v12724_v42  ;;  %v17480_v31 = vld [vmem:[#allocation82_spill] sm:$0xff] }
 0x38e   : > { %10625 = vmatmul.mubr.msk.f32.gmra.mrb[150].mxu1 %vm1593_vm13, %v12779_v26 }
 0x38f   : > { %10627 = vmatprep.mubr.msk.f32.mxu1 %vm1593_vm13, %v12788_v32 }
 0x390   : > { %11009 = vmatmul.mubr.msk.f32.gmra.mrb[146].mxu0 %vm1593_vm13, %v12737_v51 }
 0x391   : > { %v10524_v36 = vpop.f32.mrb[86].mxu1  ;;  %11011 = vmatprep.mubr.msk.f32.mxu0 %vm1593_vm13, %v12746_v43 }
 0x392   : > { %3922 = vst.msk [vmem:[%s13049_s27 + $0x6b8] sm:$0xff] %vm1593_vm13, %v10524_v36  ;;  %v3498_v37 = vpop.f32.mrb[87].mxu1  ;;  %10628 = vmatmul.mubr.msk.f32.gmra.mrb[152].mxu1 %vm1593_vm13, %v12796_v14  ;;  %v17481_v36 = vld [vmem:[#allocation84_spill] sm:$0xff] }
 0x393   : > { %3921 = vst.msk [vmem:[%s13049_s27 + $0x6b0] sm:$0xff] %vm1593_vm13, %v3498_v37  ;;  %10630 = vmatprep.mubr.msk.f32.mxu1 %vm1593_vm13, %v12806_v15  ;;  %v10329_v42 = vpop.f32.mrb[84].mxu0 }
 0x394   : > { %3792 = vst.msk [vmem:[%s13049_s27 + $0x2a8] sm:$0xff] %vm1593_vm13, %v10329_v42  ;;  %v2848_v51 = vpop.f32.mrb[85].mxu0  ;;  %11012 = vmatmul.mubr.msk.f32.gmra.mrb[148].mxu0 %vm1593_vm13, %v12761_v28 }
 0x395   : > { %3791 = vst.msk [vmem:[%s13049_s27 + $0x2a0] sm:$0xff] %vm1593_vm13, %v2848_v51  ;;  %11014 = vmatprep.mubr.msk.f32.mxu0 %vm1593_vm13, %v12770_v19  ;;  %v17482_v51 = vld [vmem:[#allocation86_spill] sm:$0xff] }
 0x396   : > { %10631 = vmatmul.mubr.msk.f32.gmra.mrb[154].mxu1 %vm1593_vm13, %v12814_v5 }
 0x397   : > { %10633 = vmatprep.mubr.msk.f32.mxu1 %vm1593_vm13, %v12824_v48 }
 0x398   : > { %11015 = vmatmul.mubr.msk.f32.gmra.mrb[150].mxu0 %vm1593_vm13, %v12779_v26 }
 0x399   : > { %v10527_v43 = vpop.f32.mrb[88].mxu1  ;;  %11017 = vmatprep.mubr.msk.f32.mxu0 %vm1593_vm13, %v12788_v32 }
 0x39a   : > { %3924 = vst.msk [vmem:[%s13049_s27 + $0x6c8] sm:$0xff] %vm1593_vm13, %v10527_v43  ;;  %v3508_v28 = vpop.f32.mrb[89].mxu1  ;;  %10634 = vmatmul.mubr.msk.f32.gmra.mrb[156].mxu1 %vm1593_vm13, %v12834_v4 }
 0x39b   : > { %3923 = vst.msk [vmem:[%s13049_s27 + $0x6c0] sm:$0xff] %vm1593_vm13, %v3508_v28  ;;  %10636 = vmatprep.mubr.msk.f32.mxu1 %vm1593_vm13, %v12842_v49  ;;  %v10332_v19 = vpop.f32.mrb[86].mxu0 }
 0x39c   : > { %3794 = vst.msk [vmem:[%s13049_s27 + $0x2b8] sm:$0xff] %vm1593_vm13, %v10332_v19  ;;  %v2858_v26 = vpop.f32.mrb[87].mxu0  ;;  %11018 = vmatmul.mubr.msk.f32.gmra.mrb[152].mxu0 %vm1593_vm13, %v12796_v14  ;;  %v17483_v19 = vld [vmem:[#allocation89_spill] sm:$0xff] }
 0x39d   : > { %3793 = vst.msk [vmem:[%s13049_s27 + $0x2b0] sm:$0xff] %vm1593_vm13, %v2858_v26  ;;  %11020 = vmatprep.mubr.msk.f32.mxu0 %vm1593_vm13, %v12806_v15  ;;  %v17484_v26 = vld [vmem:[#allocation91_spill] sm:$0xff] }
 0x39e   : > { %10637 = vmatmul.mubr.msk.f32.gmra.mrb[158].mxu1 %vm1593_vm13, %v12852_v56 }
 0x39f   : > { %10639 = vmatprep.mubr.msk.f32.mxu1 %vm1593_vm13, %v12860_v30 }
 0x3a0   : > { %11021 = vmatmul.mubr.msk.f32.gmra.mrb[154].mxu0 %vm1593_vm13, %v12814_v5 }
 0x3a1   : > { %v10530_v32 = vpop.f32.mrb[90].mxu1  ;;  %11023 = vmatprep.mubr.msk.f32.mxu0 %vm1593_vm13, %v12824_v48 }
 0x3a2   : > { %3926 = vst.msk [vmem:[%s13049_s27 + $0x6d8] sm:$0xff] %vm1593_vm13, %v10530_v32  ;;  %v3518_v14 = vpop.f32.mrb[91].mxu1  ;;  %10640 = vmatmul.mubr.msk.f32.gmra.mrb[160].mxu1 %vm1593_vm13, %v12868_v9 }
 0x3a3   : > { %3925 = vst.msk [vmem:[%s13049_s27 + $0x6d0] sm:$0xff] %vm1593_vm13, %v3518_v14  ;;  %10642 = vmatprep.mubr.msk.f32.mxu1 %vm1593_vm13, %v12879_v6  ;;  %v10335_v15 = vpop.f32.mrb[88].mxu0 }
 0x3a4   : > { %3796 = vst.msk [vmem:[%s13049_s27 + $0x2c8] sm:$0xff] %vm1593_vm13, %v10335_v15  ;;  %v2868_v5 = vpop.f32.mrb[89].mxu0  ;;  %11024 = vmatmul.mubr.msk.f32.gmra.mrb[156].mxu0 %vm1593_vm13, %v12834_v4  ;;  %v17485_v15 = vld [vmem:[#allocation93_spill] sm:$0xff] }
 0x3a5   : > { %3795 = vst.msk [vmem:[%s13049_s27 + $0x2c0] sm:$0xff] %vm1593_vm13, %v2868_v5  ;;  %11026 = vmatprep.mubr.msk.f32.mxu0 %vm1593_vm13, %v12842_v49 }
 0x3a6   : > { %10643 = vmatmul.mubr.msk.f32.gmra.mrb[162].mxu1 %vm1593_vm13, %v12889_v40 }
 0x3a7   : > { %10645 = vmatprep.mubr.msk.f32.mxu1 %vm1593_vm13, %v12898_v27 }
 0x3a8   : > { %11027 = vmatmul.mubr.msk.f32.gmra.mrb[158].mxu0 %vm1593_vm13, %v12852_v56 }
 0x3a9   : > { %v10533_v48 = vpop.f32.mrb[92].mxu1  ;;  %11029 = vmatprep.mubr.msk.f32.mxu0 %vm1593_vm13, %v12860_v30  ;;  %v17468_v30 = vld [vmem:[#allocation58_spill] sm:$0xff] }
 0x3aa   : > { %3928 = vst.msk [vmem:[%s13049_s27 + $0x6e8] sm:$0xff] %vm1593_vm13, %v10533_v48  ;;  %v3528_v4 = vpop.f32.mrb[93].mxu1  ;;  %10646 = vmatmul.mubr.msk.f32.gmra.mrb[164].mxu1 %vm1593_vm13, %v17467_v18 }
 0x3ab   : > { %3927 = vst.msk [vmem:[%s13049_s27 + $0x6e0] sm:$0xff] %vm1593_vm13, %v3528_v4  ;;  %10648 = vmatprep.mubr.msk.f32.mxu1 %vm1593_vm13, %v12919_v58  ;;  %v10338_v49 = vpop.f32.mrb[90].mxu0  ;;  %v17486_v4 = vld [vmem:[#allocation97_spill] sm:$0xff] }
 0x3ac   : > { %3798 = vst.msk [vmem:[%s13049_s27 + $0x2d8] sm:$0xff] %vm1593_vm13, %v10338_v49  ;;  %v2878_v56 = vpop.f32.mrb[91].mxu0  ;;  %11030 = vmatmul.mubr.msk.f32.gmra.mrb[160].mxu0 %vm1593_vm13, %v12868_v9 }
 0x3ad   : > { %3797 = vst.msk [vmem:[%s13049_s27 + $0x2d0] sm:$0xff] %vm1593_vm13, %v2878_v56  ;;  %11032 = vmatprep.mubr.msk.f32.mxu0 %vm1593_vm13, %v12879_v6  ;;  %v17471_v6 = vld [vmem:[#allocation64_spill] sm:$0xff]  ;;  %v17487_v56 = vld [vmem:[#allocation99_spill] sm:$0xff] }
 0x3ae   : > { %10649 = vmatmul.mubr.msk.f32.gmra.mrb[166].mxu1 %vm1593_vm13, %v17468_v30 }
 0x3af   : > { %10651 = vmatprep.mubr.msk.f32.mxu1 %vm1593_vm13, %v17469_v39 }
 0x3b0   : > { %11033 = vmatmul.mubr.msk.f32.gmra.mrb[162].mxu0 %vm1593_vm13, %v12889_v40 }
 0x3b1   : > { %v10536_v17 = vpop.f32.mrb[94].mxu1  ;;  %11035 = vmatprep.mubr.msk.f32.mxu0 %vm1593_vm13, %v12898_v27  ;;  %v17472_v27 = vld [vmem:[#allocation66_spill] sm:$0xff] }
 0x3b2   : > { %3930 = vst.msk [vmem:[%s13049_s27 + $0x6f8] sm:$0xff] %vm1593_vm13, %v10536_v17  ;;  %v3538_v9 = vpop.f32.mrb[95].mxu1  ;;  %10652 = vmatmul.mubr.msk.f32.gmra.mrb[168].mxu1 %vm1593_vm13, %v17470_v50  ;;  %v17489_v17 = vld [vmem:[#allocation103_spill] sm:$0xff] }
 0x3b3   : > { %3929 = vst.msk [vmem:[%s13049_s27 + $0x6f0] sm:$0xff] %vm1593_vm13, %v3538_v9  ;;  %10654 = vmatprep.mubr.msk.f32.mxu1 %vm1593_vm13, %v17471_v6  ;;  %v10341_v53 = vpop.f32.mrb[92].mxu0  ;;  %v17490_v9 = vld [vmem:[#allocation105_spill] sm:$0xff] }
 0x3b4   : > { %3800 = vst.msk [vmem:[%s13049_s27 + $0x2e8] sm:$0xff] %vm1593_vm13, %v10341_v53  ;;  %v2888_v40 = vpop.f32.mrb[93].mxu0  ;;  %11036 = vmatmul.mubr.msk.f32.gmra.mrb[164].mxu0 %vm1593_vm13, %v17467_v18  ;;  %v17491_v53 = vld [vmem:[#allocation107_spill] sm:$0xff] }
 0x3b5   : > { %3799 = vst.msk [vmem:[%s13049_s27 + $0x2e0] sm:$0xff] %vm1593_vm13, %v2888_v40  ;;  %11038 = vmatprep.mubr.msk.f32.mxu0 %vm1593_vm13, %v12919_v58  ;;  %v17475_v58 = vld [vmem:[#allocation72_spill] sm:$0xff] }
 0x3b6   : > { %10655 = vmatmul.mubr.msk.f32.gmra.mrb[170].mxu1 %vm1593_vm13, %v17472_v27 }
 0x3b7   : > { %10657 = vmatprep.mubr.msk.f32.mxu1 %vm1593_vm13, %v17473_v55 }
 0x3b8   : > { %11039 = vmatmul.mubr.msk.f32.gmra.mrb[166].mxu0 %vm1593_vm13, %v17468_v30 }
 0x3b9   : > { %v10539_v60 = vpop.f32.mrb[96].mxu1  ;;  %11041 = vmatprep.mubr.msk.f32.mxu0 %vm1593_vm13, %v17469_v39 }
 0x3ba   : > { %3932 = vst.msk [vmem:[%s13049_s27 + $0x708] sm:$0xff] %vm1593_vm13, %v10539_v60  ;;  %v3548_v63 = vpop.f32.mrb[97].mxu1  ;;  %10658 = vmatmul.mubr.msk.f32.gmra.mrb[172].mxu1 %vm1593_vm13, %v17474_v0 }
 0x3bb   : > { %3931 = vst.msk [vmem:[%s13049_s27 + $0x700] sm:$0xff] %vm1593_vm13, %v3548_v63  ;;  %10660 = vmatprep.mubr.msk.f32.mxu1 %vm1593_vm13, %v17475_v58  ;;  %v10344_v16 = vpop.f32.mrb[94].mxu0 }
 0x3bc   : > { %3802 = vst.msk [vmem:[%s13049_s27 + $0x2f8] sm:$0xff] %vm1593_vm13, %v10344_v16  ;;  %v2898_v12 = vpop.f32.mrb[95].mxu0  ;;  %11042 = vmatmul.mubr.msk.f32.gmra.mrb[168].mxu0 %vm1593_vm13, %v17470_v50 }
 0x3bd   : > { %3801 = vst.msk [vmem:[%s13049_s27 + $0x2f0] sm:$0xff] %vm1593_vm13, %v2898_v12  ;;  %11044 = vmatprep.mubr.msk.f32.mxu0 %vm1593_vm13, %v17471_v6 }
 0x3be   : > { %10661 = vmatmul.mubr.msk.f32.gmra.mrb[174].mxu1 %vm1593_vm13, %v17476_v25 }
 0x3bf   : > { %10663 = vmatprep.mubr.msk.f32.mxu1 %vm1593_vm13, %v17477_v34 }
 0x3c0   : > { %11045 = vmatmul.mubr.msk.f32.gmra.mrb[170].mxu0 %vm1593_vm13, %v17472_v27  ;;  %v17493_v27 = vld [vmem:[#allocation111_spill] sm:$0xff] }
 0x3c1   : > { %v10542_v38 = vpop.f32.mrb[98].mxu1  ;;  %11047 = vmatprep.mubr.msk.f32.mxu0 %vm1593_vm13, %v17473_v55  ;;  %v17494_v55 = vld [vmem:[#allocation113_spill] sm:$0xff] }
 0x3c2   : > { %3934 = vst.msk [vmem:[%s13049_s27 + $0x718] sm:$0xff] %vm1593_vm13, %v10542_v38  ;;  %v3558_v45 = vpop.f32.mrb[99].mxu1  ;;  %10664 = vmatmul.mubr.msk.f32.gmra.mrb[176].mxu1 %vm1593_vm13, %v17478_v61 }
 0x3c3   : > { %3933 = vst.msk [vmem:[%s13049_s27 + $0x710] sm:$0xff] %vm1593_vm13, %v3558_v45  ;;  %10666 = vmatprep.mubr.msk.f32.mxu1 %vm1593_vm13, %v17479_v13  ;;  %v10347_v22 = vpop.f32.mrb[96].mxu0 }
 0x3c4   : > { %3804 = vst.msk [vmem:[%s13049_s27 + $0x308] sm:$0xff] %vm1593_vm13, %v10347_v22  ;;  %v2908_v20 = vpop.f32.mrb[97].mxu0  ;;  %11048 = vmatmul.mubr.msk.f32.gmra.mrb[172].mxu0 %vm1593_vm13, %v17474_v0  ;;  %v17495_v0 = vld [vmem:[#allocation115_spill] sm:$0xff]  ;;  %v17498_v22 = vld [vmem:[#allocation137_spill] sm:$0xff] }
 0x3c5   : > { %3803 = vst.msk [vmem:[%s13049_s27 + $0x300] sm:$0xff] %vm1593_vm13, %v2908_v20  ;;  %11050 = vmatprep.mubr.msk.f32.mxu0 %vm1593_vm13, %v17475_v58 }
 0x3c6   : > { %10667 = vmatmul.mubr.msk.f32.gmra.mrb[178].mxu1 %vm1593_vm13, %v17480_v31 }
 0x3c7   : > { %10669 = vmatprep.mubr.msk.f32.mxu1 %vm1593_vm13, %v17481_v36 }
 0x3c8   : > { %11051 = vmatmul.mubr.msk.f32.gmra.mrb[174].mxu0 %vm1593_vm13, %v17476_v25 }
 0x3c9   : > { %v10545_v37 = vpop.f32.mrb[100].mxu1  ;;  %11053 = vmatprep.mubr.msk.f32.mxu0 %vm1593_vm13, %v17477_v34 }
 0x3ca   : > { %3936 = vst.msk [vmem:[%s13049_s27 + $0x728] sm:$0xff] %vm1593_vm13, %v10545_v37  ;;  %v3568_v42 = vpop.f32.mrb[101].mxu1  ;;  %10670 = vmatmul.mubr.msk.f32.gmra.mrb[180].mxu1 %vm1593_vm13, %v17482_v51  ;;  %v17502_v37 = vld [vmem:[#allocation145_spill] sm:$0xff] }
 0x3cb   : > { %3935 = vst.msk [vmem:[%s13049_s27 + $0x720] sm:$0xff] %vm1593_vm13, %v3568_v42  ;;  %10672 = vmatprep.mubr.msk.f32.mxu1 %vm1593_vm13, %v13082_v7  ;;  %v10350_v43 = vpop.f32.mrb[98].mxu0 }
 0x3cc   : > { %3806 = vst.msk [vmem:[%s13049_s27 + $0x318] sm:$0xff] %vm1593_vm13, %v10350_v43  ;;  %v2918_v28 = vpop.f32.mrb[99].mxu0  ;;  %11054 = vmatmul.mubr.msk.f32.gmra.mrb[176].mxu0 %vm1593_vm13, %v17478_v61  ;;  %v17504_v43 = vld [vmem:[#allocation149_spill] sm:$0xff] }
 0x3cd   : > { %3805 = vst.msk [vmem:[%s13049_s27 + $0x310] sm:$0xff] %vm1593_vm13, %v2918_v28  ;;  %11056 = vmatprep.mubr.msk.f32.mxu0 %vm1593_vm13, %v17479_v13 }
 0x3ce   : > { %10673 = vmatmul.mubr.msk.f32.gmra.mrb[182].mxu1 %vm1593_vm13, %v17483_v19 }
 0x3cf   : > { %10675 = vmatprep.mubr.msk.f32.mxu1 %vm1593_vm13, %v17484_v26 }
 0x3d0   : > { %11057 = vmatmul.mubr.msk.f32.gmra.mrb[178].mxu0 %vm1593_vm13, %v17480_v31  ;;  %v17499_v31 = vld [vmem:[#allocation139_spill] sm:$0xff] }
 0x3d1   : > { %v10548_v32 = vpop.f32.mrb[102].mxu1  ;;  %11059 = vmatprep.mubr.msk.f32.mxu0 %vm1593_vm13, %v17481_v36 }
 0x3d2   : > { %3938 = vst.msk [vmem:[%s13049_s27 + $0x738] sm:$0xff] %vm1593_vm13, %v10548_v32  ;;  %v3578_v14 = vpop.f32.mrb[103].mxu1  ;;  %10676 = vmatmul.mubr.msk.f32.gmra.mrb[184].mxu1 %vm1593_vm13, %v17485_v15  ;;  %v17506_v32 = vld [vmem:[#allocation153_spill] sm:$0xff] }
 0x3d3   : > { %3937 = vst.msk [vmem:[%s13049_s27 + $0x730] sm:$0xff] %vm1593_vm13, %v3578_v14  ;;  %10678 = vmatprep.mubr.msk.f32.mxu1 %vm1593_vm13, %v13134_v2  ;;  %v10353_v5 = vpop.f32.mrb[100].mxu0 }
 0x3d4   : > { %3808 = vst.msk [vmem:[%s13049_s27 + $0x328] sm:$0xff] %vm1593_vm13, %v10353_v5  ;;  %v2928_v48 = vpop.f32.mrb[101].mxu0  ;;  %11060 = vmatmul.mubr.msk.f32.gmra.mrb[180].mxu0 %vm1593_vm13, %v17482_v51  ;;  %v17503_v51 = vld [vmem:[#allocation147_spill] sm:$0xff] }
 0x3d5   : > { %3807 = vst.msk [vmem:[%s13049_s27 + $0x320] sm:$0xff] %vm1593_vm13, %v2928_v48  ;;  %11062 = vmatprep.mubr.msk.f32.mxu0 %vm1593_vm13, %v13082_v7  ;;  %v17488_v7 = vld [vmem:[#allocation101_spill] sm:$0xff]  ;;  %v17507_v5 = vld [vmem:[#allocation155_spill] sm:$0xff] }
 0x3d6   : > { %10679 = vmatmul.mubr.msk.f32.gmra.mrb[186].mxu1 %vm1593_vm13, %v13146_v62  ;;  %v17508_v48 = vld [vmem:[#allocation157_spill] sm:$0xff] }
 0x3d7   : > { %10681 = vmatprep.mubr.msk.f32.mxu1 %vm1593_vm13, %v17486_v4 }
 0x3d8   : > { %11063 = vmatmul.mubr.msk.f32.gmra.mrb[182].mxu0 %vm1593_vm13, %v17483_v19 }
 0x3d9   : > { %v10551_v18 = vpop.f32.mrb[104].mxu1  ;;  %11065 = vmatprep.mubr.msk.f32.mxu0 %vm1593_vm13, %v17484_v26  ;;  %v17505_v26 = vld [vmem:[#allocation151_spill] sm:$0xff] }
 0x3da   : > { %3940 = vst.msk [vmem:[%s13049_s27 + $0x748] sm:$0xff] %vm1593_vm13, %v10551_v18  ;;  %v3588_v49 = vpop.f32.mrb[105].mxu1  ;;  %10682 = vmatmul.mubr.msk.f32.gmra.mrb[188].mxu1 %vm1593_vm13, %v17487_v56 }
 0x3db   : > { %3939 = vst.msk [vmem:[%s13049_s27 + $0x740] sm:$0xff] %vm1593_vm13, %v3588_v49  ;;  %10684 = vmatprep.mubr.msk.f32.mxu1 %vm1593_vm13, %v17488_v7  ;;  %v10356_v30 = vpop.f32.mrb[102].mxu0  ;;  %v17509_v49 = vld [vmem:[#allocation159_spill] sm:$0xff] }
 0x3dc   : > { %3810 = vst.msk [vmem:[%s13049_s27 + $0x338] sm:$0xff] %vm1593_vm13, %v10356_v30  ;;  %v2938_v39 = vpop.f32.mrb[103].mxu0  ;;  %11066 = vmatmul.mubr.msk.f32.gmra.mrb[184].mxu0 %vm1593_vm13, %v17485_v15 }
 0x3dd   : > { %3809 = vst.msk [vmem:[%s13049_s27 + $0x330] sm:$0xff] %vm1593_vm13, %v2938_v39  ;;  %11068 = vmatprep.mubr.msk.f32.mxu0 %vm1593_vm13, %v13134_v2  ;;  %v17492_v2 = vld [vmem:[#allocation109_spill] sm:$0xff]  ;;  %v17511_v39 = vld [vmem:[#allocation163_spill] sm:$0xff] }
 0x3de   : > { %10685 = vmatmul.mubr.msk.f32.gmra.mrb[190].mxu1 %vm1593_vm13, %v17489_v17 }
 0x3df   : > { %10687 = vmatprep.mubr.msk.f32.mxu1 %vm1593_vm13, %v17490_v9 }
 0x3e0   : > { %11069 = vmatmul.mubr.msk.f32.gmra.mrb[186].mxu0 %vm1593_vm13, %v13146_v62 }
 0x3e1   : > { %v10554_v50 = vpop.f32.mrb[106].mxu1  ;;  %11071 = vmatprep.mubr.msk.f32.mxu0 %vm1593_vm13, %v17486_v4 }
 0x3e2   : > { %3942 = vst.msk [vmem:[%s13049_s27 + $0x758] sm:$0xff] %vm1593_vm13, %v10554_v50  ;;  %v3598_v6 = vpop.f32.mrb[107].mxu1  ;;  %10688 = vmatmul.mubr.msk.f32.gmra.mrb[192].mxu1 %vm1593_vm13, %v17491_v53 }
 0x3e3   : > { %3941 = vst.msk [vmem:[%s13049_s27 + $0x750] sm:$0xff] %vm1593_vm13, %v3598_v6  ;;  %10690 = vmatprep.mubr.msk.f32.mxu1 %vm1593_vm13, %v17492_v2  ;;  %v10359_v40 = vpop.f32.mrb[104].mxu0  ;;  %v17513_v6 = vld [vmem:[#allocation167_spill] sm:$0xff] }
 0x3e4   : > { %3812 = vst.msk [vmem:[%s13049_s27 + $0x348] sm:$0xff] %vm1593_vm13, %v10359_v40  ;;  %v2948_v62 = vpop.f32.mrb[105].mxu0  ;;  %11072 = vmatmul.mubr.msk.f32.gmra.mrb[188].mxu0 %vm1593_vm13, %v17487_v56  ;;  %v17510_v56 = vld [vmem:[#allocation161_spill] sm:$0xff] }
 0x3e5   : > { %3811 = vst.msk [vmem:[%s13049_s27 + $0x340] sm:$0xff] %vm1593_vm13, %v2948_v62  ;;  %11074 = vmatprep.mubr.msk.f32.mxu0 %vm1593_vm13, %v17488_v7  ;;  %v17515_v62 = vld [vmem:[#allocation171_spill] sm:$0xff] }
 0x3e6   : > { %10691 = vmatmul.mubr.msk.f32.gmra.mrb[194].mxu1 %vm1593_vm13, %v17493_v27 }
 0x3e7   : > { %10693 = vmatprep.mubr.msk.f32.mxu1 %vm1593_vm13, %v17494_v55 }
 0x3e8   : > { %11075 = vmatmul.mubr.msk.f32.gmra.mrb[190].mxu0 %vm1593_vm13, %v17489_v17  ;;  %v17512_v17 = vld [vmem:[#allocation165_spill] sm:$0xff] }
 0x3e9   : > { %v10557_v60 = vpop.f32.mrb[108].mxu1  ;;  %11077 = vmatprep.mubr.msk.f32.mxu0 %vm1593_vm13, %v17490_v9 }
 0x3ea   : > { %3944 = vst.msk [vmem:[%s13049_s27 + $0x768] sm:$0xff] %vm1593_vm13, %v10557_v60  ;;  %v3608_v63 = vpop.f32.mrb[109].mxu1  ;;  %10694 = vmatmul.mubr.msk.f32.gmra.mrb[196].mxu1 %vm1593_vm13, %v17495_v0 }
 0x3eb   : > { %3943 = vst.msk [vmem:[%s13049_s27 + $0x760] sm:$0xff] %vm1593_vm13, %v3608_v63  ;;  %10696 = vmatprep.mubr.msk.f32.mxu1 %vm1593_vm13, %v13295_v1  ;;  %v10362_v58 = vpop.f32.mrb[106].mxu0 }
 0x3ec   : > { %3814 = vst.msk [vmem:[%s13049_s27 + $0x358] sm:$0xff] %vm1593_vm13, %v10362_v58  ;;  %v2958_v16 = vpop.f32.mrb[107].mxu0  ;;  %11078 = vmatmul.mubr.msk.f32.gmra.mrb[192].mxu0 %vm1593_vm13, %v17491_v53  ;;  %v17514_v53 = vld [vmem:[#allocation169_spill] sm:$0xff]  ;;  %v17517_v58 = vld [vmem:[#allocation175_spill] sm:$0xff] }
 0x3ed   : > { %3813 = vst.msk [vmem:[%s13049_s27 + $0x350] sm:$0xff] %vm1593_vm13, %v2958_v16  ;;  %11080 = vmatprep.mubr.msk.f32.mxu0 %vm1593_vm13, %v17492_v2  ;;  %v17518_v16 = vld [vmem:[#allocation177_spill] sm:$0xff] }
 0x3ee   : > { %10697 = vmatmul.mubr.msk.f32.gmra.mrb[198].mxu1 %vm1593_vm13, %v13308_v3 }
 0x3ef   : > { %10699 = vmatprep.mubr.msk.f32.mxu1 %vm1593_vm13, %v13321_v21 }
 0x3f0   : > { %11081 = vmatmul.mubr.msk.f32.gmra.mrb[194].mxu0 %vm1593_vm13, %v17493_v27  ;;  %v17516_v27 = vld [vmem:[#allocation173_spill] sm:$0xff] }
 0x3f1   : > { %v10560_v12 = vpop.f32.mrb[110].mxu1  ;;  %11083 = vmatprep.mubr.msk.f32.mxu0 %vm1593_vm13, %v17494_v55 }
 0x3f2   : > { %3946 = vst.msk [vmem:[%s13049_s27 + $0x778] sm:$0xff] %vm1593_vm13, %v10560_v12  ;;  %v3618_v25 = vpop.f32.mrb[111].mxu1  ;;  %10700 = vmatmul.mubr.msk.f32.gmra.mrb[200].mxu1 %vm1593_vm13, %v13333_v46 }
 0x3f3   : > { %3945 = vst.msk [vmem:[%s13049_s27 + $0x770] sm:$0xff] %vm1593_vm13, %v3618_v25  ;;  %10702 = vmatprep.mubr.msk.f32.mxu1 %vm1593_vm13, %v13347_v35  ;;  %v10365_v34 = vpop.f32.mrb[108].mxu0 }
 0x3f4   : > { %3816 = vst.msk [vmem:[%s13049_s27 + $0x368] sm:$0xff] %vm1593_vm13, %v10365_v34  ;;  %v2968_v38 = vpop.f32.mrb[109].mxu0  ;;  %11084 = vmatmul.mubr.msk.f32.gmra.mrb[196].mxu0 %vm1593_vm13, %v17495_v0  ;;  %v17519_v34 = vld [vmem:[#allocation179_spill] sm:$0xff] }
 0x3f5   : > { %3815 = vst.msk [vmem:[%s13049_s27 + $0x360] sm:$0xff] %vm1593_vm13, %v2968_v38  ;;  %11086 = vmatprep.mubr.msk.f32.mxu0 %vm1593_vm13, %v13295_v1  ;;  %v17520_v38 = vld [vmem:[#allocation181_spill] sm:$0xff] }
 0x3f6   : > { %10703 = vmatmul.mubr.msk.f32.gmra.mrb[202].mxu1 %vm1593_vm13, %v13359_v23 }
 0x3f7   : > { %10705 = vmatprep.mubr.msk.f32.mxu1 %vm1593_vm13, %v13373_v44 }
 0x3f8   : > { %11087 = vmatmul.mubr.msk.f32.gmra.mrb[198].mxu0 %vm1593_vm13, %v13308_v3 }
 0x3f9   : > { %v10563_v45 = vpop.f32.mrb[112].mxu1  ;;  %11089 = vmatprep.mubr.msk.f32.mxu0 %vm1593_vm13, %v13321_v21 }
 0x3fa   : > { %3948 = vst.msk [vmem:[%s13049_s27 + $0x788] sm:$0xff] %vm1593_vm13, %v10563_v45  ;;  %v3628_v61 = vpop.f32.mrb[113].mxu1  ;;  %10706 = vmatmul.mubr.msk.f32.gmra.mrb[204].mxu1 %vm1593_vm13, %v13387_v33 }
 0x3fb   : > { %3947 = vst.msk [vmem:[%s13049_s27 + $0x780] sm:$0xff] %vm1593_vm13, %v3628_v61  ;;  %10708 = vmatprep.mubr.msk.f32.mxu1 %vm1593_vm13, %v13399_v41  ;;  %v10368_v1 = vpop.f32.mrb[110].mxu0 }
 0x3fc   : > { %3818 = vst.msk [vmem:[%s13049_s27 + $0x378] sm:$0xff] %vm1593_vm13, %v10368_v1  ;;  %v2978_v3 = vpop.f32.mrb[111].mxu0  ;;  %11090 = vmatmul.mubr.msk.f32.gmra.mrb[200].mxu0 %vm1593_vm13, %v13333_v46 }
 0x3fd   : > { %3817 = vst.msk [vmem:[%s13049_s27 + $0x370] sm:$0xff] %vm1593_vm13, %v2978_v3  ;;  %11092 = vmatprep.mubr.msk.f32.mxu0 %vm1593_vm13, %v13347_v35 }
 0x3fe   : > { %10709 = vmatmul.mubr.msk.f32.gmra.mrb[206].mxu1 %vm1593_vm13, %v13413_v10 }
 0x3ff   : > { %10711 = vmatprep.mubr.msk.f32.mxu1 %vm1593_vm13, %v13425_v29 }
 0x400   : > { %11093 = vmatmul.mubr.msk.f32.gmra.mrb[202].mxu0 %vm1593_vm13, %v13359_v23 }
 0x401   : > { %v10566_v21 = vpop.f32.mrb[114].mxu1  ;;  %11095 = vmatprep.mubr.msk.f32.mxu0 %vm1593_vm13, %v13373_v44 }
 0x402   : > { %3950 = vst.msk [vmem:[%s13049_s27 + $0x798] sm:$0xff] %vm1593_vm13, %v10566_v21  ;;  %v3638_v46 = vpop.f32.mrb[115].mxu1  ;;  %10712 = vmatmul.mubr.msk.f32.gmra.mrb[208].mxu1 %vm1593_vm13, %v13437_v11  ;;  %v17521_v21 = vld [vmem:[#allocation183_spill] sm:$0xff] }
 0x403   : > { %3949 = vst.msk [vmem:[%s13049_s27 + $0x790] sm:$0xff] %vm1593_vm13, %v3638_v46  ;;  %10714 = vmatprep.mubr.msk.f32.mxu1 %vm1593_vm13, %v13449_v47  ;;  %v10371_v35 = vpop.f32.mrb[112].mxu0  ;;  %v17522_v46 = vld [vmem:[#allocation185_spill] sm:$0xff] }
 0x404   : > { %3820 = vst.msk [vmem:[%s13049_s27 + $0x388] sm:$0xff] %vm1593_vm13, %v10371_v35  ;;  %v2988_v23 = vpop.f32.mrb[113].mxu0  ;;  %11096 = vmatmul.mubr.msk.f32.gmra.mrb[204].mxu0 %vm1593_vm13, %v13387_v33 }
 0x405   : > { %3819 = vst.msk [vmem:[%s13049_s27 + $0x380] sm:$0xff] %vm1593_vm13, %v2988_v23  ;;  %11098 = vmatprep.mubr.msk.f32.mxu0 %vm1593_vm13, %v13399_v41  ;;  %v17496_v41 = vld [vmem:[#allocation133_spill] sm:$0xff] }
 0x406   : > { %10715 = vmatmul.mubr.msk.f32.gmra.mrb[210].mxu1 %vm1593_vm13, %v13461_v54 }
 0x407   : > { %10717 = vmatprep.mubr.msk.f32.mxu1 %vm1593_vm13, %v13473_v57 }
 0x408   : > { %11099 = vmatmul.mubr.msk.f32.gmra.mrb[206].mxu0 %vm1593_vm13, %v13413_v10 }
 0x409   : > { %v10569_v44 = vpop.f32.mrb[116].mxu1  ;;  %11101 = vmatprep.mubr.msk.f32.mxu0 %vm1593_vm13, %v13425_v29  ;;  %v17497_v29 = vld [vmem:[#allocation135_spill] sm:$0xff] }
 0x40a   : > { %3952 = vst.msk [vmem:[%s13049_s27 + $0x7a8] sm:$0xff] %vm1593_vm13, %v10569_v44  ;;  %v3648_v33 = vpop.f32.mrb[117].mxu1  ;;  %10718 = vmatmul.mubr.msk.f32.gmra.mrb[212].mxu1 %vm1593_vm13, %v13485_v52 }
 0x40b   : > { %3951 = vst.msk [vmem:[%s13049_s27 + $0x7a0] sm:$0xff] %vm1593_vm13, %v3648_v33  ;;  %10720 = vmatprep.mubr.msk.f32.mxu1 %vm1593_vm13, %v17496_v41  ;;  %v10374_v13 = vpop.f32.mrb[114].mxu0 }
 0x40c   : > { %3822 = vst.msk [vmem:[%s13049_s27 + $0x398] sm:$0xff] %vm1593_vm13, %v10374_v13  ;;  %v2998_v10 = vpop.f32.mrb[115].mxu0  ;;  %11102 = vmatmul.mubr.msk.f32.gmra.mrb[208].mxu0 %vm1593_vm13, %v13437_v11  ;;  %v17524_v13 = vld [vmem:[#allocation189_spill] sm:$0xff] }
 0x40d   : > { %3821 = vst.msk [vmem:[%s13049_s27 + $0x390] sm:$0xff] %vm1593_vm13, %v2998_v10  ;;  %11104 = vmatprep.mubr.msk.f32.mxu0 %vm1593_vm13, %v13449_v47  ;;  %v17500_v47 = vld [vmem:[#allocation141_spill] sm:$0xff] }
 0x40e   : > { %10721 = vmatmul.mubr.msk.f32.gmra.mrb[214].mxu1 %vm1593_vm13, %v17497_v29 }
 0x40f   : > { %10723 = vmatprep.mubr.msk.f32.mxu1 %vm1593_vm13, %v17498_v22 }
 0x410   : > { %11105 = vmatmul.mubr.msk.f32.gmra.mrb[210].mxu0 %vm1593_vm13, %v13461_v54 }
 0x411   : > { %v10572_v20 = vpop.f32.mrb[118].mxu1  ;;  %11107 = vmatprep.mubr.msk.f32.mxu0 %vm1593_vm13, %v13473_v57  ;;  %v17501_v57 = vld [vmem:[#allocation143_spill] sm:$0xff] }
 0x412   : > { %3954 = vst.msk [vmem:[%s13049_s27 + $0x7b8] sm:$0xff] %vm1593_vm13, %v10572_v20  ;;  %v3658_v11 = vpop.f32.mrb[119].mxu1  ;;  %10724 = vmatmul.mubr.msk.f32.gmra.mrb[216].mxu1 %vm1593_vm13, %v17499_v31 }
 0x413   : > { %3953 = vst.msk [vmem:[%s13049_s27 + $0x7b0] sm:$0xff] %vm1593_vm13, %v3658_v11  ;;  %10726 = vmatprep.mubr.msk.f32.mxu1 %vm1593_vm13, %v17500_v47  ;;  %v10377_v36 = vpop.f32.mrb[116].mxu0  ;;  %v17525_v11 = vld [vmem:[#allocation191_spill] sm:$0xff] }
 0x414   : > { %3824 = vst.msk [vmem:[%s13049_s27 + $0x3a8] sm:$0xff] %vm1593_vm13, %v10377_v36  ;;  %v3008_v54 = vpop.f32.mrb[117].mxu0  ;;  %11108 = vmatmul.mubr.msk.f32.gmra.mrb[212].mxu0 %vm1593_vm13, %v13485_v52 }
 0x415   : > { %3823 = vst.msk [vmem:[%s13049_s27 + $0x3a0] sm:$0xff] %vm1593_vm13, %v3008_v54  ;;  %11110 = vmatprep.mubr.msk.f32.mxu0 %vm1593_vm13, %v17496_v41  ;;  %v17523_v41 = vld [vmem:[#allocation187_spill] sm:$0xff] }
 0x416   : > { %10727 = vmatmul.mubr.msk.f32.gmra.mrb[218].mxu1 %vm1593_vm13, %v17501_v57 }
 0x417   : > { %10729 = vmatprep.mubr.msk.f32.mxu1 %vm1593_vm13, %v17502_v37 }
 0x418   : > { %11111 = vmatmul.mubr.msk.f32.gmra.mrb[214].mxu0 %vm1593_vm13, %v17497_v29 }
 0x419   : > { %v10575_v42 = vpop.f32.mrb[120].mxu1  ;;  %11113 = vmatprep.mubr.msk.f32.mxu0 %vm1593_vm13, %v17498_v22 }
 0x41a   : > { %3956 = vst.msk [vmem:[%s13049_s27 + $0x7c8] sm:$0xff] %vm1593_vm13, %v10575_v42  ;;  %v3668_v52 = vpop.f32.mrb[121].mxu1  ;;  %10730 = vmatmul.mubr.msk.f32.gmra.mrb[220].mxu1 %vm1593_vm13, %v17503_v51  ;;  %v17528_v42 = vld [vmem:[#allocation197_spill] sm:$0xff] }
 0x41b   : > { %3955 = vst.msk [vmem:[%s13049_s27 + $0x7c0] sm:$0xff] %vm1593_vm13, %v3668_v52  ;;  %10732 = vmatprep.mubr.msk.f32.mxu1 %vm1593_vm13, %v17504_v43  ;;  %v10380_v28 = vpop.f32.mrb[118].mxu0 }
 0x41c   : > { %3826 = vst.msk [vmem:[%s13049_s27 + $0x3b8] sm:$0xff] %vm1593_vm13, %v10380_v28  ;;  %v3018_v19 = vpop.f32.mrb[119].mxu0  ;;  %11114 = vmatmul.mubr.msk.f32.gmra.mrb[216].mxu0 %vm1593_vm13, %v17499_v31  ;;  %v17526_v31 = vld [vmem:[#allocation193_spill] sm:$0xff] }
 0x41d   : > { %3825 = vst.msk [vmem:[%s13049_s27 + $0x3b0] sm:$0xff] %vm1593_vm13, %v3018_v19  ;;  %11116 = vmatprep.mubr.msk.f32.mxu0 %vm1593_vm13, %v17500_v47  ;;  %v17529_v19 = vld [vmem:[#allocation199_spill] sm:$0xff] }
 0x41e   : > { %10733 = vmatmul.mubr.msk.f32.gmra.mrb[222].mxu1 %vm1593_vm13, %v17505_v26 }
 0x41f   : > { %10735 = vmatprep.mubr.msk.f32.mxu1 %vm1593_vm13, %v17506_v32 }
 0x420   : > { %11117 = vmatmul.mubr.msk.f32.gmra.mrb[218].mxu0 %vm1593_vm13, %v17501_v57 }
 0x421   : > { %v10578_v14 = vpop.f32.mrb[122].mxu1  ;;  %11119 = vmatprep.mubr.msk.f32.mxu0 %vm1593_vm13, %v17502_v37  ;;  %v17527_v37 = vld [vmem:[#allocation195_spill] sm:$0xff] }
 0x422   : > { %3958 = vst.msk [vmem:[%s13049_s27 + $0x7d8] sm:$0xff] %vm1593_vm13, %v10578_v14  ;;  %v3678_v15 = vpop.f32.mrb[123].mxu1  ;;  %10736 = vmatmul.mubr.msk.f32.gmra.mrb[224].mxu1 %vm1593_vm13, %v17507_v5 }
 0x423   : > { %3957 = vst.msk [vmem:[%s13049_s27 + $0x7d0] sm:$0xff] %vm1593_vm13, %v3678_v15  ;;  %10738 = vmatprep.mubr.msk.f32.mxu1 %vm1593_vm13, %v17508_v48  ;;  %v10383_v4 = vpop.f32.mrb[120].mxu0 }
 0x424   : > { %3828 = vst.msk [vmem:[%s13049_s27 + $0x3c8] sm:$0xff] %vm1593_vm13, %v10383_v4  ;;  %v3028_v18 = vpop.f32.mrb[121].mxu0  ;;  %11120 = vmatmul.mubr.msk.f32.gmra.mrb[220].mxu0 %vm1593_vm13, %v17503_v51  ;;  %v17532_v4 = vld [vmem:[#allocation205_spill] sm:$0xff] }
 0x425   : > { %3827 = vst.msk [vmem:[%s13049_s27 + $0x3c0] sm:$0xff] %vm1593_vm13, %v3028_v18  ;;  %11122 = vmatprep.mubr.msk.f32.mxu0 %vm1593_vm13, %v17504_v43 }
 0x426   : > { %10739 = vmatmul.mubr.msk.f32.gmra.mrb[226].mxu1 %vm1593_vm13, %v17509_v49 }
 0x427   : > { %10741 = vmatprep.mubr.msk.f32.mxu1 %vm1593_vm13, %v17510_v56 }
 0x428   : > { %11123 = vmatmul.mubr.msk.f32.gmra.mrb[222].mxu0 %vm1593_vm13, %v17505_v26  ;;  %v17530_v26 = vld [vmem:[#allocation201_spill] sm:$0xff] }
 0x429   : > { %v10581_v7 = vpop.f32.mrb[124].mxu1  ;;  %11125 = vmatprep.mubr.msk.f32.mxu0 %vm1593_vm13, %v17506_v32 }
 0x42a   : > { %3960 = vst.msk [vmem:[%s13049_s27 + $0x7e8] sm:$0xff] %vm1593_vm13, %v10581_v7  ;;  %v3688_v30 = vpop.f32.mrb[125].mxu1  ;;  %10742 = vmatmul.mubr.msk.f32.gmra.mrb[228].mxu1 %vm1593_vm13, %v17511_v39 }
 0x42b   : > { %3959 = vst.msk [vmem:[%s13049_s27 + $0x7e0] sm:$0xff] %vm1593_vm13, %v3688_v30  ;;  %10744 = vmatprep.mubr.msk.f32.mxu1 %vm1593_vm13, %v17512_v17  ;;  %v10386_v9 = vpop.f32.mrb[122].mxu0  ;;  %v17533_v30 = vld [vmem:[#allocation207_spill] sm:$0xff] }
 0x42c   : > { %3830 = vst.msk [vmem:[%s13049_s27 + $0x3d8] sm:$0xff] %vm1593_vm13, %v10386_v9  ;;  %v3038_v50 = vpop.f32.mrb[123].mxu0  ;;  %11126 = vmatmul.mubr.msk.f32.gmra.mrb[224].mxu0 %vm1593_vm13, %v17507_v5 }
 0x42d   : > { %3829 = vst.msk [vmem:[%s13049_s27 + $0x3d0] sm:$0xff] %vm1593_vm13, %v3038_v50  ;;  %11128 = vmatprep.mubr.msk.f32.mxu0 %vm1593_vm13, %v17508_v48  ;;  %v17531_v48 = vld [vmem:[#allocation203_spill] sm:$0xff] }
 0x42e   : > { %10745 = vmatmul.mubr.msk.f32.gmra.mrb[230].mxu1 %vm1593_vm13, %v17513_v6 }
 0x42f   : > { %10747 = vmatprep.mubr.msk.f32.mxu1 %vm1593_vm13, %v17514_v53 }
 0x430   : > { %11129 = vmatmul.mubr.msk.f32.gmra.mrb[226].mxu0 %vm1593_vm13, %v17509_v49 }
 0x431   : > { %v10584_v2 = vpop.f32.mrb[126].mxu1  ;;  %11131 = vmatprep.mubr.msk.f32.mxu0 %vm1593_vm13, %v17510_v56 }
 0x432   : > { %3962 = vst.msk [vmem:[%s13049_s27 + $0x7f8] sm:$0xff] %vm1593_vm13, %v10584_v2  ;;  %v3698_v40 = vpop.f32.mrb[127].mxu1  ;;  %10748 = vmatmul.mubr.msk.f32.gmra.mrb[232].mxu1 %vm1593_vm13, %v17515_v62 }
 0x433   : > { %3961 = vst.msk [vmem:[%s13049_s27 + $0x7f0] sm:$0xff] %vm1593_vm13, %v3698_v40  ;;  %10750 = vmatprep.mubr.msk.f32.mxu1 %vm1593_vm13, %v17516_v27  ;;  %v10389_v55 = vpop.f32.mrb[124].mxu0 }
 0x434   : > { %3832 = vst.msk [vmem:[%s13049_s27 + $0x3e8] sm:$0xff] %vm1593_vm13, %v10389_v55  ;;  %v3048_v60 = vpop.f32.mrb[125].mxu0  ;;  %11132 = vmatmul.mubr.msk.f32.gmra.mrb[228].mxu0 %vm1593_vm13, %v17511_v39 }
 0x435   : > { %v10593_v63 = vpop.f32.mrb[128].mxu1  ;;  %3831 = vst.msk [vmem:[%s13049_s27 + $0x3e0] sm:$0xff] %vm1593_vm13, %v3048_v60  ;;  %11134 = vmatprep.mubr.msk.f32.mxu0 %vm1593_vm13, %v17512_v17 }
 0x436   : > { %5312 = vst.msk [vmem:[%s14614_s7 + $0x8] sm:$0xff] %vm1593_vm13, %v10593_v63  ;;  %v4032_v0 = vpop.f32.mrb[129].mxu1  ;;  %10751 = vmatmul.mubr.msk.f32.gmra.mrb[234].mxu1 %vm1593_vm13, %v17517_v58 }
 0x437   : > { %5311 = vst.msk [vmem:[%s14614_s7] sm:$0xff] %vm1593_vm13, %v4032_v0  ;;  %10753 = vmatprep.mubr.msk.f32.mxu1 %vm1593_vm13, %v17518_v16 }
 0x438   : > { %11135 = vmatmul.mubr.msk.f32.gmra.mrb[230].mxu0 %vm1593_vm13, %v17513_v6 }
 0x439   : > { %v10596_v12 = vpop.f32.mrb[130].mxu1  ;;  %11137 = vmatprep.mubr.msk.f32.mxu0 %vm1593_vm13, %v17514_v53 }
 0x43a   : > { %5314 = vst.msk [vmem:[%s14614_s7 + $0x18] sm:$0xff] %vm1593_vm13, %v10596_v12  ;;  %v4042_v25 = vpop.f32.mrb[131].mxu1  ;;  %10754 = vmatmul.mubr.msk.f32.gmra.mrb[236].mxu1 %vm1593_vm13, %v17519_v34 }
 0x43b   : > { %5313 = vst.msk [vmem:[%s14614_s7 + $0x10] sm:$0xff] %vm1593_vm13, %v4042_v25  ;;  %10756 = vmatprep.mubr.msk.f32.mxu1 %vm1593_vm13, %v17520_v38  ;;  %v10392_v45 = vpop.f32.mrb[126].mxu0 }
 0x43c   : > { %3834 = vst.msk [vmem:[%s13049_s27 + $0x3f8] sm:$0xff] %vm1593_vm13, %v10392_v45  ;;  %v3058_v61 = vpop.f32.mrb[127].mxu0  ;;  %11138 = vmatmul.mubr.msk.f32.gmra.mrb[232].mxu0 %vm1593_vm13, %v17515_v62  ;;  %v17534_v62 = vld [vmem:[#allocation210_spill] sm:$0xff]  ;;  %v17539_v45 = vld [vmem:[#allocation19_spill] sm:$0xff] }
 0x43d   : > { %v10599_v1 = vpop.f32.mrb[132].mxu1  ;;  %3833 = vst.msk [vmem:[%s13049_s27 + $0x3f0] sm:$0xff] %vm1593_vm13, %v3058_v61  ;;  %11140 = vmatprep.mubr.msk.f32.mxu0 %vm1593_vm13, %v17516_v27  ;;  %v17535_v27 = vld [vmem:[#allocation15_spill] sm:$0xff] }
 0x43e   : > { %5316 = vst.msk [vmem:[%s14614_s7 + $0x28] sm:$0xff] %vm1593_vm13, %v10599_v1  ;;  %v4052_v3 = vpop.f32.mrb[133].mxu1  ;;  %10757 = vmatmul.mubr.msk.f32.gmra.mrb[238].mxu1 %vm1593_vm13, %v17521_v21 }
 0x43f   : > { %5315 = vst.msk [vmem:[%s14614_s7 + $0x20] sm:$0xff] %vm1593_vm13, %v4052_v3  ;;  %10759 = vmatprep.mubr.msk.f32.mxu1 %vm1593_vm13, %v17522_v46  ;;  %v10983_v35 = vpop.f32.mrb[128].mxu0  ;;  %v17540_v3 = vld [vmem:[#allocation20_spill] sm:$0xff] }
 0x440   : > { %6916 = vst.msk [vmem:[%s14653_s10 + $0x8] sm:$0xff] %vm1593_vm13, %v10983_v35  ;;  %v5636_v23 = vpop.f32.mrb[129].mxu0  ;;  %11141 = vmatmul.mubr.msk.f32.gmra.mrb[234].mxu0 %vm1593_vm13, %v17517_v58  ;;  %v17536_v58 = vld [vmem:[#allocation16_spill] sm:$0xff] }
 0x441   : > { %v10602_v44 = vpop.f32.mrb[134].mxu1  ;;  %6915 = vst.msk [vmem:[%s14653_s10] sm:$0xff] %vm1593_vm13, %v5636_v23  ;;  %11143 = vmatprep.mubr.msk.f32.mxu0 %vm1593_vm13, %v17518_v16  ;;  %v17537_v16 = vld [vmem:[#allocation17_spill] sm:$0xff] }
 0x442   : > { %5318 = vst.msk [vmem:[%s14614_s7 + $0x38] sm:$0xff] %vm1593_vm13, %v10602_v44  ;;  %v4062_v33 = vpop.f32.mrb[135].mxu1  ;;  %10760 = vmatmul.mubr.msk.f32.gmra.mrb[240].mxu1 %vm1593_vm13, %v17523_v41 }
 0x443   : > { %5317 = vst.msk [vmem:[%s14614_s7 + $0x30] sm:$0xff] %vm1593_vm13, %v4062_v33  ;;  %10762 = vmatprep.mubr.msk.f32.mxu1 %vm1593_vm13, %v17524_v13  ;;  %v10986_v10 = vpop.f32.mrb[130].mxu0  ;;  %v17542_v33 = vld [vmem:[#allocation22_spill] sm:$0xff] }
 0x444   : > { %6918 = vst.msk [vmem:[%s14653_s10 + $0x18] sm:$0xff] %vm1593_vm13, %v10986_v10  ;;  %v5646_v29 = vpop.f32.mrb[131].mxu0  ;;  %11144 = vmatmul.mubr.msk.f32.gmra.mrb[236].mxu0 %vm1593_vm13, %v17519_v34 }
 0x445   : > { %v10605_v22 = vpop.f32.mrb[136].mxu1  ;;  %6917 = vst.msk [vmem:[%s14653_s10 + $0x10] sm:$0xff] %vm1593_vm13, %v5646_v29  ;;  %11146 = vmatprep.mubr.msk.f32.mxu0 %vm1593_vm13, %v17520_v38  ;;  %v17538_v38 = vld [vmem:[#allocation18_spill] sm:$0xff] }
 0x446   : > { %5320 = vst.msk [vmem:[%s14614_s7 + $0x48] sm:$0xff] %vm1593_vm13, %v10605_v22  ;;  %v4072_v20 = vpop.f32.mrb[137].mxu1  ;;  %10763 = vmatmul.mubr.msk.f32.gmra.mrb[242].mxu1 %vm1593_vm13, %v17525_v11 }
 0x447   : > { %5319 = vst.msk [vmem:[%s14614_s7 + $0x40] sm:$0xff] %vm1593_vm13, %v4072_v20  ;;  %10765 = vmatprep.mubr.msk.f32.mxu1 %vm1593_vm13, %v17526_v31  ;;  %v10989_v47 = vpop.f32.mrb[132].mxu0  ;;  %v17544_v20 = vld [vmem:[#allocation24_spill] sm:$0xff] }
 0x448   : > { %6920 = vst.msk [vmem:[%s14653_s10 + $0x28] sm:$0xff] %vm1593_vm13, %v10989_v47  ;;  %v5656_v36 = vpop.f32.mrb[133].mxu0  ;;  %11147 = vmatmul.mubr.msk.f32.gmra.mrb[238].mxu0 %vm1593_vm13, %v17521_v21  ;;  %v17541_v21 = vld [vmem:[#allocation21_spill] sm:$0xff] }
 0x449   : > { %v10608_v54 = vpop.f32.mrb[138].mxu1  ;;  %6919 = vst.msk [vmem:[%s14653_s10 + $0x20] sm:$0xff] %vm1593_vm13, %v5656_v36  ;;  %11149 = vmatprep.mubr.msk.f32.mxu0 %vm1593_vm13, %v17522_v46 }
 0x44a   : > { %5322 = vst.msk [vmem:[%s14614_s7 + $0x58] sm:$0xff] %vm1593_vm13, %v10608_v54  ;;  %v4082_v57 = vpop.f32.mrb[139].mxu1  ;;  %10766 = vmatmul.mubr.msk.f32.gmra.mrb[244].mxu1 %vm1593_vm13, %v17527_v37 }
 0x44b   : > { %5321 = vst.msk [vmem:[%s14614_s7 + $0x50] sm:$0xff] %vm1593_vm13, %v4082_v57  ;;  %10768 = vmatprep.mubr.msk.f32.mxu1 %vm1593_vm13, %v17528_v42  ;;  %v10992_v52 = vpop.f32.mrb[134].mxu0  ;;  %v17546_v57 = vld [vmem:[#allocation26_spill] sm:$0xff] }
 0x44c   : > { %6922 = vst.msk [vmem:[%s14653_s10 + $0x38] sm:$0xff] %vm1593_vm13, %v10992_v52  ;;  %v5666_v51 = vpop.f32.mrb[135].mxu0  ;;  %11150 = vmatmul.mubr.msk.f32.gmra.mrb[240].mxu0 %vm1593_vm13, %v17523_v41  ;;  %v17543_v41 = vld [vmem:[#allocation23_spill] sm:$0xff] }
 0x44d   : > { %v10611_v43 = vpop.f32.mrb[140].mxu1  ;;  %6921 = vst.msk [vmem:[%s14653_s10 + $0x30] sm:$0xff] %vm1593_vm13, %v5666_v51  ;;  %11152 = vmatprep.mubr.msk.f32.mxu0 %vm1593_vm13, %v17524_v13 }
 0x44e   : > { %5324 = vst.msk [vmem:[%s14614_s7 + $0x68] sm:$0xff] %vm1593_vm13, %v10611_v43  ;;  %v4092_v28 = vpop.f32.mrb[141].mxu1  ;;  %10769 = vmatmul.mubr.msk.f32.gmra.mrb[246].mxu1 %vm1593_vm13, %v17529_v19 }
 0x44f   : > { %5323 = vst.msk [vmem:[%s14614_s7 + $0x60] sm:$0xff] %vm1593_vm13, %v4092_v28  ;;  %10771 = vmatprep.mubr.msk.f32.mxu1 %vm1593_vm13, %v17530_v26  ;;  %v10995_v32 = vpop.f32.mrb[136].mxu0  ;;  %v17548_v28 = vld [vmem:[#allocation28_spill] sm:$0xff] }
 0x450   : > { %6924 = vst.msk [vmem:[%s14653_s10 + $0x48] sm:$0xff] %vm1593_vm13, %v10995_v32  ;;  %v5676_v14 = vpop.f32.mrb[137].mxu0  ;;  %11153 = vmatmul.mubr.msk.f32.gmra.mrb[242].mxu0 %vm1593_vm13, %v17525_v11  ;;  %v17545_v11 = vld [vmem:[#allocation25_spill] sm:$0xff] }
 0x451   : > { %v10614_v15 = vpop.f32.mrb[142].mxu1  ;;  %6923 = vst.msk [vmem:[%s14653_s10 + $0x40] sm:$0xff] %vm1593_vm13, %v5676_v14  ;;  %11155 = vmatprep.mubr.msk.f32.mxu0 %vm1593_vm13, %v17526_v31 }
 0x452   : > { %5326 = vst.msk [vmem:[%s14614_s7 + $0x78] sm:$0xff] %vm1593_vm13, %v10614_v15  ;;  %v4102_v5 = vpop.f32.mrb[143].mxu1  ;;  %10772 = vmatmul.mubr.msk.f32.gmra.mrb[248].mxu1 %vm1593_vm13, %v17531_v48 }
 0x453   : > { %5325 = vst.msk [vmem:[%s14614_s7 + $0x70] sm:$0xff] %vm1593_vm13, %v4102_v5  ;;  %10774 = vmatprep.mubr.msk.f32.mxu1 %vm1593_vm13, %v17532_v4  ;;  %v10998_v18 = vpop.f32.mrb[138].mxu0  ;;  %v17550_v5 = vld [vmem:[#allocation30_spill] sm:$0xff] }
 0x454   : > { %6926 = vst.msk [vmem:[%s14653_s10 + $0x58] sm:$0xff] %vm1593_vm13, %v10998_v18  ;;  %v5686_v49 = vpop.f32.mrb[139].mxu0  ;;  %11156 = vmatmul.mubr.msk.f32.gmra.mrb[244].mxu0 %vm1593_vm13, %v17527_v37  ;;  %v17547_v37 = vld [vmem:[#allocation27_spill] sm:$0xff] }
 0x455   : > { %v10617_v56 = vpop.f32.mrb[144].mxu1  ;;  %6925 = vst.msk [vmem:[%s14653_s10 + $0x50] sm:$0xff] %vm1593_vm13, %v5686_v49  ;;  %11158 = vmatprep.mubr.msk.f32.mxu0 %vm1593_vm13, %v17528_v42 }
 0x456   : > { %5328 = vst.msk [vmem:[%s14614_s7 + $0x88] sm:$0xff] %vm1593_vm13, %v10617_v56  ;;  %v4112_v7 = vpop.f32.mrb[145].mxu1  ;;  %10775 = vmatmul.mubr.msk.f32.gmra.mrb[250].mxu1 %vm1593_vm13, %v17533_v30 }
 0x457   : > { %5327 = vst.msk [vmem:[%s14614_s7 + $0x80] sm:$0xff] %vm1593_vm13, %v4112_v7  ;;  %10777 = vmatprep.mubr.msk.f32.mxu1 %vm1593_vm13, %v13953_v8  ;;  %v11001_v39 = vpop.f32.mrb[140].mxu0  ;;  %v17552_v7 = vld [vmem:[#allocation32_spill] sm:$0xff] }
 0x458   : > { %6928 = vst.msk [vmem:[%s14653_s10 + $0x68] sm:$0xff] %vm1593_vm13, %v11001_v39  ;;  %v5696_v17 = vpop.f32.mrb[141].mxu0  ;;  %11159 = vmatmul.mubr.msk.f32.gmra.mrb[246].mxu0 %vm1593_vm13, %v17529_v19  ;;  %v17549_v19 = vld [vmem:[#allocation29_spill] sm:$0xff] }
 0x459   : > { %v10620_v9 = vpop.f32.mrb[146].mxu1  ;;  %6927 = vst.msk [vmem:[%s14653_s10 + $0x60] sm:$0xff] %vm1593_vm13, %v5696_v17  ;;  %11161 = vmatprep.mubr.msk.f32.mxu0 %vm1593_vm13, %v17530_v26 }
 0x45a   : > { %5330 = vst.msk [vmem:[%s14614_s7 + $0x98] sm:$0xff] %vm1593_vm13, %v10620_v9  ;;  %v4122_v50 = vpop.f32.mrb[147].mxu1  ;;  %10778 = vmatmul.mubr.msk.f32.gmra.mrb[252].mxu1 %vm1593_vm13, %v13967_v59 }
 0x45b   : > { %5329 = vst.msk [vmem:[%s14614_s7 + $0x90] sm:$0xff] %vm1593_vm13, %v4122_v50  ;;  %10780 = vmatprep.mubr.msk.f32.mxu1 %vm1593_vm13, %v13979_v24  ;;  %v11004_v6 = vpop.f32.mrb[142].mxu0 }
 0x45c   : > { %6930 = vst.msk [vmem:[%s14653_s10 + $0x78] sm:$0xff] %vm1593_vm13, %v11004_v6  ;;  %v5706_v53 = vpop.f32.mrb[143].mxu0  ;;  %11162 = vmatmul.mubr.msk.f32.gmra.mrb[248].mxu0 %vm1593_vm13, %v17531_v48  ;;  %v17551_v48 = vld [vmem:[#allocation31_spill] sm:$0xff]  ;;  %v17554_v6 = vld [vmem:[#allocation34_spill] sm:$0xff] }
 0x45d   : > { %v10623_v2 = vpop.f32.mrb[148].mxu1  ;;  %6929 = vst.msk [vmem:[%s14653_s10 + $0x70] sm:$0xff] %vm1593_vm13, %v5706_v53  ;;  %11164 = vmatprep.mubr.msk.f32.mxu0 %vm1593_vm13, %v17532_v4  ;;  %v17555_v53 = vld [vmem:[#allocation35_spill] sm:$0xff] }
 0x45e   : > { %5332 = vst.msk [vmem:[%s14614_s7 + $0xa8] sm:$0xff] %vm1593_vm13, %v10623_v2  ;;  %v4132_v40 = vpop.f32.mrb[149].mxu1  ;;  %10781 = vmatmul.mubr.msk.f32.gmra.mrb[254].mxu1 %vm1593_vm13, %v17534_v62 }
 0x45f   : > { %5331 = vst.msk [vmem:[%s14614_s7 + $0xa0] sm:$0xff] %vm1593_vm13, %v4132_v40  ;;  %10783 = vmatprep.mubr.msk.f32.mxu1 %vm1593_vm13, %v17535_v27  ;;  %v11007_v55 = vpop.f32.mrb[144].mxu0 }
 0x460   : > { %6932 = vst.msk [vmem:[%s14653_s10 + $0x88] sm:$0xff] %vm1593_vm13, %v11007_v55  ;;  %v5716_v60 = vpop.f32.mrb[145].mxu0  ;;  %11165 = vmatmul.mubr.msk.f32.gmra.mrb[250].mxu0 %vm1593_vm13, %v17533_v30  ;;  %v17553_v30 = vld [vmem:[#allocation33_spill] sm:$0xff]  ;;  %v17556_v55 = vld [vmem:[#allocation36_spill] sm:$0xff] }
 0x461   : > { %v10626_v63 = vpop.f32.mrb[150].mxu1  ;;  %6931 = vst.msk [vmem:[%s14653_s10 + $0x80] sm:$0xff] %vm1593_vm13, %v5716_v60  ;;  %11167 = vmatprep.mubr.msk.f32.mxu0 %vm1593_vm13, %v13953_v8  ;;  %v17557_v60 = vld [vmem:[#allocation37_spill] sm:$0xff] }
 0x462   : > { %5334 = vst.msk [vmem:[%s14614_s7 + $0xb8] sm:$0xff] %vm1593_vm13, %v10626_v63  ;;  %v4142_v0 = vpop.f32.mrb[151].mxu1  ;;  %10784 = vmatmul.mubr.msk.f32.gmra.mrb[0].mxu1 %vm1593_vm13, %v17536_v58 }
 0x463   : > { %5333 = vst.msk [vmem:[%s14614_s7 + $0xb0] sm:$0xff] %vm1593_vm13, %v4142_v0  ;;  %10786 = vmatprep.mubr.msk.f32.mxu1 %vm1593_vm13, %v17537_v16  ;;  %v11010_v12 = vpop.f32.mrb[146].mxu0 }
 0x464   : > { %6934 = vst.msk [vmem:[%s14653_s10 + $0x98] sm:$0xff] %vm1593_vm13, %v11010_v12  ;;  %v5726_v25 = vpop.f32.mrb[147].mxu0  ;;  %11168 = vmatmul.mubr.msk.f32.gmra.mrb[252].mxu0 %vm1593_vm13, %v13967_v59  ;;  %v17558_v12 = vld [vmem:[#allocation38_spill] sm:$0xff] }
 0x465   : > { %v10629_v8 = vpop.f32.mrb[152].mxu1  ;;  %6933 = vst.msk [vmem:[%s14653_s10 + $0x90] sm:$0xff] %vm1593_vm13, %v5726_v25  ;;  %11170 = vmatprep.mubr.msk.f32.mxu0 %vm1593_vm13, %v13979_v24  ;;  %v17559_v25 = vld [vmem:[#allocation39_spill] sm:$0xff] }
 0x466   : > { %5336 = vst.msk [vmem:[%s14614_s7 + $0xc8] sm:$0xff] %vm1593_vm13, %v10629_v8  ;;  %v4152_v34 = vpop.f32.mrb[153].mxu1  ;;  %10787 = vmatmul.mubr.msk.f32.gmra.mrb[2].mxu1 %vm1593_vm13, %v17538_v38 }
 0x467   : > { %5335 = vst.msk [vmem:[%s14614_s7 + $0xc0] sm:$0xff] %vm1593_vm13, %v4152_v34  ;;  %10789 = vmatprep.mubr.msk.f32.mxu1 %vm1593_vm13, %v17539_v45  ;;  %v11013_v59 = vpop.f32.mrb[148].mxu0 }
 0x468   : > { %6936 = vst.msk [vmem:[%s14653_s10 + $0xa8] sm:$0xff] %vm1593_vm13, %v11013_v59  ;;  %v5736_v61 = vpop.f32.mrb[149].mxu0  ;;  %11171 = vmatmul.mubr.msk.f32.gmra.mrb[254].mxu0 %vm1593_vm13, %v17534_v62  ;;  %v17560_v59 = vld [vmem:[#allocation40_spill] sm:$0xff] }
 0x469   : > { %v10632_v24 = vpop.f32.mrb[154].mxu1  ;;  %6935 = vst.msk [vmem:[%s14653_s10 + $0xa0] sm:$0xff] %vm1593_vm13, %v5736_v61  ;;  %11173 = vmatprep.mubr.msk.f32.mxu0 %vm1593_vm13, %v17535_v27  ;;  %v17561_v61 = vld [vmem:[#allocation41_spill] sm:$0xff] }
 0x46a   : > { %5338 = vst.msk [vmem:[%s14614_s7 + $0xd8] sm:$0xff] %vm1593_vm13, %v10632_v24  ;;  %v4162_v1 = vpop.f32.mrb[155].mxu1  ;;  %10790 = vmatmul.mubr.msk.f32.gmra.mrb[4].mxu1 %vm1593_vm13, %v17540_v3 }
 0x46b   : > { %5337 = vst.msk [vmem:[%s14614_s7 + $0xd0] sm:$0xff] %vm1593_vm13, %v4162_v1  ;;  %10792 = vmatprep.mubr.msk.f32.mxu1 %vm1593_vm13, %v17541_v21  ;;  %v11016_v46 = vpop.f32.mrb[150].mxu0 }
 0x46c   : > { %6938 = vst.msk [vmem:[%s14653_s10 + $0xb8] sm:$0xff] %vm1593_vm13, %v11016_v46  ;;  %v5746_v35 = vpop.f32.mrb[151].mxu0  ;;  %11174 = vmatmul.mubr.msk.f32.gmra.mrb[0].mxu0 %vm1593_vm13, %v17536_v58  ;;  %v17562_v46 = vld [vmem:[#allocation42_spill] sm:$0xff] }
 0x46d   : > { %v10635_v23 = vpop.f32.mrb[156].mxu1  ;;  %6937 = vst.msk [vmem:[%s14653_s10 + $0xb0] sm:$0xff] %vm1593_vm13, %v5746_v35  ;;  %11176 = vmatprep.mubr.msk.f32.mxu0 %vm1593_vm13, %v17537_v16  ;;  %v17563_v35 = vld [vmem:[#allocation43_spill] sm:$0xff] }
 0x46e   : > { %5340 = vst.msk [vmem:[%s14614_s7 + $0xe8] sm:$0xff] %vm1593_vm13, %v10635_v23  ;;  %v4172_v44 = vpop.f32.mrb[157].mxu1  ;;  %10793 = vmatmul.mubr.msk.f32.gmra.mrb[6].mxu1 %vm1593_vm13, %v17542_v33 }
 0x46f   : > { %5339 = vst.msk [vmem:[%s14614_s7 + $0xe0] sm:$0xff] %vm1593_vm13, %v4172_v44  ;;  %10795 = vmatprep.mubr.msk.f32.mxu1 %vm1593_vm13, %v17543_v41  ;;  %v11019_v13 = vpop.f32.mrb[152].mxu0 }
 0x470   : > { %6940 = vst.msk [vmem:[%s14653_s10 + $0xc8] sm:$0xff] %vm1593_vm13, %v11019_v13  ;;  %v5756_v10 = vpop.f32.mrb[153].mxu0  ;;  %11177 = vmatmul.mubr.msk.f32.gmra.mrb[2].mxu0 %vm1593_vm13, %v17538_v38  ;;  %v17564_v13 = vld [vmem:[#allocation44_spill] sm:$0xff] }
 0x471   : > { %v10638_v29 = vpop.f32.mrb[158].mxu1  ;;  %6939 = vst.msk [vmem:[%s14653_s10 + $0xc0] sm:$0xff] %vm1593_vm13, %v5756_v10  ;;  %11179 = vmatprep.mubr.msk.f32.mxu0 %vm1593_vm13, %v17539_v45  ;;  %v17565_v10 = vld [vmem:[#allocation45_spill] sm:$0xff] }
 0x472   : > { %5342 = vst.msk [vmem:[%s14614_s7 + $0xf8] sm:$0xff] %vm1593_vm13, %v10638_v29  ;;  %v4182_v22 = vpop.f32.mrb[159].mxu1  ;;  %10796 = vmatmul.mubr.msk.f32.gmra.mrb[8].mxu1 %vm1593_vm13, %v17544_v20 }
 0x473   : > { %5341 = vst.msk [vmem:[%s14614_s7 + $0xf0] sm:$0xff] %vm1593_vm13, %v4182_v22  ;;  %10798 = vmatprep.mubr.msk.f32.mxu1 %vm1593_vm13, %v17545_v11  ;;  %v11022_v31 = vpop.f32.mrb[154].mxu0 }
 0x474   : > { %6942 = vst.msk [vmem:[%s14653_s10 + $0xd8] sm:$0xff] %vm1593_vm13, %v11022_v31  ;;  %v5766_v47 = vpop.f32.mrb[155].mxu0  ;;  %11180 = vmatmul.mubr.msk.f32.gmra.mrb[4].mxu0 %vm1593_vm13, %v17540_v3  ;;  %v17566_v31 = vld [vmem:[#allocation46_spill] sm:$0xff] }
 0x475   : > { %v10641_v36 = vpop.f32.mrb[160].mxu1  ;;  %6941 = vst.msk [vmem:[%s14653_s10 + $0xd0] sm:$0xff] %vm1593_vm13, %v5766_v47  ;;  %11182 = vmatprep.mubr.msk.f32.mxu0 %vm1593_vm13, %v17541_v21  ;;  %v17567_v47 = vld [vmem:[#allocation47_spill] sm:$0xff] }
 0x476   : > { %5344 = vst.msk [vmem:[%s14614_s7 + $0x108] sm:$0xff] %vm1593_vm13, %v10641_v36  ;;  %v4192_v54 = vpop.f32.mrb[161].mxu1  ;;  %10799 = vmatmul.mubr.msk.f32.gmra.mrb[10].mxu1 %vm1593_vm13, %v17546_v57 }
 0x477   : > { %5343 = vst.msk [vmem:[%s14614_s7 + $0x100] sm:$0xff] %vm1593_vm13, %v4192_v54  ;;  %10801 = vmatprep.mubr.msk.f32.mxu1 %vm1593_vm13, %v17547_v37  ;;  %v11025_v42 = vpop.f32.mrb[156].mxu0 }
 0x478   : > { %6944 = vst.msk [vmem:[%s14653_s10 + $0xe8] sm:$0xff] %vm1593_vm13, %v11025_v42  ;;  %v5776_v52 = vpop.f32.mrb[157].mxu0  ;;  %11183 = vmatmul.mubr.msk.f32.gmra.mrb[6].mxu0 %vm1593_vm13, %v17542_v33  ;;  %v17568_v42 = vld [vmem:[#allocation48_spill] sm:$0xff] }
 0x479   : > { %v10644_v51 = vpop.f32.mrb[162].mxu1  ;;  %6943 = vst.msk [vmem:[%s14653_s10 + $0xe0] sm:$0xff] %vm1593_vm13, %v5776_v52  ;;  %11185 = vmatprep.mubr.msk.f32.mxu0 %vm1593_vm13, %v17543_v41  ;;  %v17569_v52 = vld [vmem:[#allocation49_spill] sm:$0xff] }
 0x47a   : > { %5346 = vst.msk [vmem:[%s14614_s7 + $0x118] sm:$0xff] %vm1593_vm13, %v10644_v51  ;;  %v4202_v43 = vpop.f32.mrb[163].mxu1  ;;  %10802 = vmatmul.mubr.msk.f32.gmra.mrb[12].mxu1 %vm1593_vm13, %v17548_v28 }
 0x47b   : > { %5345 = vst.msk [vmem:[%s14614_s7 + $0x110] sm:$0xff] %vm1593_vm13, %v4202_v43  ;;  %10804 = vmatprep.mubr.msk.f32.mxu1 %vm1593_vm13, %v17549_v19  ;;  %v11028_v26 = vpop.f32.mrb[158].mxu0 }
 0x47c   : > { %6946 = vst.msk [vmem:[%s14653_s10 + $0xf8] sm:$0xff] %vm1593_vm13, %v11028_v26  ;;  %v5786_v32 = vpop.f32.mrb[159].mxu0  ;;  %11186 = vmatmul.mubr.msk.f32.gmra.mrb[8].mxu0 %vm1593_vm13, %v17544_v20  ;;  %v17570_v26 = vld [vmem:[#allocation50_spill] sm:$0xff] }
 0x47d   : > { %v10647_v14 = vpop.f32.mrb[164].mxu1  ;;  %6945 = vst.msk [vmem:[%s14653_s10 + $0xf0] sm:$0xff] %vm1593_vm13, %v5786_v32  ;;  %11188 = vmatprep.mubr.msk.f32.mxu0 %vm1593_vm13, %v17545_v11  ;;  %v17571_v32 = vld [vmem:[#allocation51_spill] sm:$0xff] }
 0x47e   : > { %5348 = vst.msk [vmem:[%s14614_s7 + $0x128] sm:$0xff] %vm1593_vm13, %v10647_v14  ;;  %v4212_v15 = vpop.f32.mrb[165].mxu1  ;;  %10805 = vmatmul.mubr.msk.f32.gmra.mrb[14].mxu1 %vm1593_vm13, %v17550_v5 }
 0x47f   : > { %5347 = vst.msk [vmem:[%s14614_s7 + $0x120] sm:$0xff] %vm1593_vm13, %v4212_v15  ;;  %10807 = vmatprep.mubr.msk.f32.mxu1 %vm1593_vm13, %v17551_v48  ;;  %v11031_v4 = vpop.f32.mrb[160].mxu0 }
 0x480   : > { %6948 = vst.msk [vmem:[%s14653_s10 + $0x108] sm:$0xff] %vm1593_vm13, %v11031_v4  ;;  %v5796_v18 = vpop.f32.mrb[161].mxu0  ;;  %11189 = vmatmul.mubr.msk.f32.gmra.mrb[10].mxu0 %vm1593_vm13, %v17546_v57  ;;  %v17572_v4 = vld [vmem:[#allocation52_spill] sm:$0xff] }
 0x481   : > { %v10650_v49 = vpop.f32.mrb[166].mxu1  ;;  %6947 = vst.msk [vmem:[%s14653_s10 + $0x100] sm:$0xff] %vm1593_vm13, %v5796_v18  ;;  %11191 = vmatprep.mubr.msk.f32.mxu0 %vm1593_vm13, %v17547_v37  ;;  %v17573_v18 = vld [vmem:[#allocation53_spill] sm:$0xff] }
 0x482   : > { %5350 = vst.msk [vmem:[%s14614_s7 + $0x138] sm:$0xff] %vm1593_vm13, %v10650_v49  ;;  %v4222_v56 = vpop.f32.mrb[167].mxu1  ;;  %10808 = vmatmul.mubr.msk.f32.gmra.mrb[16].mxu1 %vm1593_vm13, %v17552_v7 }
 0x483   : > { %5349 = vst.msk [vmem:[%s14614_s7 + $0x130] sm:$0xff] %vm1593_vm13, %v4222_v56  ;;  %10810 = vmatprep.mubr.msk.f32.mxu1 %vm1593_vm13, %v17553_v30  ;;  %v11034_v39 = vpop.f32.mrb[162].mxu0 }
 0x484   : > { %6950 = vst.msk [vmem:[%s14653_s10 + $0x118] sm:$0xff] %vm1593_vm13, %v11034_v39  ;;  %v5806_v17 = vpop.f32.mrb[163].mxu0  ;;  %11192 = vmatmul.mubr.msk.f32.gmra.mrb[12].mxu0 %vm1593_vm13, %v17548_v28  ;;  %v17574_v39 = vld [vmem:[#allocation54_spill] sm:$0xff] }
 0x485   : > { %v10653_v9 = vpop.f32.mrb[168].mxu1  ;;  %6949 = vst.msk [vmem:[%s14653_s10 + $0x110] sm:$0xff] %vm1593_vm13, %v5806_v17  ;;  %11194 = vmatprep.mubr.msk.f32.mxu0 %vm1593_vm13, %v17549_v19  ;;  %v17575_v17 = vld [vmem:[#allocation56_spill] sm:$0xff] }
 0x486   : > { %5352 = vst.msk [vmem:[%s14614_s7 + $0x148] sm:$0xff] %vm1593_vm13, %v10653_v9  ;;  %v4232_v50 = vpop.f32.mrb[169].mxu1  ;;  %10811 = vmatmul.mubr.msk.f32.gmra.mrb[18].mxu1 %vm1593_vm13, %v17554_v6 }
 0x487   : > { %5351 = vst.msk [vmem:[%s14614_s7 + $0x140] sm:$0xff] %vm1593_vm13, %v4232_v50  ;;  %10813 = vmatprep.mubr.msk.f32.mxu1 %vm1593_vm13, %v17555_v53  ;;  %v11037_v2 = vpop.f32.mrb[164].mxu0 }
 0x488   : > { %6952 = vst.msk [vmem:[%s14653_s10 + $0x128] sm:$0xff] %vm1593_vm13, %v11037_v2  ;;  %v5816_v40 = vpop.f32.mrb[165].mxu0  ;;  %11195 = vmatmul.mubr.msk.f32.gmra.mrb[14].mxu0 %vm1593_vm13, %v17550_v5  ;;  %v17576_v2 = vld [vmem:[#allocation57_spill] sm:$0xff] }
 0x489   : > { %v10656_v62 = vpop.f32.mrb[170].mxu1  ;;  %6951 = vst.msk [vmem:[%s14653_s10 + $0x120] sm:$0xff] %vm1593_vm13, %v5816_v40  ;;  %11197 = vmatprep.mubr.msk.f32.mxu0 %vm1593_vm13, %v17551_v48  ;;  %v17577_v40 = vld [vmem:[#allocation59_spill] sm:$0xff] }
 0x48a   : > { %5354 = vst.msk [vmem:[%s14614_s7 + $0x158] sm:$0xff] %vm1593_vm13, %v10656_v62  ;;  %v4242_v27 = vpop.f32.mrb[171].mxu1  ;;  %10814 = vmatmul.mubr.msk.f32.gmra.mrb[20].mxu1 %vm1593_vm13, %v17556_v55 }
 0x48b   : > { %5353 = vst.msk [vmem:[%s14614_s7 + $0x150] sm:$0xff] %vm1593_vm13, %v4242_v27  ;;  %10816 = vmatprep.mubr.msk.f32.mxu1 %vm1593_vm13, %v17557_v60  ;;  %v11040_v63 = vpop.f32.mrb[166].mxu0 }
 0x48c   : > { %6954 = vst.msk [vmem:[%s14653_s10 + $0x138] sm:$0xff] %vm1593_vm13, %v11040_v63  ;;  %v5826_v0 = vpop.f32.mrb[167].mxu0  ;;  %11198 = vmatmul.mubr.msk.f32.gmra.mrb[16].mxu0 %vm1593_vm13, %v17552_v7  ;;  %v17578_v63 = vld [vmem:[#allocation61_spill] sm:$0xff] }
 0x48d   : > { %v10659_v58 = vpop.f32.mrb[172].mxu1  ;;  %6953 = vst.msk [vmem:[%s14653_s10 + $0x130] sm:$0xff] %vm1593_vm13, %v5826_v0  ;;  %11200 = vmatprep.mubr.msk.f32.mxu0 %vm1593_vm13, %v17553_v30  ;;  %v17579_v0 = vld [vmem:[#allocation63_spill] sm:$0xff] }
 0x48e   : > { %5356 = vst.msk [vmem:[%s14614_s7 + $0x168] sm:$0xff] %vm1593_vm13, %v10659_v58  ;;  %v4252_v16 = vpop.f32.mrb[173].mxu1  ;;  %10817 = vmatmul.mubr.msk.f32.gmra.mrb[22].mxu1 %vm1593_vm13, %v17558_v12 }
 0x48f   : > { %5355 = vst.msk [vmem:[%s14614_s7 + $0x160] sm:$0xff] %vm1593_vm13, %v4252_v16  ;;  %10819 = vmatprep.mubr.msk.f32.mxu1 %vm1593_vm13, %v17559_v25  ;;  %v11043_v8 = vpop.f32.mrb[168].mxu0 }
 0x490   : > { %6956 = vst.msk [vmem:[%s14653_s10 + $0x148] sm:$0xff] %vm1593_vm13, %v11043_v8  ;;  %v5836_v34 = vpop.f32.mrb[169].mxu0  ;;  %11201 = vmatmul.mubr.msk.f32.gmra.mrb[18].mxu0 %vm1593_vm13, %v17554_v6  ;;  %v17580_v8 = vld [vmem:[#allocation65_spill] sm:$0xff] }
 0x491   : > { %v10662_v38 = vpop.f32.mrb[174].mxu1  ;;  %6955 = vst.msk [vmem:[%s14653_s10 + $0x140] sm:$0xff] %vm1593_vm13, %v5836_v34  ;;  %11203 = vmatprep.mubr.msk.f32.mxu0 %vm1593_vm13, %v17555_v53  ;;  %v17581_v34 = vld [vmem:[#allocation67_spill] sm:$0xff] }
 0x492   : > { %5358 = vst.msk [vmem:[%s14614_s7 + $0x178] sm:$0xff] %vm1593_vm13, %v10662_v38  ;;  %v4262_v45 = vpop.f32.mrb[175].mxu1  ;;  %10820 = vmatmul.mubr.msk.f32.gmra.mrb[24].mxu1 %vm1593_vm13, %v17560_v59 }
 0x493   : > { %5357 = vst.msk [vmem:[%s14614_s7 + $0x170] sm:$0xff] %vm1593_vm13, %v4262_v45  ;;  %10822 = vmatprep.mubr.msk.f32.mxu1 %vm1593_vm13, %v17561_v61  ;;  %v11046_v24 = vpop.f32.mrb[170].mxu0 }
 0x494   : > { %6958 = vst.msk [vmem:[%s14653_s10 + $0x158] sm:$0xff] %vm1593_vm13, %v11046_v24  ;;  %v5846_v1 = vpop.f32.mrb[171].mxu0  ;;  %11204 = vmatmul.mubr.msk.f32.gmra.mrb[20].mxu0 %vm1593_vm13, %v17556_v55  ;;  %v17582_v24 = vld [vmem:[#allocation69_spill] sm:$0xff] }
 0x495   : > { %v10665_v3 = vpop.f32.mrb[176].mxu1  ;;  %6957 = vst.msk [vmem:[%s14653_s10 + $0x150] sm:$0xff] %vm1593_vm13, %v5846_v1  ;;  %11206 = vmatprep.mubr.msk.f32.mxu0 %vm1593_vm13, %v17557_v60  ;;  %v17583_v1 = vld [vmem:[#allocation71_spill] sm:$0xff] }
 0x496   : > { %5360 = vst.msk [vmem:[%s14614_s7 + $0x188] sm:$0xff] %vm1593_vm13, %v10665_v3  ;;  %v4272_v21 = vpop.f32.mrb[177].mxu1  ;;  %10823 = vmatmul.mubr.msk.f32.gmra.mrb[26].mxu1 %vm1593_vm13, %v17562_v46 }
 0x497   : > { %5359 = vst.msk [vmem:[%s14614_s7 + $0x180] sm:$0xff] %vm1593_vm13, %v4272_v21  ;;  %10825 = vmatprep.mubr.msk.f32.mxu1 %vm1593_vm13, %v17563_v35  ;;  %v11049_v23 = vpop.f32.mrb[172].mxu0 }
 0x498   : > { %6960 = vst.msk [vmem:[%s14653_s10 + $0x168] sm:$0xff] %vm1593_vm13, %v11049_v23  ;;  %v5856_v44 = vpop.f32.mrb[173].mxu0  ;;  %11207 = vmatmul.mubr.msk.f32.gmra.mrb[22].mxu0 %vm1593_vm13, %v17558_v12  ;;  %v17584_v23 = vld [vmem:[#allocation73_spill] sm:$0xff] }
 0x499   : > { %v10668_v33 = vpop.f32.mrb[178].mxu1  ;;  %6959 = vst.msk [vmem:[%s14653_s10 + $0x160] sm:$0xff] %vm1593_vm13, %v5856_v44  ;;  %11209 = vmatprep.mubr.msk.f32.mxu0 %vm1593_vm13, %v17559_v25  ;;  %v17585_v44 = vld [vmem:[#allocation75_spill] sm:$0xff] }
 0x49a   : > { %5362 = vst.msk [vmem:[%s14614_s7 + $0x198] sm:$0xff] %vm1593_vm13, %v10668_v33  ;;  %v4282_v41 = vpop.f32.mrb[179].mxu1  ;;  %10826 = vmatmul.mubr.msk.f32.gmra.mrb[28].mxu1 %vm1593_vm13, %v17564_v13 }
 0x49b   : > { %5361 = vst.msk [vmem:[%s14614_s7 + $0x190] sm:$0xff] %vm1593_vm13, %v4282_v41  ;;  %10828 = vmatprep.mubr.msk.f32.mxu1 %vm1593_vm13, %v17565_v10  ;;  %v11052_v29 = vpop.f32.mrb[174].mxu0 }
 0x49c   : > { %6962 = vst.msk [vmem:[%s14653_s10 + $0x178] sm:$0xff] %vm1593_vm13, %v11052_v29  ;;  %v5866_v22 = vpop.f32.mrb[175].mxu0  ;;  %11210 = vmatmul.mubr.msk.f32.gmra.mrb[24].mxu0 %vm1593_vm13, %v17560_v59  ;;  %v17586_v29 = vld [vmem:[#allocation77_spill] sm:$0xff] }
 0x49d   : > { %v10671_v20 = vpop.f32.mrb[180].mxu1  ;;  %6961 = vst.msk [vmem:[%s14653_s10 + $0x170] sm:$0xff] %vm1593_vm13, %v5866_v22  ;;  %11212 = vmatprep.mubr.msk.f32.mxu0 %vm1593_vm13, %v17561_v61  ;;  %v17587_v22 = vld [vmem:[#allocation79_spill] sm:$0xff] }
 0x49e   : > { %5364 = vst.msk [vmem:[%s14614_s7 + $0x1a8] sm:$0xff] %vm1593_vm13, %v10671_v20  ;;  %v4292_v11 = vpop.f32.mrb[181].mxu1  ;;  %10829 = vmatmul.mubr.msk.f32.gmra.mrb[30].mxu1 %vm1593_vm13, %v17566_v31 }
 0x49f   : > { %5363 = vst.msk [vmem:[%s14614_s7 + $0x1a0] sm:$0xff] %vm1593_vm13, %v4292_v11  ;;  %10831 = vmatprep.mubr.msk.f32.mxu1 %vm1593_vm13, %v17567_v47  ;;  %v11055_v36 = vpop.f32.mrb[176].mxu0 }
 0x4a0   : > { %6964 = vst.msk [vmem:[%s14653_s10 + $0x188] sm:$0xff] %vm1593_vm13, %v11055_v36  ;;  %v5876_v54 = vpop.f32.mrb[177].mxu0  ;;  %11213 = vmatmul.mubr.msk.f32.gmra.mrb[26].mxu0 %vm1593_vm13, %v17562_v46  ;;  %v17588_v36 = vld [vmem:[#allocation81_spill] sm:$0xff] }
 0x4a1   : > { %v10674_v57 = vpop.f32.mrb[182].mxu1  ;;  %6963 = vst.msk [vmem:[%s14653_s10 + $0x180] sm:$0xff] %vm1593_vm13, %v5876_v54  ;;  %11215 = vmatprep.mubr.msk.f32.mxu0 %vm1593_vm13, %v17563_v35  ;;  %v17589_v54 = vld [vmem:[#allocation83_spill] sm:$0xff] }
 0x4a2   : > { %5366 = vst.msk [vmem:[%s14614_s7 + $0x1b8] sm:$0xff] %vm1593_vm13, %v10674_v57  ;;  %v4302_v37 = vpop.f32.mrb[183].mxu1  ;;  %10832 = vmatmul.mubr.msk.f32.gmra.mrb[32].mxu1 %vm1593_vm13, %v17568_v42 }
 0x4a3   : > { %5365 = vst.msk [vmem:[%s14614_s7 + $0x1b0] sm:$0xff] %vm1593_vm13, %v4302_v37  ;;  %10834 = vmatprep.mubr.msk.f32.mxu1 %vm1593_vm13, %v17569_v52  ;;  %v11058_v51 = vpop.f32.mrb[178].mxu0 }
 0x4a4   : > { %6966 = vst.msk [vmem:[%s14653_s10 + $0x198] sm:$0xff] %vm1593_vm13, %v11058_v51  ;;  %v5886_v43 = vpop.f32.mrb[179].mxu0  ;;  %11216 = vmatmul.mubr.msk.f32.gmra.mrb[28].mxu0 %vm1593_vm13, %v17564_v13  ;;  %v17590_v51 = vld [vmem:[#allocation85_spill] sm:$0xff] }
 0x4a5   : > { %v10677_v28 = vpop.f32.mrb[184].mxu1  ;;  %6965 = vst.msk [vmem:[%s14653_s10 + $0x190] sm:$0xff] %vm1593_vm13, %v5886_v43  ;;  %11218 = vmatprep.mubr.msk.f32.mxu0 %vm1593_vm13, %v17565_v10  ;;  %v17591_v43 = vld [vmem:[#allocation87_spill] sm:$0xff] }
 0x4a6   : > { %5368 = vst.msk [vmem:[%s14614_s7 + $0x1c8] sm:$0xff] %vm1593_vm13, %v10677_v28  ;;  %v4312_v19 = vpop.f32.mrb[185].mxu1  ;;  %10835 = vmatmul.mubr.msk.f32.gmra.mrb[34].mxu1 %vm1593_vm13, %v17570_v26 }
 0x4a7   : > { %5367 = vst.msk [vmem:[%s14614_s7 + $0x1c0] sm:$0xff] %vm1593_vm13, %v4312_v19  ;;  %10837 = vmatprep.mubr.msk.f32.mxu1 %vm1593_vm13, %v17571_v32  ;;  %v11061_v14 = vpop.f32.mrb[180].mxu0 }
 0x4a8   : > { %6968 = vst.msk [vmem:[%s14653_s10 + $0x1a8] sm:$0xff] %vm1593_vm13, %v11061_v14  ;;  %v5896_v15 = vpop.f32.mrb[181].mxu0  ;;  %11219 = vmatmul.mubr.msk.f32.gmra.mrb[30].mxu0 %vm1593_vm13, %v17566_v31  ;;  %v17592_v14 = vld [vmem:[#allocation88_spill] sm:$0xff] }
 0x4a9   : > { %v10680_v5 = vpop.f32.mrb[186].mxu1  ;;  %6967 = vst.msk [vmem:[%s14653_s10 + $0x1a0] sm:$0xff] %vm1593_vm13, %v5896_v15  ;;  %11221 = vmatprep.mubr.msk.f32.mxu0 %vm1593_vm13, %v17567_v47  ;;  %v17593_v15 = vld [vmem:[#allocation90_spill] sm:$0xff] }
 0x4aa   : > { %5370 = vst.msk [vmem:[%s14614_s7 + $0x1d8] sm:$0xff] %vm1593_vm13, %v10680_v5  ;;  %v4322_v48 = vpop.f32.mrb[187].mxu1  ;;  %10838 = vmatmul.mubr.msk.f32.gmra.mrb[36].mxu1 %vm1593_vm13, %v17572_v4 }
 0x4ab   : > { %5369 = vst.msk [vmem:[%s14614_s7 + $0x1d0] sm:$0xff] %vm1593_vm13, %v4322_v48  ;;  %10840 = vmatprep.mubr.msk.f32.mxu1 %vm1593_vm13, %v17573_v18  ;;  %v11064_v49 = vpop.f32.mrb[182].mxu0 }
 0x4ac   : > { %6970 = vst.msk [vmem:[%s14653_s10 + $0x1b8] sm:$0xff] %vm1593_vm13, %v11064_v49  ;;  %v5906_v56 = vpop.f32.mrb[183].mxu0  ;;  %11222 = vmatmul.mubr.msk.f32.gmra.mrb[32].mxu0 %vm1593_vm13, %v17568_v42  ;;  %v17594_v49 = vld [vmem:[#allocation92_spill] sm:$0xff] }
 0x4ad   : > { %v10683_v7 = vpop.f32.mrb[188].mxu1  ;;  %6969 = vst.msk [vmem:[%s14653_s10 + $0x1b0] sm:$0xff] %vm1593_vm13, %v5906_v56  ;;  %11224 = vmatprep.mubr.msk.f32.mxu0 %vm1593_vm13, %v17569_v52  ;;  %v17595_v56 = vld [vmem:[#allocation94_spill] sm:$0xff] }
 0x4ae   : > { %5372 = vst.msk [vmem:[%s14614_s7 + $0x1e8] sm:$0xff] %vm1593_vm13, %v10683_v7  ;;  %v4332_v30 = vpop.f32.mrb[189].mxu1  ;;  %10841 = vmatmul.mubr.msk.f32.gmra.mrb[38].mxu1 %vm1593_vm13, %v17574_v39 }
 0x4af   : > { %5371 = vst.msk [vmem:[%s14614_s7 + $0x1e0] sm:$0xff] %vm1593_vm13, %v4332_v30  ;;  %10843 = vmatprep.mubr.msk.f32.mxu1 %vm1593_vm13, %v17575_v17  ;;  %v11067_v9 = vpop.f32.mrb[184].mxu0 }
 0x4b0   : > { %6972 = vst.msk [vmem:[%s14653_s10 + $0x1c8] sm:$0xff] %vm1593_vm13, %v11067_v9  ;;  %v5916_v50 = vpop.f32.mrb[185].mxu0  ;;  %11225 = vmatmul.mubr.msk.f32.gmra.mrb[34].mxu0 %vm1593_vm13, %v17570_v26  ;;  %v17596_v9 = vld [vmem:[#allocation95_spill] sm:$0xff] }
 0x4b1   : > { %v10686_v6 = vpop.f32.mrb[190].mxu1  ;;  %6971 = vst.msk [vmem:[%s14653_s10 + $0x1c0] sm:$0xff] %vm1593_vm13, %v5916_v50  ;;  %11227 = vmatprep.mubr.msk.f32.mxu0 %vm1593_vm13, %v17571_v32  ;;  %v17597_v50 = vld [vmem:[#allocation96_spill] sm:$0xff] }
 0x4b2   : > { %5374 = vst.msk [vmem:[%s14614_s7 + $0x1f8] sm:$0xff] %vm1593_vm13, %v10686_v6  ;;  %v4342_v53 = vpop.f32.mrb[191].mxu1  ;;  %10844 = vmatmul.mubr.msk.f32.gmra.mrb[40].mxu1 %vm1593_vm13, %v17576_v2 }
 0x4b3   : > { %5373 = vst.msk [vmem:[%s14614_s7 + $0x1f0] sm:$0xff] %vm1593_vm13, %v4342_v53  ;;  %10846 = vmatprep.mubr.msk.f32.mxu1 %vm1593_vm13, %v17577_v40  ;;  %v11070_v62 = vpop.f32.mrb[186].mxu0 }
 0x4b4   : > { %6974 = vst.msk [vmem:[%s14653_s10 + $0x1d8] sm:$0xff] %vm1593_vm13, %v11070_v62  ;;  %v5926_v27 = vpop.f32.mrb[187].mxu0  ;;  %11228 = vmatmul.mubr.msk.f32.gmra.mrb[36].mxu0 %vm1593_vm13, %v17572_v4  ;;  %v17598_v62 = vld [vmem:[#allocation98_spill] sm:$0xff] }
 0x4b5   : > { %v10689_v55 = vpop.f32.mrb[192].mxu1  ;;  %6973 = vst.msk [vmem:[%s14653_s10 + $0x1d0] sm:$0xff] %vm1593_vm13, %v5926_v27  ;;  %11230 = vmatprep.mubr.msk.f32.mxu0 %vm1593_vm13, %v17573_v18  ;;  %v17599_v27 = vld [vmem:[#allocation100_spill] sm:$0xff] }
 0x4b6   : > { %5376 = vst.msk [vmem:[%s14614_s7 + $0x208] sm:$0xff] %vm1593_vm13, %v10689_v55  ;;  %v4352_v60 = vpop.f32.mrb[193].mxu1  ;;  %10847 = vmatmul.mubr.msk.f32.gmra.mrb[42].mxu1 %vm1593_vm13, %v17578_v63 }
 0x4b7   : > { %5375 = vst.msk [vmem:[%s14614_s7 + $0x200] sm:$0xff] %vm1593_vm13, %v4352_v60  ;;  %10849 = vmatprep.mubr.msk.f32.mxu1 %vm1593_vm13, %v17579_v0  ;;  %v11073_v58 = vpop.f32.mrb[188].mxu0 }
 0x4b8   : > { %6976 = vst.msk [vmem:[%s14653_s10 + $0x1e8] sm:$0xff] %vm1593_vm13, %v11073_v58  ;;  %v5936_v16 = vpop.f32.mrb[189].mxu0  ;;  %11231 = vmatmul.mubr.msk.f32.gmra.mrb[38].mxu0 %vm1593_vm13, %v17574_v39  ;;  %v17600_v58 = vld [vmem:[#allocation102_spill] sm:$0xff] }
 0x4b9   : > { %v10692_v12 = vpop.f32.mrb[194].mxu1  ;;  %6975 = vst.msk [vmem:[%s14653_s10 + $0x1e0] sm:$0xff] %vm1593_vm13, %v5936_v16  ;;  %11233 = vmatprep.mubr.msk.f32.mxu0 %vm1593_vm13, %v17575_v17  ;;  %v17601_v16 = vld [vmem:[#allocation104_spill] sm:$0xff] }
 0x4ba   : > { %5378 = vst.msk [vmem:[%s14614_s7 + $0x218] sm:$0xff] %vm1593_vm13, %v10692_v12  ;;  %v4362_v25 = vpop.f32.mrb[195].mxu1  ;;  %10850 = vmatmul.mubr.msk.f32.gmra.mrb[44].mxu1 %vm1593_vm13, %v17580_v8 }
 0x4bb   : > { %5377 = vst.msk [vmem:[%s14614_s7 + $0x210] sm:$0xff] %vm1593_vm13, %v4362_v25  ;;  %10852 = vmatprep.mubr.msk.f32.mxu1 %vm1593_vm13, %v17581_v34  ;;  %v11076_v38 = vpop.f32.mrb[190].mxu0 }
 0x4bc   : > { %6978 = vst.msk [vmem:[%s14653_s10 + $0x1f8] sm:$0xff] %vm1593_vm13, %v11076_v38  ;;  %v5946_v45 = vpop.f32.mrb[191].mxu0  ;;  %11234 = vmatmul.mubr.msk.f32.gmra.mrb[40].mxu0 %vm1593_vm13, %v17576_v2  ;;  %v17602_v38 = vld [vmem:[#allocation106_spill] sm:$0xff] }
 0x4bd   : > { %v10695_v59 = vpop.f32.mrb[196].mxu1  ;;  %6977 = vst.msk [vmem:[%s14653_s10 + $0x1f0] sm:$0xff] %vm1593_vm13, %v5946_v45  ;;  %11236 = vmatprep.mubr.msk.f32.mxu0 %vm1593_vm13, %v17577_v40  ;;  %v17603_v45 = vld [vmem:[#allocation108_spill] sm:$0xff] }
 0x4be   : > { %5380 = vst.msk [vmem:[%s14614_s7 + $0x228] sm:$0xff] %vm1593_vm13, %v10695_v59  ;;  %v4372_v61 = vpop.f32.mrb[197].mxu1  ;;  %10853 = vmatmul.mubr.msk.f32.gmra.mrb[46].mxu1 %vm1593_vm13, %v17582_v24 }
 0x4bf   : > { %5379 = vst.msk [vmem:[%s14614_s7 + $0x220] sm:$0xff] %vm1593_vm13, %v4372_v61  ;;  %10855 = vmatprep.mubr.msk.f32.mxu1 %vm1593_vm13, %v17583_v1  ;;  %v11079_v3 = vpop.f32.mrb[192].mxu0 }
 0x4c0   : > { %6980 = vst.msk [vmem:[%s14653_s10 + $0x208] sm:$0xff] %vm1593_vm13, %v11079_v3  ;;  %v5956_v21 = vpop.f32.mrb[193].mxu0  ;;  %11237 = vmatmul.mubr.msk.f32.gmra.mrb[42].mxu0 %vm1593_vm13, %v17578_v63  ;;  %v17604_v3 = vld [vmem:[#allocation110_spill] sm:$0xff] }
 0x4c1   : > { %v10698_v46 = vpop.f32.mrb[198].mxu1  ;;  %6979 = vst.msk [vmem:[%s14653_s10 + $0x200] sm:$0xff] %vm1593_vm13, %v5956_v21  ;;  %11239 = vmatprep.mubr.msk.f32.mxu0 %vm1593_vm13, %v17579_v0  ;;  %v17605_v21 = vld [vmem:[#allocation112_spill] sm:$0xff] }
 0x4c2   : > { %5382 = vst.msk [vmem:[%s14614_s7 + $0x238] sm:$0xff] %vm1593_vm13, %v10698_v46  ;;  %v4382_v35 = vpop.f32.mrb[199].mxu1  ;;  %10856 = vmatmul.mubr.msk.f32.gmra.mrb[48].mxu1 %vm1593_vm13, %v17584_v23 }
 0x4c3   : > { %5381 = vst.msk [vmem:[%s14614_s7 + $0x230] sm:$0xff] %vm1593_vm13, %v4382_v35  ;;  %10858 = vmatprep.mubr.msk.f32.mxu1 %vm1593_vm13, %v17585_v44  ;;  %v11082_v33 = vpop.f32.mrb[194].mxu0 }
 0x4c4   : > { %6982 = vst.msk [vmem:[%s14653_s10 + $0x218] sm:$0xff] %vm1593_vm13, %v11082_v33  ;;  %v5966_v41 = vpop.f32.mrb[195].mxu0  ;;  %11240 = vmatmul.mubr.msk.f32.gmra.mrb[44].mxu0 %vm1593_vm13, %v17580_v8  ;;  %v17606_v33 = vld [vmem:[#allocation114_spill] sm:$0xff] }
 0x4c5   : > { %v10701_v13 = vpop.f32.mrb[200].mxu1  ;;  %6981 = vst.msk [vmem:[%s14653_s10 + $0x210] sm:$0xff] %vm1593_vm13, %v5966_v41  ;;  %11242 = vmatprep.mubr.msk.f32.mxu0 %vm1593_vm13, %v17581_v34  ;;  %v17607_v41 = vld [vmem:[#allocation116_spill] sm:$0xff] }
 0x4c6   : > { %5384 = vst.msk [vmem:[%s14614_s7 + $0x248] sm:$0xff] %vm1593_vm13, %v10701_v13  ;;  %v4392_v10 = vpop.f32.mrb[201].mxu1  ;;  %10859 = vmatmul.mubr.msk.f32.gmra.mrb[50].mxu1 %vm1593_vm13, %v17586_v29 }
 0x4c7   : > { %5383 = vst.msk [vmem:[%s14614_s7 + $0x240] sm:$0xff] %vm1593_vm13, %v4392_v10  ;;  %10861 = vmatprep.mubr.msk.f32.mxu1 %vm1593_vm13, %v17587_v22  ;;  %v11085_v20 = vpop.f32.mrb[196].mxu0 }
 0x4c8   : > { %6984 = vst.msk [vmem:[%s14653_s10 + $0x228] sm:$0xff] %vm1593_vm13, %v11085_v20  ;;  %v5976_v11 = vpop.f32.mrb[197].mxu0  ;;  %11243 = vmatmul.mubr.msk.f32.gmra.mrb[46].mxu0 %vm1593_vm13, %v17582_v24  ;;  %v17608_v20 = vld [vmem:[#allocation117_spill] sm:$0xff] }
 0x4c9   : > { %v10704_v31 = vpop.f32.mrb[202].mxu1  ;;  %6983 = vst.msk [vmem:[%s14653_s10 + $0x220] sm:$0xff] %vm1593_vm13, %v5976_v11  ;;  %11245 = vmatprep.mubr.msk.f32.mxu0 %vm1593_vm13, %v17583_v1  ;;  %v17609_v11 = vld [vmem:[#allocation118_spill] sm:$0xff] }
 0x4ca   : > { %5386 = vst.msk [vmem:[%s14614_s7 + $0x258] sm:$0xff] %vm1593_vm13, %v10704_v31  ;;  %v4402_v47 = vpop.f32.mrb[203].mxu1  ;;  %10862 = vmatmul.mubr.msk.f32.gmra.mrb[52].mxu1 %vm1593_vm13, %v17588_v36 }
 0x4cb   : > { %5385 = vst.msk [vmem:[%s14614_s7 + $0x250] sm:$0xff] %vm1593_vm13, %v4402_v47  ;;  %10864 = vmatprep.mubr.msk.f32.mxu1 %vm1593_vm13, %v17589_v54  ;;  %v11088_v57 = vpop.f32.mrb[198].mxu0 }
 0x4cc   : > { %6986 = vst.msk [vmem:[%s14653_s10 + $0x238] sm:$0xff] %vm1593_vm13, %v11088_v57  ;;  %v5986_v37 = vpop.f32.mrb[199].mxu0  ;;  %11246 = vmatmul.mubr.msk.f32.gmra.mrb[48].mxu0 %vm1593_vm13, %v17584_v23  ;;  %v17610_v57 = vld [vmem:[#allocation119_spill] sm:$0xff] }
 0x4cd   : > { %v10707_v42 = vpop.f32.mrb[204].mxu1  ;;  %6985 = vst.msk [vmem:[%s14653_s10 + $0x230] sm:$0xff] %vm1593_vm13, %v5986_v37  ;;  %11248 = vmatprep.mubr.msk.f32.mxu0 %vm1593_vm13, %v17585_v44  ;;  %v17611_v37 = vld [vmem:[#allocation120_spill] sm:$0xff] }
 0x4ce   : > { %5388 = vst.msk [vmem:[%s14614_s7 + $0x268] sm:$0xff] %vm1593_vm13, %v10707_v42  ;;  %v4412_v52 = vpop.f32.mrb[205].mxu1  ;;  %10865 = vmatmul.mubr.msk.f32.gmra.mrb[54].mxu1 %vm1593_vm13, %v17590_v51 }
 0x4cf   : > { %5387 = vst.msk [vmem:[%s14614_s7 + $0x260] sm:$0xff] %vm1593_vm13, %v4412_v52  ;;  %10867 = vmatprep.mubr.msk.f32.mxu1 %vm1593_vm13, %v17591_v43  ;;  %v11091_v28 = vpop.f32.mrb[200].mxu0 }
 0x4d0   : > { %6988 = vst.msk [vmem:[%s14653_s10 + $0x248] sm:$0xff] %vm1593_vm13, %v11091_v28  ;;  %v5996_v19 = vpop.f32.mrb[201].mxu0  ;;  %11249 = vmatmul.mubr.msk.f32.gmra.mrb[50].mxu0 %vm1593_vm13, %v17586_v29  ;;  %v17612_v28 = vld [vmem:[#allocation121_spill] sm:$0xff] }
 0x4d1   : > { %v10710_v26 = vpop.f32.mrb[206].mxu1  ;;  %6987 = vst.msk [vmem:[%s14653_s10 + $0x240] sm:$0xff] %vm1593_vm13, %v5996_v19  ;;  %11251 = vmatprep.mubr.msk.f32.mxu0 %vm1593_vm13, %v17587_v22  ;;  %v17613_v19 = vld [vmem:[#allocation122_spill] sm:$0xff] }
 0x4d2   : > { %5390 = vst.msk [vmem:[%s14614_s7 + $0x278] sm:$0xff] %vm1593_vm13, %v10710_v26  ;;  %v4422_v32 = vpop.f32.mrb[207].mxu1  ;;  %10868 = vmatmul.mubr.msk.f32.gmra.mrb[56].mxu1 %vm1593_vm13, %v17592_v14 }
 0x4d3   : > { %5389 = vst.msk [vmem:[%s14614_s7 + $0x270] sm:$0xff] %vm1593_vm13, %v4422_v32  ;;  %10870 = vmatprep.mubr.msk.f32.mxu1 %vm1593_vm13, %v17593_v15  ;;  %v11094_v5 = vpop.f32.mrb[202].mxu0 }
 0x4d4   : > { %6990 = vst.msk [vmem:[%s14653_s10 + $0x258] sm:$0xff] %vm1593_vm13, %v11094_v5  ;;  %v6006_v48 = vpop.f32.mrb[203].mxu0  ;;  %11252 = vmatmul.mubr.msk.f32.gmra.mrb[52].mxu0 %vm1593_vm13, %v17588_v36  ;;  %v17614_v5 = vld [vmem:[#allocation123_spill] sm:$0xff] }
 0x4d5   : > { %v10713_v4 = vpop.f32.mrb[208].mxu1  ;;  %6989 = vst.msk [vmem:[%s14653_s10 + $0x250] sm:$0xff] %vm1593_vm13, %v6006_v48  ;;  %11254 = vmatprep.mubr.msk.f32.mxu0 %vm1593_vm13, %v17589_v54  ;;  %v17615_v48 = vld [vmem:[#allocation124_spill] sm:$0xff] }
 0x4d6   : > { %5392 = vst.msk [vmem:[%s14614_s7 + $0x288] sm:$0xff] %vm1593_vm13, %v10713_v4  ;;  %v4432_v18 = vpop.f32.mrb[209].mxu1  ;;  %10871 = vmatmul.mubr.msk.f32.gmra.mrb[58].mxu1 %vm1593_vm13, %v17594_v49 }
 0x4d7   : > { %5391 = vst.msk [vmem:[%s14614_s7 + $0x280] sm:$0xff] %vm1593_vm13, %v4432_v18  ;;  %10873 = vmatprep.mubr.msk.f32.mxu1 %vm1593_vm13, %v17595_v56  ;;  %v11097_v7 = vpop.f32.mrb[204].mxu0 }
 0x4d8   : > { %6992 = vst.msk [vmem:[%s14653_s10 + $0x268] sm:$0xff] %vm1593_vm13, %v11097_v7  ;;  %v6016_v30 = vpop.f32.mrb[205].mxu0  ;;  %11255 = vmatmul.mubr.msk.f32.gmra.mrb[54].mxu0 %vm1593_vm13, %v17590_v51  ;;  %v17616_v7 = vld [vmem:[#allocation125_spill] sm:$0xff] }
 0x4d9   : > { %v10716_v39 = vpop.f32.mrb[210].mxu1  ;;  %6991 = vst.msk [vmem:[%s14653_s10 + $0x260] sm:$0xff] %vm1593_vm13, %v6016_v30  ;;  %11257 = vmatprep.mubr.msk.f32.mxu0 %vm1593_vm13, %v17591_v43  ;;  %v17617_v30 = vld [vmem:[#allocation126_spill] sm:$0xff] }
 0x4da   : > { %5394 = vst.msk [vmem:[%s14614_s7 + $0x298] sm:$0xff] %vm1593_vm13, %v10716_v39  ;;  %v4442_v17 = vpop.f32.mrb[211].mxu1  ;;  %10874 = vmatmul.mubr.msk.f32.gmra.mrb[60].mxu1 %vm1593_vm13, %v17596_v9 }
 0x4db   : > { %5393 = vst.msk [vmem:[%s14614_s7 + $0x290] sm:$0xff] %vm1593_vm13, %v4442_v17  ;;  %10876 = vmatprep.mubr.msk.f32.mxu1 %vm1593_vm13, %v17597_v50  ;;  %v11100_v6 = vpop.f32.mrb[206].mxu0 }
 0x4dc   : > { %6994 = vst.msk [vmem:[%s14653_s10 + $0x278] sm:$0xff] %vm1593_vm13, %v11100_v6  ;;  %v6026_v53 = vpop.f32.mrb[207].mxu0  ;;  %11258 = vmatmul.mubr.msk.f32.gmra.mrb[56].mxu0 %vm1593_vm13, %v17592_v14  ;;  %v17618_v6 = vld [vmem:[#allocation127_spill] sm:$0xff] }
 0x4dd   : > { %v10719_v2 = vpop.f32.mrb[212].mxu1  ;;  %6993 = vst.msk [vmem:[%s14653_s10 + $0x270] sm:$0xff] %vm1593_vm13, %v6026_v53  ;;  %11260 = vmatprep.mubr.msk.f32.mxu0 %vm1593_vm13, %v17593_v15  ;;  %v17619_v53 = vld [vmem:[#allocation128_spill] sm:$0xff] }
 0x4de   : > { %5396 = vst.msk [vmem:[%s14614_s7 + $0x2a8] sm:$0xff] %vm1593_vm13, %v10719_v2  ;;  %v4452_v40 = vpop.f32.mrb[213].mxu1  ;;  %10877 = vmatmul.mubr.msk.f32.gmra.mrb[62].mxu1 %vm1593_vm13, %v17598_v62 }
 0x4df   : > { %5395 = vst.msk [vmem:[%s14614_s7 + $0x2a0] sm:$0xff] %vm1593_vm13, %v4452_v40  ;;  %10879 = vmatprep.mubr.msk.f32.mxu1 %vm1593_vm13, %v17599_v27  ;;  %v11103_v55 = vpop.f32.mrb[208].mxu0 }
 0x4e0   : > { %6996 = vst.msk [vmem:[%s14653_s10 + $0x288] sm:$0xff] %vm1593_vm13, %v11103_v55  ;;  %v6036_v60 = vpop.f32.mrb[209].mxu0  ;;  %11261 = vmatmul.mubr.msk.f32.gmra.mrb[58].mxu0 %vm1593_vm13, %v17594_v49  ;;  %v17620_v55 = vld [vmem:[#allocation129_spill] sm:$0xff] }
 0x4e1   : > { %v10722_v63 = vpop.f32.mrb[214].mxu1  ;;  %6995 = vst.msk [vmem:[%s14653_s10 + $0x280] sm:$0xff] %vm1593_vm13, %v6036_v60  ;;  %11263 = vmatprep.mubr.msk.f32.mxu0 %vm1593_vm13, %v17595_v56  ;;  %v17621_v60 = vld [vmem:[#allocation130_spill] sm:$0xff] }
 0x4e2   : > { %5398 = vst.msk [vmem:[%s14614_s7 + $0x2b8] sm:$0xff] %vm1593_vm13, %v10722_v63  ;;  %v4462_v0 = vpop.f32.mrb[215].mxu1  ;;  %10880 = vmatmul.mubr.msk.f32.gmra.mrb[64].mxu1 %vm1593_vm13, %v17600_v58 }
 0x4e3   : > { %5397 = vst.msk [vmem:[%s14614_s7 + $0x2b0] sm:$0xff] %vm1593_vm13, %v4462_v0  ;;  %10882 = vmatprep.mubr.msk.f32.mxu1 %vm1593_vm13, %v17601_v16  ;;  %v11106_v12 = vpop.f32.mrb[210].mxu0 }
 0x4e4   : > { %6998 = vst.msk [vmem:[%s14653_s10 + $0x298] sm:$0xff] %vm1593_vm13, %v11106_v12  ;;  %v6046_v25 = vpop.f32.mrb[211].mxu0  ;;  %11264 = vmatmul.mubr.msk.f32.gmra.mrb[60].mxu0 %vm1593_vm13, %v17596_v9  ;;  %v17622_v12 = vld [vmem:[#allocation131_spill] sm:$0xff] }
 0x4e5   : > { %v10725_v8 = vpop.f32.mrb[216].mxu1  ;;  %6997 = vst.msk [vmem:[%s14653_s10 + $0x290] sm:$0xff] %vm1593_vm13, %v6046_v25  ;;  %11266 = vmatprep.mubr.msk.f32.mxu0 %vm1593_vm13, %v17597_v50  ;;  %v17623_v25 = vld [vmem:[#allocation132_spill] sm:$0xff] }
 0x4e6   : > { %5400 = vst.msk [vmem:[%s14614_s7 + $0x2c8] sm:$0xff] %vm1593_vm13, %v10725_v8  ;;  %v4472_v34 = vpop.f32.mrb[217].mxu1  ;;  %10883 = vmatmul.mubr.msk.f32.gmra.mrb[66].mxu1 %vm1593_vm13, %v17602_v38 }
 0x4e7   : > { %5399 = vst.msk [vmem:[%s14614_s7 + $0x2c0] sm:$0xff] %vm1593_vm13, %v4472_v34  ;;  %10885 = vmatprep.mubr.msk.f32.mxu1 %vm1593_vm13, %v17603_v45  ;;  %v11109_v59 = vpop.f32.mrb[212].mxu0 }
 0x4e8   : > { %7000 = vst.msk [vmem:[%s14653_s10 + $0x2a8] sm:$0xff] %vm1593_vm13, %v11109_v59  ;;  %v6056_v61 = vpop.f32.mrb[213].mxu0  ;;  %11267 = vmatmul.mubr.msk.f32.gmra.mrb[62].mxu0 %vm1593_vm13, %v17598_v62  ;;  %v17624_v59 = vld [vmem:[#allocation134_spill] sm:$0xff] }
 0x4e9   : > { %v10728_v24 = vpop.f32.mrb[218].mxu1  ;;  %6999 = vst.msk [vmem:[%s14653_s10 + $0x2a0] sm:$0xff] %vm1593_vm13, %v6056_v61  ;;  %11269 = vmatprep.mubr.msk.f32.mxu0 %vm1593_vm13, %v17599_v27  ;;  %v17625_v61 = vld [vmem:[#allocation136_spill] sm:$0xff] }
 0x4ea   : > { %5402 = vst.msk [vmem:[%s14614_s7 + $0x2d8] sm:$0xff] %vm1593_vm13, %v10728_v24  ;;  %v4482_v1 = vpop.f32.mrb[219].mxu1  ;;  %10886 = vmatmul.mubr.msk.f32.gmra.mrb[68].mxu1 %vm1593_vm13, %v17604_v3 }
 0x4eb   : > { %5401 = vst.msk [vmem:[%s14614_s7 + $0x2d0] sm:$0xff] %vm1593_vm13, %v4482_v1  ;;  %10888 = vmatprep.mubr.msk.f32.mxu1 %vm1593_vm13, %v17605_v21  ;;  %v11112_v46 = vpop.f32.mrb[214].mxu0 }
 0x4ec   : > { %7002 = vst.msk [vmem:[%s14653_s10 + $0x2b8] sm:$0xff] %vm1593_vm13, %v11112_v46  ;;  %v6066_v35 = vpop.f32.mrb[215].mxu0  ;;  %11270 = vmatmul.mubr.msk.f32.gmra.mrb[64].mxu0 %vm1593_vm13, %v17600_v58  ;;  %v17626_v46 = vld [vmem:[#allocation138_spill] sm:$0xff] }
 0x4ed   : > { %v10731_v23 = vpop.f32.mrb[220].mxu1  ;;  %7001 = vst.msk [vmem:[%s14653_s10 + $0x2b0] sm:$0xff] %vm1593_vm13, %v6066_v35  ;;  %11272 = vmatprep.mubr.msk.f32.mxu0 %vm1593_vm13, %v17601_v16  ;;  %v17627_v35 = vld [vmem:[#allocation140_spill] sm:$0xff] }
 0x4ee   : > { %5404 = vst.msk [vmem:[%s14614_s7 + $0x2e8] sm:$0xff] %vm1593_vm13, %v10731_v23  ;;  %v4492_v44 = vpop.f32.mrb[221].mxu1  ;;  %10889 = vmatmul.mubr.msk.f32.gmra.mrb[70].mxu1 %vm1593_vm13, %v17606_v33 }
 0x4ef   : > { %5403 = vst.msk [vmem:[%s14614_s7 + $0x2e0] sm:$0xff] %vm1593_vm13, %v4492_v44  ;;  %10891 = vmatprep.mubr.msk.f32.mxu1 %vm1593_vm13, %v17607_v41  ;;  %v11115_v13 = vpop.f32.mrb[216].mxu0 }
 0x4f0   : > { %7004 = vst.msk [vmem:[%s14653_s10 + $0x2c8] sm:$0xff] %vm1593_vm13, %v11115_v13  ;;  %v6076_v10 = vpop.f32.mrb[217].mxu0  ;;  %11273 = vmatmul.mubr.msk.f32.gmra.mrb[66].mxu0 %vm1593_vm13, %v17602_v38  ;;  %v17628_v13 = vld [vmem:[#allocation142_spill] sm:$0xff] }
 0x4f1   : > { %v10734_v29 = vpop.f32.mrb[222].mxu1  ;;  %7003 = vst.msk [vmem:[%s14653_s10 + $0x2c0] sm:$0xff] %vm1593_vm13, %v6076_v10  ;;  %11275 = vmatprep.mubr.msk.f32.mxu0 %vm1593_vm13, %v17603_v45  ;;  %v17629_v10 = vld [vmem:[#allocation144_spill] sm:$0xff] }
 0x4f2   : > { %5406 = vst.msk [vmem:[%s14614_s7 + $0x2f8] sm:$0xff] %vm1593_vm13, %v10734_v29  ;;  %v4502_v22 = vpop.f32.mrb[223].mxu1  ;;  %10892 = vmatmul.mubr.msk.f32.gmra.mrb[72].mxu1 %vm1593_vm13, %v17608_v20 }
 0x4f3   : > { %5405 = vst.msk [vmem:[%s14614_s7 + $0x2f0] sm:$0xff] %vm1593_vm13, %v4502_v22  ;;  %10894 = vmatprep.mubr.msk.f32.mxu1 %vm1593_vm13, %v17609_v11  ;;  %v11118_v31 = vpop.f32.mrb[218].mxu0 }
 0x4f4   : > { %7006 = vst.msk [vmem:[%s14653_s10 + $0x2d8] sm:$0xff] %vm1593_vm13, %v11118_v31  ;;  %v6086_v47 = vpop.f32.mrb[219].mxu0  ;;  %11276 = vmatmul.mubr.msk.f32.gmra.mrb[68].mxu0 %vm1593_vm13, %v17604_v3  ;;  %v17630_v31 = vld [vmem:[#allocation146_spill] sm:$0xff] }
 0x4f5   : > { %v10737_v36 = vpop.f32.mrb[224].mxu1  ;;  %7005 = vst.msk [vmem:[%s14653_s10 + $0x2d0] sm:$0xff] %vm1593_vm13, %v6086_v47  ;;  %11278 = vmatprep.mubr.msk.f32.mxu0 %vm1593_vm13, %v17605_v21  ;;  %v17631_v47 = vld [vmem:[#allocation148_spill] sm:$0xff] }
 0x4f6   : > { %5408 = vst.msk [vmem:[%s14614_s7 + $0x308] sm:$0xff] %vm1593_vm13, %v10737_v36  ;;  %v4512_v54 = vpop.f32.mrb[225].mxu1  ;;  %10895 = vmatmul.mubr.msk.f32.gmra.mrb[74].mxu1 %vm1593_vm13, %v17610_v57 }
 0x4f7   : > { %5407 = vst.msk [vmem:[%s14614_s7 + $0x300] sm:$0xff] %vm1593_vm13, %v4512_v54  ;;  %10897 = vmatprep.mubr.msk.f32.mxu1 %vm1593_vm13, %v17611_v37  ;;  %v11121_v42 = vpop.f32.mrb[220].mxu0 }
 0x4f8   : > { %7008 = vst.msk [vmem:[%s14653_s10 + $0x2e8] sm:$0xff] %vm1593_vm13, %v11121_v42  ;;  %v6096_v52 = vpop.f32.mrb[221].mxu0  ;;  %11279 = vmatmul.mubr.msk.f32.gmra.mrb[70].mxu0 %vm1593_vm13, %v17606_v33  ;;  %v17632_v42 = vld [vmem:[#allocation150_spill] sm:$0xff] }
 0x4f9   : > { %v10740_v51 = vpop.f32.mrb[226].mxu1  ;;  %7007 = vst.msk [vmem:[%s14653_s10 + $0x2e0] sm:$0xff] %vm1593_vm13, %v6096_v52  ;;  %11281 = vmatprep.mubr.msk.f32.mxu0 %vm1593_vm13, %v17607_v41  ;;  %v17633_v52 = vld [vmem:[#allocation152_spill] sm:$0xff] }
 0x4fa   : > { %5410 = vst.msk [vmem:[%s14614_s7 + $0x318] sm:$0xff] %vm1593_vm13, %v10740_v51  ;;  %v4522_v43 = vpop.f32.mrb[227].mxu1  ;;  %10898 = vmatmul.mubr.msk.f32.gmra.mrb[76].mxu1 %vm1593_vm13, %v17612_v28 }
 0x4fb   : > { %5409 = vst.msk [vmem:[%s14614_s7 + $0x310] sm:$0xff] %vm1593_vm13, %v4522_v43  ;;  %10900 = vmatprep.mubr.msk.f32.mxu1 %vm1593_vm13, %v17613_v19  ;;  %v11124_v26 = vpop.f32.mrb[222].mxu0 }
 0x4fc   : > { %7010 = vst.msk [vmem:[%s14653_s10 + $0x2f8] sm:$0xff] %vm1593_vm13, %v11124_v26  ;;  %v6106_v32 = vpop.f32.mrb[223].mxu0  ;;  %11282 = vmatmul.mubr.msk.f32.gmra.mrb[72].mxu0 %vm1593_vm13, %v17608_v20  ;;  %v17634_v26 = vld [vmem:[#allocation154_spill] sm:$0xff] }
 0x4fd   : > { %v10743_v14 = vpop.f32.mrb[228].mxu1  ;;  %7009 = vst.msk [vmem:[%s14653_s10 + $0x2f0] sm:$0xff] %vm1593_vm13, %v6106_v32  ;;  %11284 = vmatprep.mubr.msk.f32.mxu0 %vm1593_vm13, %v17609_v11  ;;  %v17635_v32 = vld [vmem:[#allocation156_spill] sm:$0xff] }
 0x4fe   : > { %5412 = vst.msk [vmem:[%s14614_s7 + $0x328] sm:$0xff] %vm1593_vm13, %v10743_v14  ;;  %v4532_v15 = vpop.f32.mrb[229].mxu1  ;;  %10901 = vmatmul.mubr.msk.f32.gmra.mrb[78].mxu1 %vm1593_vm13, %v17614_v5 }
 0x4ff   : > { %5411 = vst.msk [vmem:[%s14614_s7 + $0x320] sm:$0xff] %vm1593_vm13, %v4532_v15  ;;  %10903 = vmatprep.mubr.msk.f32.mxu1 %vm1593_vm13, %v17615_v48  ;;  %v11127_v4 = vpop.f32.mrb[224].mxu0 }
 0x500   : > { %7012 = vst.msk [vmem:[%s14653_s10 + $0x308] sm:$0xff] %vm1593_vm13, %v11127_v4  ;;  %v6116_v18 = vpop.f32.mrb[225].mxu0  ;;  %11285 = vmatmul.mubr.msk.f32.gmra.mrb[74].mxu0 %vm1593_vm13, %v17610_v57  ;;  %v17636_v4 = vld [vmem:[#allocation158_spill] sm:$0xff] }
 0x501   : > { %v10746_v49 = vpop.f32.mrb[230].mxu1  ;;  %7011 = vst.msk [vmem:[%s14653_s10 + $0x300] sm:$0xff] %vm1593_vm13, %v6116_v18  ;;  %11287 = vmatprep.mubr.msk.f32.mxu0 %vm1593_vm13, %v17611_v37  ;;  %v17637_v18 = vld [vmem:[#allocation160_spill] sm:$0xff] }
 0x502   : > { %5414 = vst.msk [vmem:[%s14614_s7 + $0x338] sm:$0xff] %vm1593_vm13, %v10746_v49  ;;  %v4542_v56 = vpop.f32.mrb[231].mxu1  ;;  %10904 = vmatmul.mubr.msk.f32.gmra.mrb[80].mxu1 %vm1593_vm13, %v17616_v7 }
 0x503   : > { %5413 = vst.msk [vmem:[%s14614_s7 + $0x330] sm:$0xff] %vm1593_vm13, %v4542_v56  ;;  %10906 = vmatprep.mubr.msk.f32.mxu1 %vm1593_vm13, %v17617_v30  ;;  %v11130_v39 = vpop.f32.mrb[226].mxu0 }
 0x504   : > { %7014 = vst.msk [vmem:[%s14653_s10 + $0x318] sm:$0xff] %vm1593_vm13, %v11130_v39  ;;  %v6126_v17 = vpop.f32.mrb[227].mxu0  ;;  %11288 = vmatmul.mubr.msk.f32.gmra.mrb[76].mxu0 %vm1593_vm13, %v17612_v28  ;;  %v17638_v39 = vld [vmem:[#allocation162_spill] sm:$0xff] }
 0x505   : > { %v10749_v9 = vpop.f32.mrb[232].mxu1  ;;  %7013 = vst.msk [vmem:[%s14653_s10 + $0x310] sm:$0xff] %vm1593_vm13, %v6126_v17  ;;  %11290 = vmatprep.mubr.msk.f32.mxu0 %vm1593_vm13, %v17613_v19  ;;  %v17639_v17 = vld [vmem:[#allocation164_spill] sm:$0xff] }
 0x506   : > { %5416 = vst.msk [vmem:[%s14614_s7 + $0x348] sm:$0xff] %vm1593_vm13, %v10749_v9  ;;  %v4552_v50 = vpop.f32.mrb[233].mxu1  ;;  %10907 = vmatmul.mubr.msk.f32.gmra.mrb[82].mxu1 %vm1593_vm13, %v17618_v6 }
 0x507   : > { %5415 = vst.msk [vmem:[%s14614_s7 + $0x340] sm:$0xff] %vm1593_vm13, %v4552_v50  ;;  %10909 = vmatprep.mubr.msk.f32.mxu1 %vm1593_vm13, %v17619_v53  ;;  %v11133_v2 = vpop.f32.mrb[228].mxu0 }
 0x508   : > { %7016 = vst.msk [vmem:[%s14653_s10 + $0x328] sm:$0xff] %vm1593_vm13, %v11133_v2  ;;  %v6136_v40 = vpop.f32.mrb[229].mxu0  ;;  %11291 = vmatmul.mubr.msk.f32.gmra.mrb[78].mxu0 %vm1593_vm13, %v17614_v5  ;;  %v17640_v2 = vld [vmem:[#allocation166_spill] sm:$0xff] }
 0x509   : > { %v10752_v62 = vpop.f32.mrb[234].mxu1  ;;  %7015 = vst.msk [vmem:[%s14653_s10 + $0x320] sm:$0xff] %vm1593_vm13, %v6136_v40  ;;  %11293 = vmatprep.mubr.msk.f32.mxu0 %vm1593_vm13, %v17615_v48  ;;  %v17641_v40 = vld [vmem:[#allocation168_spill] sm:$0xff] }
 0x50a   : > { %5418 = vst.msk [vmem:[%s14614_s7 + $0x358] sm:$0xff] %vm1593_vm13, %v10752_v62  ;;  %v4562_v27 = vpop.f32.mrb[235].mxu1  ;;  %10910 = vmatmul.mubr.msk.f32.gmra.mrb[84].mxu1 %vm1593_vm13, %v17620_v55 }
 0x50b   : > { %5417 = vst.msk [vmem:[%s14614_s7 + $0x350] sm:$0xff] %vm1593_vm13, %v4562_v27  ;;  %10912 = vmatprep.mubr.msk.f32.mxu1 %vm1593_vm13, %v17621_v60  ;;  %v11136_v63 = vpop.f32.mrb[230].mxu0 }
 0x50c   : > { %7018 = vst.msk [vmem:[%s14653_s10 + $0x338] sm:$0xff] %vm1593_vm13, %v11136_v63  ;;  %v6146_v0 = vpop.f32.mrb[231].mxu0  ;;  %11294 = vmatmul.mubr.msk.f32.gmra.mrb[80].mxu0 %vm1593_vm13, %v17616_v7  ;;  %v17642_v63 = vld [vmem:[#allocation170_spill] sm:$0xff] }
 0x50d   : > { %v10755_v58 = vpop.f32.mrb[236].mxu1  ;;  %7017 = vst.msk [vmem:[%s14653_s10 + $0x330] sm:$0xff] %vm1593_vm13, %v6146_v0  ;;  %11296 = vmatprep.mubr.msk.f32.mxu0 %vm1593_vm13, %v17617_v30  ;;  %v17643_v0 = vld [vmem:[#allocation172_spill] sm:$0xff] }
 0x50e   : > { %5420 = vst.msk [vmem:[%s14614_s7 + $0x368] sm:$0xff] %vm1593_vm13, %v10755_v58  ;;  %v4572_v16 = vpop.f32.mrb[237].mxu1  ;;  %10913 = vmatmul.mubr.msk.f32.gmra.mrb[86].mxu1 %vm1593_vm13, %v17622_v12 }
 0x50f   : > { %5419 = vst.msk [vmem:[%s14614_s7 + $0x360] sm:$0xff] %vm1593_vm13, %v4572_v16  ;;  %10915 = vmatprep.mubr.msk.f32.mxu1 %vm1593_vm13, %v17623_v25  ;;  %v11139_v8 = vpop.f32.mrb[232].mxu0 }
 0x510   : > { %7020 = vst.msk [vmem:[%s14653_s10 + $0x348] sm:$0xff] %vm1593_vm13, %v11139_v8  ;;  %v6156_v34 = vpop.f32.mrb[233].mxu0  ;;  %11297 = vmatmul.mubr.msk.f32.gmra.mrb[82].mxu0 %vm1593_vm13, %v17618_v6  ;;  %v17644_v8 = vld [vmem:[#allocation174_spill] sm:$0xff] }
 0x511   : > { %v10758_v38 = vpop.f32.mrb[238].mxu1  ;;  %7019 = vst.msk [vmem:[%s14653_s10 + $0x340] sm:$0xff] %vm1593_vm13, %v6156_v34  ;;  %11299 = vmatprep.mubr.msk.f32.mxu0 %vm1593_vm13, %v17619_v53  ;;  %v17645_v34 = vld [vmem:[#allocation176_spill] sm:$0xff] }
 0x512   : > { %5422 = vst.msk [vmem:[%s14614_s7 + $0x378] sm:$0xff] %vm1593_vm13, %v10758_v38  ;;  %v4582_v45 = vpop.f32.mrb[239].mxu1  ;;  %10916 = vmatmul.mubr.msk.f32.gmra.mrb[88].mxu1 %vm1593_vm13, %v17624_v59 }
 0x513   : > { %5421 = vst.msk [vmem:[%s14614_s7 + $0x370] sm:$0xff] %vm1593_vm13, %v4582_v45  ;;  %10918 = vmatprep.mubr.msk.f32.mxu1 %vm1593_vm13, %v17625_v61  ;;  %v11142_v24 = vpop.f32.mrb[234].mxu0 }
 0x514   : > { %7022 = vst.msk [vmem:[%s14653_s10 + $0x358] sm:$0xff] %vm1593_vm13, %v11142_v24  ;;  %v6166_v1 = vpop.f32.mrb[235].mxu0  ;;  %11300 = vmatmul.mubr.msk.f32.gmra.mrb[84].mxu0 %vm1593_vm13, %v17620_v55  ;;  %v17646_v24 = vld [vmem:[#allocation178_spill] sm:$0xff] }
 0x515   : > { %v10761_v3 = vpop.f32.mrb[240].mxu1  ;;  %7021 = vst.msk [vmem:[%s14653_s10 + $0x350] sm:$0xff] %vm1593_vm13, %v6166_v1  ;;  %11302 = vmatprep.mubr.msk.f32.mxu0 %vm1593_vm13, %v17621_v60  ;;  %v17647_v1 = vld [vmem:[#allocation180_spill] sm:$0xff] }
 0x516   : > { %5424 = vst.msk [vmem:[%s14614_s7 + $0x388] sm:$0xff] %vm1593_vm13, %v10761_v3  ;;  %v4592_v21 = vpop.f32.mrb[241].mxu1  ;;  %10919 = vmatmul.mubr.msk.f32.gmra.mrb[90].mxu1 %vm1593_vm13, %v17626_v46 }
 0x517   : > { %5423 = vst.msk [vmem:[%s14614_s7 + $0x380] sm:$0xff] %vm1593_vm13, %v4592_v21  ;;  %10921 = vmatprep.mubr.msk.f32.mxu1 %vm1593_vm13, %v17627_v35  ;;  %v11145_v23 = vpop.f32.mrb[236].mxu0 }
 0x518   : > { %7024 = vst.msk [vmem:[%s14653_s10 + $0x368] sm:$0xff] %vm1593_vm13, %v11145_v23  ;;  %v6176_v44 = vpop.f32.mrb[237].mxu0  ;;  %11303 = vmatmul.mubr.msk.f32.gmra.mrb[86].mxu0 %vm1593_vm13, %v17622_v12  ;;  %v17648_v23 = vld [vmem:[#allocation182_spill] sm:$0xff] }
 0x519   : > { %v10764_v33 = vpop.f32.mrb[242].mxu1  ;;  %7023 = vst.msk [vmem:[%s14653_s10 + $0x360] sm:$0xff] %vm1593_vm13, %v6176_v44  ;;  %11305 = vmatprep.mubr.msk.f32.mxu0 %vm1593_vm13, %v17623_v25  ;;  %v17649_v44 = vld [vmem:[#allocation184_spill] sm:$0xff] }
 0x51a   : > { %5426 = vst.msk [vmem:[%s14614_s7 + $0x398] sm:$0xff] %vm1593_vm13, %v10764_v33  ;;  %v4602_v41 = vpop.f32.mrb[243].mxu1  ;;  %10922 = vmatmul.mubr.msk.f32.gmra.mrb[92].mxu1 %vm1593_vm13, %v17628_v13 }
 0x51b   : > { %5425 = vst.msk [vmem:[%s14614_s7 + $0x390] sm:$0xff] %vm1593_vm13, %v4602_v41  ;;  %10924 = vmatprep.mubr.msk.f32.mxu1 %vm1593_vm13, %v17629_v10  ;;  %v11148_v29 = vpop.f32.mrb[238].mxu0 }
 0x51c   : > { %7026 = vst.msk [vmem:[%s14653_s10 + $0x378] sm:$0xff] %vm1593_vm13, %v11148_v29  ;;  %v6186_v22 = vpop.f32.mrb[239].mxu0  ;;  %11306 = vmatmul.mubr.msk.f32.gmra.mrb[88].mxu0 %vm1593_vm13, %v17624_v59  ;;  %v17650_v29 = vld [vmem:[#allocation186_spill] sm:$0xff] }
 0x51d   : > { %v10767_v20 = vpop.f32.mrb[244].mxu1  ;;  %7025 = vst.msk [vmem:[%s14653_s10 + $0x370] sm:$0xff] %vm1593_vm13, %v6186_v22  ;;  %11308 = vmatprep.mubr.msk.f32.mxu0 %vm1593_vm13, %v17625_v61  ;;  %v17651_v22 = vld [vmem:[#allocation188_spill] sm:$0xff] }
 0x51e   : > { %5428 = vst.msk [vmem:[%s14614_s7 + $0x3a8] sm:$0xff] %vm1593_vm13, %v10767_v20  ;;  %v4612_v11 = vpop.f32.mrb[245].mxu1  ;;  %10925 = vmatmul.mubr.msk.f32.gmra.mrb[94].mxu1 %vm1593_vm13, %v17630_v31 }
 0x51f   : > { %5427 = vst.msk [vmem:[%s14614_s7 + $0x3a0] sm:$0xff] %vm1593_vm13, %v4612_v11  ;;  %10927 = vmatprep.mubr.msk.f32.mxu1 %vm1593_vm13, %v17631_v47  ;;  %v11151_v36 = vpop.f32.mrb[240].mxu0 }
 0x520   : > { %7028 = vst.msk [vmem:[%s14653_s10 + $0x388] sm:$0xff] %vm1593_vm13, %v11151_v36  ;;  %v6196_v54 = vpop.f32.mrb[241].mxu0  ;;  %11309 = vmatmul.mubr.msk.f32.gmra.mrb[90].mxu0 %vm1593_vm13, %v17626_v46  ;;  %v17652_v36 = vld [vmem:[#allocation190_spill] sm:$0xff] }
 0x521   : > { %v10770_v57 = vpop.f32.mrb[246].mxu1  ;;  %7027 = vst.msk [vmem:[%s14653_s10 + $0x380] sm:$0xff] %vm1593_vm13, %v6196_v54  ;;  %11311 = vmatprep.mubr.msk.f32.mxu0 %vm1593_vm13, %v17627_v35  ;;  %v17653_v54 = vld [vmem:[#allocation192_spill] sm:$0xff] }
 0x522   : > { %5430 = vst.msk [vmem:[%s14614_s7 + $0x3b8] sm:$0xff] %vm1593_vm13, %v10770_v57  ;;  %v4622_v37 = vpop.f32.mrb[247].mxu1  ;;  %10928 = vmatmul.mubr.msk.f32.gmra.mrb[96].mxu1 %vm1593_vm13, %v17632_v42 }
 0x523   : > { %5429 = vst.msk [vmem:[%s14614_s7 + $0x3b0] sm:$0xff] %vm1593_vm13, %v4622_v37  ;;  %10930 = vmatprep.mubr.msk.f32.mxu1 %vm1593_vm13, %v17633_v52  ;;  %v11154_v51 = vpop.f32.mrb[242].mxu0 }
 0x524   : > { %7030 = vst.msk [vmem:[%s14653_s10 + $0x398] sm:$0xff] %vm1593_vm13, %v11154_v51  ;;  %v6206_v43 = vpop.f32.mrb[243].mxu0  ;;  %11312 = vmatmul.mubr.msk.f32.gmra.mrb[92].mxu0 %vm1593_vm13, %v17628_v13  ;;  %v17654_v51 = vld [vmem:[#allocation194_spill] sm:$0xff] }
 0x525   : > { %v10773_v28 = vpop.f32.mrb[248].mxu1  ;;  %7029 = vst.msk [vmem:[%s14653_s10 + $0x390] sm:$0xff] %vm1593_vm13, %v6206_v43  ;;  %11314 = vmatprep.mubr.msk.f32.mxu0 %vm1593_vm13, %v17629_v10  ;;  %v17655_v43 = vld [vmem:[#allocation196_spill] sm:$0xff] }
 0x526   : > { %5432 = vst.msk [vmem:[%s14614_s7 + $0x3c8] sm:$0xff] %vm1593_vm13, %v10773_v28  ;;  %v4632_v19 = vpop.f32.mrb[249].mxu1  ;;  %10931 = vmatmul.mubr.msk.f32.gmra.mrb[98].mxu1 %vm1593_vm13, %v17634_v26 }
 0x527   : > { %5431 = vst.msk [vmem:[%s14614_s7 + $0x3c0] sm:$0xff] %vm1593_vm13, %v4632_v19  ;;  %10933 = vmatprep.mubr.msk.f32.mxu1 %vm1593_vm13, %v17635_v32  ;;  %v11157_v14 = vpop.f32.mrb[244].mxu0 }
 0x528   : > { %7032 = vst.msk [vmem:[%s14653_s10 + $0x3a8] sm:$0xff] %vm1593_vm13, %v11157_v14  ;;  %v6216_v15 = vpop.f32.mrb[245].mxu0  ;;  %11315 = vmatmul.mubr.msk.f32.gmra.mrb[94].mxu0 %vm1593_vm13, %v17630_v31  ;;  %v17656_v14 = vld [vmem:[#allocation198_spill] sm:$0xff] }
 0x529   : > { %v10776_v5 = vpop.f32.mrb[250].mxu1  ;;  %7031 = vst.msk [vmem:[%s14653_s10 + $0x3a0] sm:$0xff] %vm1593_vm13, %v6216_v15  ;;  %11317 = vmatprep.mubr.msk.f32.mxu0 %vm1593_vm13, %v17631_v47  ;;  %v17657_v15 = vld [vmem:[#allocation200_spill] sm:$0xff] }
 0x52a   : > { %5434 = vst.msk [vmem:[%s14614_s7 + $0x3d8] sm:$0xff] %vm1593_vm13, %v10776_v5  ;;  %v4642_v48 = vpop.f32.mrb[251].mxu1  ;;  %10934 = vmatmul.mubr.msk.f32.gmra.mrb[100].mxu1 %vm1593_vm13, %v17636_v4 }
 0x52b   : > { %5433 = vst.msk [vmem:[%s14614_s7 + $0x3d0] sm:$0xff] %vm1593_vm13, %v4642_v48  ;;  %10936 = vmatprep.mubr.msk.f32.mxu1 %vm1593_vm13, %v17637_v18  ;;  %v11160_v49 = vpop.f32.mrb[246].mxu0 }
 0x52c   : > { %7034 = vst.msk [vmem:[%s14653_s10 + $0x3b8] sm:$0xff] %vm1593_vm13, %v11160_v49  ;;  %v6226_v56 = vpop.f32.mrb[247].mxu0  ;;  %11318 = vmatmul.mubr.msk.f32.gmra.mrb[96].mxu0 %vm1593_vm13, %v17632_v42  ;;  %v17658_v49 = vld [vmem:[#allocation202_spill] sm:$0xff] }
 0x52d   : > { %v10779_v7 = vpop.f32.mrb[252].mxu1  ;;  %7033 = vst.msk [vmem:[%s14653_s10 + $0x3b0] sm:$0xff] %vm1593_vm13, %v6226_v56  ;;  %11320 = vmatprep.mubr.msk.f32.mxu0 %vm1593_vm13, %v17633_v52  ;;  %v17659_v56 = vld [vmem:[#allocation204_spill] sm:$0xff] }
 0x52e   : > { %5436 = vst.msk [vmem:[%s14614_s7 + $0x3e8] sm:$0xff] %vm1593_vm13, %v10779_v7  ;;  %v4652_v30 = vpop.f32.mrb[253].mxu1  ;;  %10937 = vmatmul.mubr.msk.f32.gmra.mrb[102].mxu1 %vm1593_vm13, %v17638_v39 }
 0x52f   : > { %5435 = vst.msk [vmem:[%s14614_s7 + $0x3e0] sm:$0xff] %vm1593_vm13, %v4652_v30  ;;  %10939 = vmatprep.mubr.msk.f32.mxu1 %vm1593_vm13, %v17639_v17  ;;  %v11163_v9 = vpop.f32.mrb[248].mxu0 }
 0x530   : > { %7036 = vst.msk [vmem:[%s14653_s10 + $0x3c8] sm:$0xff] %vm1593_vm13, %v11163_v9  ;;  %v6236_v50 = vpop.f32.mrb[249].mxu0  ;;  %11321 = vmatmul.mubr.msk.f32.gmra.mrb[98].mxu0 %vm1593_vm13, %v17634_v26  ;;  %v17660_v9 = vld [vmem:[#allocation206_spill] sm:$0xff] }
 0x531   : > { %v10782_v6 = vpop.f32.mrb[254].mxu1  ;;  %7035 = vst.msk [vmem:[%s14653_s10 + $0x3c0] sm:$0xff] %vm1593_vm13, %v6236_v50  ;;  %11323 = vmatprep.mubr.msk.f32.mxu0 %vm1593_vm13, %v17635_v32  ;;  %v17661_v50 = vld [vmem:[#allocation208_spill] sm:$0xff] }
 0x532   : > { %5438 = vst.msk [vmem:[%s14614_s7 + $0x3f8] sm:$0xff] %vm1593_vm13, %v10782_v6  ;;  %v4662_v53 = vpop.f32.mrb[255].mxu1  ;;  %10940 = vmatmul.mubr.msk.f32.gmra.mrb[104].mxu1 %vm1593_vm13, %v17640_v2 }
 0x533   : > { %5437 = vst.msk [vmem:[%s14614_s7 + $0x3f0] sm:$0xff] %vm1593_vm13, %v4662_v53  ;;  %10942 = vmatprep.mubr.msk.f32.mxu1 %vm1593_vm13, %v17641_v40  ;;  %v11166_v62 = vpop.f32.mrb[250].mxu0 }
 0x534   : > { %7038 = vst.msk [vmem:[%s14653_s10 + $0x3d8] sm:$0xff] %vm1593_vm13, %v11166_v62  ;;  %v6246_v27 = vpop.f32.mrb[251].mxu0  ;;  %11324 = vmatmul.mubr.msk.f32.gmra.mrb[100].mxu0 %vm1593_vm13, %v17636_v4  ;;  %v17662_v62 = vld [vmem:[#allocation209_spill] sm:$0xff] }
 0x535   : > { %v10785_v55 = vpop.f32.mrb[0].mxu1  ;;  %7037 = vst.msk [vmem:[%s14653_s10 + $0x3d0] sm:$0xff] %vm1593_vm13, %v6246_v27  ;;  %11326 = vmatprep.mubr.msk.f32.mxu0 %vm1593_vm13, %v17637_v18 }
 0x536   : > { %5440 = vst.msk [vmem:[%s14614_s7 + $0x408] sm:$0xff] %vm1593_vm13, %v10785_v55  ;;  %v4672_v60 = vpop.f32.mrb[1].mxu1  ;;  %10943 = vmatmul.mubr.msk.f32.gmra.mrb[106].mxu1 %vm1593_vm13, %v17642_v63 }
 0x537   : > { %5439 = vst.msk [vmem:[%s14614_s7 + $0x400] sm:$0xff] %vm1593_vm13, %v4672_v60  ;;  %10945 = vmatprep.mubr.msk.f32.mxu1 %vm1593_vm13, %v17643_v0  ;;  %v11169_v58 = vpop.f32.mrb[252].mxu0 }
 0x538   : > { %7040 = vst.msk [vmem:[%s14653_s10 + $0x3e8] sm:$0xff] %vm1593_vm13, %v11169_v58  ;;  %v6256_v16 = vpop.f32.mrb[253].mxu0  ;;  %11327 = vmatmul.mubr.msk.f32.gmra.mrb[102].mxu0 %vm1593_vm13, %v17638_v39 }
 0x539   : > { %v10788_v12 = vpop.f32.mrb[2].mxu1  ;;  %7039 = vst.msk [vmem:[%s14653_s10 + $0x3e0] sm:$0xff] %vm1593_vm13, %v6256_v16  ;;  %11329 = vmatprep.mubr.msk.f32.mxu0 %vm1593_vm13, %v17639_v17 }
 0x53a   : > { %5442 = vst.msk [vmem:[%s14614_s7 + $0x418] sm:$0xff] %vm1593_vm13, %v10788_v12  ;;  %v4682_v25 = vpop.f32.mrb[3].mxu1  ;;  %10946 = vmatmul.mubr.msk.f32.gmra.mrb[108].mxu1 %vm1593_vm13, %v17644_v8 }
 0x53b   : > { %5441 = vst.msk [vmem:[%s14614_s7 + $0x410] sm:$0xff] %vm1593_vm13, %v4682_v25  ;;  %10948 = vmatprep.mubr.msk.f32.mxu1 %vm1593_vm13, %v17645_v34  ;;  %v11172_v38 = vpop.f32.mrb[254].mxu0 }
 0x53c   : > { %7042 = vst.msk [vmem:[%s14653_s10 + $0x3f8] sm:$0xff] %vm1593_vm13, %v11172_v38  ;;  %v6266_v45 = vpop.f32.mrb[255].mxu0  ;;  %11330 = vmatmul.mubr.msk.f32.gmra.mrb[104].mxu0 %vm1593_vm13, %v17640_v2 }
 0x53d   : > { %v10791_v59 = vpop.f32.mrb[4].mxu1  ;;  %7041 = vst.msk [vmem:[%s14653_s10 + $0x3f0] sm:$0xff] %vm1593_vm13, %v6266_v45  ;;  %11332 = vmatprep.mubr.msk.f32.mxu0 %vm1593_vm13, %v17641_v40 }
 0x53e   : > { %5444 = vst.msk [vmem:[%s14614_s7 + $0x428] sm:$0xff] %vm1593_vm13, %v10791_v59  ;;  %v4692_v61 = vpop.f32.mrb[5].mxu1  ;;  %10949 = vmatmul.mubr.msk.f32.gmra.mrb[110].mxu1 %vm1593_vm13, %v17646_v24 }
 0x53f   : > { %5443 = vst.msk [vmem:[%s14614_s7 + $0x420] sm:$0xff] %vm1593_vm13, %v4692_v61  ;;  %10951 = vmatprep.mubr.msk.f32.mxu1 %vm1593_vm13, %v17647_v1  ;;  %v11175_v3 = vpop.f32.mrb[0].mxu0 }
 0x540   : > { %7044 = vst.msk [vmem:[%s14653_s10 + $0x408] sm:$0xff] %vm1593_vm13, %v11175_v3  ;;  %v6276_v21 = vpop.f32.mrb[1].mxu0  ;;  %11333 = vmatmul.mubr.msk.f32.gmra.mrb[106].mxu0 %vm1593_vm13, %v17642_v63 }
 0x541   : > { %v10794_v46 = vpop.f32.mrb[6].mxu1  ;;  %7043 = vst.msk [vmem:[%s14653_s10 + $0x400] sm:$0xff] %vm1593_vm13, %v6276_v21  ;;  %11335 = vmatprep.mubr.msk.f32.mxu0 %vm1593_vm13, %v17643_v0 }
 0x542   : > { %5446 = vst.msk [vmem:[%s14614_s7 + $0x438] sm:$0xff] %vm1593_vm13, %v10794_v46  ;;  %v4702_v35 = vpop.f32.mrb[7].mxu1  ;;  %10952 = vmatmul.mubr.msk.f32.gmra.mrb[112].mxu1 %vm1593_vm13, %v17648_v23 }
 0x543   : > { %5445 = vst.msk [vmem:[%s14614_s7 + $0x430] sm:$0xff] %vm1593_vm13, %v4702_v35  ;;  %10954 = vmatprep.mubr.msk.f32.mxu1 %vm1593_vm13, %v17649_v44  ;;  %v11178_v33 = vpop.f32.mrb[2].mxu0 }
 0x544   : > { %7046 = vst.msk [vmem:[%s14653_s10 + $0x418] sm:$0xff] %vm1593_vm13, %v11178_v33  ;;  %v6286_v41 = vpop.f32.mrb[3].mxu0  ;;  %11336 = vmatmul.mubr.msk.f32.gmra.mrb[108].mxu0 %vm1593_vm13, %v17644_v8 }
 0x545   : > { %v10797_v13 = vpop.f32.mrb[8].mxu1  ;;  %7045 = vst.msk [vmem:[%s14653_s10 + $0x410] sm:$0xff] %vm1593_vm13, %v6286_v41  ;;  %11338 = vmatprep.mubr.msk.f32.mxu0 %vm1593_vm13, %v17645_v34 }
 0x546   : > { %5448 = vst.msk [vmem:[%s14614_s7 + $0x448] sm:$0xff] %vm1593_vm13, %v10797_v13  ;;  %v4712_v10 = vpop.f32.mrb[9].mxu1  ;;  %10955 = vmatmul.mubr.msk.f32.gmra.mrb[114].mxu1 %vm1593_vm13, %v17650_v29 }
 0x547   : > { %5447 = vst.msk [vmem:[%s14614_s7 + $0x440] sm:$0xff] %vm1593_vm13, %v4712_v10  ;;  %10957 = vmatprep.mubr.msk.f32.mxu1 %vm1593_vm13, %v17651_v22  ;;  %v11181_v20 = vpop.f32.mrb[4].mxu0 }
 0x548   : > { %7048 = vst.msk [vmem:[%s14653_s10 + $0x428] sm:$0xff] %vm1593_vm13, %v11181_v20  ;;  %v6296_v11 = vpop.f32.mrb[5].mxu0  ;;  %11339 = vmatmul.mubr.msk.f32.gmra.mrb[110].mxu0 %vm1593_vm13, %v17646_v24 }
 0x549   : > { %v10800_v31 = vpop.f32.mrb[10].mxu1  ;;  %7047 = vst.msk [vmem:[%s14653_s10 + $0x420] sm:$0xff] %vm1593_vm13, %v6296_v11  ;;  %11341 = vmatprep.mubr.msk.f32.mxu0 %vm1593_vm13, %v17647_v1 }
 0x54a   : > { %5450 = vst.msk [vmem:[%s14614_s7 + $0x458] sm:$0xff] %vm1593_vm13, %v10800_v31  ;;  %v4722_v47 = vpop.f32.mrb[11].mxu1  ;;  %10958 = vmatmul.mubr.msk.f32.gmra.mrb[116].mxu1 %vm1593_vm13, %v17652_v36 }
 0x54b   : > { %5449 = vst.msk [vmem:[%s14614_s7 + $0x450] sm:$0xff] %vm1593_vm13, %v4722_v47  ;;  %10960 = vmatprep.mubr.msk.f32.mxu1 %vm1593_vm13, %v17653_v54  ;;  %v11184_v57 = vpop.f32.mrb[6].mxu0 }
 0x54c   : > { %7050 = vst.msk [vmem:[%s14653_s10 + $0x438] sm:$0xff] %vm1593_vm13, %v11184_v57  ;;  %v6306_v37 = vpop.f32.mrb[7].mxu0  ;;  %11342 = vmatmul.mubr.msk.f32.gmra.mrb[112].mxu0 %vm1593_vm13, %v17648_v23 }
 0x54d   : > { %v10803_v42 = vpop.f32.mrb[12].mxu1  ;;  %7049 = vst.msk [vmem:[%s14653_s10 + $0x430] sm:$0xff] %vm1593_vm13, %v6306_v37  ;;  %11344 = vmatprep.mubr.msk.f32.mxu0 %vm1593_vm13, %v17649_v44 }
 0x54e   : > { %5452 = vst.msk [vmem:[%s14614_s7 + $0x468] sm:$0xff] %vm1593_vm13, %v10803_v42  ;;  %v4732_v52 = vpop.f32.mrb[13].mxu1  ;;  %10961 = vmatmul.mubr.msk.f32.gmra.mrb[118].mxu1 %vm1593_vm13, %v17654_v51 }
 0x54f   : > { %5451 = vst.msk [vmem:[%s14614_s7 + $0x460] sm:$0xff] %vm1593_vm13, %v4732_v52  ;;  %10963 = vmatprep.mubr.msk.f32.mxu1 %vm1593_vm13, %v17655_v43  ;;  %v11187_v28 = vpop.f32.mrb[8].mxu0 }
 0x550   : > { %7052 = vst.msk [vmem:[%s14653_s10 + $0x448] sm:$0xff] %vm1593_vm13, %v11187_v28  ;;  %v6316_v19 = vpop.f32.mrb[9].mxu0  ;;  %11345 = vmatmul.mubr.msk.f32.gmra.mrb[114].mxu0 %vm1593_vm13, %v17650_v29 }
 0x551   : > { %v10806_v26 = vpop.f32.mrb[14].mxu1  ;;  %7051 = vst.msk [vmem:[%s14653_s10 + $0x440] sm:$0xff] %vm1593_vm13, %v6316_v19  ;;  %11347 = vmatprep.mubr.msk.f32.mxu0 %vm1593_vm13, %v17651_v22 }
 0x552   : > { %5454 = vst.msk [vmem:[%s14614_s7 + $0x478] sm:$0xff] %vm1593_vm13, %v10806_v26  ;;  %v4742_v32 = vpop.f32.mrb[15].mxu1  ;;  %10964 = vmatmul.mubr.msk.f32.gmra.mrb[120].mxu1 %vm1593_vm13, %v17656_v14 }
 0x553   : > { %5453 = vst.msk [vmem:[%s14614_s7 + $0x470] sm:$0xff] %vm1593_vm13, %v4742_v32  ;;  %10966 = vmatprep.mubr.msk.f32.mxu1 %vm1593_vm13, %v17657_v15  ;;  %v11190_v5 = vpop.f32.mrb[10].mxu0 }
 0x554   : > { %7054 = vst.msk [vmem:[%s14653_s10 + $0x458] sm:$0xff] %vm1593_vm13, %v11190_v5  ;;  %v6326_v48 = vpop.f32.mrb[11].mxu0  ;;  %11348 = vmatmul.mubr.msk.f32.gmra.mrb[116].mxu0 %vm1593_vm13, %v17652_v36 }
 0x555   : > { %v10809_v4 = vpop.f32.mrb[16].mxu1  ;;  %7053 = vst.msk [vmem:[%s14653_s10 + $0x450] sm:$0xff] %vm1593_vm13, %v6326_v48  ;;  %11350 = vmatprep.mubr.msk.f32.mxu0 %vm1593_vm13, %v17653_v54 }
 0x556   : > { %5456 = vst.msk [vmem:[%s14614_s7 + $0x488] sm:$0xff] %vm1593_vm13, %v10809_v4  ;;  %v4752_v18 = vpop.f32.mrb[17].mxu1  ;;  %10967 = vmatmul.mubr.msk.f32.gmra.mrb[122].mxu1 %vm1593_vm13, %v17658_v49 }
 0x557   : > { %5455 = vst.msk [vmem:[%s14614_s7 + $0x480] sm:$0xff] %vm1593_vm13, %v4752_v18  ;;  %10969 = vmatprep.mubr.msk.f32.mxu1 %vm1593_vm13, %v17659_v56  ;;  %v11193_v7 = vpop.f32.mrb[12].mxu0 }
 0x558   : > { %7056 = vst.msk [vmem:[%s14653_s10 + $0x468] sm:$0xff] %vm1593_vm13, %v11193_v7  ;;  %v6336_v30 = vpop.f32.mrb[13].mxu0  ;;  %11351 = vmatmul.mubr.msk.f32.gmra.mrb[118].mxu0 %vm1593_vm13, %v17654_v51 }
 0x559   : > { %v10812_v39 = vpop.f32.mrb[18].mxu1  ;;  %7055 = vst.msk [vmem:[%s14653_s10 + $0x460] sm:$0xff] %vm1593_vm13, %v6336_v30  ;;  %11353 = vmatprep.mubr.msk.f32.mxu0 %vm1593_vm13, %v17655_v43 }
 0x55a   : > { %5458 = vst.msk [vmem:[%s14614_s7 + $0x498] sm:$0xff] %vm1593_vm13, %v10812_v39  ;;  %v4762_v17 = vpop.f32.mrb[19].mxu1  ;;  %10970 = vmatmul.mubr.msk.f32.gmra.mrb[124].mxu1 %vm1593_vm13, %v17660_v9 }
 0x55b   : > { %5457 = vst.msk [vmem:[%s14614_s7 + $0x490] sm:$0xff] %vm1593_vm13, %v4762_v17  ;;  %10972 = vmatprep.mubr.msk.f32.mxu1 %vm1593_vm13, %v17661_v50  ;;  %v11196_v6 = vpop.f32.mrb[14].mxu0 }
 0x55c   : > { %7058 = vst.msk [vmem:[%s14653_s10 + $0x478] sm:$0xff] %vm1593_vm13, %v11196_v6  ;;  %v6346_v53 = vpop.f32.mrb[15].mxu0  ;;  %11354 = vmatmul.mubr.msk.f32.gmra.mrb[120].mxu0 %vm1593_vm13, %v17656_v14 }
 0x55d   : > { %v10815_v2 = vpop.f32.mrb[20].mxu1  ;;  %7057 = vst.msk [vmem:[%s14653_s10 + $0x470] sm:$0xff] %vm1593_vm13, %v6346_v53  ;;  %11356 = vmatprep.mubr.msk.f32.mxu0 %vm1593_vm13, %v17657_v15 }
 0x55e   : > { %5460 = vst.msk [vmem:[%s14614_s7 + $0x4a8] sm:$0xff] %vm1593_vm13, %v10815_v2  ;;  %v4772_v40 = vpop.f32.mrb[21].mxu1  ;;  %10973 = vmatmul.mubr.msk.f32.gmra.mrb[126].mxu1 %vm1593_vm13, %v17662_v62 }
 0x55f   : > { %5459 = vst.msk [vmem:[%s14614_s7 + $0x4a0] sm:$0xff] %vm1593_vm13, %v4772_v40  ;;  %v11199_v27 = vpop.f32.mrb[16].mxu0 }
 0x560   : > { %7060 = vst.msk [vmem:[%s14653_s10 + $0x488] sm:$0xff] %vm1593_vm13, %v11199_v27  ;;  %v6356_v55 = vpop.f32.mrb[17].mxu0  ;;  %11357 = vmatmul.mubr.msk.f32.gmra.mrb[122].mxu0 %vm1593_vm13, %v17658_v49 }
 0x561   : > { %v10818_v60 = vpop.f32.mrb[22].mxu1  ;;  %7059 = vst.msk [vmem:[%s14653_s10 + $0x480] sm:$0xff] %vm1593_vm13, %v6356_v55  ;;  %11359 = vmatprep.mubr.msk.f32.mxu0 %vm1593_vm13, %v17659_v56 }
 0x562   : > { %5462 = vst.msk [vmem:[%s14614_s7 + $0x4b8] sm:$0xff] %vm1593_vm13, %v10818_v60  ;;  %v4782_v63 = vpop.f32.mrb[23].mxu1 }
 0x563   : > { %5461 = vst.msk [vmem:[%s14614_s7 + $0x4b0] sm:$0xff] %vm1593_vm13, %v4782_v63  ;;  %v11202_v0 = vpop.f32.mrb[18].mxu0 }
 0x564   : > { %7062 = vst.msk [vmem:[%s14653_s10 + $0x498] sm:$0xff] %vm1593_vm13, %v11202_v0  ;;  %v6366_v58 = vpop.f32.mrb[19].mxu0  ;;  %11360 = vmatmul.mubr.msk.f32.gmra.mrb[124].mxu0 %vm1593_vm13, %v17660_v9 }
 0x565   : > { %v10821_v16 = vpop.f32.mrb[24].mxu1  ;;  %7061 = vst.msk [vmem:[%s14653_s10 + $0x490] sm:$0xff] %vm1593_vm13, %v6366_v58  ;;  %11362 = vmatprep.mubr.msk.f32.mxu0 %vm1593_vm13, %v17661_v50 }
 0x566   : > { %5464 = vst.msk [vmem:[%s14614_s7 + $0x4c8] sm:$0xff] %vm1593_vm13, %v10821_v16  ;;  %v4792_v12 = vpop.f32.mrb[25].mxu1 }
 0x567   : > { %5463 = vst.msk [vmem:[%s14614_s7 + $0x4c0] sm:$0xff] %vm1593_vm13, %v4792_v12  ;;  %v11205_v25 = vpop.f32.mrb[20].mxu0 }
 0x568   : > { %7064 = vst.msk [vmem:[%s14653_s10 + $0x4a8] sm:$0xff] %vm1593_vm13, %v11205_v25  ;;  %v6376_v8 = vpop.f32.mrb[21].mxu0  ;;  %11363 = vmatmul.mubr.msk.f32.gmra.mrb[126].mxu0 %vm1593_vm13, %v17662_v62 }
 0x569   : > { %v10824_v34 = vpop.f32.mrb[26].mxu1  ;;  %7063 = vst.msk [vmem:[%s14653_s10 + $0x4a0] sm:$0xff] %vm1593_vm13, %v6376_v8 }
 0x56a   : > { %5466 = vst.msk [vmem:[%s14614_s7 + $0x4d8] sm:$0xff] %vm1593_vm13, %v10824_v34  ;;  %v4802_v38 = vpop.f32.mrb[27].mxu1 }
 0x56b   : > { %5465 = vst.msk [vmem:[%s14614_s7 + $0x4d0] sm:$0xff] %vm1593_vm13, %v4802_v38  ;;  %v11208_v45 = vpop.f32.mrb[22].mxu0 }
 0x56c   : > { %7066 = vst.msk [vmem:[%s14653_s10 + $0x4b8] sm:$0xff] %vm1593_vm13, %v11208_v45  ;;  %v6386_v59 = vpop.f32.mrb[23].mxu0 }
 0x56d   : > { %v10827_v61 = vpop.f32.mrb[28].mxu1  ;;  %7065 = vst.msk [vmem:[%s14653_s10 + $0x4b0] sm:$0xff] %vm1593_vm13, %v6386_v59 }
 0x56e   : > { %5468 = vst.msk [vmem:[%s14614_s7 + $0x4e8] sm:$0xff] %vm1593_vm13, %v10827_v61  ;;  %v4812_v24 = vpop.f32.mrb[29].mxu1 }
 0x56f   : > { %5467 = vst.msk [vmem:[%s14614_s7 + $0x4e0] sm:$0xff] %vm1593_vm13, %v4812_v24  ;;  %v11211_v1 = vpop.f32.mrb[24].mxu0 }
 0x570   : > { %7068 = vst.msk [vmem:[%s14653_s10 + $0x4c8] sm:$0xff] %vm1593_vm13, %v11211_v1  ;;  %v6396_v3 = vpop.f32.mrb[25].mxu0 }
 0x571   : > { %v10830_v21 = vpop.f32.mrb[30].mxu1  ;;  %7067 = vst.msk [vmem:[%s14653_s10 + $0x4c0] sm:$0xff] %vm1593_vm13, %v6396_v3 }
 0x572   : > { %5470 = vst.msk [vmem:[%s14614_s7 + $0x4f8] sm:$0xff] %vm1593_vm13, %v10830_v21  ;;  %v4822_v46 = vpop.f32.mrb[31].mxu1 }
 0x573   : > { %5469 = vst.msk [vmem:[%s14614_s7 + $0x4f0] sm:$0xff] %vm1593_vm13, %v4822_v46  ;;  %v11214_v35 = vpop.f32.mrb[26].mxu0 }
 0x574   : > { %7070 = vst.msk [vmem:[%s14653_s10 + $0x4d8] sm:$0xff] %vm1593_vm13, %v11214_v35  ;;  %v6406_v23 = vpop.f32.mrb[27].mxu0 }
 0x575   : > { %v10833_v44 = vpop.f32.mrb[32].mxu1  ;;  %7069 = vst.msk [vmem:[%s14653_s10 + $0x4d0] sm:$0xff] %vm1593_vm13, %v6406_v23 }
 0x576   : > { %5472 = vst.msk [vmem:[%s14614_s7 + $0x508] sm:$0xff] %vm1593_vm13, %v10833_v44  ;;  %v4832_v33 = vpop.f32.mrb[33].mxu1 }
 0x577   : > { %5471 = vst.msk [vmem:[%s14614_s7 + $0x500] sm:$0xff] %vm1593_vm13, %v4832_v33  ;;  %v11217_v41 = vpop.f32.mrb[28].mxu0 }
 0x578   : > { %7072 = vst.msk [vmem:[%s14653_s10 + $0x4e8] sm:$0xff] %vm1593_vm13, %v11217_v41  ;;  %v6416_v13 = vpop.f32.mrb[29].mxu0 }
 0x579   : > { %v10836_v10 = vpop.f32.mrb[34].mxu1  ;;  %7071 = vst.msk [vmem:[%s14653_s10 + $0x4e0] sm:$0xff] %vm1593_vm13, %v6416_v13 }
 0x57a   : > { %5474 = vst.msk [vmem:[%s14614_s7 + $0x518] sm:$0xff] %vm1593_vm13, %v10836_v10  ;;  %v4842_v29 = vpop.f32.mrb[35].mxu1 }
 0x57b   : > { %5473 = vst.msk [vmem:[%s14614_s7 + $0x510] sm:$0xff] %vm1593_vm13, %v4842_v29  ;;  %v11220_v22 = vpop.f32.mrb[30].mxu0 }
 0x57c   : > { %7074 = vst.msk [vmem:[%s14653_s10 + $0x4f8] sm:$0xff] %vm1593_vm13, %v11220_v22  ;;  %v6426_v20 = vpop.f32.mrb[31].mxu0 }
 0x57d   : > { %v10839_v11 = vpop.f32.mrb[36].mxu1  ;;  %7073 = vst.msk [vmem:[%s14653_s10 + $0x4f0] sm:$0xff] %vm1593_vm13, %v6426_v20 }
 0x57e   : > { %5476 = vst.msk [vmem:[%s14614_s7 + $0x528] sm:$0xff] %vm1593_vm13, %v10839_v11  ;;  %v4852_v31 = vpop.f32.mrb[37].mxu1 }
 0x57f   : > { %5475 = vst.msk [vmem:[%s14614_s7 + $0x520] sm:$0xff] %vm1593_vm13, %v4852_v31  ;;  %v11223_v47 = vpop.f32.mrb[32].mxu0 }
 0x580   : > { %7076 = vst.msk [vmem:[%s14653_s10 + $0x508] sm:$0xff] %vm1593_vm13, %v11223_v47  ;;  %v6436_v36 = vpop.f32.mrb[33].mxu0 }
 0x581   : > { %v10842_v54 = vpop.f32.mrb[38].mxu1  ;;  %7075 = vst.msk [vmem:[%s14653_s10 + $0x500] sm:$0xff] %vm1593_vm13, %v6436_v36 }
 0x582   : > { %5478 = vst.msk [vmem:[%s14614_s7 + $0x538] sm:$0xff] %vm1593_vm13, %v10842_v54  ;;  %v4862_v57 = vpop.f32.mrb[39].mxu1 }
 0x583   : > { %5477 = vst.msk [vmem:[%s14614_s7 + $0x530] sm:$0xff] %vm1593_vm13, %v4862_v57  ;;  %v11226_v37 = vpop.f32.mrb[34].mxu0 }
 0x584   : > { %7078 = vst.msk [vmem:[%s14653_s10 + $0x518] sm:$0xff] %vm1593_vm13, %v11226_v37  ;;  %v6446_v42 = vpop.f32.mrb[35].mxu0 }
 0x585   : > { %v10845_v52 = vpop.f32.mrb[40].mxu1  ;;  %7077 = vst.msk [vmem:[%s14653_s10 + $0x510] sm:$0xff] %vm1593_vm13, %v6446_v42 }
 0x586   : > { %5480 = vst.msk [vmem:[%s14614_s7 + $0x548] sm:$0xff] %vm1593_vm13, %v10845_v52  ;;  %v4872_v51 = vpop.f32.mrb[41].mxu1 }
 0x587   : > { %5479 = vst.msk [vmem:[%s14614_s7 + $0x540] sm:$0xff] %vm1593_vm13, %v4872_v51  ;;  %v11229_v43 = vpop.f32.mrb[36].mxu0 }
 0x588   : > { %7080 = vst.msk [vmem:[%s14653_s10 + $0x528] sm:$0xff] %vm1593_vm13, %v11229_v43  ;;  %v6456_v28 = vpop.f32.mrb[37].mxu0 }
 0x589   : > { %v10848_v19 = vpop.f32.mrb[42].mxu1  ;;  %7079 = vst.msk [vmem:[%s14653_s10 + $0x520] sm:$0xff] %vm1593_vm13, %v6456_v28 }
 0x58a   : > { %5482 = vst.msk [vmem:[%s14614_s7 + $0x558] sm:$0xff] %vm1593_vm13, %v10848_v19  ;;  %v4882_v26 = vpop.f32.mrb[43].mxu1 }
 0x58b   : > { %5481 = vst.msk [vmem:[%s14614_s7 + $0x550] sm:$0xff] %vm1593_vm13, %v4882_v26  ;;  %v11232_v32 = vpop.f32.mrb[38].mxu0 }
 0x58c   : > { %7082 = vst.msk [vmem:[%s14653_s10 + $0x538] sm:$0xff] %vm1593_vm13, %v11232_v32  ;;  %v6466_v14 = vpop.f32.mrb[39].mxu0 }
 0x58d   : > { %v10851_v15 = vpop.f32.mrb[44].mxu1  ;;  %7081 = vst.msk [vmem:[%s14653_s10 + $0x530] sm:$0xff] %vm1593_vm13, %v6466_v14 }
 0x58e   : > { %5484 = vst.msk [vmem:[%s14614_s7 + $0x568] sm:$0xff] %vm1593_vm13, %v10851_v15  ;;  %v4892_v5 = vpop.f32.mrb[45].mxu1 }
 0x58f   : > { %5483 = vst.msk [vmem:[%s14614_s7 + $0x560] sm:$0xff] %vm1593_vm13, %v4892_v5  ;;  %v11235_v48 = vpop.f32.mrb[40].mxu0 }
 0x590   : > { %7084 = vst.msk [vmem:[%s14653_s10 + $0x548] sm:$0xff] %vm1593_vm13, %v11235_v48  ;;  %v6476_v4 = vpop.f32.mrb[41].mxu0 }
 0x591   : > { %v10854_v18 = vpop.f32.mrb[46].mxu1  ;;  %7083 = vst.msk [vmem:[%s14653_s10 + $0x540] sm:$0xff] %vm1593_vm13, %v6476_v4 }
 0x592   : > { %5486 = vst.msk [vmem:[%s14614_s7 + $0x578] sm:$0xff] %vm1593_vm13, %v10854_v18  ;;  %v4902_v49 = vpop.f32.mrb[47].mxu1 }
 0x593   : > { %5485 = vst.msk [vmem:[%s14614_s7 + $0x570] sm:$0xff] %vm1593_vm13, %v4902_v49  ;;  %v11238_v56 = vpop.f32.mrb[42].mxu0 }
 0x594   : > { %7086 = vst.msk [vmem:[%s14653_s10 + $0x558] sm:$0xff] %vm1593_vm13, %v11238_v56  ;;  %v6486_v7 = vpop.f32.mrb[43].mxu0 }
 0x595   : > { %v10857_v30 = vpop.f32.mrb[48].mxu1  ;;  %7085 = vst.msk [vmem:[%s14653_s10 + $0x550] sm:$0xff] %vm1593_vm13, %v6486_v7 }
 0x596   : > { %5488 = vst.msk [vmem:[%s14614_s7 + $0x588] sm:$0xff] %vm1593_vm13, %v10857_v30  ;;  %v4912_v39 = vpop.f32.mrb[49].mxu1 }
 0x597   : > { %5487 = vst.msk [vmem:[%s14614_s7 + $0x580] sm:$0xff] %vm1593_vm13, %v4912_v39  ;;  %v11241_v17 = vpop.f32.mrb[44].mxu0 }
 0x598   : > { %7088 = vst.msk [vmem:[%s14653_s10 + $0x568] sm:$0xff] %vm1593_vm13, %v11241_v17  ;;  %v6496_v9 = vpop.f32.mrb[45].mxu0 }
 0x599   : > { %v10860_v50 = vpop.f32.mrb[50].mxu1  ;;  %7087 = vst.msk [vmem:[%s14653_s10 + $0x560] sm:$0xff] %vm1593_vm13, %v6496_v9 }
 0x59a   : > { %5490 = vst.msk [vmem:[%s14614_s7 + $0x598] sm:$0xff] %vm1593_vm13, %v10860_v50  ;;  %v4922_v6 = vpop.f32.mrb[51].mxu1 }
 0x59b   : > { %5489 = vst.msk [vmem:[%s14614_s7 + $0x590] sm:$0xff] %vm1593_vm13, %v4922_v6  ;;  %v11244_v53 = vpop.f32.mrb[46].mxu0 }
 0x59c   : > { %7090 = vst.msk [vmem:[%s14653_s10 + $0x578] sm:$0xff] %vm1593_vm13, %v11244_v53  ;;  %v6506_v2 = vpop.f32.mrb[47].mxu0 }
 0x59d   : > { %v10863_v40 = vpop.f32.mrb[52].mxu1  ;;  %7089 = vst.msk [vmem:[%s14653_s10 + $0x570] sm:$0xff] %vm1593_vm13, %v6506_v2 }
 0x59e   : > { %5492 = vst.msk [vmem:[%s14614_s7 + $0x5a8] sm:$0xff] %vm1593_vm13, %v10863_v40  ;;  %v4932_v62 = vpop.f32.mrb[53].mxu1 }
 0x59f   : > { %5491 = vst.msk [vmem:[%s14614_s7 + $0x5a0] sm:$0xff] %vm1593_vm13, %v4932_v62  ;;  %v11247_v27 = vpop.f32.mrb[48].mxu0 }
 0x5a0   : > { %7092 = vst.msk [vmem:[%s14653_s10 + $0x588] sm:$0xff] %vm1593_vm13, %v11247_v27  ;;  %v6516_v55 = vpop.f32.mrb[49].mxu0 }
 0x5a1   : > { %v10866_v60 = vpop.f32.mrb[54].mxu1  ;;  %7091 = vst.msk [vmem:[%s14653_s10 + $0x580] sm:$0xff] %vm1593_vm13, %v6516_v55 }
 0x5a2   : > { %5494 = vst.msk [vmem:[%s14614_s7 + $0x5b8] sm:$0xff] %vm1593_vm13, %v10866_v60  ;;  %v4942_v63 = vpop.f32.mrb[55].mxu1 }
 0x5a3   : > { %5493 = vst.msk [vmem:[%s14614_s7 + $0x5b0] sm:$0xff] %vm1593_vm13, %v4942_v63  ;;  %v11250_v0 = vpop.f32.mrb[50].mxu0 }
 0x5a4   : > { %7094 = vst.msk [vmem:[%s14653_s10 + $0x598] sm:$0xff] %vm1593_vm13, %v11250_v0  ;;  %v6526_v58 = vpop.f32.mrb[51].mxu0 }
 0x5a5   : > { %v10869_v16 = vpop.f32.mrb[56].mxu1  ;;  %7093 = vst.msk [vmem:[%s14653_s10 + $0x590] sm:$0xff] %vm1593_vm13, %v6526_v58 }
 0x5a6   : > { %5496 = vst.msk [vmem:[%s14614_s7 + $0x5c8] sm:$0xff] %vm1593_vm13, %v10869_v16  ;;  %v4952_v12 = vpop.f32.mrb[57].mxu1 }
 0x5a7   : > { %5495 = vst.msk [vmem:[%s14614_s7 + $0x5c0] sm:$0xff] %vm1593_vm13, %v4952_v12  ;;  %v11253_v25 = vpop.f32.mrb[52].mxu0 }
 0x5a8   : > { %7096 = vst.msk [vmem:[%s14653_s10 + $0x5a8] sm:$0xff] %vm1593_vm13, %v11253_v25  ;;  %v6536_v8 = vpop.f32.mrb[53].mxu0 }
 0x5a9   : > { %v10872_v34 = vpop.f32.mrb[58].mxu1  ;;  %7095 = vst.msk [vmem:[%s14653_s10 + $0x5a0] sm:$0xff] %vm1593_vm13, %v6536_v8 }
 0x5aa   : > { %5498 = vst.msk [vmem:[%s14614_s7 + $0x5d8] sm:$0xff] %vm1593_vm13, %v10872_v34  ;;  %v4962_v38 = vpop.f32.mrb[59].mxu1 }
 0x5ab   : > { %5497 = vst.msk [vmem:[%s14614_s7 + $0x5d0] sm:$0xff] %vm1593_vm13, %v4962_v38  ;;  %v11256_v45 = vpop.f32.mrb[54].mxu0 }
 0x5ac   : > { %7098 = vst.msk [vmem:[%s14653_s10 + $0x5b8] sm:$0xff] %vm1593_vm13, %v11256_v45  ;;  %v6546_v59 = vpop.f32.mrb[55].mxu0 }
 0x5ad   : > { %v10875_v61 = vpop.f32.mrb[60].mxu1  ;;  %7097 = vst.msk [vmem:[%s14653_s10 + $0x5b0] sm:$0xff] %vm1593_vm13, %v6546_v59 }
 0x5ae   : > { %5500 = vst.msk [vmem:[%s14614_s7 + $0x5e8] sm:$0xff] %vm1593_vm13, %v10875_v61  ;;  %v4972_v24 = vpop.f32.mrb[61].mxu1 }
 0x5af   : > { %5499 = vst.msk [vmem:[%s14614_s7 + $0x5e0] sm:$0xff] %vm1593_vm13, %v4972_v24  ;;  %v11259_v1 = vpop.f32.mrb[56].mxu0 }
 0x5b0   : > { %7100 = vst.msk [vmem:[%s14653_s10 + $0x5c8] sm:$0xff] %vm1593_vm13, %v11259_v1  ;;  %v6556_v3 = vpop.f32.mrb[57].mxu0 }
 0x5b1   : > { %v10878_v21 = vpop.f32.mrb[62].mxu1  ;;  %7099 = vst.msk [vmem:[%s14653_s10 + $0x5c0] sm:$0xff] %vm1593_vm13, %v6556_v3 }
 0x5b2   : > { %5502 = vst.msk [vmem:[%s14614_s7 + $0x5f8] sm:$0xff] %vm1593_vm13, %v10878_v21  ;;  %v4982_v46 = vpop.f32.mrb[63].mxu1 }
 0x5b3   : > { %5501 = vst.msk [vmem:[%s14614_s7 + $0x5f0] sm:$0xff] %vm1593_vm13, %v4982_v46  ;;  %v11262_v35 = vpop.f32.mrb[58].mxu0 }
 0x5b4   : > { %7102 = vst.msk [vmem:[%s14653_s10 + $0x5d8] sm:$0xff] %vm1593_vm13, %v11262_v35  ;;  %v6566_v23 = vpop.f32.mrb[59].mxu0 }
 0x5b5   : > { %v10881_v44 = vpop.f32.mrb[64].mxu1  ;;  %7101 = vst.msk [vmem:[%s14653_s10 + $0x5d0] sm:$0xff] %vm1593_vm13, %v6566_v23 }
 0x5b6   : > { %5504 = vst.msk [vmem:[%s14614_s7 + $0x608] sm:$0xff] %vm1593_vm13, %v10881_v44  ;;  %v4992_v33 = vpop.f32.mrb[65].mxu1 }
 0x5b7   : > { %5503 = vst.msk [vmem:[%s14614_s7 + $0x600] sm:$0xff] %vm1593_vm13, %v4992_v33  ;;  %v11265_v41 = vpop.f32.mrb[60].mxu0 }
 0x5b8   : > { %7104 = vst.msk [vmem:[%s14653_s10 + $0x5e8] sm:$0xff] %vm1593_vm13, %v11265_v41  ;;  %v6576_v13 = vpop.f32.mrb[61].mxu0 }
 0x5b9   : > { %v10884_v10 = vpop.f32.mrb[66].mxu1  ;;  %7103 = vst.msk [vmem:[%s14653_s10 + $0x5e0] sm:$0xff] %vm1593_vm13, %v6576_v13 }
 0x5ba   : > { %5506 = vst.msk [vmem:[%s14614_s7 + $0x618] sm:$0xff] %vm1593_vm13, %v10884_v10  ;;  %v5002_v29 = vpop.f32.mrb[67].mxu1 }
 0x5bb   : > { %5505 = vst.msk [vmem:[%s14614_s7 + $0x610] sm:$0xff] %vm1593_vm13, %v5002_v29  ;;  %v11268_v22 = vpop.f32.mrb[62].mxu0 }
 0x5bc   : > { %7106 = vst.msk [vmem:[%s14653_s10 + $0x5f8] sm:$0xff] %vm1593_vm13, %v11268_v22  ;;  %v6586_v20 = vpop.f32.mrb[63].mxu0 }
 0x5bd   : > { %v10887_v11 = vpop.f32.mrb[68].mxu1  ;;  %7105 = vst.msk [vmem:[%s14653_s10 + $0x5f0] sm:$0xff] %vm1593_vm13, %v6586_v20 }
 0x5be   : > { %5508 = vst.msk [vmem:[%s14614_s7 + $0x628] sm:$0xff] %vm1593_vm13, %v10887_v11  ;;  %v5012_v31 = vpop.f32.mrb[69].mxu1 }
 0x5bf   : > { %5507 = vst.msk [vmem:[%s14614_s7 + $0x620] sm:$0xff] %vm1593_vm13, %v5012_v31  ;;  %v11271_v47 = vpop.f32.mrb[64].mxu0 }
 0x5c0   : > { %7108 = vst.msk [vmem:[%s14653_s10 + $0x608] sm:$0xff] %vm1593_vm13, %v11271_v47  ;;  %v6596_v36 = vpop.f32.mrb[65].mxu0 }
 0x5c1   : > { %v10890_v54 = vpop.f32.mrb[70].mxu1  ;;  %7107 = vst.msk [vmem:[%s14653_s10 + $0x600] sm:$0xff] %vm1593_vm13, %v6596_v36 }
 0x5c2   : > { %5510 = vst.msk [vmem:[%s14614_s7 + $0x638] sm:$0xff] %vm1593_vm13, %v10890_v54  ;;  %v5022_v57 = vpop.f32.mrb[71].mxu1 }
 0x5c3   : > { %5509 = vst.msk [vmem:[%s14614_s7 + $0x630] sm:$0xff] %vm1593_vm13, %v5022_v57  ;;  %v11274_v37 = vpop.f32.mrb[66].mxu0 }
 0x5c4   : > { %7110 = vst.msk [vmem:[%s14653_s10 + $0x618] sm:$0xff] %vm1593_vm13, %v11274_v37  ;;  %v6606_v42 = vpop.f32.mrb[67].mxu0 }
 0x5c5   : > { %v10893_v52 = vpop.f32.mrb[72].mxu1  ;;  %7109 = vst.msk [vmem:[%s14653_s10 + $0x610] sm:$0xff] %vm1593_vm13, %v6606_v42 }
 0x5c6   : > { %5512 = vst.msk [vmem:[%s14614_s7 + $0x648] sm:$0xff] %vm1593_vm13, %v10893_v52  ;;  %v5032_v51 = vpop.f32.mrb[73].mxu1 }
 0x5c7   : > { %5511 = vst.msk [vmem:[%s14614_s7 + $0x640] sm:$0xff] %vm1593_vm13, %v5032_v51  ;;  %v11277_v43 = vpop.f32.mrb[68].mxu0 }
 0x5c8   : > { %7112 = vst.msk [vmem:[%s14653_s10 + $0x628] sm:$0xff] %vm1593_vm13, %v11277_v43  ;;  %v6616_v28 = vpop.f32.mrb[69].mxu0 }
 0x5c9   : > { %v10896_v19 = vpop.f32.mrb[74].mxu1  ;;  %7111 = vst.msk [vmem:[%s14653_s10 + $0x620] sm:$0xff] %vm1593_vm13, %v6616_v28 }
 0x5ca   : > { %5514 = vst.msk [vmem:[%s14614_s7 + $0x658] sm:$0xff] %vm1593_vm13, %v10896_v19  ;;  %v5042_v26 = vpop.f32.mrb[75].mxu1 }
 0x5cb   : > { %5513 = vst.msk [vmem:[%s14614_s7 + $0x650] sm:$0xff] %vm1593_vm13, %v5042_v26  ;;  %v11280_v32 = vpop.f32.mrb[70].mxu0 }
 0x5cc   : > { %7114 = vst.msk [vmem:[%s14653_s10 + $0x638] sm:$0xff] %vm1593_vm13, %v11280_v32  ;;  %v6626_v14 = vpop.f32.mrb[71].mxu0 }
 0x5cd   : > { %v10899_v15 = vpop.f32.mrb[76].mxu1  ;;  %7113 = vst.msk [vmem:[%s14653_s10 + $0x630] sm:$0xff] %vm1593_vm13, %v6626_v14 }
 0x5ce   : > { %5516 = vst.msk [vmem:[%s14614_s7 + $0x668] sm:$0xff] %vm1593_vm13, %v10899_v15  ;;  %v5052_v5 = vpop.f32.mrb[77].mxu1 }
 0x5cf   : > { %5515 = vst.msk [vmem:[%s14614_s7 + $0x660] sm:$0xff] %vm1593_vm13, %v5052_v5  ;;  %v11283_v48 = vpop.f32.mrb[72].mxu0 }
 0x5d0   : > { %7116 = vst.msk [vmem:[%s14653_s10 + $0x648] sm:$0xff] %vm1593_vm13, %v11283_v48  ;;  %v6636_v4 = vpop.f32.mrb[73].mxu0 }
 0x5d1   : > { %v10902_v18 = vpop.f32.mrb[78].mxu1  ;;  %7115 = vst.msk [vmem:[%s14653_s10 + $0x640] sm:$0xff] %vm1593_vm13, %v6636_v4 }
 0x5d2   : > { %5518 = vst.msk [vmem:[%s14614_s7 + $0x678] sm:$0xff] %vm1593_vm13, %v10902_v18  ;;  %v5062_v49 = vpop.f32.mrb[79].mxu1 }
 0x5d3   : > { %5517 = vst.msk [vmem:[%s14614_s7 + $0x670] sm:$0xff] %vm1593_vm13, %v5062_v49  ;;  %v11286_v56 = vpop.f32.mrb[74].mxu0 }
 0x5d4   : > { %7118 = vst.msk [vmem:[%s14653_s10 + $0x658] sm:$0xff] %vm1593_vm13, %v11286_v56  ;;  %v6646_v7 = vpop.f32.mrb[75].mxu0 }
 0x5d5   : > { %v10905_v30 = vpop.f32.mrb[80].mxu1  ;;  %7117 = vst.msk [vmem:[%s14653_s10 + $0x650] sm:$0xff] %vm1593_vm13, %v6646_v7 }
 0x5d6   : > { %5520 = vst.msk [vmem:[%s14614_s7 + $0x688] sm:$0xff] %vm1593_vm13, %v10905_v30  ;;  %v5072_v39 = vpop.f32.mrb[81].mxu1 }
 0x5d7   : > { %5519 = vst.msk [vmem:[%s14614_s7 + $0x680] sm:$0xff] %vm1593_vm13, %v5072_v39  ;;  %v11289_v17 = vpop.f32.mrb[76].mxu0 }
 0x5d8   : > { %7120 = vst.msk [vmem:[%s14653_s10 + $0x668] sm:$0xff] %vm1593_vm13, %v11289_v17  ;;  %v6656_v9 = vpop.f32.mrb[77].mxu0 }
 0x5d9   : > { %v10908_v50 = vpop.f32.mrb[82].mxu1  ;;  %7119 = vst.msk [vmem:[%s14653_s10 + $0x660] sm:$0xff] %vm1593_vm13, %v6656_v9 }
 0x5da   : > { %5522 = vst.msk [vmem:[%s14614_s7 + $0x698] sm:$0xff] %vm1593_vm13, %v10908_v50  ;;  %v5082_v6 = vpop.f32.mrb[83].mxu1 }
 0x5db   : > { %5521 = vst.msk [vmem:[%s14614_s7 + $0x690] sm:$0xff] %vm1593_vm13, %v5082_v6  ;;  %v11292_v53 = vpop.f32.mrb[78].mxu0 }
 0x5dc   : > { %7122 = vst.msk [vmem:[%s14653_s10 + $0x678] sm:$0xff] %vm1593_vm13, %v11292_v53  ;;  %v6666_v2 = vpop.f32.mrb[79].mxu0 }
 0x5dd   : > { %v10911_v40 = vpop.f32.mrb[84].mxu1  ;;  %7121 = vst.msk [vmem:[%s14653_s10 + $0x670] sm:$0xff] %vm1593_vm13, %v6666_v2 }
 0x5de   : > { %5524 = vst.msk [vmem:[%s14614_s7 + $0x6a8] sm:$0xff] %vm1593_vm13, %v10911_v40  ;;  %v5092_v62 = vpop.f32.mrb[85].mxu1 }
 0x5df   : > { %5523 = vst.msk [vmem:[%s14614_s7 + $0x6a0] sm:$0xff] %vm1593_vm13, %v5092_v62  ;;  %v11295_v27 = vpop.f32.mrb[80].mxu0 }
 0x5e0   : > { %7124 = vst.msk [vmem:[%s14653_s10 + $0x688] sm:$0xff] %vm1593_vm13, %v11295_v27  ;;  %v6676_v55 = vpop.f32.mrb[81].mxu0 }
 0x5e1   : > { %v10914_v60 = vpop.f32.mrb[86].mxu1  ;;  %7123 = vst.msk [vmem:[%s14653_s10 + $0x680] sm:$0xff] %vm1593_vm13, %v6676_v55 }
 0x5e2   : > { %5526 = vst.msk [vmem:[%s14614_s7 + $0x6b8] sm:$0xff] %vm1593_vm13, %v10914_v60  ;;  %v5102_v63 = vpop.f32.mrb[87].mxu1 }
 0x5e3   : > { %5525 = vst.msk [vmem:[%s14614_s7 + $0x6b0] sm:$0xff] %vm1593_vm13, %v5102_v63  ;;  %v11298_v0 = vpop.f32.mrb[82].mxu0 }
 0x5e4   : > { %7126 = vst.msk [vmem:[%s14653_s10 + $0x698] sm:$0xff] %vm1593_vm13, %v11298_v0  ;;  %v6686_v58 = vpop.f32.mrb[83].mxu0 }
 0x5e5   : > { %v10917_v16 = vpop.f32.mrb[88].mxu1  ;;  %7125 = vst.msk [vmem:[%s14653_s10 + $0x690] sm:$0xff] %vm1593_vm13, %v6686_v58 }
 0x5e6   : > { %5528 = vst.msk [vmem:[%s14614_s7 + $0x6c8] sm:$0xff] %vm1593_vm13, %v10917_v16  ;;  %v5112_v12 = vpop.f32.mrb[89].mxu1 }
 0x5e7   : > { %5527 = vst.msk [vmem:[%s14614_s7 + $0x6c0] sm:$0xff] %vm1593_vm13, %v5112_v12  ;;  %v11301_v25 = vpop.f32.mrb[84].mxu0 }
 0x5e8   : > { %7128 = vst.msk [vmem:[%s14653_s10 + $0x6a8] sm:$0xff] %vm1593_vm13, %v11301_v25  ;;  %v6696_v8 = vpop.f32.mrb[85].mxu0 }
 0x5e9   : > { %v10920_v34 = vpop.f32.mrb[90].mxu1  ;;  %7127 = vst.msk [vmem:[%s14653_s10 + $0x6a0] sm:$0xff] %vm1593_vm13, %v6696_v8 }
 0x5ea   : > { %5530 = vst.msk [vmem:[%s14614_s7 + $0x6d8] sm:$0xff] %vm1593_vm13, %v10920_v34  ;;  %v5122_v38 = vpop.f32.mrb[91].mxu1 }
 0x5eb   : > { %5529 = vst.msk [vmem:[%s14614_s7 + $0x6d0] sm:$0xff] %vm1593_vm13, %v5122_v38  ;;  %v11304_v45 = vpop.f32.mrb[86].mxu0 }
 0x5ec   : > { %7130 = vst.msk [vmem:[%s14653_s10 + $0x6b8] sm:$0xff] %vm1593_vm13, %v11304_v45  ;;  %v6706_v59 = vpop.f32.mrb[87].mxu0 }
 0x5ed   : > { %v10923_v61 = vpop.f32.mrb[92].mxu1  ;;  %7129 = vst.msk [vmem:[%s14653_s10 + $0x6b0] sm:$0xff] %vm1593_vm13, %v6706_v59 }
 0x5ee   : > { %5532 = vst.msk [vmem:[%s14614_s7 + $0x6e8] sm:$0xff] %vm1593_vm13, %v10923_v61  ;;  %v5132_v24 = vpop.f32.mrb[93].mxu1 }
 0x5ef   : > { %5531 = vst.msk [vmem:[%s14614_s7 + $0x6e0] sm:$0xff] %vm1593_vm13, %v5132_v24  ;;  %v11307_v1 = vpop.f32.mrb[88].mxu0 }
 0x5f0   : > { %7132 = vst.msk [vmem:[%s14653_s10 + $0x6c8] sm:$0xff] %vm1593_vm13, %v11307_v1  ;;  %v6716_v3 = vpop.f32.mrb[89].mxu0 }
 0x5f1   : > { %v10926_v21 = vpop.f32.mrb[94].mxu1  ;;  %7131 = vst.msk [vmem:[%s14653_s10 + $0x6c0] sm:$0xff] %vm1593_vm13, %v6716_v3 }
 0x5f2   : > { %5534 = vst.msk [vmem:[%s14614_s7 + $0x6f8] sm:$0xff] %vm1593_vm13, %v10926_v21  ;;  %v5142_v46 = vpop.f32.mrb[95].mxu1 }
 0x5f3   : > { %5533 = vst.msk [vmem:[%s14614_s7 + $0x6f0] sm:$0xff] %vm1593_vm13, %v5142_v46  ;;  %v11310_v35 = vpop.f32.mrb[90].mxu0 }
 0x5f4   : > { %7134 = vst.msk [vmem:[%s14653_s10 + $0x6d8] sm:$0xff] %vm1593_vm13, %v11310_v35  ;;  %v6726_v23 = vpop.f32.mrb[91].mxu0 }
 0x5f5   : > { %v10929_v44 = vpop.f32.mrb[96].mxu1  ;;  %7133 = vst.msk [vmem:[%s14653_s10 + $0x6d0] sm:$0xff] %vm1593_vm13, %v6726_v23 }
 0x5f6   : > { %5536 = vst.msk [vmem:[%s14614_s7 + $0x708] sm:$0xff] %vm1593_vm13, %v10929_v44  ;;  %v5152_v33 = vpop.f32.mrb[97].mxu1 }
 0x5f7   : > { %5535 = vst.msk [vmem:[%s14614_s7 + $0x700] sm:$0xff] %vm1593_vm13, %v5152_v33  ;;  %v11313_v41 = vpop.f32.mrb[92].mxu0 }
 0x5f8   : > { %7136 = vst.msk [vmem:[%s14653_s10 + $0x6e8] sm:$0xff] %vm1593_vm13, %v11313_v41  ;;  %v6736_v13 = vpop.f32.mrb[93].mxu0 }
 0x5f9   : > { %v10932_v10 = vpop.f32.mrb[98].mxu1  ;;  %7135 = vst.msk [vmem:[%s14653_s10 + $0x6e0] sm:$0xff] %vm1593_vm13, %v6736_v13 }
 0x5fa   : > { %5538 = vst.msk [vmem:[%s14614_s7 + $0x718] sm:$0xff] %vm1593_vm13, %v10932_v10  ;;  %v5162_v29 = vpop.f32.mrb[99].mxu1 }
 0x5fb   : > { %5537 = vst.msk [vmem:[%s14614_s7 + $0x710] sm:$0xff] %vm1593_vm13, %v5162_v29  ;;  %v11316_v22 = vpop.f32.mrb[94].mxu0 }
 0x5fc   : > { %7138 = vst.msk [vmem:[%s14653_s10 + $0x6f8] sm:$0xff] %vm1593_vm13, %v11316_v22  ;;  %v6746_v20 = vpop.f32.mrb[95].mxu0 }
 0x5fd   : > { %v10935_v11 = vpop.f32.mrb[100].mxu1  ;;  %7137 = vst.msk [vmem:[%s14653_s10 + $0x6f0] sm:$0xff] %vm1593_vm13, %v6746_v20 }
 0x5fe   : > { %5540 = vst.msk [vmem:[%s14614_s7 + $0x728] sm:$0xff] %vm1593_vm13, %v10935_v11  ;;  %v5172_v31 = vpop.f32.mrb[101].mxu1 }
 0x5ff   : > { %5539 = vst.msk [vmem:[%s14614_s7 + $0x720] sm:$0xff] %vm1593_vm13, %v5172_v31  ;;  %v11319_v47 = vpop.f32.mrb[96].mxu0 }
 0x600   : > { %7140 = vst.msk [vmem:[%s14653_s10 + $0x708] sm:$0xff] %vm1593_vm13, %v11319_v47  ;;  %v6756_v36 = vpop.f32.mrb[97].mxu0 }
 0x601   : > { %v10938_v54 = vpop.f32.mrb[102].mxu1  ;;  %7139 = vst.msk [vmem:[%s14653_s10 + $0x700] sm:$0xff] %vm1593_vm13, %v6756_v36 }
 0x602   : > { %5542 = vst.msk [vmem:[%s14614_s7 + $0x738] sm:$0xff] %vm1593_vm13, %v10938_v54  ;;  %v5182_v57 = vpop.f32.mrb[103].mxu1 }
 0x603   : > { %5541 = vst.msk [vmem:[%s14614_s7 + $0x730] sm:$0xff] %vm1593_vm13, %v5182_v57  ;;  %v11322_v37 = vpop.f32.mrb[98].mxu0 }
 0x604   : > { %7142 = vst.msk [vmem:[%s14653_s10 + $0x718] sm:$0xff] %vm1593_vm13, %v11322_v37  ;;  %v6766_v42 = vpop.f32.mrb[99].mxu0 }
 0x605   : > { %v10941_v52 = vpop.f32.mrb[104].mxu1  ;;  %7141 = vst.msk [vmem:[%s14653_s10 + $0x710] sm:$0xff] %vm1593_vm13, %v6766_v42 }
 0x606   : > { %5544 = vst.msk [vmem:[%s14614_s7 + $0x748] sm:$0xff] %vm1593_vm13, %v10941_v52  ;;  %v5192_v51 = vpop.f32.mrb[105].mxu1 }
 0x607   : > { %5543 = vst.msk [vmem:[%s14614_s7 + $0x740] sm:$0xff] %vm1593_vm13, %v5192_v51  ;;  %v11325_v43 = vpop.f32.mrb[100].mxu0 }
 0x608   : > { %7144 = vst.msk [vmem:[%s14653_s10 + $0x728] sm:$0xff] %vm1593_vm13, %v11325_v43  ;;  %v6776_v28 = vpop.f32.mrb[101].mxu0 }
 0x609   : > { %v10944_v19 = vpop.f32.mrb[106].mxu1  ;;  %7143 = vst.msk [vmem:[%s14653_s10 + $0x720] sm:$0xff] %vm1593_vm13, %v6776_v28 }
 0x60a   : > { %5546 = vst.msk [vmem:[%s14614_s7 + $0x758] sm:$0xff] %vm1593_vm13, %v10944_v19  ;;  %v5202_v26 = vpop.f32.mrb[107].mxu1 }
 0x60b   : > { %5545 = vst.msk [vmem:[%s14614_s7 + $0x750] sm:$0xff] %vm1593_vm13, %v5202_v26  ;;  %v11328_v32 = vpop.f32.mrb[102].mxu0 }
 0x60c   : > { %7146 = vst.msk [vmem:[%s14653_s10 + $0x738] sm:$0xff] %vm1593_vm13, %v11328_v32  ;;  %v6786_v14 = vpop.f32.mrb[103].mxu0 }
 0x60d   : > { %v10947_v15 = vpop.f32.mrb[108].mxu1  ;;  %7145 = vst.msk [vmem:[%s14653_s10 + $0x730] sm:$0xff] %vm1593_vm13, %v6786_v14 }
 0x60e   : > { %5548 = vst.msk [vmem:[%s14614_s7 + $0x768] sm:$0xff] %vm1593_vm13, %v10947_v15  ;;  %v5212_v5 = vpop.f32.mrb[109].mxu1 }
 0x60f   : > { %5547 = vst.msk [vmem:[%s14614_s7 + $0x760] sm:$0xff] %vm1593_vm13, %v5212_v5  ;;  %v11331_v48 = vpop.f32.mrb[104].mxu0 }
 0x610   : > { %7148 = vst.msk [vmem:[%s14653_s10 + $0x748] sm:$0xff] %vm1593_vm13, %v11331_v48  ;;  %v6796_v4 = vpop.f32.mrb[105].mxu0 }
 0x611   : > { %v10950_v18 = vpop.f32.mrb[110].mxu1  ;;  %7147 = vst.msk [vmem:[%s14653_s10 + $0x740] sm:$0xff] %vm1593_vm13, %v6796_v4 }
 0x612   : > { %5550 = vst.msk [vmem:[%s14614_s7 + $0x778] sm:$0xff] %vm1593_vm13, %v10950_v18  ;;  %v5222_v49 = vpop.f32.mrb[111].mxu1 }
 0x613   : > { %5549 = vst.msk [vmem:[%s14614_s7 + $0x770] sm:$0xff] %vm1593_vm13, %v5222_v49  ;;  %v11334_v56 = vpop.f32.mrb[106].mxu0 }
 0x614   : > { %7150 = vst.msk [vmem:[%s14653_s10 + $0x758] sm:$0xff] %vm1593_vm13, %v11334_v56  ;;  %v6806_v7 = vpop.f32.mrb[107].mxu0 }
 0x615   : > { %v10953_v30 = vpop.f32.mrb[112].mxu1  ;;  %7149 = vst.msk [vmem:[%s14653_s10 + $0x750] sm:$0xff] %vm1593_vm13, %v6806_v7 }
 0x616   : > { %5552 = vst.msk [vmem:[%s14614_s7 + $0x788] sm:$0xff] %vm1593_vm13, %v10953_v30  ;;  %v5232_v39 = vpop.f32.mrb[113].mxu1 }
 0x617   : > { %5551 = vst.msk [vmem:[%s14614_s7 + $0x780] sm:$0xff] %vm1593_vm13, %v5232_v39  ;;  %v11337_v17 = vpop.f32.mrb[108].mxu0 }
 0x618   : > { %7152 = vst.msk [vmem:[%s14653_s10 + $0x768] sm:$0xff] %vm1593_vm13, %v11337_v17  ;;  %v6816_v9 = vpop.f32.mrb[109].mxu0 }
 0x619   : > { %v10956_v50 = vpop.f32.mrb[114].mxu1  ;;  %7151 = vst.msk [vmem:[%s14653_s10 + $0x760] sm:$0xff] %vm1593_vm13, %v6816_v9 }
 0x61a   : > { %5554 = vst.msk [vmem:[%s14614_s7 + $0x798] sm:$0xff] %vm1593_vm13, %v10956_v50  ;;  %v5242_v6 = vpop.f32.mrb[115].mxu1 }
 0x61b   : > { %5553 = vst.msk [vmem:[%s14614_s7 + $0x790] sm:$0xff] %vm1593_vm13, %v5242_v6  ;;  %v11340_v53 = vpop.f32.mrb[110].mxu0 }
 0x61c   : > { %7154 = vst.msk [vmem:[%s14653_s10 + $0x778] sm:$0xff] %vm1593_vm13, %v11340_v53  ;;  %v6826_v2 = vpop.f32.mrb[111].mxu0 }
 0x61d   : > { %v10959_v40 = vpop.f32.mrb[116].mxu1  ;;  %7153 = vst.msk [vmem:[%s14653_s10 + $0x770] sm:$0xff] %vm1593_vm13, %v6826_v2 }
 0x61e   : > { %5556 = vst.msk [vmem:[%s14614_s7 + $0x7a8] sm:$0xff] %vm1593_vm13, %v10959_v40  ;;  %v5252_v62 = vpop.f32.mrb[117].mxu1 }
 0x61f   : > { %5555 = vst.msk [vmem:[%s14614_s7 + $0x7a0] sm:$0xff] %vm1593_vm13, %v5252_v62  ;;  %v11343_v27 = vpop.f32.mrb[112].mxu0 }
 0x620   : > { %7156 = vst.msk [vmem:[%s14653_s10 + $0x788] sm:$0xff] %vm1593_vm13, %v11343_v27  ;;  %v6836_v55 = vpop.f32.mrb[113].mxu0 }
 0x621   : > { %v10962_v60 = vpop.f32.mrb[118].mxu1  ;;  %7155 = vst.msk [vmem:[%s14653_s10 + $0x780] sm:$0xff] %vm1593_vm13, %v6836_v55 }
 0x622   : > { %5558 = vst.msk [vmem:[%s14614_s7 + $0x7b8] sm:$0xff] %vm1593_vm13, %v10962_v60  ;;  %v5262_v63 = vpop.f32.mrb[119].mxu1 }
 0x623   : > { %5557 = vst.msk [vmem:[%s14614_s7 + $0x7b0] sm:$0xff] %vm1593_vm13, %v5262_v63  ;;  %v11346_v0 = vpop.f32.mrb[114].mxu0 }
 0x624   : > { %7158 = vst.msk [vmem:[%s14653_s10 + $0x798] sm:$0xff] %vm1593_vm13, %v11346_v0  ;;  %v6846_v58 = vpop.f32.mrb[115].mxu0 }
 0x625   : > { %v10965_v16 = vpop.f32.mrb[120].mxu1  ;;  %7157 = vst.msk [vmem:[%s14653_s10 + $0x790] sm:$0xff] %vm1593_vm13, %v6846_v58 }
 0x626   : > { %5560 = vst.msk [vmem:[%s14614_s7 + $0x7c8] sm:$0xff] %vm1593_vm13, %v10965_v16  ;;  %v5272_v12 = vpop.f32.mrb[121].mxu1 }
 0x627   : > { %5559 = vst.msk [vmem:[%s14614_s7 + $0x7c0] sm:$0xff] %vm1593_vm13, %v5272_v12  ;;  %v11349_v25 = vpop.f32.mrb[116].mxu0 }
 0x628   : > { %7160 = vst.msk [vmem:[%s14653_s10 + $0x7a8] sm:$0xff] %vm1593_vm13, %v11349_v25  ;;  %v6856_v8 = vpop.f32.mrb[117].mxu0 }
 0x629   : > { %v10968_v34 = vpop.f32.mrb[122].mxu1  ;;  %7159 = vst.msk [vmem:[%s14653_s10 + $0x7a0] sm:$0xff] %vm1593_vm13, %v6856_v8 }
 0x62a   : > { %5562 = vst.msk [vmem:[%s14614_s7 + $0x7d8] sm:$0xff] %vm1593_vm13, %v10968_v34  ;;  %v5282_v38 = vpop.f32.mrb[123].mxu1 }
 0x62b   : > { %5561 = vst.msk [vmem:[%s14614_s7 + $0x7d0] sm:$0xff] %vm1593_vm13, %v5282_v38  ;;  %v11352_v45 = vpop.f32.mrb[118].mxu0 }
 0x62c   : > { %7162 = vst.msk [vmem:[%s14653_s10 + $0x7b8] sm:$0xff] %vm1593_vm13, %v11352_v45  ;;  %v6866_v59 = vpop.f32.mrb[119].mxu0 }
 0x62d   : > { %v10971_v61 = vpop.f32.mrb[124].mxu1  ;;  %7161 = vst.msk [vmem:[%s14653_s10 + $0x7b0] sm:$0xff] %vm1593_vm13, %v6866_v59 }
 0x62e   : > { %5564 = vst.msk [vmem:[%s14614_s7 + $0x7e8] sm:$0xff] %vm1593_vm13, %v10971_v61  ;;  %v5292_v24 = vpop.f32.mrb[125].mxu1 }
 0x62f   : > { %5563 = vst.msk [vmem:[%s14614_s7 + $0x7e0] sm:$0xff] %vm1593_vm13, %v5292_v24  ;;  %v11355_v1 = vpop.f32.mrb[120].mxu0 }
 0x630   : > { %7164 = vst.msk [vmem:[%s14653_s10 + $0x7c8] sm:$0xff] %vm1593_vm13, %v11355_v1  ;;  %v6876_v3 = vpop.f32.mrb[121].mxu0 }
 0x631   : > { %v10974_v21 = vpop.f32.mrb[126].mxu1  ;;  %7163 = vst.msk [vmem:[%s14653_s10 + $0x7c0] sm:$0xff] %vm1593_vm13, %v6876_v3 }
 0x632   : > { %5566 = vst.msk [vmem:[%s14614_s7 + $0x7f8] sm:$0xff] %vm1593_vm13, %v10974_v21  ;;  %v5302_v46 = vpop.f32.mrb[127].mxu1 }
 0x633   : > { %5565 = vst.msk [vmem:[%s14614_s7 + $0x7f0] sm:$0xff] %vm1593_vm13, %v5302_v46  ;;  %v11358_v35 = vpop.f32.mrb[122].mxu0 }
 0x634   : > { %7166 = vst.msk [vmem:[%s14653_s10 + $0x7d8] sm:$0xff] %vm1593_vm13, %v11358_v35  ;;  %v6886_v23 = vpop.f32.mrb[123].mxu0 }
 0x635   : > { %7165 = vst.msk [vmem:[%s14653_s10 + $0x7d0] sm:$0xff] %vm1593_vm13, %v6886_v23 }
 0x637   : > { %v11361_v44 = vpop.f32.mrb[124].mxu0  ;;  %7185 = sbr.rel (!%p12295_p6) target bundleno = 1670 (0x686), region = 56 }
 0x638   : > { %7168 = vst.msk [vmem:[%s14653_s10 + $0x7e8] sm:$0xff] %vm1593_vm13, %v11361_v44  ;;  %v6896_v33 = vpop.f32.mrb[125].mxu0 }
 0x639   : > { %7167 = vst.msk [vmem:[%s14653_s10 + $0x7e0] sm:$0xff] %vm1593_vm13, %v6896_v33 }
 0x63b   : > { %v11364_v41 = vpop.f32.mrb[126].mxu0 }
 0x63c   : > { %7170 = vst.msk [vmem:[%s14653_s10 + $0x7f8] sm:$0xff] %vm1593_vm13, %v11364_v41  ;;  %v6906_v13 = vpop.f32.mrb[127].mxu0 }
 0x63d   : > { %7169 = vst.msk [vmem:[%s14653_s10 + $0x7f0] sm:$0xff] %vm1593_vm13, %v6906_v13 }
 0x63e   : > { %s17683_s13 = smov (!%p7188_p9, %s7187_s13), 256 }
 0x63f   : > { %s9365_s21 = sshll.u32 %s17683_s13, 7 }
 0x640   : > { %p9368_p11 = scmp.eq.s32.totalorder %s9365_s21, 0 }
 0x641   : > { %s16264_s28 = sshrl.u32 (!%p9368_p11), %s17683_s13, 6 }
 0x642   : > { %7196 = sbr.rel (%p9368_p11) target bundleno = 1670 (0x686), region = 60  ;;  %p9369_p12 = scmp.le.s32.totalorder (!%p9368_p11), %s16264_s28, 0 }
 0x649   : > { %8418 = sbr.rel (%p9369_p12) target bundleno = 1649 (0x671), region = 286  ;;  %s17663_s18 = smov (!%p9369_p12), %s16258_s15 }
 0x64a   : > { %s17664_s19 = smov (!%p9369_p12), %s13049_s27  ;;  %s16273_s20 = smov (!%p9369_p12), 0  }
 0x64b   : > { %s16275_s9 = smov (!%p9369_p12), 0  }
 0x650 LB: >> { %v7384_v10 = vld [vmem:[%s12026_s19] sm:$0xff]  ;;  %v7386_v29 = vld [vmem:[%s12026_s19 + $0x8] sm:$0xff]  ;;  %v7388_v22 = vld [vmem:[%s12026_s19 + $0x10] sm:$0xff]  ;;  %s7512_s12 = sadd.s32 1, %s12030_s20  ;;  %s7378_s9 = sadd.s32 1, %s12034_s9   ;;  %s12034_s9 = sphi %s16275_s9, %s7378_s9   ;;  %s12030_s20 = sphi %s16273_s20, %s17667_s20   ;;  %s12026_s19 = sphi %s17664_s19, %s17666_s19   ;;  %s12022_s18 = sphi %s17663_s18, %s17665_s18  }
 0x651   : >> { %7385 = vst [vmem:[%s12022_s18] sm:$0xff] %v7384_v10  ;;  %7387 = vst [vmem:[%s12022_s18 + $0x8] sm:$0xff] %v7386_v29  ;;  %v7390_v20 = vld [vmem:[%s12026_s19 + $0x18] sm:$0xff]  ;;  %v7392_v11 = vld [vmem:[%s12026_s19 + $0x20] sm:$0xff]  ;;  %p7513_p0 = scmp.ge.s32.totalorder %s7512_s12, %s16264_s28  ;;  %p7377_p4 = scmp.ge.s32.totalorder %s7378_s9, %s16264_s28 }
 0x652   : >> { %7389 = vst [vmem:[%s12022_s18 + $0x10] sm:$0xff] %v7388_v22  ;;  %v7394_v31 = vld [vmem:[%s12026_s19 + $0x28] sm:$0xff]  ;;  %7391 = vst [vmem:[%s12022_s18 + $0x18] sm:$0xff] %v7390_v20  ;;  %v7396_v47 = vld [vmem:[%s12026_s19 + $0x30] sm:$0xff] }
 0x653   : >> { %7393 = vst [vmem:[%s12022_s18 + $0x20] sm:$0xff] %v7392_v11  ;;  %7395 = vst [vmem:[%s12022_s18 + $0x28] sm:$0xff] %v7394_v31  ;;  %v7398_v36 = vld [vmem:[%s12026_s19 + $0x38] sm:$0xff]  ;;  %v7400_v54 = vld [vmem:[%s12026_s19 + $0x40] sm:$0xff]  ;;  %s17685_s12 = smov (%p7513_p0, %s7512_s12), 0 }
 0x654   : >> { %7397 = vst [vmem:[%s12022_s18 + $0x30] sm:$0xff] %v7396_v47  ;;  %7399 = vst [vmem:[%s12022_s18 + $0x38] sm:$0xff] %v7398_v36  ;;  %v7402_v57 = vld [vmem:[%s12026_s19 + $0x48] sm:$0xff]  ;;  %v7404_v37 = vld [vmem:[%s12026_s19 + $0x50] sm:$0xff]  ;;  %s9370_s8 = sshll.u32 %s17685_s12, 9  ;;  %s17667_s20 = smov %s17685_s12 }
 0x655   : >> { %7401 = vst [vmem:[%s12022_s18 + $0x40] sm:$0xff] %v7400_v54  ;;  %v7406_v42 = vld [vmem:[%s12026_s19 + $0x58] sm:$0xff]  ;;  %7403 = vst [vmem:[%s12022_s18 + $0x48] sm:$0xff] %v7402_v57  ;;  %v7408_v52 = vld [vmem:[%s12026_s19 + $0x60] sm:$0xff]  ;;  %s16331_s26 = scalar_lea.vmem %s13049_s27, %s9370_s8 [#allocation9]   ;;  %s16334_s11 = scalar_lea.vmem %s16258_s15, %s9370_s8  }
 0x656   : >> { %7405 = vst [vmem:[%s12022_s18 + $0x50] sm:$0xff] %v7404_v37  ;;  %7407 = vst [vmem:[%s12022_s18 + $0x58] sm:$0xff] %v7406_v42  ;;  %v7410_v51 = vld [vmem:[%s12026_s19 + $0x68] sm:$0xff]  ;;  %v7412_v43 = vld [vmem:[%s12026_s19 + $0x70] sm:$0xff] }
 0x657   : >> { %7409 = vst [vmem:[%s12022_s18 + $0x60] sm:$0xff] %v7408_v52  ;;  %7411 = vst [vmem:[%s12022_s18 + $0x68] sm:$0xff] %v7410_v51  ;;  %v7414_v28 = vld [vmem:[%s12026_s19 + $0x78] sm:$0xff]  ;;  %v7416_v19 = vld [vmem:[%s12026_s19 + $0x80] sm:$0xff] }
 0x658   : >> { %7413 = vst [vmem:[%s12022_s18 + $0x70] sm:$0xff] %v7412_v43  ;;  %v7418_v26 = vld [vmem:[%s12026_s19 + $0x88] sm:$0xff]  ;;  %7415 = vst [vmem:[%s12022_s18 + $0x78] sm:$0xff] %v7414_v28  ;;  %v7420_v32 = vld [vmem:[%s12026_s19 + $0x90] sm:$0xff] }
 0x659   : >> { %7417 = vst [vmem:[%s12022_s18 + $0x80] sm:$0xff] %v7416_v19  ;;  %7419 = vst [vmem:[%s12022_s18 + $0x88] sm:$0xff] %v7418_v26  ;;  %v7422_v14 = vld [vmem:[%s12026_s19 + $0x98] sm:$0xff]  ;;  %v7424_v15 = vld [vmem:[%s12026_s19 + $0xa0] sm:$0xff] }
 0x65a   : >> { %7421 = vst [vmem:[%s12022_s18 + $0x90] sm:$0xff] %v7420_v32  ;;  %7423 = vst [vmem:[%s12022_s18 + $0x98] sm:$0xff] %v7422_v14  ;;  %v7426_v5 = vld [vmem:[%s12026_s19 + $0xa8] sm:$0xff]  ;;  %v7428_v48 = vld [vmem:[%s12026_s19 + $0xb0] sm:$0xff] }
 0x65b   : >> { %7425 = vst [vmem:[%s12022_s18 + $0xa0] sm:$0xff] %v7424_v15  ;;  %v7430_v4 = vld [vmem:[%s12026_s19 + $0xb8] sm:$0xff]  ;;  %7427 = vst [vmem:[%s12022_s18 + $0xa8] sm:$0xff] %v7426_v5  ;;  %v7432_v18 = vld [vmem:[%s12026_s19 + $0xc0] sm:$0xff] }
 0x65c   : >> { %7429 = vst [vmem:[%s12022_s18 + $0xb0] sm:$0xff] %v7428_v48  ;;  %7431 = vst [vmem:[%s12022_s18 + $0xb8] sm:$0xff] %v7430_v4  ;;  %v7434_v49 = vld [vmem:[%s12026_s19 + $0xc8] sm:$0xff]  ;;  %v7436_v56 = vld [vmem:[%s12026_s19 + $0xd0] sm:$0xff] }
 0x65d   : >> { %7433 = vst [vmem:[%s12022_s18 + $0xc0] sm:$0xff] %v7432_v18  ;;  %7435 = vst [vmem:[%s12022_s18 + $0xc8] sm:$0xff] %v7434_v49  ;;  %v7438_v7 = vld [vmem:[%s12026_s19 + $0xd8] sm:$0xff]  ;;  %v7440_v30 = vld [vmem:[%s12026_s19 + $0xe0] sm:$0xff] }
 0x65e   : >> { %7437 = vst [vmem:[%s12022_s18 + $0xd0] sm:$0xff] %v7436_v56  ;;  %v7442_v39 = vld [vmem:[%s12026_s19 + $0xe8] sm:$0xff]  ;;  %7439 = vst [vmem:[%s12022_s18 + $0xd8] sm:$0xff] %v7438_v7  ;;  %v7444_v17 = vld [vmem:[%s12026_s19 + $0xf0] sm:$0xff] }
 0x65f   : >> { %7441 = vst [vmem:[%s12022_s18 + $0xe0] sm:$0xff] %v7440_v30  ;;  %7443 = vst [vmem:[%s12022_s18 + $0xe8] sm:$0xff] %v7442_v39  ;;  %v7446_v9 = vld [vmem:[%s12026_s19 + $0xf8] sm:$0xff]  ;;  %v7448_v50 = vld [vmem:[%s12026_s19 + $0x100] sm:$0xff] }
 0x660   : >> { %7445 = vst [vmem:[%s12022_s18 + $0xf0] sm:$0xff] %v7444_v17  ;;  %7447 = vst [vmem:[%s12022_s18 + $0xf8] sm:$0xff] %v7446_v9  ;;  %v7450_v6 = vld [vmem:[%s12026_s19 + $0x108] sm:$0xff]  ;;  %v7452_v53 = vld [vmem:[%s12026_s19 + $0x110] sm:$0xff] }
 0x661   : >> { %7449 = vst [vmem:[%s12022_s18 + $0x100] sm:$0xff] %v7448_v50  ;;  %v7454_v2 = vld [vmem:[%s12026_s19 + $0x118] sm:$0xff]  ;;  %7451 = vst [vmem:[%s12022_s18 + $0x108] sm:$0xff] %v7450_v6  ;;  %v7456_v40 = vld [vmem:[%s12026_s19 + $0x120] sm:$0xff] }
 0x662   : >> { %7453 = vst [vmem:[%s12022_s18 + $0x110] sm:$0xff] %v7452_v53  ;;  %7455 = vst [vmem:[%s12022_s18 + $0x118] sm:$0xff] %v7454_v2  ;;  %v7458_v62 = vld [vmem:[%s12026_s19 + $0x128] sm:$0xff]  ;;  %v7460_v27 = vld [vmem:[%s12026_s19 + $0x130] sm:$0xff] }
 0x663   : >> { %7457 = vst [vmem:[%s12022_s18 + $0x120] sm:$0xff] %v7456_v40  ;;  %7459 = vst [vmem:[%s12022_s18 + $0x128] sm:$0xff] %v7458_v62  ;;  %v7462_v55 = vld [vmem:[%s12026_s19 + $0x138] sm:$0xff]  ;;  %v7464_v60 = vld [vmem:[%s12026_s19 + $0x140] sm:$0xff] }
 0x664   : >> { %7461 = vst [vmem:[%s12022_s18 + $0x130] sm:$0xff] %v7460_v27  ;;  %v7466_v63 = vld [vmem:[%s12026_s19 + $0x148] sm:$0xff]  ;;  %7463 = vst [vmem:[%s12022_s18 + $0x138] sm:$0xff] %v7462_v55  ;;  %v7468_v0 = vld [vmem:[%s12026_s19 + $0x150] sm:$0xff] }
 0x665   : >> { %7465 = vst [vmem:[%s12022_s18 + $0x140] sm:$0xff] %v7464_v60  ;;  %7467 = vst [vmem:[%s12022_s18 + $0x148] sm:$0xff] %v7466_v63  ;;  %v7470_v58 = vld [vmem:[%s12026_s19 + $0x158] sm:$0xff]  ;;  %v7472_v16 = vld [vmem:[%s12026_s19 + $0x160] sm:$0xff] }
 0x666   : >> { %7469 = vst [vmem:[%s12022_s18 + $0x150] sm:$0xff] %v7468_v0  ;;  %7471 = vst [vmem:[%s12022_s18 + $0x158] sm:$0xff] %v7470_v58  ;;  %v7474_v12 = vld [vmem:[%s12026_s19 + $0x168] sm:$0xff]  ;;  %v7476_v25 = vld [vmem:[%s12026_s19 + $0x170] sm:$0xff] }
 0x667   : >> { %7473 = vst [vmem:[%s12022_s18 + $0x160] sm:$0xff] %v7472_v16  ;;  %v7478_v8 = vld [vmem:[%s12026_s19 + $0x178] sm:$0xff]  ;;  %7475 = vst [vmem:[%s12022_s18 + $0x168] sm:$0xff] %v7474_v12  ;;  %v7480_v34 = vld [vmem:[%s12026_s19 + $0x180] sm:$0xff] }
 0x668   : >> { %7477 = vst [vmem:[%s12022_s18 + $0x170] sm:$0xff] %v7476_v25  ;;  %7479 = vst [vmem:[%s12022_s18 + $0x178] sm:$0xff] %v7478_v8  ;;  %v7482_v38 = vld [vmem:[%s12026_s19 + $0x188] sm:$0xff]  ;;  %v7484_v45 = vld [vmem:[%s12026_s19 + $0x190] sm:$0xff] }
 0x669   : >> { %7481 = vst [vmem:[%s12022_s18 + $0x180] sm:$0xff] %v7480_v34  ;;  %7483 = vst [vmem:[%s12022_s18 + $0x188] sm:$0xff] %v7482_v38  ;;  %v7486_v59 = vld [vmem:[%s12026_s19 + $0x198] sm:$0xff]  ;;  %v7488_v61 = vld [vmem:[%s12026_s19 + $0x1a0] sm:$0xff] }
 0x66a   : >> { %7485 = vst [vmem:[%s12022_s18 + $0x190] sm:$0xff] %v7484_v45  ;;  %v7490_v24 = vld [vmem:[%s12026_s19 + $0x1a8] sm:$0xff]  ;;  %7487 = vst [vmem:[%s12022_s18 + $0x198] sm:$0xff] %v7486_v59  ;;  %v7492_v1 = vld [vmem:[%s12026_s19 + $0x1b0] sm:$0xff]  ;;  %7380 = sbr.rel (!%p7377_p4) target bundleno = 1616 (0x650), region = 292 }
 0x66b   : >> { %7489 = vst [vmem:[%s12022_s18 + $0x1a0] sm:$0xff] %v7488_v61  ;;  %7491 = vst [vmem:[%s12022_s18 + $0x1a8] sm:$0xff] %v7490_v24  ;;  %v7494_v3 = vld [vmem:[%s12026_s19 + $0x1b8] sm:$0xff]  ;;  %v7496_v21 = vld [vmem:[%s12026_s19 + $0x1c0] sm:$0xff] }
 0x66c   : >> { %7493 = vst [vmem:[%s12022_s18 + $0x1b0] sm:$0xff] %v7492_v1  ;;  %7495 = vst [vmem:[%s12022_s18 + $0x1b8] sm:$0xff] %v7494_v3  ;;  %v7498_v46 = vld [vmem:[%s12026_s19 + $0x1c8] sm:$0xff]  ;;  %v7500_v35 = vld [vmem:[%s12026_s19 + $0x1d0] sm:$0xff] }
 0x66d   : >> { %7497 = vst [vmem:[%s12022_s18 + $0x1c0] sm:$0xff] %v7496_v21  ;;  %v7502_v23 = vld [vmem:[%s12026_s19 + $0x1d8] sm:$0xff]  ;;  %7499 = vst [vmem:[%s12022_s18 + $0x1c8] sm:$0xff] %v7498_v46  ;;  %v7504_v44 = vld [vmem:[%s12026_s19 + $0x1e0] sm:$0xff] }
 0x66e   : >> { %7501 = vst [vmem:[%s12022_s18 + $0x1d0] sm:$0xff] %v7500_v35  ;;  %7503 = vst [vmem:[%s12022_s18 + $0x1d8] sm:$0xff] %v7502_v23  ;;  %v7506_v33 = vld [vmem:[%s12026_s19 + $0x1e8] sm:$0xff]  ;;  %v7508_v41 = vld [vmem:[%s12026_s19 + $0x1f0] sm:$0xff] }
 0x66f   : >> { %7505 = vst [vmem:[%s12022_s18 + $0x1e0] sm:$0xff] %v7504_v44  ;;  %7507 = vst [vmem:[%s12022_s18 + $0x1e8] sm:$0xff] %v7506_v33  ;;  %v7510_v13 = vld [vmem:[%s12026_s19 + $0x1f8] sm:$0xff]  ;;  %s17666_s19 = smov %s16331_s26 }
 0x670   : >> { %7509 = vst [vmem:[%s12022_s18 + $0x1f0] sm:$0xff] %v7508_v41  ;;  %7511 = vst [vmem:[%s12022_s18 + $0x1f8] sm:$0xff] %v7510_v13  ;;  %s17665_s18 = smov %s16334_s11 }
 0x671 PF: > { %s16439_s24 = sand.u32 63, %s17683_s13   ;;  %s9410_s29 = sshll.u32 %s16264_s28, 9 }
 0x672   : > { %s7523_s30 = scalar_lea.vmem %s13049_s27, %s9410_s29 [#allocation9]   ;;  %s7525_s21 = scalar_lea.vmem %s16258_s15, %s9410_s29  }
 0x673   : > { %p9375_p7 = scmp.le.s32.totalorder %s16439_s24, 0 }
 0x674   : > { %s12036_s8 = smov (!%p9375_p7), %s7525_s21   ;;  %s12040_s26 = smov (!%p9375_p7), %s7523_s30  }
 0x675   : > { %8432 = sbr.rel (%p9375_p7) target bundleno = 1670 (0x686), region = 297  ;;  %s12044_s11 = smov (!%p9375_p7), 0  }
 0x676   : > { %s12048_s12 = smov (!%p9375_p7), 0  }
 0x67c LB: >> { %v7535_v10 = vld [vmem:[%s12042_s26] sm:$0xff]  ;;  %s7537_s13 = sadd.s32 1, %s12046_s11  ;;  %s7529_s12 = sadd.s32 1, %s12050_s12   ;;  %s12050_s12 = sphi %s12048_s12, %s7529_s12   ;;  %s12046_s11 = sphi %s12044_s11, %s12045_s11   ;;  %s12042_s26 = sphi %s12040_s26, %s7542_s26   ;;  %s12038_s8 = sphi %s12036_s8, %s7543_s8  }
 0x67d   : >> { %7536 = vst [vmem:[%s12038_s8] sm:$0xff] %v7535_v10  ;;  %p7538_p10 = scmp.ge.s32.totalorder %s7537_s13, %s16439_s24  ;;  %p7528_p3 = scmp.ge.s32.totalorder %s7529_s12, %s16439_s24 }
 0x67f   : >> { %s17687_s13 = smov (%p7538_p10, %s7537_s13), 0  ;;  %7531 = sbr.rel (!%p7528_p3) target bundleno = 1660 (0x67c), region = 303 }
 0x680   : >> { %s9376_s27 = sshll.u32 %s17687_s13, 3  ;;  %s12045_s11 = smov %s17687_s13  }
 0x681   : >> { %s7542_s26 = scalar_lea.vmem %s7523_s30, %s9376_s27 [#allocation9]   ;;  %s7543_s8 = scalar_lea.vmem %s7525_s21, %s9376_s27  }
 0x686 PF: > { %7549 = sbr.rel (!%p12295_p6) target bundleno = 1749 (0x6d5), region = 108  ;;  %s9378_s15 = sshll.u32 (%p12295_p6), %s12183_s25, 8 }
 0x687   : > { %s9412_s28 = sshll.u32 (%p12295_p6), %s12183_s25, 11  ;;  %s7551_s18 = ssub.s32 (%p12295_p6), 313, %s9378_s15 }
 0x688   : > { %s16454_s9 = scalar_lea.vmem (%p12295_p6), %s16857_s5, %s9412_s28   ;;  %p7552_p13 = scmp.lt.s32.totalorder (%p12295_p6), %s7551_s18, 256 }
 0x68d   : > { %s17689_s18 = smov (!%p7552_p13, %s7551_s18), 256 }
 0x68e   : > { %s9379_s24 = sshll.u32 %s17689_s18, 7 }
 0x68f   : > { %p9382_p8 = scmp.eq.s32.totalorder %s9379_s24, 0 }
 0x690   : > { %s16460_s29 = sshrl.u32 (!%p9382_p8), %s17689_s18, 6 }
 0x691   : > { %7560 = sbr.rel (%p9382_p8) target bundleno = 1749 (0x6d5), region = 112  ;;  %p9383_p1 = scmp.le.s32.totalorder (!%p9382_p8), %s16460_s29, 0 }
 0x698   : > { %8446 = sbr.rel (%p9383_p1) target bundleno = 1728 (0x6c0), region = 308  ;;  %s17668_s30 = smov (!%p9383_p1), %s16454_s9 }
 0x699   : > { %s17669_s21 = smov (!%p9383_p1), %s14614_s7  ;;  %s16469_s8 = smov (!%p9383_p1), 0  }
 0x69a   : > { %s16471_s26 = smov (!%p9383_p1), 0  }
 0x69f LB: >> { %v7748_v29 = vld [vmem:[%s12058_s21] sm:$0xff]  ;;  %v7750_v22 = vld [vmem:[%s12058_s21 + $0x8] sm:$0xff]  ;;  %v7752_v20 = vld [vmem:[%s12058_s21 + $0x10] sm:$0xff]  ;;  %s7876_s11 = sadd.s32 1, %s12062_s8  ;;  %s7742_s26 = sadd.s32 1, %s12066_s26   ;;  %s12066_s26 = sphi %s16471_s26, %s7742_s26   ;;  %s12062_s8 = sphi %s16469_s8, %s17672_s8   ;;  %s12058_s21 = sphi %s17669_s21, %s17671_s21   ;;  %s12054_s30 = sphi %s17668_s30, %s17670_s30  }
 0x6a0   : >> { %7749 = vst [vmem:[%s12054_s30] sm:$0xff] %v7748_v29  ;;  %7751 = vst [vmem:[%s12054_s30 + $0x8] sm:$0xff] %v7750_v22  ;;  %v7754_v11 = vld [vmem:[%s12058_s21 + $0x18] sm:$0xff]  ;;  %v7756_v31 = vld [vmem:[%s12058_s21 + $0x20] sm:$0xff]  ;;  %p7877_p2 = scmp.ge.s32.totalorder %s7876_s11, %s16460_s29  ;;  %p7741_p5 = scmp.ge.s32.totalorder %s7742_s26, %s16460_s29 }
 0x6a1   : >> { %7753 = vst [vmem:[%s12054_s30 + $0x10] sm:$0xff] %v7752_v20  ;;  %v7758_v47 = vld [vmem:[%s12058_s21 + $0x28] sm:$0xff]  ;;  %7755 = vst [vmem:[%s12054_s30 + $0x18] sm:$0xff] %v7754_v11  ;;  %v7760_v36 = vld [vmem:[%s12058_s21 + $0x30] sm:$0xff] }
 0x6a2   : >> { %7757 = vst [vmem:[%s12054_s30 + $0x20] sm:$0xff] %v7756_v31  ;;  %7759 = vst [vmem:[%s12054_s30 + $0x28] sm:$0xff] %v7758_v47  ;;  %v7762_v54 = vld [vmem:[%s12058_s21 + $0x38] sm:$0xff]  ;;  %v7764_v57 = vld [vmem:[%s12058_s21 + $0x40] sm:$0xff]  ;;  %s17691_s11 = smov (%p7877_p2, %s7876_s11), 0 }
 0x6a3   : >> { %7761 = vst [vmem:[%s12054_s30 + $0x30] sm:$0xff] %v7760_v36  ;;  %7763 = vst [vmem:[%s12054_s30 + $0x38] sm:$0xff] %v7762_v54  ;;  %v7766_v37 = vld [vmem:[%s12058_s21 + $0x48] sm:$0xff]  ;;  %v7768_v42 = vld [vmem:[%s12058_s21 + $0x50] sm:$0xff]  ;;  %s9384_s12 = sshll.u32 %s17691_s11, 9  ;;  %s17672_s8 = smov %s17691_s11 }
 0x6a4   : >> { %7765 = vst [vmem:[%s12054_s30 + $0x40] sm:$0xff] %v7764_v57  ;;  %v7770_v52 = vld [vmem:[%s12058_s21 + $0x58] sm:$0xff]  ;;  %7767 = vst [vmem:[%s12054_s30 + $0x48] sm:$0xff] %v7766_v37  ;;  %v7772_v51 = vld [vmem:[%s12058_s21 + $0x60] sm:$0xff]  ;;  %s16527_s13 = scalar_lea.vmem %s14614_s7, %s9384_s12 [#allocation10]   ;;  %s16530_s27 = scalar_lea.vmem %s16454_s9, %s9384_s12  }
 0x6a5   : >> { %7769 = vst [vmem:[%s12054_s30 + $0x50] sm:$0xff] %v7768_v42  ;;  %7771 = vst [vmem:[%s12054_s30 + $0x58] sm:$0xff] %v7770_v52  ;;  %v7774_v43 = vld [vmem:[%s12058_s21 + $0x68] sm:$0xff]  ;;  %v7776_v28 = vld [vmem:[%s12058_s21 + $0x70] sm:$0xff] }
 0x6a6   : >> { %7773 = vst [vmem:[%s12054_s30 + $0x60] sm:$0xff] %v7772_v51  ;;  %7775 = vst [vmem:[%s12054_s30 + $0x68] sm:$0xff] %v7774_v43  ;;  %v7778_v19 = vld [vmem:[%s12058_s21 + $0x78] sm:$0xff]  ;;  %v7780_v26 = vld [vmem:[%s12058_s21 + $0x80] sm:$0xff] }
 0x6a7   : >> { %7777 = vst [vmem:[%s12054_s30 + $0x70] sm:$0xff] %v7776_v28  ;;  %v7782_v32 = vld [vmem:[%s12058_s21 + $0x88] sm:$0xff]  ;;  %7779 = vst [vmem:[%s12054_s30 + $0x78] sm:$0xff] %v7778_v19  ;;  %v7784_v14 = vld [vmem:[%s12058_s21 + $0x90] sm:$0xff] }
 0x6a8   : >> { %7781 = vst [vmem:[%s12054_s30 + $0x80] sm:$0xff] %v7780_v26  ;;  %7783 = vst [vmem:[%s12054_s30 + $0x88] sm:$0xff] %v7782_v32  ;;  %v7786_v15 = vld [vmem:[%s12058_s21 + $0x98] sm:$0xff]  ;;  %v7788_v5 = vld [vmem:[%s12058_s21 + $0xa0] sm:$0xff] }
 0x6a9   : >> { %7785 = vst [vmem:[%s12054_s30 + $0x90] sm:$0xff] %v7784_v14  ;;  %7787 = vst [vmem:[%s12054_s30 + $0x98] sm:$0xff] %v7786_v15  ;;  %v7790_v48 = vld [vmem:[%s12058_s21 + $0xa8] sm:$0xff]  ;;  %v7792_v4 = vld [vmem:[%s12058_s21 + $0xb0] sm:$0xff] }
 0x6aa   : >> { %7789 = vst [vmem:[%s12054_s30 + $0xa0] sm:$0xff] %v7788_v5  ;;  %v7794_v18 = vld [vmem:[%s12058_s21 + $0xb8] sm:$0xff]  ;;  %7791 = vst [vmem:[%s12054_s30 + $0xa8] sm:$0xff] %v7790_v48  ;;  %v7796_v49 = vld [vmem:[%s12058_s21 + $0xc0] sm:$0xff] }
 0x6ab   : >> { %7793 = vst [vmem:[%s12054_s30 + $0xb0] sm:$0xff] %v7792_v4  ;;  %7795 = vst [vmem:[%s12054_s30 + $0xb8] sm:$0xff] %v7794_v18  ;;  %v7798_v56 = vld [vmem:[%s12058_s21 + $0xc8] sm:$0xff]  ;;  %v7800_v7 = vld [vmem:[%s12058_s21 + $0xd0] sm:$0xff] }
 0x6ac   : >> { %7797 = vst [vmem:[%s12054_s30 + $0xc0] sm:$0xff] %v7796_v49  ;;  %7799 = vst [vmem:[%s12054_s30 + $0xc8] sm:$0xff] %v7798_v56  ;;  %v7802_v30 = vld [vmem:[%s12058_s21 + $0xd8] sm:$0xff]  ;;  %v7804_v39 = vld [vmem:[%s12058_s21 + $0xe0] sm:$0xff] }
 0x6ad   : >> { %7801 = vst [vmem:[%s12054_s30 + $0xd0] sm:$0xff] %v7800_v7  ;;  %v7806_v17 = vld [vmem:[%s12058_s21 + $0xe8] sm:$0xff]  ;;  %7803 = vst [vmem:[%s12054_s30 + $0xd8] sm:$0xff] %v7802_v30  ;;  %v7808_v9 = vld [vmem:[%s12058_s21 + $0xf0] sm:$0xff] }
 0x6ae   : >> { %7805 = vst [vmem:[%s12054_s30 + $0xe0] sm:$0xff] %v7804_v39  ;;  %7807 = vst [vmem:[%s12054_s30 + $0xe8] sm:$0xff] %v7806_v17  ;;  %v7810_v50 = vld [vmem:[%s12058_s21 + $0xf8] sm:$0xff]  ;;  %v7812_v6 = vld [vmem:[%s12058_s21 + $0x100] sm:$0xff] }
 0x6af   : >> { %7809 = vst [vmem:[%s12054_s30 + $0xf0] sm:$0xff] %v7808_v9  ;;  %7811 = vst [vmem:[%s12054_s30 + $0xf8] sm:$0xff] %v7810_v50  ;;  %v7814_v53 = vld [vmem:[%s12058_s21 + $0x108] sm:$0xff]  ;;  %v7816_v2 = vld [vmem:[%s12058_s21 + $0x110] sm:$0xff] }
 0x6b0   : >> { %7813 = vst [vmem:[%s12054_s30 + $0x100] sm:$0xff] %v7812_v6  ;;  %v7818_v40 = vld [vmem:[%s12058_s21 + $0x118] sm:$0xff]  ;;  %7815 = vst [vmem:[%s12054_s30 + $0x108] sm:$0xff] %v7814_v53  ;;  %v7820_v62 = vld [vmem:[%s12058_s21 + $0x120] sm:$0xff] }
 0x6b1   : >> { %7817 = vst [vmem:[%s12054_s30 + $0x110] sm:$0xff] %v7816_v2  ;;  %7819 = vst [vmem:[%s12054_s30 + $0x118] sm:$0xff] %v7818_v40  ;;  %v7822_v27 = vld [vmem:[%s12058_s21 + $0x128] sm:$0xff]  ;;  %v7824_v55 = vld [vmem:[%s12058_s21 + $0x130] sm:$0xff] }
 0x6b2   : >> { %7821 = vst [vmem:[%s12054_s30 + $0x120] sm:$0xff] %v7820_v62  ;;  %7823 = vst [vmem:[%s12054_s30 + $0x128] sm:$0xff] %v7822_v27  ;;  %v7826_v60 = vld [vmem:[%s12058_s21 + $0x138] sm:$0xff]  ;;  %v7828_v63 = vld [vmem:[%s12058_s21 + $0x140] sm:$0xff] }
 0x6b3   : >> { %7825 = vst [vmem:[%s12054_s30 + $0x130] sm:$0xff] %v7824_v55  ;;  %v7830_v0 = vld [vmem:[%s12058_s21 + $0x148] sm:$0xff]  ;;  %7827 = vst [vmem:[%s12054_s30 + $0x138] sm:$0xff] %v7826_v60  ;;  %v7832_v58 = vld [vmem:[%s12058_s21 + $0x150] sm:$0xff] }
 0x6b4   : >> { %7829 = vst [vmem:[%s12054_s30 + $0x140] sm:$0xff] %v7828_v63  ;;  %7831 = vst [vmem:[%s12054_s30 + $0x148] sm:$0xff] %v7830_v0  ;;  %v7834_v16 = vld [vmem:[%s12058_s21 + $0x158] sm:$0xff]  ;;  %v7836_v12 = vld [vmem:[%s12058_s21 + $0x160] sm:$0xff] }
 0x6b5   : >> { %7833 = vst [vmem:[%s12054_s30 + $0x150] sm:$0xff] %v7832_v58  ;;  %7835 = vst [vmem:[%s12054_s30 + $0x158] sm:$0xff] %v7834_v16  ;;  %v7838_v25 = vld [vmem:[%s12058_s21 + $0x168] sm:$0xff]  ;;  %v7840_v8 = vld [vmem:[%s12058_s21 + $0x170] sm:$0xff] }
 0x6b6   : >> { %7837 = vst [vmem:[%s12054_s30 + $0x160] sm:$0xff] %v7836_v12  ;;  %v7842_v34 = vld [vmem:[%s12058_s21 + $0x178] sm:$0xff]  ;;  %7839 = vst [vmem:[%s12054_s30 + $0x168] sm:$0xff] %v7838_v25  ;;  %v7844_v38 = vld [vmem:[%s12058_s21 + $0x180] sm:$0xff] }
 0x6b7   : >> { %7841 = vst [vmem:[%s12054_s30 + $0x170] sm:$0xff] %v7840_v8  ;;  %7843 = vst [vmem:[%s12054_s30 + $0x178] sm:$0xff] %v7842_v34  ;;  %v7846_v45 = vld [vmem:[%s12058_s21 + $0x188] sm:$0xff]  ;;  %v7848_v59 = vld [vmem:[%s12058_s21 + $0x190] sm:$0xff] }
 0x6b8   : >> { %7845 = vst [vmem:[%s12054_s30 + $0x180] sm:$0xff] %v7844_v38  ;;  %7847 = vst [vmem:[%s12054_s30 + $0x188] sm:$0xff] %v7846_v45  ;;  %v7850_v61 = vld [vmem:[%s12058_s21 + $0x198] sm:$0xff]  ;;  %v7852_v24 = vld [vmem:[%s12058_s21 + $0x1a0] sm:$0xff] }
 0x6b9   : >> { %7849 = vst [vmem:[%s12054_s30 + $0x190] sm:$0xff] %v7848_v59  ;;  %v7854_v1 = vld [vmem:[%s12058_s21 + $0x1a8] sm:$0xff]  ;;  %7851 = vst [vmem:[%s12054_s30 + $0x198] sm:$0xff] %v7850_v61  ;;  %v7856_v3 = vld [vmem:[%s12058_s21 + $0x1b0] sm:$0xff]  ;;  %7744 = sbr.rel (!%p7741_p5) target bundleno = 1695 (0x69f), region = 314 }
 0x6ba   : >> { %7853 = vst [vmem:[%s12054_s30 + $0x1a0] sm:$0xff] %v7852_v24  ;;  %7855 = vst [vmem:[%s12054_s30 + $0x1a8] sm:$0xff] %v7854_v1  ;;  %v7858_v21 = vld [vmem:[%s12058_s21 + $0x1b8] sm:$0xff]  ;;  %v7860_v46 = vld [vmem:[%s12058_s21 + $0x1c0] sm:$0xff] }
 0x6bb   : >> { %7857 = vst [vmem:[%s12054_s30 + $0x1b0] sm:$0xff] %v7856_v3  ;;  %7859 = vst [vmem:[%s12054_s30 + $0x1b8] sm:$0xff] %v7858_v21  ;;  %v7862_v35 = vld [vmem:[%s12058_s21 + $0x1c8] sm:$0xff]  ;;  %v7864_v23 = vld [vmem:[%s12058_s21 + $0x1d0] sm:$0xff] }
 0x6bc   : >> { %7861 = vst [vmem:[%s12054_s30 + $0x1c0] sm:$0xff] %v7860_v46  ;;  %v7866_v44 = vld [vmem:[%s12058_s21 + $0x1d8] sm:$0xff]  ;;  %7863 = vst [vmem:[%s12054_s30 + $0x1c8] sm:$0xff] %v7862_v35  ;;  %v7868_v33 = vld [vmem:[%s12058_s21 + $0x1e0] sm:$0xff] }
 0x6bd   : >> { %7865 = vst [vmem:[%s12054_s30 + $0x1d0] sm:$0xff] %v7864_v23  ;;  %7867 = vst [vmem:[%s12054_s30 + $0x1d8] sm:$0xff] %v7866_v44  ;;  %v7870_v41 = vld [vmem:[%s12058_s21 + $0x1e8] sm:$0xff]  ;;  %v7872_v13 = vld [vmem:[%s12058_s21 + $0x1f0] sm:$0xff] }
 0x6be   : >> { %7869 = vst [vmem:[%s12054_s30 + $0x1e0] sm:$0xff] %v7868_v33  ;;  %7871 = vst [vmem:[%s12054_s30 + $0x1e8] sm:$0xff] %v7870_v41  ;;  %v7874_v10 = vld [vmem:[%s12058_s21 + $0x1f8] sm:$0xff]  ;;  %s17671_s21 = smov %s16527_s13 }
 0x6bf   : >> { %7873 = vst [vmem:[%s12054_s30 + $0x1f0] sm:$0xff] %v7872_v13  ;;  %7875 = vst [vmem:[%s12054_s30 + $0x1f8] sm:$0xff] %v7874_v10  ;;  %s17670_s30 = smov %s16530_s27 }
 0x6c0 PF: > { %s16635_s15 = sand.u32 63, %s17689_s18   ;;  %s9413_s28 = sshll.u32 %s16460_s29, 9 }
 0x6c1   : > { %s7887_s19 = scalar_lea.vmem %s14614_s7, %s9413_s28 [#allocation10]   ;;  %s7889_s20 = scalar_lea.vmem %s16454_s9, %s9413_s28  }
 0x6c2   : > { %p9389_p9 = scmp.le.s32.totalorder %s16635_s15, 0 }
 0x6c3   : > { %s12068_s24 = smov (!%p9389_p9), %s7889_s20   ;;  %s12072_s12 = smov (!%p9389_p9), %s7887_s19  }
 0x6c4   : > { %8460 = sbr.rel (%p9389_p9) target bundleno = 1749 (0x6d5), region = 319  ;;  %s12076_s13 = smov (!%p9389_p9), 0  }
 0x6c5   : > { %s12080_s11 = smov (!%p9389_p9), 0  }
 0x6cb LB: >> { %v7899_v29 = vld [vmem:[%s12074_s12] sm:$0xff]  ;;  %s7901_s18 = sadd.s32 1, %s12078_s13  ;;  %s7893_s11 = sadd.s32 1, %s12082_s11   ;;  %s12082_s11 = sphi %s12080_s11, %s7893_s11   ;;  %s12078_s13 = sphi %s12076_s13, %s12077_s13   ;;  %s12074_s12 = sphi %s12072_s12, %s7906_s12   ;;  %s12070_s24 = sphi %s12068_s24, %s7907_s24  }
 0x6cc   : >> { %7900 = vst [vmem:[%s12070_s24] sm:$0xff] %v7899_v29  ;;  %p7902_p11 = scmp.ge.s32.totalorder %s7901_s18, %s16635_s15  ;;  %p7892_p12 = scmp.ge.s32.totalorder %s7893_s11, %s16635_s15 }
 0x6ce   : >> { %s17693_s18 = smov (%p7902_p11, %s7901_s18), 0  ;;  %7895 = sbr.rel (!%p7892_p12) target bundleno = 1739 (0x6cb), region = 325 }
 0x6cf   : >> { %s9390_s7 = sshll.u32 %s17693_s18, 3  ;;  %s12077_s13 = smov %s17693_s18  }
 0x6d0   : >> { %s7906_s12 = scalar_lea.vmem %s7887_s19, %s9390_s7 [#allocation10]   ;;  %s7907_s24 = scalar_lea.vmem %s7889_s20, %s9390_s7  }
 0x6d5 PF: > { %7913 = sbr.rel (!%p12295_p6) target bundleno = 1828 (0x724), region = 160  ;;  %s9392_s9 = sshll.u32 (%p12295_p6), %s12183_s25, 8 }
 0x6d6   : > { %s9415_s29 = sshll.u32 (%p12295_p6), %s12183_s25, 11  ;;  %s7915_s30 = ssub.s32 (%p12295_p6), 313, %s9392_s9 }
 0x6d7   : > { %s16650_s26 = scalar_lea.vmem (%p12295_p6), %s16858_s6, %s9415_s29   ;;  %p7916_p0 = scmp.lt.s32.totalorder (%p12295_p6), %s7915_s30, 256 }
 0x6dc   : > { %s17695_s30 = smov (!%p7916_p0, %s7915_s30), 256 }
 0x6dd   : > { %s9393_s27 = sshll.u32 %s17695_s30, 7 }
 0x6de   : > { %p9396_p4 = scmp.eq.s32.totalorder %s9393_s27, 0 }
 0x6df   : > { %s16656_s16 = sshrl.u32 (!%p9396_p4), %s17695_s30, 6 }
 0x6e0   : > { %7924 = sbr.rel (%p9396_p4) target bundleno = 1828 (0x724), region = 164  ;;  %p9397_p6 = scmp.le.s32.totalorder (!%p9396_p4), %s16656_s16, 0 }
 0x6e7   : > { %8474 = sbr.rel (%p9397_p6) target bundleno = 1807 (0x70f), region = 330  ;;  %s17673_s25 = smov (!%p9397_p6), %s16650_s26 }
 0x6e8   : > { %s17674_s15 = smov (!%p9397_p6), %s14653_s10  ;;  %s16665_s28 = smov (!%p9397_p6), 0  }
 0x6e9   : > { %s16667_s19 = smov (!%p9397_p6), 0  }
 0x6ee LB: >> { %v8112_v22 = vld [vmem:[%s12090_s15] sm:$0xff]  ;;  %v8114_v20 = vld [vmem:[%s12090_s15 + $0x8] sm:$0xff]  ;;  %v8116_v11 = vld [vmem:[%s12090_s15 + $0x10] sm:$0xff]  ;;  %s8240_s20 = sadd.s32 1, %s12094_s28  ;;  %s8106_s19 = sadd.s32 1, %s12098_s19   ;;  %s12098_s19 = sphi %s16667_s19, %s8106_s19   ;;  %s12094_s28 = sphi %s16665_s28, %s17677_s28   ;;  %s12090_s15 = sphi %s17674_s15, %s17676_s15   ;;  %s12086_s25 = sphi %s17673_s25, %s17675_s25  }
 0x6ef   : >> { %8113 = vst [vmem:[%s12086_s25] sm:$0xff] %v8112_v22  ;;  %8115 = vst [vmem:[%s12086_s25 + $0x8] sm:$0xff] %v8114_v20  ;;  %v8118_v31 = vld [vmem:[%s12090_s15 + $0x18] sm:$0xff]  ;;  %v8120_v47 = vld [vmem:[%s12090_s15 + $0x20] sm:$0xff]  ;;  %p8241_p7 = scmp.ge.s32.totalorder %s8240_s20, %s16656_s16  ;;  %p8105_p10 = scmp.ge.s32.totalorder %s8106_s19, %s16656_s16 }
 0x6f0   : >> { %8117 = vst [vmem:[%s12086_s25 + $0x10] sm:$0xff] %v8116_v11  ;;  %v8122_v36 = vld [vmem:[%s12090_s15 + $0x28] sm:$0xff]  ;;  %8119 = vst [vmem:[%s12086_s25 + $0x18] sm:$0xff] %v8118_v31  ;;  %v8124_v54 = vld [vmem:[%s12090_s15 + $0x30] sm:$0xff] }
 0x6f1   : >> { %8121 = vst [vmem:[%s12086_s25 + $0x20] sm:$0xff] %v8120_v47  ;;  %8123 = vst [vmem:[%s12086_s25 + $0x28] sm:$0xff] %v8122_v36  ;;  %v8126_v57 = vld [vmem:[%s12090_s15 + $0x38] sm:$0xff]  ;;  %v8128_v37 = vld [vmem:[%s12090_s15 + $0x40] sm:$0xff]  ;;  %s17697_s20 = smov (%p8241_p7, %s8240_s20), 0 }
 0x6f2   : >> { %8125 = vst [vmem:[%s12086_s25 + $0x30] sm:$0xff] %v8124_v54  ;;  %8127 = vst [vmem:[%s12086_s25 + $0x38] sm:$0xff] %v8126_v57  ;;  %v8130_v42 = vld [vmem:[%s12090_s15 + $0x48] sm:$0xff]  ;;  %v8132_v52 = vld [vmem:[%s12090_s15 + $0x50] sm:$0xff]  ;;  %s9398_s24 = sshll.u32 %s17697_s20, 9  ;;  %s17677_s28 = smov %s17697_s20 }
 0x6f3   : >> { %8129 = vst [vmem:[%s12086_s25 + $0x40] sm:$0xff] %v8128_v37  ;;  %v8134_v51 = vld [vmem:[%s12090_s15 + $0x58] sm:$0xff]  ;;  %8131 = vst [vmem:[%s12086_s25 + $0x48] sm:$0xff] %v8130_v42  ;;  %v8136_v43 = vld [vmem:[%s12090_s15 + $0x60] sm:$0xff]  ;;  %s16723_s12 = scalar_lea.vmem %s14653_s10, %s9398_s24 [#allocation11]   ;;  %s16726_s13 = scalar_lea.vmem %s16650_s26, %s9398_s24  }
 0x6f4   : >> { %8133 = vst [vmem:[%s12086_s25 + $0x50] sm:$0xff] %v8132_v52  ;;  %8135 = vst [vmem:[%s12086_s25 + $0x58] sm:$0xff] %v8134_v51  ;;  %v8138_v28 = vld [vmem:[%s12090_s15 + $0x68] sm:$0xff]  ;;  %v8140_v19 = vld [vmem:[%s12090_s15 + $0x70] sm:$0xff] }
 0x6f5   : >> { %8137 = vst [vmem:[%s12086_s25 + $0x60] sm:$0xff] %v8136_v43  ;;  %8139 = vst [vmem:[%s12086_s25 + $0x68] sm:$0xff] %v8138_v28  ;;  %v8142_v26 = vld [vmem:[%s12090_s15 + $0x78] sm:$0xff]  ;;  %v8144_v32 = vld [vmem:[%s12090_s15 + $0x80] sm:$0xff] }
 0x6f6   : >> { %8141 = vst [vmem:[%s12086_s25 + $0x70] sm:$0xff] %v8140_v19  ;;  %v8146_v14 = vld [vmem:[%s12090_s15 + $0x88] sm:$0xff]  ;;  %8143 = vst [vmem:[%s12086_s25 + $0x78] sm:$0xff] %v8142_v26  ;;  %v8148_v15 = vld [vmem:[%s12090_s15 + $0x90] sm:$0xff] }
 0x6f7   : >> { %8145 = vst [vmem:[%s12086_s25 + $0x80] sm:$0xff] %v8144_v32  ;;  %8147 = vst [vmem:[%s12086_s25 + $0x88] sm:$0xff] %v8146_v14  ;;  %v8150_v5 = vld [vmem:[%s12090_s15 + $0x98] sm:$0xff]  ;;  %v8152_v48 = vld [vmem:[%s12090_s15 + $0xa0] sm:$0xff] }
 0x6f8   : >> { %8149 = vst [vmem:[%s12086_s25 + $0x90] sm:$0xff] %v8148_v15  ;;  %8151 = vst [vmem:[%s12086_s25 + $0x98] sm:$0xff] %v8150_v5  ;;  %v8154_v4 = vld [vmem:[%s12090_s15 + $0xa8] sm:$0xff]  ;;  %v8156_v18 = vld [vmem:[%s12090_s15 + $0xb0] sm:$0xff] }
 0x6f9   : >> { %8153 = vst [vmem:[%s12086_s25 + $0xa0] sm:$0xff] %v8152_v48  ;;  %v8158_v49 = vld [vmem:[%s12090_s15 + $0xb8] sm:$0xff]  ;;  %8155 = vst [vmem:[%s12086_s25 + $0xa8] sm:$0xff] %v8154_v4  ;;  %v8160_v56 = vld [vmem:[%s12090_s15 + $0xc0] sm:$0xff] }
 0x6fa   : >> { %8157 = vst [vmem:[%s12086_s25 + $0xb0] sm:$0xff] %v8156_v18  ;;  %8159 = vst [vmem:[%s12086_s25 + $0xb8] sm:$0xff] %v8158_v49  ;;  %v8162_v7 = vld [vmem:[%s12090_s15 + $0xc8] sm:$0xff]  ;;  %v8164_v30 = vld [vmem:[%s12090_s15 + $0xd0] sm:$0xff] }
 0x6fb   : >> { %8161 = vst [vmem:[%s12086_s25 + $0xc0] sm:$0xff] %v8160_v56  ;;  %8163 = vst [vmem:[%s12086_s25 + $0xc8] sm:$0xff] %v8162_v7  ;;  %v8166_v39 = vld [vmem:[%s12090_s15 + $0xd8] sm:$0xff]  ;;  %v8168_v17 = vld [vmem:[%s12090_s15 + $0xe0] sm:$0xff] }
 0x6fc   : >> { %8165 = vst [vmem:[%s12086_s25 + $0xd0] sm:$0xff] %v8164_v30  ;;  %v8170_v9 = vld [vmem:[%s12090_s15 + $0xe8] sm:$0xff]  ;;  %8167 = vst [vmem:[%s12086_s25 + $0xd8] sm:$0xff] %v8166_v39  ;;  %v8172_v50 = vld [vmem:[%s12090_s15 + $0xf0] sm:$0xff] }
 0x6fd   : >> { %8169 = vst [vmem:[%s12086_s25 + $0xe0] sm:$0xff] %v8168_v17  ;;  %8171 = vst [vmem:[%s12086_s25 + $0xe8] sm:$0xff] %v8170_v9  ;;  %v8174_v6 = vld [vmem:[%s12090_s15 + $0xf8] sm:$0xff]  ;;  %v8176_v53 = vld [vmem:[%s12090_s15 + $0x100] sm:$0xff] }
 0x6fe   : >> { %8173 = vst [vmem:[%s12086_s25 + $0xf0] sm:$0xff] %v8172_v50  ;;  %8175 = vst [vmem:[%s12086_s25 + $0xf8] sm:$0xff] %v8174_v6  ;;  %v8178_v2 = vld [vmem:[%s12090_s15 + $0x108] sm:$0xff]  ;;  %v8180_v40 = vld [vmem:[%s12090_s15 + $0x110] sm:$0xff] }
 0x6ff   : >> { %8177 = vst [vmem:[%s12086_s25 + $0x100] sm:$0xff] %v8176_v53  ;;  %v8182_v62 = vld [vmem:[%s12090_s15 + $0x118] sm:$0xff]  ;;  %8179 = vst [vmem:[%s12086_s25 + $0x108] sm:$0xff] %v8178_v2  ;;  %v8184_v27 = vld [vmem:[%s12090_s15 + $0x120] sm:$0xff] }
 0x700   : >> { %8181 = vst [vmem:[%s12086_s25 + $0x110] sm:$0xff] %v8180_v40  ;;  %8183 = vst [vmem:[%s12086_s25 + $0x118] sm:$0xff] %v8182_v62  ;;  %v8186_v55 = vld [vmem:[%s12090_s15 + $0x128] sm:$0xff]  ;;  %v8188_v60 = vld [vmem:[%s12090_s15 + $0x130] sm:$0xff] }
 0x701   : >> { %8185 = vst [vmem:[%s12086_s25 + $0x120] sm:$0xff] %v8184_v27  ;;  %8187 = vst [vmem:[%s12086_s25 + $0x128] sm:$0xff] %v8186_v55  ;;  %v8190_v63 = vld [vmem:[%s12090_s15 + $0x138] sm:$0xff]  ;;  %v8192_v0 = vld [vmem:[%s12090_s15 + $0x140] sm:$0xff] }
 0x702   : >> { %8189 = vst [vmem:[%s12086_s25 + $0x130] sm:$0xff] %v8188_v60  ;;  %v8194_v58 = vld [vmem:[%s12090_s15 + $0x148] sm:$0xff]  ;;  %8191 = vst [vmem:[%s12086_s25 + $0x138] sm:$0xff] %v8190_v63  ;;  %v8196_v16 = vld [vmem:[%s12090_s15 + $0x150] sm:$0xff] }
 0x703   : >> { %8193 = vst [vmem:[%s12086_s25 + $0x140] sm:$0xff] %v8192_v0  ;;  %8195 = vst [vmem:[%s12086_s25 + $0x148] sm:$0xff] %v8194_v58  ;;  %v8198_v12 = vld [vmem:[%s12090_s15 + $0x158] sm:$0xff]  ;;  %v8200_v25 = vld [vmem:[%s12090_s15 + $0x160] sm:$0xff] }
 0x704   : >> { %8197 = vst [vmem:[%s12086_s25 + $0x150] sm:$0xff] %v8196_v16  ;;  %8199 = vst [vmem:[%s12086_s25 + $0x158] sm:$0xff] %v8198_v12  ;;  %v8202_v8 = vld [vmem:[%s12090_s15 + $0x168] sm:$0xff]  ;;  %v8204_v34 = vld [vmem:[%s12090_s15 + $0x170] sm:$0xff] }
 0x705   : >> { %8201 = vst [vmem:[%s12086_s25 + $0x160] sm:$0xff] %v8200_v25  ;;  %v8206_v38 = vld [vmem:[%s12090_s15 + $0x178] sm:$0xff]  ;;  %8203 = vst [vmem:[%s12086_s25 + $0x168] sm:$0xff] %v8202_v8  ;;  %v8208_v45 = vld [vmem:[%s12090_s15 + $0x180] sm:$0xff] }
 0x706   : >> { %8205 = vst [vmem:[%s12086_s25 + $0x170] sm:$0xff] %v8204_v34  ;;  %8207 = vst [vmem:[%s12086_s25 + $0x178] sm:$0xff] %v8206_v38  ;;  %v8210_v59 = vld [vmem:[%s12090_s15 + $0x188] sm:$0xff]  ;;  %v8212_v61 = vld [vmem:[%s12090_s15 + $0x190] sm:$0xff] }
 0x707   : >> { %8209 = vst [vmem:[%s12086_s25 + $0x180] sm:$0xff] %v8208_v45  ;;  %8211 = vst [vmem:[%s12086_s25 + $0x188] sm:$0xff] %v8210_v59  ;;  %v8214_v24 = vld [vmem:[%s12090_s15 + $0x198] sm:$0xff]  ;;  %v8216_v1 = vld [vmem:[%s12090_s15 + $0x1a0] sm:$0xff] }
 0x708   : >> { %8213 = vst [vmem:[%s12086_s25 + $0x190] sm:$0xff] %v8212_v61  ;;  %v8218_v3 = vld [vmem:[%s12090_s15 + $0x1a8] sm:$0xff]  ;;  %8215 = vst [vmem:[%s12086_s25 + $0x198] sm:$0xff] %v8214_v24  ;;  %v8220_v21 = vld [vmem:[%s12090_s15 + $0x1b0] sm:$0xff]  ;;  %8108 = sbr.rel (!%p8105_p10) target bundleno = 1774 (0x6ee), region = 336 }
 0x709   : >> { %8217 = vst [vmem:[%s12086_s25 + $0x1a0] sm:$0xff] %v8216_v1  ;;  %8219 = vst [vmem:[%s12086_s25 + $0x1a8] sm:$0xff] %v8218_v3  ;;  %v8222_v46 = vld [vmem:[%s12090_s15 + $0x1b8] sm:$0xff]  ;;  %v8224_v35 = vld [vmem:[%s12090_s15 + $0x1c0] sm:$0xff] }
 0x70a   : >> { %8221 = vst [vmem:[%s12086_s25 + $0x1b0] sm:$0xff] %v8220_v21  ;;  %8223 = vst [vmem:[%s12086_s25 + $0x1b8] sm:$0xff] %v8222_v46  ;;  %v8226_v23 = vld [vmem:[%s12090_s15 + $0x1c8] sm:$0xff]  ;;  %v8228_v44 = vld [vmem:[%s12090_s15 + $0x1d0] sm:$0xff] }
 0x70b   : >> { %8225 = vst [vmem:[%s12086_s25 + $0x1c0] sm:$0xff] %v8224_v35  ;;  %v8230_v33 = vld [vmem:[%s12090_s15 + $0x1d8] sm:$0xff]  ;;  %8227 = vst [vmem:[%s12086_s25 + $0x1c8] sm:$0xff] %v8226_v23  ;;  %v8232_v41 = vld [vmem:[%s12090_s15 + $0x1e0] sm:$0xff] }
 0x70c   : >> { %8229 = vst [vmem:[%s12086_s25 + $0x1d0] sm:$0xff] %v8228_v44  ;;  %8231 = vst [vmem:[%s12086_s25 + $0x1d8] sm:$0xff] %v8230_v33  ;;  %v8234_v13 = vld [vmem:[%s12090_s15 + $0x1e8] sm:$0xff]  ;;  %v8236_v10 = vld [vmem:[%s12090_s15 + $0x1f0] sm:$0xff] }
 0x70d   : >> { %8233 = vst [vmem:[%s12086_s25 + $0x1e0] sm:$0xff] %v8232_v41  ;;  %8235 = vst [vmem:[%s12086_s25 + $0x1e8] sm:$0xff] %v8234_v13  ;;  %v8238_v29 = vld [vmem:[%s12090_s15 + $0x1f8] sm:$0xff]  ;;  %s17676_s15 = smov %s16723_s12 }
 0x70e   : >> { %8237 = vst [vmem:[%s12086_s25 + $0x1f0] sm:$0xff] %v8236_v10  ;;  %8239 = vst [vmem:[%s12086_s25 + $0x1f8] sm:$0xff] %v8238_v29  ;;  %s17675_s25 = smov %s16726_s13 }
 0x70f PF: > { %s16831_s11 = sand.u32 63, %s17695_s30   ;;  %s9416_s18 = sshll.u32 %s16656_s16, 9 }
 0x710   : > { %s8251_s7 = scalar_lea.vmem %s14653_s10, %s9416_s18 [#allocation11]   ;;  %s8253_s9 = scalar_lea.vmem %s16650_s26, %s9416_s18  }
 0x711   : > { %p9403_p3 = scmp.le.s32.totalorder %s16831_s11, 0 }
 0x712   : > { %s12100_s29 = smov (!%p9403_p3), %s8253_s9   ;;  %s12104_s21 = smov (!%p9403_p3), %s8251_s7  }
 0x713   : > { %8488 = sbr.rel (%p9403_p3) target bundleno = 1828 (0x724), region = 341  ;;  %s12108_s8 = smov (!%p9403_p3), 0  }
 0x714   : > { %s12112_s27 = smov (!%p9403_p3), 0  }
 0x71a LB: >> { %v8263_v22 = vld [vmem:[%s12106_s21] sm:$0xff]  ;;  %s8265_s30 = sadd.s32 1, %s12110_s8  ;;  %s8257_s27 = sadd.s32 1, %s12114_s27   ;;  %s12114_s27 = sphi %s12112_s27, %s8257_s27   ;;  %s12110_s8 = sphi %s12108_s8, %s12109_s8   ;;  %s12106_s21 = sphi %s12104_s21, %s8270_s21   ;;  %s12102_s29 = sphi %s12100_s29, %s8271_s29  }
 0x71b   : >> { %8264 = vst [vmem:[%s12102_s29] sm:$0xff] %v8263_v22  ;;  %p8266_p13 = scmp.ge.s32.totalorder %s8265_s30, %s16831_s11  ;;  %p8256_p8 = scmp.ge.s32.totalorder %s8257_s27, %s16831_s11 }
 0x71d   : >> { %s17699_s30 = smov (%p8266_p13, %s8265_s30), 0  ;;  %8259 = sbr.rel (!%p8256_p8) target bundleno = 1818 (0x71a), region = 347 }
 0x71e   : >> { %s9404_s10 = sshll.u32 %s17699_s30, 3  ;;  %s12109_s8 = smov %s17699_s30  }
 0x71f   : >> { %s8270_s21 = scalar_lea.vmem %s8251_s7, %s9404_s10 [#allocation11]   ;;  %s8271_s29 = scalar_lea.vmem %s8253_s9, %s9404_s10  }
 0x724 PF: > { %p19_p1 = scmp.ge.s32.totalorder %s12285_s14, 4   ;;  %s17678_s21 = smov %s12010_s22 }
 0x725   : > { %s17679_s22 = smov %s12014_s23  ;;  %s17680_s23 = smov %s12301_s17 }
 0x726   : > { %s17681_s24 = smov %s12285_s14  ;;  %21 = sbr.rel (!%p19_p1) target bundleno = 5 (0x5), region = 358 }
 0x72d   :  { %8301 = vsyncpa [#allocation3], 1 }
 0x72e   :  { %8303 = vsyncpa [#allocation3 + $0x1], 1 }
 0x72f   :  { %8304 = vsyncpa [#allocation5], 1 }
 0x730   :  { %8305 = vsyncpa [#allocation8], 1 }

</bundles_post_ra>
